<compile_context>
chip_gen: v6e
topology: v6e:2x2x1
jax: 0.10.0
libtpu: 0.0.40
codegen_flags: <defaults>
</compile_context>

<pallas_src>
import jax
import jax.numpy as jnp
from jax.experimental import pallas as pl
from jax.experimental.pallas import tpu as pltpu

BN_EPS = 1e-5
LANE = 128
SUB = 8

_ROLL_MATCHES_JNP = [True]   # resolved on-device by _detect_roll_semantics()


def _round_up(v, m):
    return ((v + m - 1) // m) * m


def _detect_roll_semantics():
    """Resolve pltpu.roll's sign convention once, on device, before tracing."""
    try:
        def k(x_ref, o_ref):
            o_ref[...] = pltpu.roll(x_ref[...], 1, axis=0)
        x = jnp.arange(8 * LANE, dtype=jnp.float32).reshape(8, LANE)
        y = pl.pallas_call(
            k, out_shape=jax.ShapeDtypeStruct((8, LANE), jnp.float32))(x)
        _ROLL_MATCHES_JNP[0] = bool(y[1, 0] == x[0, 0])
    except Exception:
        _ROLL_MATCHES_JNP[0] = True


def _row_roll(v, shift):
    """jnp.roll(v, shift, axis=0) semantics, lowered to an XLU rotate."""
    n = v.shape[0]
    s = shift % n
    if s == 0:
        return v
    if not _ROLL_MATCHES_JNP[0]:
        s = (n - s) % n
    return pltpu.roll(v, s, axis=0)


def _vmem_limit_bytes():
    try:
        cap = int(pltpu.get_tpu_info().vmem_capacity_bytes)
    except Exception:
        cap = 64 * 1024 * 1024
    return int(min(100 * 1024 * 1024, (cap * 3) // 4))


# ----------------------------------------------------------------------------
# Fused BasicBlock kernel
# ----------------------------------------------------------------------------
def _make_block_kernel(Ho, Wo, WP, CinP, CoutP, phase, equal, cdtype):
    """One full BasicBlock for one batch element.

    phase=False: x block is (1, Ho, Wo, CinP)          (raw input)
    phase=True : x block is (1, Ho+1, WP, 4*CinP)      (space-to-depth of the
                 spatially zero-padded input; channel-block order
                 (py,px) = (1,0),(0,0),(0,1),(1,1)).

    Staged activations live in (rows, WP, ch) f32 scratch with WP % 8 == 0 so
    row slabs flatten to (Ho*WP, ch) without relayout.  Conv results are
    accumulated at flat column j+1, i.e. already in the padded layout the next
    conv (or the output extraction) expects.
    """
    C, Co = CinP, CoutP
    M = Ho * WP

    def conv3x3(P, w_ref, cin):
        # P: (Ho+2, WP, cin) f32, data at rows 1..Ho / cols 1..Wo, zero border.
        # w_ref: (9*cin, Co) rows in (dy, dx) raster order.
        # Returns (M, Co) f32 with the conv output at flat columns 1..Wo.
        acc = jnp.zeros((M, Co), jnp.float32)
        for dy in range(3):
            slab = P[dy:dy + Ho].reshape(M, cin)
            op = jnp.concatenate(
                [_row_roll(slab, 1), slab, _row_roll(slab, -1)], axis=-1)
            acc = acc + jnp.dot(op.astype(cdtype),
                                w_ref[3 * dy * cin:3 * (dy + 1) * cin, :],
                                preferred_element_type=jnp.float32)
        return acc

    def kernel(*refs):
        if equal:
            (x_ref, w1_ref, w2_ref, s1_ref, b1_ref, s2_ref, b2_ref,
             o_ref, a_scr, b_scr) = refs
            ws_ref = None
        else:
            (x_ref, w1_ref, w2_ref, s1_ref, b1_ref, s2_ref, b2_ref, ws_ref,
             o_ref, a_scr, b_scr) = refs

        # ---- bn1 + relu, stage padded `a` in VMEM ----------------------------
        a = jnp.maximum(x_ref[0] * s1_ref[0] + b1_ref[0], 0.0)        # f32

        if phase:
            a_scr[...] = a
            # zero the conv padding (original spatial border) AFTER bn+relu:
            # row u=0 <-> py=0 blocks (1,2); row u=Ho <-> py=1 blocks (0,3)
            a_scr[0:1, :, C:3 * C] = jnp.zeros((1, WP, 2 * C), jnp.float32)
            a_scr[Ho:Ho + 1, :, 0:C] = jnp.zeros((1, WP, C), jnp.float32)
            a_scr[Ho:Ho + 1, :, 3 * C:4 * C] = jnp.zeros((1, WP, C), jnp.float32)
            # col v=0 <-> px=0 blocks (0,1); col v=Wo <-> px=1 blocks (2,3)
            a_scr[:, 0:1, 0:2 * C] = jnp.zeros((Ho + 1, 1, 2 * C), jnp.float32)
            a_scr[:, Wo:Wo + 1, 2 * C:4 * C] = jnp.zeros((Ho + 1, 1, 2 * C),
                                                         jnp.float32)

            A = a_scr[...]
            S0 = A[0:Ho].reshape(M, 4 * C)
            S1 = A[1:Ho + 1].reshape(M, 4 * C)
            S0r = _row_roll(S0, 1)

            # ---- conv1 (3x3, stride 2) as 4 phase-grouped dots ---------------
            acc1 = jnp.dot(S0r.astype(cdtype), w1_ref[0:4 * C, :],
                           preferred_element_type=jnp.float32)
            acc1 = acc1 + jnp.dot(S0[:, 0:2 * C].astype(cdtype),
                                  w1_ref[4 * C:6 * C, :],
                                  preferred_element_type=jnp.float32)
            acc1 = acc1 + jnp.dot(
                _row_roll(S1[:, C:3 * C], 1).astype(cdtype),
                w1_ref[6 * C:8 * C, :], preferred_element_type=jnp.float32)
            acc1 = acc1 + jnp.dot(S1[:, C:2 * C].astype(cdtype),
                                  w1_ref[8 * C:9 * C, :],
                                  preferred_element_type=jnp.float32)
        else:
            a_scr[1:Ho + 1, 1:Wo + 1, :] = a
            zrow = jnp.zeros((1, WP, C), jnp.float32)
            a_scr[0:1] = zrow
            a_scr[Ho + 1:Ho + 2] = zrow
            zcol = jnp.zeros((Ho + 2, 1, C), jnp.float32)
            a_scr[:, 0:1, :] = zcol
            a_scr[:, Wo + 1:Wo + 2, :] = zcol

            A = a_scr[...]
            # ---- conv1 (3x3, stride 1): 3 dots of K = 3*C ---------------------
            acc1 = conv3x3(A, w1_ref, C)

        # ---- bn2 + relu, stage padded `b` (conv2 input) ----------------------
        b = jnp.maximum(acc1 * s2_ref[0] + b2_ref[0], 0.0)             # f32
        b_scr[1:Ho + 1, :, :] = b.reshape(Ho, WP, Co)
        zrow2 = jnp.zeros((1, WP, Co), jnp.float32)
        b_scr[0:1] = zrow2
        b_scr[Ho + 1:Ho + 2] = zrow2
        zcol2 = jnp.zeros((Ho + 2, 1, Co), jnp.float32)
        b_scr[:, 0:1, :] = zcol2
        b_scr[:, Wo + 1:Wo + 2, :] = zcol2

        # ---- conv2 (3x3, stride 1) -------------------------------------------
        acc2 = conv3x3(b_scr[...], w2_ref, Co)

        # ---- shortcut ---------------------------------------------------------
        if not equal:
            if phase:
                sc = S0r[:, 3 * C:4 * C]          # a at (2r, 2c), pre-shifted
            else:
                sc = A[1:Ho + 1].reshape(M, C)    # a (stride 1)
            acc2 = acc2 + jnp.dot(sc.astype(cdtype), ws_ref[...],
                                  preferred_element_type=jnp.float32)

        out = acc2.reshape(Ho, WP, Co)[:, 1:Wo + 1, :]
        if equal:
            out = out + x_ref[0]                  # identity residual, re-read
        o_ref[0] = out.astype(o_ref.dtype)

    return kernel


# ----------------------------------------------------------------------------
# One BasicBlock forward (channel-padded NHWC in / out), one pallas_call
# ----------------------------------------------------------------------------
def basic_block_forward(x, pp):
    N, H, W, CinP = x.shape
    assert CinP == pp["CinP"]
    CoutP = pp["CoutP"]
    stride, equal = pp["stride"], pp["equal"]
    cdtype = x.dtype
    phase = stride == 2

    if phase:
        assert H % 2 == 0 and W % 2 == 0
        Ho, Wo = H // 2, W // 2
        WP = _round_up(Wo + 2, SUB)
        # zero-pad spatially, then space-to-depth with phase-block order
        # (py,px) = (1,0),(0,0),(0,1),(1,1); width-pad to WP so every kernel
        # slab flattens without relayout.
        xp = jnp.pad(x, ((0, 0), (1, 1), (1, 1), (0, 0)))
        xin = jnp.concatenate(
            [xp[:, 1::2, 0::2, :], xp[:, 0::2, 0::2, :],
             xp[:, 0::2, 1::2, :], xp[:, 1::2, 1::2, :]], axis=-1)
        xin = jnp.pad(xin, ((0, 0), (0, 0), (0, WP - (Wo + 1)), (0, 0)))
        a_rows, a_ch = Ho + 1, 4 * CinP
    else:
        assert stride == 1
        Ho, Wo = H, W
        WP = _round_up(Wo + 2, SUB)
        xin = x
        a_rows, a_ch = Ho + 2, CinP

    R, S, PC = xin.shape[1], xin.shape[2], xin.shape[3]

    kernel = _make_block_kernel(Ho, Wo, WP, CinP, CoutP, phase, equal, cdtype)

    arrays = [xin, pp["w1"], pp["w2"], pp["s1"], pp["b1"], pp["s2"], pp["b2"]]
    in_specs = [
        pl.BlockSpec((1, R, S, PC), lambda n: (n, 0, 0, 0)),
        pl.BlockSpec((9 * CinP, CoutP), lambda n: (0, 0)),   # weights stay
        pl.BlockSpec((9 * CoutP, CoutP), lambda n: (0, 0)),  # resident
        pl.BlockSpec((1, a_ch), lambda n: (0, 0)),
        pl.BlockSpec((1, a_ch), lambda n: (0, 0)),
        pl.BlockSpec((1, CoutP), lambda n: (0, 0)),
        pl.BlockSpec((1, CoutP), lambda n: (0, 0)),
    ]
    if not equal:
        arrays.append(pp["ws"])
        in_specs.append(pl.BlockSpec((CinP, CoutP), lambda n: (0, 0)))

    esz = jnp.dtype(cdtype).itemsize
    flops = 2 * N * Ho * WP * (9 * CinP * CoutP + 9 * CoutP * CoutP
                               + (0 if equal else CinP * CoutP))
    bytes_accessed = (xin.size + N * Ho * Wo * CoutP + pp["w1"].size
                      + pp["w2"].size + (0 if equal else pp["ws"].size)) * esz

    out = pl.pallas_call(
        kernel,
        out_shape=jax.ShapeDtypeStruct((N, Ho, Wo, CoutP), cdtype),
        grid=(N,),
        in_specs=in_specs,
        out_specs=pl.BlockSpec((1, Ho, Wo, CoutP), lambda n: (n, 0, 0, 0)),
        scratch_shapes=[pltpu.VMEM((a_rows, WP, a_ch), jnp.float32),   # padded a
                        pltpu.VMEM((Ho + 2, WP, CoutP), jnp.float32)],  # padded b
        compiler_params=pltpu.CompilerParams(
            dimension_semantics=("parallel",),
            vmem_limit_bytes=_vmem_limit_bytes()),
        cost_estimate=pl.CostEstimate(flops=int(flops), transcendentals=0,
                                      bytes_accessed=int(bytes_accessed)),
    )(*arrays)
    return out


# ----------------------------------------------------------------------------
# Parameter construction (deterministic, synthetic; eval-mode BN folded)
# ----------------------------------------------------------------------------
def _bn_fold(key, c):
    kg, kb, km, kv = jax.random.split(key, 4)
    gamma = 1.0 + 0.1 * jax.random.normal(kg, (c,), jnp.float32)
    beta = 0.1 * jax.random.normal(kb, (c,), jnp.float32)
    mean = 0.1 * jax.random.normal(km, (c,), jnp.float32)
    var = jnp.abs(jax.random.normal(kv, (c,), jnp.float32)) + 0.5
    scale = gamma / jnp.sqrt(var + BN_EPS)
    shift = beta - mean * scale
    return scale.reshape(1, c), shift.reshape(1, c)


def _conv_weight(key, cout, cin, k):
    # PyTorch layout (Cout, Cin, kH, kW) -> tap-major (k*k, Cin, Cout)
    w = jax.random.normal(key, (cout, cin, k, k), jnp.float32) / (k * (cin ** 0.5))
    return jnp.transpose(w, (2, 3, 1, 0)).reshape(k * k, cin, cout)


def init_basic_block(key, cin, cout, stride):
    ks = jax.random.split(key, 5)
    s1, b1 = _bn_fold(ks[0], cin)
    s2, b2 = _bn_fold(ks[1], cout)
    w1 = _conv_weight(ks[2], cout, cin, 3)
    w2 = _conv_weight(ks[3], cout, cout, 3)
    equal = cin == cout
    if equal:
        assert stride == 1, "identity shortcut requires stride 1"
        ws = None
    else:
        ws = _conv_weight(ks[4], cout, cin, 1)
    return dict(s1=s1, b1=b1, w1=w1, s2=s2, b2=b2, w2=w2, ws=ws,
                stride=stride, equal=equal, cin=cin, cout=cout)


def init_network_block(key, nb_layers, in_planes, out_planes, stride):
    # Mirrors NetworkBlock._make_layer: layer 0 gets (in_planes, stride),
    # the rest get (out_planes, 1).
    keys = jax.random.split(key, nb_layers)
    layers = []
    for i in range(nb_layers):
        ci = in_planes if i == 0 else out_planes
        s = stride if i == 0 else 1
        layers.append(init_basic_block(keys[i], ci, out_planes, s))
    return layers


def _pack_phase_w(w):
    """(9, C, Co) tap-major (dy,dx) -> (9C, Co) grouped for the 4 s2d dots.

    Groups (ry,cx): (0,0) K=4C [W(1,0),W(0,0),W(0,1),W(1,1)];
    (0,1) K=2C [W(1,2),W(0,2)]; (1,0) K=2C [W(2,0),W(2,1)]; (1,1) K=C [W(2,2)].
    """
    Wt = lambda dy, dx: w[dy * 3 + dx]
    g00 = jnp.concatenate([Wt(1, 0), Wt(0, 0), Wt(0, 1), Wt(1, 1)], axis=0)
    g01 = jnp.concatenate([Wt(1, 2), Wt(0, 2)], axis=0)
    g10 = jnp.concatenate([Wt(2, 0), Wt(2, 1)], axis=0)
    g11 = Wt(2, 2)
    return jnp.concatenate([g00, g01, g10, g11], axis=0)


def prep_block_params(p, cdtype):
    """Pad channels to lane multiples and reformat params for the kernel."""
    cin, cout = p["cin"], p["cout"]
    CinP, CoutP = _round_up(cin, LANE), _round_up(cout, LANE)

    def padw(w, ci_p, co_p):
        _, ci, co = w.shape
        return jnp.pad(w, ((0, 0), (0, ci_p - ci), (0, co_p - co))).astype(cdtype)

    def padv(v, cp):
        return jnp.pad(v, ((0, 0), (0, cp - v.shape[1]))).astype(jnp.float32)

    w1 = padw(p["w1"], CinP, CoutP)        # (9, CinP, CoutP)
    w2 = padw(p["w2"], CoutP, CoutP)       # (9, CoutP, CoutP)
    if p["stride"] == 2:
        w1p = _pack_phase_w(w1)            # grouped by s2d phase
    else:
        w1p = w1.reshape(9 * CinP, CoutP)  # raster (dy,dx)
    w2p = w2.reshape(9 * CoutP, CoutP)

    s1, b1 = padv(p["s1"], CinP), padv(p["b1"], CinP)
    if p["stride"] == 2:                   # tile BN params over the 4 s2d blocks
        s1, b1 = jnp.tile(s1, (1, 4)), jnp.tile(b1, (1, 4))
    ws = None if p["equal"] else padw(p["ws"], CinP, CoutP)[0]
    return dict(w1=w1p, w2=w2p, ws=ws, s1=s1, b1=b1,
                s2=padv(p["s2"], CoutP), b2=padv(p["b2"], CoutP),
                stride=p["stride"], equal=p["equal"],
                cin=cin, cout=cout, CinP=CinP, CoutP=CoutP)


def network_block_forward(x_nchw, prepped_layers, cdtype=jnp.bfloat16):
    # layout: NCHW (PyTorch) -> channel-padded bf16 NHWC internally -> NCHW out
    x = jnp.transpose(x_nchw, (0, 2, 3, 1)).astype(cdtype)
    first = prepped_layers[0]
    x = jnp.pad(x, ((0, 0), (0, 0), (0, 0), (0, first["CinP"] - first["cin"])))
    for pp in prepped_layers:
        x = basic_block_forward(x, pp)
    x = x[..., :prepped_layers[-1]["cout"]]
    return jnp.transpose(x, (0, 3, 1, 2))


# ----------------------------------------------------------------------------
# Pure-JAX reference (bf16-rounded conv operands, f32 accumulation)
# ----------------------------------------------------------------------------
def _ref_conv(z, w, stride, cdtype):
    kk, ci, co = w.shape
    k = int(round(kk ** 0.5))
    pad = k // 2
    zb = z.astype(cdtype).astype(jnp.float32)
    wb = w.astype(cdtype).astype(jnp.float32)
    return jax.lax.conv_general_dilated(
        zb, wb.reshape(k, k, ci, co), (stride, stride), [(pad, pad), (pad, pad)],
        dimension_numbers=("NHWC", "HWIO", "NHWC"),
        precision=jax.lax.Precision.HIGHEST)


def basic_block_ref(x, p, cdtype):  # NHWC, real channel counts
    bn_relu = lambda z, sc, sh: jnp.maximum(
        z * sc.reshape(1, 1, 1, -1) + sh.reshape(1, 1, 1, -1), 0.0)
    a = bn_relu(x, p["s1"], p["b1"])
    y = _ref_conv(a, p["w1"], p["stride"], cdtype)
    y = bn_relu(y, p["s2"], p["b2"])
    y = _ref_conv(y, p["w2"], 1, cdtype)
    res = x if p["equal"] else _ref_conv(a, p["ws"], p["stride"], cdtype)
    return res + y


# ----------------------------------------------------------------------------
if __name__ == "__main__":
    _detect_roll_semantics()        # fix pltpu.roll sign before any tracing

    key = jax.random.PRNGKey(0)
    kx, kp = jax.random.split(key)

    N, Cin, H, W = 2, 4, 16, 16
    Cout, nb_layers, stride = 8, 2, 2
    cdtype = jnp.bfloat16

    x = jax.random.normal(kx, (N, Cin, H, W), jnp.float32)
    layers = init_network_block(kp, nb_layers, Cin, Cout, stride)
    prepped = [prep_block_params(p, cdtype) for p in layers]

    fwd = jax.jit(lambda t: network_block_forward(t, prepped, cdtype))
    out = jax.block_until_ready(fwd(x))

    # reference with matched bf16 rounding of conv operands / weights
    xr = jnp.transpose(x, (0, 2, 3, 1)).astype(cdtype).astype(jnp.float32)
    for p in layers:
        xr = basic_block_ref(xr, p, cdtype)
        xr = xr.astype(cdtype).astype(jnp.float32)   # inter-layer bf16, like kernel
    ref = jnp.transpose(xr, (0, 3, 1, 2))

    out_f = out.astype(jnp.float32)
    assert out.shape == ref.shape == (N, Cout, H // stride, W // stride)
    err = float(jnp.max(jnp.abs(out_f - ref)))
    assert jnp.allclose(out_f, ref, atol=5e-2, rtol=5e-2), err
    print("KERNEL_OK")
</pallas_src>

<mosaic_0001>
module attributes {stable_mosaic.version = 11 : i64} {
  func.func @k(%arg0: memref<8x128xf32, #tpu.memory_space<vmem>>, %arg1: memref<8x128xf32, #tpu.memory_space<vmem>>) attributes {dimension_semantics = [], scalar_prefetch = 0 : i64, scratch_operands = 0 : i64, tpu.core_type = #tpu.core_type<tc>} {
    %c0 = arith.constant 0 : index
    %c0_0 = arith.constant 0 : index
    %0 = vector.load %arg0[%c0, %c0_0] : memref<8x128xf32, #tpu.memory_space<vmem>>, vector<8x128xf32>
    %c1_i32 = arith.constant 1 : i32
    %1 = tpu.dynamic_rotate %0 by %c1_i32 dim 0 : vector<8x128xf32>, i32 -> vector<8x128xf32>
    %c0_1 = arith.constant 0 : index
    %c0_2 = arith.constant 0 : index
    %2 = vector.load %arg1[%c0_1, %c0_2] : memref<8x128xf32, #tpu.memory_space<vmem>>, vector<8x128xf32>
    tpu.vector_store %arg1[%c0_1, %c0_2], %1 {strides = array<i32>} : memref<8x128xf32, #tpu.memory_space<vmem>>, vector<8x128xf32>,
    return
  }
}

module attributes {stable_mosaic.version = 11 : i64} {
  func.func @kernel(%arg0: i32, %arg1: memref<1x9x16x512xbf16, #tpu.memory_space<vmem>>, %arg2: memref<1152x128xbf16, #tpu.memory_space<vmem>>, %arg3: memref<1152x128xbf16, #tpu.memory_space<vmem>>, %arg4: memref<1x512xf32, #tpu.memory_space<vmem>>, %arg5: memref<1x512xf32, #tpu.memory_space<vmem>>, %arg6: memref<1x128xf32, #tpu.memory_space<vmem>>, %arg7: memref<1x128xf32, #tpu.memory_space<vmem>>, %arg8: memref<128x128xbf16, #tpu.memory_space<vmem>>, %arg9: memref<1x8x8x128xbf16, #tpu.memory_space<vmem>>, %arg10: memref<9x16x512xf32, #tpu.memory_space<vmem>>, %arg11: memref<10x16x128xf32, #tpu.memory_space<vmem>>) attributes {dimension_semantics = [#tpu.dimension_semantics<parallel>], iteration_bounds = array<i64: 2>, scalar_prefetch = 0 : i64, scratch_operands = 2 : i64, tpu.core_type = #tpu.core_type<tc>, window_params = [{transform_indices = @transform_0, window_bounds = array<i64: 1, 9, 16, 512>}, {pipeline_mode = #tpu.pipeline_mode<synchronous>, transform_indices = @transform_1, window_bounds = array<i64: 1152, 128>}, {pipeline_mode = #tpu.pipeline_mode<synchronous>, transform_indices = @transform_2, window_bounds = array<i64: 1152, 128>}, {pipeline_mode = #tpu.pipeline_mode<synchronous>, transform_indices = @transform_3, window_bounds = array<i64: 1, 512>}, {pipeline_mode = #tpu.pipeline_mode<synchronous>, transform_indices = @transform_4, window_bounds = array<i64: 1, 512>}, {pipeline_mode = #tpu.pipeline_mode<synchronous>, transform_indices = @transform_5, window_bounds = array<i64: 1, 128>}, {pipeline_mode = #tpu.pipeline_mode<synchronous>, transform_indices = @transform_6, window_bounds = array<i64: 1, 128>}, {pipeline_mode = #tpu.pipeline_mode<synchronous>, transform_indices = @transform_7, window_bounds = array<i64: 128, 128>}, {transform_indices = @transform_8, window_bounds = array<i64: 1, 8, 8, 128>}]} {
    %c0 = arith.constant 0 : index
    %c0_0 = arith.constant 0 : index
    %c0_1 = arith.constant 0 : index
    %c0_2 = arith.constant 0 : index
    %0 = vector.load %arg1[%c0, %c0_0, %c0_1, %c0_2] : memref<1x9x16x512xbf16, #tpu.memory_space<vmem>>, vector<1x9x16x512xbf16>
    %1 = vector.shape_cast %0 : vector<1x9x16x512xbf16> to vector<9x16x512xbf16>
    %c0_3 = arith.constant 0 : index
    %c0_4 = arith.constant 0 : index
    %2 = vector.load %arg4[%c0_3, %c0_4] : memref<1x512xf32, #tpu.memory_space<vmem>>, vector<1x512xf32>
    %3 = vector.shape_cast %2 : vector<1x512xf32> to vector<512xf32>
    %4 = arith.extf %1 : vector<9x16x512xbf16> to vector<9x16x512xf32>
    %5 = vector.shape_cast %3 : vector<512xf32> to vector<1x1x512xf32>
    %6 = vector.broadcast %5 : vector<1x1x512xf32> to vector<9x16x512xf32>
    %7 = arith.mulf %4, %6 : vector<9x16x512xf32>
    %c0_5 = arith.constant 0 : index
    %c0_6 = arith.constant 0 : index
    %8 = vector.load %arg5[%c0_5, %c0_6] : memref<1x512xf32, #tpu.memory_space<vmem>>, vector<1x512xf32>
    %9 = vector.shape_cast %8 : vector<1x512xf32> to vector<512xf32>
    %10 = vector.shape_cast %9 : vector<512xf32> to vector<1x1x512xf32>
    %11 = vector.broadcast %10 : vector<1x1x512xf32> to vector<9x16x512xf32>
    %12 = arith.addf %7, %11 : vector<9x16x512xf32>
    %cst = arith.constant 0.000000e+00 : f32
    %13 = vector.broadcast %cst : f32 to vector<9x16x512xf32>
    %14 = arith.maximumf %12, %13 : vector<9x16x512xf32>
    %c0_7 = arith.constant 0 : index
    %c0_8 = arith.constant 0 : index
    %c0_9 = arith.constant 0 : index
    %15 = vector.load %arg10[%c0_7, %c0_8, %c0_9] : memref<9x16x512xf32, #tpu.memory_space<vmem>>, vector<9x16x512xf32>
    tpu.vector_store %arg10[%c0_7, %c0_8, %c0_9], %14 {strides = array<i32>} : memref<9x16x512xf32, #tpu.memory_space<vmem>>, vector<9x16x512xf32>,
    %cst_10 = arith.constant 0.000000e+00 : f32
    %16 = vector.broadcast %cst_10 : f32 to vector<1x16x256xf32>
    %c0_11 = arith.constant 0 : index
    %c0_12 = arith.constant 0 : index
    %c128 = arith.constant 128 : index
    %17 = vector.load %arg10[%c0_11, %c0_12, %c128] : memref<9x16x512xf32, #tpu.memory_space<vmem>>, vector<1x16x256xf32>
    tpu.vector_store %arg10[%c0_11, %c0_12, %c128], %16 {strides = array<i32>} : memref<9x16x512xf32, #tpu.memory_space<vmem>>, vector<1x16x256xf32>,
    %cst_13 = arith.constant 0.000000e+00 : f32
    %18 = vector.broadcast %cst_13 : f32 to vector<1x16x128xf32>
    %c8 = arith.constant 8 : index
    %c0_14 = arith.constant 0 : index
    %c0_15 = arith.constant 0 : index
    %19 = vector.load %arg10[%c8, %c0_14, %c0_15] : memref<9x16x512xf32, #tpu.memory_space<vmem>>, vector<1x16x128xf32>
    tpu.vector_store %arg10[%c8, %c0_14, %c0_15], %18 {strides = array<i32>} : memref<9x16x512xf32, #tpu.memory_space<vmem>>, vector<1x16x128xf32>,
    %cst_16 = arith.constant 0.000000e+00 : f32
    %20 = vector.broadcast %cst_16 : f32 to vector<1x16x128xf32>
    %c8_17 = arith.constant 8 : index
    %c0_18 = arith.constant 0 : index
    %c384 = arith.constant 384 : index
    %21 = vector.load %arg10[%c8_17, %c0_18, %c384] : memref<9x16x512xf32, #tpu.memory_space<vmem>>, vector<1x16x128xf32>
    tpu.vector_store %arg10[%c8_17, %c0_18, %c384], %20 {strides = array<i32>} : memref<9x16x512xf32, #tpu.memory_space<vmem>>, vector<1x16x128xf32>,
    %cst_19 = arith.constant 0.000000e+00 : f32
    %22 = vector.broadcast %cst_19 : f32 to vector<9x1x256xf32>
    %c0_20 = arith.constant 0 : index
    %c0_21 = arith.constant 0 : index
    %c0_22 = arith.constant 0 : index
    %23 = vector.load %arg10[%c0_20, %c0_21, %c0_22] : memref<9x16x512xf32, #tpu.memory_space<vmem>>, vector<9x1x256xf32>
    tpu.vector_store %arg10[%c0_20, %c0_21, %c0_22], %22 {strides = array<i32>} : memref<9x16x512xf32, #tpu.memory_space<vmem>>, vector<9x1x256xf32>,
    %cst_23 = arith.constant 0.000000e+00 : f32
    %24 = vector.broadcast %cst_23 : f32 to vector<9x1x256xf32>
    %c0_24 = arith.constant 0 : index
    %c8_25 = arith.constant 8 : index
    %c256 = arith.constant 256 : index
    %25 = vector.load %arg10[%c0_24, %c8_25, %c256] : memref<9x16x512xf32, #tpu.memory_space<vmem>>, vector<9x1x256xf32>
    tpu.vector_store %arg10[%c0_24, %c8_25, %c256], %24 {strides = array<i32>} : memref<9x16x512xf32, #tpu.memory_space<vmem>>, vector<9x1x256xf32>,
    %c0_26 = arith.constant 0 : index
    %c0_27 = arith.constant 0 : index
    %c0_28 = arith.constant 0 : index
    %26 = vector.load %arg10[%c0_26, %c0_27, %c0_28] : memref<9x16x512xf32, #tpu.memory_space<vmem>>, vector<9x16x512xf32>
    %27 = vector.extract_strided_slice %26 {offsets = [0, 0, 0], sizes = [8, 16, 512], strides = [1, 1, 1]} : vector<9x16x512xf32> to vector<8x16x512xf32>
    %28 = vector.shape_cast %27 : vector<8x16x512xf32> to vector<128x512xf32>
    %29 = vector.extract_strided_slice %26 {offsets = [1, 0, 0], sizes = [8, 16, 512], strides = [1, 1, 1]} : vector<9x16x512xf32> to vector<8x16x512xf32>
    %30 = vector.shape_cast %29 : vector<8x16x512xf32> to vector<128x512xf32>
    %c1_i32 = arith.constant 1 : i32
    %31 = tpu.dynamic_rotate %28 by %c1_i32 dim 0 : vector<128x512xf32>, i32 -> vector<128x512xf32>
    %32 = arith.truncf %31 : vector<128x512xf32> to vector<128x512xbf16>
    %c0_29 = arith.constant 0 : index
    %c0_30 = arith.constant 0 : index
    %33 = vector.load %arg2[%c0_29, %c0_30] : memref<1152x128xbf16, #tpu.memory_space<vmem>>, vector<512x128xbf16>
    %cst_31 = arith.constant dense<0.000000e+00> : vector<128x128xf32>
    %34 = tpu.matmul %32, %33, %cst_31 {dimension_numbers = #tpu.dot_dimension_numbers<[1], [0], [0], [1], [0, 0, 1, 1], [], []>} : vector<128x512xbf16>, vector<512x128xbf16>, vector<128x128xf32> -> vector<128x128xf32>
    %35 = vector.extract_strided_slice %28 {offsets = [0, 0], sizes = [128, 256], strides = [1, 1]} : vector<128x512xf32> to vector<128x256xf32>
    %36 = arith.truncf %35 : vector<128x256xf32> to vector<128x256xbf16>
    %c512 = arith.constant 512 : index
    %c0_32 = arith.constant 0 : index
    %37 = vector.load %arg2[%c512, %c0_32] : memref<1152x128xbf16, #tpu.memory_space<vmem>>, vector<256x128xbf16>
    %cst_33 = arith.constant dense<0.000000e+00> : vector<128x128xf32>
    %38 = tpu.matmul %36, %37, %cst_33 {dimension_numbers = #tpu.dot_dimension_numbers<[1], [0], [0], [1], [0, 0, 1, 1], [], []>} : vector<128x256xbf16>, vector<256x128xbf16>, vector<128x128xf32> -> vector<128x128xf32>
    %39 = arith.addf %34, %38 : vector<128x128xf32>
    %40 = vector.extract_strided_slice %30 {offsets = [0, 128], sizes = [128, 256], strides = [1, 1]} : vector<128x512xf32> to vector<128x256xf32>
    %c1_i32_34 = arith.constant 1 : i32
    %41 = tpu.dynamic_rotate %40 by %c1_i32_34 dim 0 : vector<128x256xf32>, i32 -> vector<128x256xf32>
    %42 = arith.truncf %41 : vector<128x256xf32> to vector<128x256xbf16>
    %c768 = arith.constant 768 : index
    %c0_35 = arith.constant 0 : index
    %43 = vector.load %arg2[%c768, %c0_35] : memref<1152x128xbf16, #tpu.memory_space<vmem>>, vector<256x128xbf16>
    %cst_36 = arith.constant dense<0.000000e+00> : vector<128x128xf32>
    %44 = tpu.matmul %42, %43, %cst_36 {dimension_numbers = #tpu.dot_dimension_numbers<[1], [0], [0], [1], [0, 0, 1, 1], [], []>} : vector<128x256xbf16>, vector<256x128xbf16>, vector<128x128xf32> -> vector<128x128xf32>
    %45 = arith.addf %39, %44 : vector<128x128xf32>
    %46 = vector.extract_strided_slice %30 {offsets = [0, 128], sizes = [128, 128], strides = [1, 1]} : vector<128x512xf32> to vector<128x128xf32>
    %47 = arith.truncf %46 : vector<128x128xf32> to vector<128x128xbf16>
    %c1024 = arith.constant 1024 : index
    %c0_37 = arith.constant 0 : index
    %48 = vector.load %arg2[%c1024, %c0_37] : memref<1152x128xbf16, #tpu.memory_space<vmem>>, vector<128x128xbf16>
    %cst_38 = arith.constant dense<0.000000e+00> : vector<128x128xf32>
    %49 = tpu.matmul %47, %48, %cst_38 {dimension_numbers = #tpu.dot_dimension_numbers<[1], [0], [0], [1], [0, 0, 1, 1], [], []>} : vector<128x128xbf16>, vector<128x128xbf16>, vector<128x128xf32> -> vector<128x128xf32>
    %50 = arith.addf %45, %49 : vector<128x128xf32>
    %c0_39 = arith.constant 0 : index
    %c0_40 = arith.constant 0 : index
    %51 = vector.load %arg6[%c0_39, %c0_40] : memref<1x128xf32, #tpu.memory_space<vmem>>, vector<1x128xf32>
    %52 = vector.shape_cast %51 : vector<1x128xf32> to vector<128xf32>
    %53 = vector.shape_cast %52 : vector<128xf32> to vector<1x128xf32>
    %54 = vector.broadcast %53 : vector<1x128xf32> to vector<128x128xf32>
    %55 = arith.mulf %50, %54 : vector<128x128xf32>
    %c0_41 = arith.constant 0 : index
    %c0_42 = arith.constant 0 : index
    %56 = vector.load %arg7[%c0_41, %c0_42] : memref<1x128xf32, #tpu.memory_space<vmem>>, vector<1x128xf32>
    %57 = vector.shape_cast %56 : vector<1x128xf32> to vector<128xf32>
    %58 = vector.shape_cast %57 : vector<128xf32> to vector<1x128xf32>
    %59 = vector.broadcast %58 : vector<1x128xf32> to vector<128x128xf32>
    %60 = arith.addf %55, %59 : vector<128x128xf32>
    %cst_43 = arith.constant 0.000000e+00 : f32
    %61 = vector.broadcast %cst_43 : f32 to vector<128x128xf32>
    %62 = arith.maximumf %60, %61 : vector<128x128xf32>
    %63 = vector.shape_cast %62 : vector<128x128xf32> to vector<8x16x128xf32>
    %c1 = arith.constant 1 : index
    %c0_44 = arith.constant 0 : index
    %c0_45 = arith.constant 0 : index
    %64 = vector.load %arg11[%c1, %c0_44, %c0_45] : memref<10x16x128xf32, #tpu.memory_space<vmem>>, vector<8x16x128xf32>
    tpu.vector_store %arg11[%c1, %c0_44, %c0_45], %63 {strides = array<i32>} : memref<10x16x128xf32, #tpu.memory_space<vmem>>, vector<8x16x128xf32>,
    %cst_46 = arith.constant 0.000000e+00 : f32
    %65 = vector.broadcast %cst_46 : f32 to vector<1x16x128xf32>
    %c0_47 = arith.constant 0 : index
    %c0_48 = arith.constant 0 : index
    %c0_49 = arith.constant 0 : index
    %66 = vector.load %arg11[%c0_47, %c0_48, %c0_49] : memref<10x16x128xf32, #tpu.memory_space<vmem>>, vector<1x16x128xf32>
    tpu.vector_store %arg11[%c0_47, %c0_48, %c0_49], %65 {strides = array<i32>} : memref<10x16x128xf32, #tpu.memory_space<vmem>>, vector<1x16x128xf32>,
    %c9 = arith.constant 9 : index
    %c0_50 = arith.constant 0 : index
    %c0_51 = arith.constant 0 : index
    %67 = vector.load %arg11[%c9, %c0_50, %c0_51] : memref<10x16x128xf32, #tpu.memory_space<vmem>>, vector<1x16x128xf32>
    tpu.vector_store %arg11[%c9, %c0_50, %c0_51], %65 {strides = array<i32>} : memref<10x16x128xf32, #tpu.memory_space<vmem>>, vector<1x16x128xf32>,
    %cst_52 = arith.constant 0.000000e+00 : f32
    %68 = vector.broadcast %cst_52 : f32 to vector<10x1x128xf32>
    %c0_53 = arith.constant 0 : index
    %c0_54 = arith.constant 0 : index
    %c0_55 = arith.constant 0 : index
    %69 = vector.load %arg11[%c0_53, %c0_54, %c0_55] : memref<10x16x128xf32, #tpu.memory_space<vmem>>, vector<10x1x128xf32>
    tpu.vector_store %arg11[%c0_53, %c0_54, %c0_55], %68 {strides = array<i32>} : memref<10x16x128xf32, #tpu.memory_space<vmem>>, vector<10x1x128xf32>,
    %c0_56 = arith.constant 0 : index
    %c9_57 = arith.constant 9 : index
    %c0_58 = arith.constant 0 : index
    %70 = vector.load %arg11[%c0_56, %c9_57, %c0_58] : memref<10x16x128xf32, #tpu.memory_space<vmem>>, vector<10x1x128xf32>
    tpu.vector_store %arg11[%c0_56, %c9_57, %c0_58], %68 {strides = array<i32>} : memref<10x16x128xf32, #tpu.memory_space<vmem>>, vector<10x1x128xf32>,
    %c0_59 = arith.constant 0 : index
    %c0_60 = arith.constant 0 : index
    %c0_61 = arith.constant 0 : index
    %71 = vector.load %arg11[%c0_59, %c0_60, %c0_61] : memref<10x16x128xf32, #tpu.memory_space<vmem>>, vector<10x16x128xf32>
    %cst_62 = arith.constant 0.000000e+00 : f32
    %72 = vector.broadcast %cst_62 : f32 to vector<128x128xf32>
    %73 = vector.extract_strided_slice %71 {offsets = [0, 0, 0], sizes = [8, 16, 128], strides = [1, 1, 1]} : vector<10x16x128xf32> to vector<8x16x128xf32>
    %74 = vector.shape_cast %73 : vector<8x16x128xf32> to vector<128x128xf32>
    %c1_i32_63 = arith.constant 1 : i32
    %75 = tpu.dynamic_rotate %74 by %c1_i32_63 dim 0 : vector<128x128xf32>, i32 -> vector<128x128xf32>
    %c127_i32 = arith.constant 127 : i32
    %76 = tpu.dynamic_rotate %74 by %c127_i32 dim 0 : vector<128x128xf32>, i32 -> vector<128x128xf32>
    %77 = tpu.concatenate %75, %74, %76 in 1 : vector<128x128xf32>, vector<128x128xf32>, vector<128x128xf32> -> vector<128x384xf32>
    %78 = arith.truncf %77 : vector<128x384xf32> to vector<128x384xbf16>
    %c0_64 = arith.constant 0 : index
    %c0_65 = arith.constant 0 : index
    %79 = vector.load %arg3[%c0_64, %c0_65] : memref<1152x128xbf16, #tpu.memory_space<vmem>>, vector<384x128xbf16>
    %cst_66 = arith.constant dense<0.000000e+00> : vector<128x128xf32>
    %80 = tpu.matmul %78, %79, %cst_66 {dimension_numbers = #tpu.dot_dimension_numbers<[1], [0], [0], [1], [0, 0, 1, 1], [], []>} : vector<128x384xbf16>, vector<384x128xbf16>, vector<128x128xf32> -> vector<128x128xf32>
    %81 = arith.addf %72, %80 : vector<128x128xf32>
    %82 = vector.extract_strided_slice %71 {offsets = [1, 0, 0], sizes = [8, 16, 128], strides = [1, 1, 1]} : vector<10x16x128xf32> to vector<8x16x128xf32>
    %83 = vector.shape_cast %82 : vector<8x16x128xf32> to vector<128x128xf32>
    %c1_i32_67 = arith.constant 1 : i32
    %84 = tpu.dynamic_rotate %83 by %c1_i32_67 dim 0 : vector<128x128xf32>, i32 -> vector<128x128xf32>
    %c127_i32_68 = arith.constant 127 : i32
    %85 = tpu.dynamic_rotate %83 by %c127_i32_68 dim 0 : vector<128x128xf32>, i32 -> vector<128x128xf32>
    %86 = tpu.concatenate %84, %83, %85 in 1 : vector<128x128xf32>, vector<128x128xf32>, vector<128x128xf32> -> vector<128x384xf32>
    %87 = arith.truncf %86 : vector<128x384xf32> to vector<128x384xbf16>
    %c384_69 = arith.constant 384 : index
    %c0_70 = arith.constant 0 : index
    %88 = vector.load %arg3[%c384_69, %c0_70] : memref<1152x128xbf16, #tpu.memory_space<vmem>>, vector<384x128xbf16>
    %cst_71 = arith.constant dense<0.000000e+00> : vector<128x128xf32>
    %89 = tpu.matmul %87, %88, %cst_71 {dimension_numbers = #tpu.dot_dimension_numbers<[1], [0], [0], [1], [0, 0, 1, 1], [], []>} : vector<128x384xbf16>, vector<384x128xbf16>, vector<128x128xf32> -> vector<128x128xf32>
    %90 = arith.addf %81, %89 : vector<128x128xf32>
    %91 = vector.extract_strided_slice %71 {offsets = [2, 0, 0], sizes = [8, 16, 128], strides = [1, 1, 1]} : vector<10x16x128xf32> to vector<8x16x128xf32>
    %92 = vector.shape_cast %91 : vector<8x16x128xf32> to vector<128x128xf32>
    %c1_i32_72 = arith.constant 1 : i32
    %93 = tpu.dynamic_rotate %92 by %c1_i32_72 dim 0 : vector<128x128xf32>, i32 -> vector<128x128xf32>
    %c127_i32_73 = arith.constant 127 : i32
    %94 = tpu.dynamic_rotate %92 by %c127_i32_73 dim 0 : vector<128x128xf32>, i32 -> vector<128x128xf32>
    %95 = tpu.concatenate %93, %92, %94 in 1 : vector<128x128xf32>, vector<128x128xf32>, vector<128x128xf32> -> vector<128x384xf32>
    %96 = arith.truncf %95 : vector<128x384xf32> to vector<128x384xbf16>
    %c768_74 = arith.constant 768 : index
    %c0_75 = arith.constant 0 : index
    %97 = vector.load %arg3[%c768_74, %c0_75] : memref<1152x128xbf16, #tpu.memory_space<vmem>>, vector<384x128xbf16>
    %cst_76 = arith.constant dense<0.000000e+00> : vector<128x128xf32>
    %98 = tpu.matmul %96, %97, %cst_76 {dimension_numbers = #tpu.dot_dimension_numbers<[1], [0], [0], [1], [0, 0, 1, 1], [], []>} : vector<128x384xbf16>, vector<384x128xbf16>, vector<128x128xf32> -> vector<128x128xf32>
    %99 = arith.addf %90, %98 : vector<128x128xf32>
    %100 = vector.extract_strided_slice %31 {offsets = [0, 384], sizes = [128, 128], strides = [1, 1]} : vector<128x512xf32> to vector<128x128xf32>
    %101 = arith.truncf %100 : vector<128x128xf32> to vector<128x128xbf16>
    %c0_77 = arith.constant 0 : index
    %c0_78 = arith.constant 0 : index
    %102 = vector.load %arg8[%c0_77, %c0_78] : memref<128x128xbf16, #tpu.memory_space<vmem>>, vector<128x128xbf16>
    %cst_79 = arith.constant dense<0.000000e+00> : vector<128x128xf32>
    %103 = tpu.matmul %101, %102, %cst_79 {dimension_numbers = #tpu.dot_dimension_numbers<[1], [0], [0], [1], [0, 0, 1, 1], [], []>} : vector<128x128xbf16>, vector<128x128xbf16>, vector<128x128xf32> -> vector<128x128xf32>
    %104 = arith.addf %99, %103 : vector<128x128xf32>
    %105 = vector.shape_cast %104 : vector<128x128xf32> to vector<8x16x128xf32>
    %106 = vector.extract_strided_slice %105 {offsets = [0, 1, 0], sizes = [8, 8, 128], strides = [1, 1, 1]} : vector<8x16x128xf32> to vector<8x8x128xf32>
    %107 = arith.truncf %106 : vector<8x8x128xf32> to vector<8x8x128xbf16>
    %c0_80 = arith.constant 0 : index
    %c0_81 = arith.constant 0 : index
    %c0_82 = arith.constant 0 : index
    %c0_83 = arith.constant 0 : index
    %108 = vector.load %arg9[%c0_80, %c0_81, %c0_82, %c0_83] : memref<1x8x8x128xbf16, #tpu.memory_space<vmem>>, vector<1x8x8x128xbf16>
    %109 = vector.shape_cast %108 : vector<1x8x8x128xbf16> to vector<8x8x128xbf16>
    %110 = vector.shape_cast %107 : vector<8x8x128xbf16> to vector<1x8x8x128xbf16>
    tpu.vector_store %arg9[%c0_80, %c0_81, %c0_82, %c0_83], %110 {strides = array<i32>} : memref<1x8x8x128xbf16, #tpu.memory_space<vmem>>, vector<1x8x8x128xbf16>,
    return
  }
  func.func @transform_0(%arg0: i32) -> (i32, i32, i32, i32) {
    %c0_i32 = arith.constant 0 : i32
    %c0_i32_0 = arith.constant 0 : i32
    %c0_i32_1 = arith.constant 0 : i32
    %c0_i32_2 = arith.constant 0 : i32
    return %arg0, %c0_i32, %c0_i32_0, %c0_i32_1 : i32, i32, i32, i32
  }
  func.func @transform_1(%arg0: i32) -> (i32, i32) {
    %c0_i32 = arith.constant 0 : i32
    %c0_i32_0 = arith.constant 0 : i32
    %c0_i32_1 = arith.constant 0 : i32
    return %c0_i32, %c0_i32_0 : i32, i32
  }
  func.func @transform_2(%arg0: i32) -> (i32, i32) {
    %c0_i32 = arith.constant 0 : i32
    %c0_i32_0 = arith.constant 0 : i32
    %c0_i32_1 = arith.constant 0 : i32
    return %c0_i32, %c0_i32_0 : i32, i32
  }
  func.func @transform_3(%arg0: i32) -> (i32, i32) {
    %c0_i32 = arith.constant 0 : i32
    %c0_i32_0 = arith.constant 0 : i32
    %c0_i32_1 = arith.constant 0 : i32
    return %c0_i32, %c0_i32_0 : i32, i32
  }
  func.func @transform_4(%arg0: i32) -> (i32, i32) {
    %c0_i32 = arith.constant 0 : i32
    %c0_i32_0 = arith.constant 0 : i32
    %c0_i32_1 = arith.constant 0 : i32
    return %c0_i32, %c0_i32_0 : i32, i32
  }
  func.func @transform_5(%arg0: i32) -> (i32, i32) {
    %c0_i32 = arith.constant 0 : i32
    %c0_i32_0 = arith.constant 0 : i32
    %c0_i32_1 = arith.constant 0 : i32
    return %c0_i32, %c0_i32_0 : i32, i32
  }
  func.func @transform_6(%arg0: i32) -> (i32, i32) {
    %c0_i32 = arith.constant 0 : i32
    %c0_i32_0 = arith.constant 0 : i32
    %c0_i32_1 = arith.constant 0 : i32
    return %c0_i32, %c0_i32_0 : i32, i32
  }
  func.func @transform_7(%arg0: i32) -> (i32, i32) {
    %c0_i32 = arith.constant 0 : i32
    %c0_i32_0 = arith.constant 0 : i32
    %c0_i32_1 = arith.constant 0 : i32
    return %c0_i32, %c0_i32_0 : i32, i32
  }
  func.func @transform_8(%arg0: i32) -> (i32, i32, i32, i32) {
    %c0_i32 = arith.constant 0 : i32
    %c0_i32_0 = arith.constant 0 : i32
    %c0_i32_1 = arith.constant 0 : i32
    %c0_i32_2 = arith.constant 0 : i32
    return %arg0, %c0_i32, %c0_i32_0, %c0_i32_1 : i32, i32, i32, i32
  }
}

module attributes {stable_mosaic.version = 11 : i64} {
  func.func @kernel(%arg0: i32, %arg1: memref<1x8x8x128xbf16, #tpu.memory_space<vmem>>, %arg2: memref<1152x128xbf16, #tpu.memory_space<vmem>>, %arg3: memref<1152x128xbf16, #tpu.memory_space<vmem>>, %arg4: memref<1x128xf32, #tpu.memory_space<vmem>>, %arg5: memref<1x128xf32, #tpu.memory_space<vmem>>, %arg6: memref<1x128xf32, #tpu.memory_space<vmem>>, %arg7: memref<1x128xf32, #tpu.memory_space<vmem>>, %arg8: memref<1x8x8x128xbf16, #tpu.memory_space<vmem>>, %arg9: memref<10x16x128xf32, #tpu.memory_space<vmem>>, %arg10: memref<10x16x128xf32, #tpu.memory_space<vmem>>) attributes {dimension_semantics = [#tpu.dimension_semantics<parallel>], iteration_bounds = array<i64: 2>, scalar_prefetch = 0 : i64, scratch_operands = 2 : i64, tpu.core_type = #tpu.core_type<tc>, window_params = [{transform_indices = @transform_0, window_bounds = array<i64: 1, 8, 8, 128>}, {pipeline_mode = #tpu.pipeline_mode<synchronous>, transform_indices = @transform_1, window_bounds = array<i64: 1152, 128>}, {pipeline_mode = #tpu.pipeline_mode<synchronous>, transform_indices = @transform_2, window_bounds = array<i64: 1152, 128>}, {pipeline_mode = #tpu.pipeline_mode<synchronous>, transform_indices = @transform_3, window_bounds = array<i64: 1, 128>}, {pipeline_mode = #tpu.pipeline_mode<synchronous>, transform_indices = @transform_4, window_bounds = array<i64: 1, 128>}, {pipeline_mode = #tpu.pipeline_mode<synchronous>, transform_indices = @transform_5, window_bounds = array<i64: 1, 128>}, {pipeline_mode = #tpu.pipeline_mode<synchronous>, transform_indices = @transform_6, window_bounds = array<i64: 1, 128>}, {transform_indices = @transform_7, window_bounds = array<i64: 1, 8, 8, 128>}]} {
    %c0 = arith.constant 0 : index
    %c0_0 = arith.constant 0 : index
    %c0_1 = arith.constant 0 : index
    %c0_2 = arith.constant 0 : index
    %0 = vector.load %arg1[%c0, %c0_0, %c0_1, %c0_2] : memref<1x8x8x128xbf16, #tpu.memory_space<vmem>>, vector<1x8x8x128xbf16>
    %1 = vector.shape_cast %0 : vector<1x8x8x128xbf16> to vector<8x8x128xbf16>
    %c0_3 = arith.constant 0 : index
    %c0_4 = arith.constant 0 : index
    %2 = vector.load %arg4[%c0_3, %c0_4] : memref<1x128xf32, #tpu.memory_space<vmem>>, vector<1x128xf32>
    %3 = vector.shape_cast %2 : vector<1x128xf32> to vector<128xf32>
    %4 = arith.extf %1 : vector<8x8x128xbf16> to vector<8x8x128xf32>
    %5 = vector.shape_cast %3 : vector<128xf32> to vector<1x1x128xf32>
    %6 = vector.broadcast %5 : vector<1x1x128xf32> to vector<8x8x128xf32>
    %7 = arith.mulf %4, %6 : vector<8x8x128xf32>
    %c0_5 = arith.constant 0 : index
    %c0_6 = arith.constant 0 : index
    %8 = vector.load %arg5[%c0_5, %c0_6] : memref<1x128xf32, #tpu.memory_space<vmem>>, vector<1x128xf32>
    %9 = vector.shape_cast %8 : vector<1x128xf32> to vector<128xf32>
    %10 = vector.shape_cast %9 : vector<128xf32> to vector<1x1x128xf32>
    %11 = vector.broadcast %10 : vector<1x1x128xf32> to vector<8x8x128xf32>
    %12 = arith.addf %7, %11 : vector<8x8x128xf32>
    %cst = arith.constant 0.000000e+00 : f32
    %13 = vector.broadcast %cst : f32 to vector<8x8x128xf32>
    %14 = arith.maximumf %12, %13 : vector<8x8x128xf32>
    %c1 = arith.constant 1 : index
    %c1_7 = arith.constant 1 : index
    %c0_8 = arith.constant 0 : index
    %15 = vector.load %arg9[%c1, %c1_7, %c0_8] : memref<10x16x128xf32, #tpu.memory_space<vmem>>, vector<8x8x128xf32>
    tpu.vector_store %arg9[%c1, %c1_7, %c0_8], %14 {strides = array<i32>} : memref<10x16x128xf32, #tpu.memory_space<vmem>>, vector<8x8x128xf32>,
    %cst_9 = arith.constant 0.000000e+00 : f32
    %16 = vector.broadcast %cst_9 : f32 to vector<1x16x128xf32>
    %c0_10 = arith.constant 0 : index
    %c0_11 = arith.constant 0 : index
    %c0_12 = arith.constant 0 : index
    %17 = vector.load %arg9[%c0_10, %c0_11, %c0_12] : memref<10x16x128xf32, #tpu.memory_space<vmem>>, vector<1x16x128xf32>
    tpu.vector_store %arg9[%c0_10, %c0_11, %c0_12], %16 {strides = array<i32>} : memref<10x16x128xf32, #tpu.memory_space<vmem>>, vector<1x16x128xf32>,
    %c9 = arith.constant 9 : index
    %c0_13 = arith.constant 0 : index
    %c0_14 = arith.constant 0 : index
    %18 = vector.load %arg9[%c9, %c0_13, %c0_14] : memref<10x16x128xf32, #tpu.memory_space<vmem>>, vector<1x16x128xf32>
    tpu.vector_store %arg9[%c9, %c0_13, %c0_14], %16 {strides = array<i32>} : memref<10x16x128xf32, #tpu.memory_space<vmem>>, vector<1x16x128xf32>,
    %cst_15 = arith.constant 0.000000e+00 : f32
    %19 = vector.broadcast %cst_15 : f32 to vector<10x1x128xf32>
    %c0_16 = arith.constant 0 : index
    %c0_17 = arith.constant 0 : index
    %c0_18 = arith.constant 0 : index
    %20 = vector.load %arg9[%c0_16, %c0_17, %c0_18] : memref<10x16x128xf32, #tpu.memory_space<vmem>>, vector<10x1x128xf32>
    tpu.vector_store %arg9[%c0_16, %c0_17, %c0_18], %19 {strides = array<i32>} : memref<10x16x128xf32, #tpu.memory_space<vmem>>, vector<10x1x128xf32>,
    %c0_19 = arith.constant 0 : index
    %c9_20 = arith.constant 9 : index
    %c0_21 = arith.constant 0 : index
    %21 = vector.load %arg9[%c0_19, %c9_20, %c0_21] : memref<10x16x128xf32, #tpu.memory_space<vmem>>, vector<10x1x128xf32>
    tpu.vector_store %arg9[%c0_19, %c9_20, %c0_21], %19 {strides = array<i32>} : memref<10x16x128xf32, #tpu.memory_space<vmem>>, vector<10x1x128xf32>,
    %c0_22 = arith.constant 0 : index
    %c0_23 = arith.constant 0 : index
    %c0_24 = arith.constant 0 : index
    %22 = vector.load %arg9[%c0_22, %c0_23, %c0_24] : memref<10x16x128xf32, #tpu.memory_space<vmem>>, vector<10x16x128xf32>
    %cst_25 = arith.constant 0.000000e+00 : f32
    %23 = vector.broadcast %cst_25 : f32 to vector<128x128xf32>
    %24 = vector.extract_strided_slice %22 {offsets = [0, 0, 0], sizes = [8, 16, 128], strides = [1, 1, 1]} : vector<10x16x128xf32> to vector<8x16x128xf32>
    %25 = vector.shape_cast %24 : vector<8x16x128xf32> to vector<128x128xf32>
    %c1_i32 = arith.constant 1 : i32
    %26 = tpu.dynamic_rotate %25 by %c1_i32 dim 0 : vector<128x128xf32>, i32 -> vector<128x128xf32>
    %c127_i32 = arith.constant 127 : i32
    %27 = tpu.dynamic_rotate %25 by %c127_i32 dim 0 : vector<128x128xf32>, i32 -> vector<128x128xf32>
    %28 = tpu.concatenate %26, %25, %27 in 1 : vector<128x128xf32>, vector<128x128xf32>, vector<128x128xf32> -> vector<128x384xf32>
    %29 = arith.truncf %28 : vector<128x384xf32> to vector<128x384xbf16>
    %c0_26 = arith.constant 0 : index
    %c0_27 = arith.constant 0 : index
    %30 = vector.load %arg2[%c0_26, %c0_27] : memref<1152x128xbf16, #tpu.memory_space<vmem>>, vector<384x128xbf16>
    %cst_28 = arith.constant dense<0.000000e+00> : vector<128x128xf32>
    %31 = tpu.matmul %29, %30, %cst_28 {dimension_numbers = #tpu.dot_dimension_numbers<[1], [0], [0], [1], [0, 0, 1, 1], [], []>} : vector<128x384xbf16>, vector<384x128xbf16>, vector<128x128xf32> -> vector<128x128xf32>
    %32 = arith.addf %23, %31 : vector<128x128xf32>
    %33 = vector.extract_strided_slice %22 {offsets = [1, 0, 0], sizes = [8, 16, 128], strides = [1, 1, 1]} : vector<10x16x128xf32> to vector<8x16x128xf32>
    %34 = vector.shape_cast %33 : vector<8x16x128xf32> to vector<128x128xf32>
    %c1_i32_29 = arith.constant 1 : i32
    %35 = tpu.dynamic_rotate %34 by %c1_i32_29 dim 0 : vector<128x128xf32>, i32 -> vector<128x128xf32>
    %c127_i32_30 = arith.constant 127 : i32
    %36 = tpu.dynamic_rotate %34 by %c127_i32_30 dim 0 : vector<128x128xf32>, i32 -> vector<128x128xf32>
    %37 = tpu.concatenate %35, %34, %36 in 1 : vector<128x128xf32>, vector<128x128xf32>, vector<128x128xf32> -> vector<128x384xf32>
    %38 = arith.truncf %37 : vector<128x384xf32> to vector<128x384xbf16>
    %c384 = arith.constant 384 : index
    %c0_31 = arith.constant 0 : index
    %39 = vector.load %arg2[%c384, %c0_31] : memref<1152x128xbf16, #tpu.memory_space<vmem>>, vector<384x128xbf16>
    %cst_32 = arith.constant dense<0.000000e+00> : vector<128x128xf32>
    %40 = tpu.matmul %38, %39, %cst_32 {dimension_numbers = #tpu.dot_dimension_numbers<[1], [0], [0], [1], [0, 0, 1, 1], [], []>} : vector<128x384xbf16>, vector<384x128xbf16>, vector<128x128xf32> -> vector<128x128xf32>
    %41 = arith.addf %32, %40 : vector<128x128xf32>
    %42 = vector.extract_strided_slice %22 {offsets = [2, 0, 0], sizes = [8, 16, 128], strides = [1, 1, 1]} : vector<10x16x128xf32> to vector<8x16x128xf32>
    %43 = vector.shape_cast %42 : vector<8x16x128xf32> to vector<128x128xf32>
    %c1_i32_33 = arith.constant 1 : i32
    %44 = tpu.dynamic_rotate %43 by %c1_i32_33 dim 0 : vector<128x128xf32>, i32 -> vector<128x128xf32>
    %c127_i32_34 = arith.constant 127 : i32
    %45 = tpu.dynamic_rotate %43 by %c127_i32_34 dim 0 : vector<128x128xf32>, i32 -> vector<128x128xf32>
    %46 = tpu.concatenate %44, %43, %45 in 1 : vector<128x128xf32>, vector<128x128xf32>, vector<128x128xf32> -> vector<128x384xf32>
    %47 = arith.truncf %46 : vector<128x384xf32> to vector<128x384xbf16>
    %c768 = arith.constant 768 : index
    %c0_35 = arith.constant 0 : index
    %48 = vector.load %arg2[%c768, %c0_35] : memref<1152x128xbf16, #tpu.memory_space<vmem>>, vector<384x128xbf16>
    %cst_36 = arith.constant dense<0.000000e+00> : vector<128x128xf32>
    %49 = tpu.matmul %47, %48, %cst_36 {dimension_numbers = #tpu.dot_dimension_numbers<[1], [0], [0], [1], [0, 0, 1, 1], [], []>} : vector<128x384xbf16>, vector<384x128xbf16>, vector<128x128xf32> -> vector<128x128xf32>
    %50 = arith.addf %41, %49 : vector<128x128xf32>
    %c0_37 = arith.constant 0 : index
    %c0_38 = arith.constant 0 : index
    %51 = vector.load %arg6[%c0_37, %c0_38] : memref<1x128xf32, #tpu.memory_space<vmem>>, vector<1x128xf32>
    %52 = vector.shape_cast %51 : vector<1x128xf32> to vector<128xf32>
    %53 = vector.shape_cast %52 : vector<128xf32> to vector<1x128xf32>
    %54 = vector.broadcast %53 : vector<1x128xf32> to vector<128x128xf32>
    %55 = arith.mulf %50, %54 : vector<128x128xf32>
    %c0_39 = arith.constant 0 : index
    %c0_40 = arith.constant 0 : index
    %56 = vector.load %arg7[%c0_39, %c0_40] : memref<1x128xf32, #tpu.memory_space<vmem>>, vector<1x128xf32>
    %57 = vector.shape_cast %56 : vector<1x128xf32> to vector<128xf32>
    %58 = vector.shape_cast %57 : vector<128xf32> to vector<1x128xf32>
    %59 = vector.broadcast %58 : vector<1x128xf32> to vector<128x128xf32>
    %60 = arith.addf %55, %59 : vector<128x128xf32>
    %cst_41 = arith.constant 0.000000e+00 : f32
    %61 = vector.broadcast %cst_41 : f32 to vector<128x128xf32>
    %62 = arith.maximumf %60, %61 : vector<128x128xf32>
    %63 = vector.shape_cast %62 : vector<128x128xf32> to vector<8x16x128xf32>
    %c1_42 = arith.constant 1 : index
    %c0_43 = arith.constant 0 : index
    %c0_44 = arith.constant 0 : index
    %64 = vector.load %arg10[%c1_42, %c0_43, %c0_44] : memref<10x16x128xf32, #tpu.memory_space<vmem>>, vector<8x16x128xf32>
    tpu.vector_store %arg10[%c1_42, %c0_43, %c0_44], %63 {strides = array<i32>} : memref<10x16x128xf32, #tpu.memory_space<vmem>>, vector<8x16x128xf32>,
    %cst_45 = arith.constant 0.000000e+00 : f32
    %65 = vector.broadcast %cst_45 : f32 to vector<1x16x128xf32>
    %c0_46 = arith.constant 0 : index
    %c0_47 = arith.constant 0 : index
    %c0_48 = arith.constant 0 : index
    %66 = vector.load %arg10[%c0_46, %c0_47, %c0_48] : memref<10x16x128xf32, #tpu.memory_space<vmem>>, vector<1x16x128xf32>
    tpu.vector_store %arg10[%c0_46, %c0_47, %c0_48], %65 {strides = array<i32>} : memref<10x16x128xf32, #tpu.memory_space<vmem>>, vector<1x16x128xf32>,
    %c9_49 = arith.constant 9 : index
    %c0_50 = arith.constant 0 : index
    %c0_51 = arith.constant 0 : index
    %67 = vector.load %arg10[%c9_49, %c0_50, %c0_51] : memref<10x16x128xf32, #tpu.memory_space<vmem>>, vector<1x16x128xf32>
    tpu.vector_store %arg10[%c9_49, %c0_50, %c0_51], %65 {strides = array<i32>} : memref<10x16x128xf32, #tpu.memory_space<vmem>>, vector<1x16x128xf32>,
    %cst_52 = arith.constant 0.000000e+00 : f32
    %68 = vector.broadcast %cst_52 : f32 to vector<10x1x128xf32>
    %c0_53 = arith.constant 0 : index
    %c0_54 = arith.constant 0 : index
    %c0_55 = arith.constant 0 : index
    %69 = vector.load %arg10[%c0_53, %c0_54, %c0_55] : memref<10x16x128xf32, #tpu.memory_space<vmem>>, vector<10x1x128xf32>
    tpu.vector_store %arg10[%c0_53, %c0_54, %c0_55], %68 {strides = array<i32>} : memref<10x16x128xf32, #tpu.memory_space<vmem>>, vector<10x1x128xf32>,
    %c0_56 = arith.constant 0 : index
    %c9_57 = arith.constant 9 : index
    %c0_58 = arith.constant 0 : index
    %70 = vector.load %arg10[%c0_56, %c9_57, %c0_58] : memref<10x16x128xf32, #tpu.memory_space<vmem>>, vector<10x1x128xf32>
    tpu.vector_store %arg10[%c0_56, %c9_57, %c0_58], %68 {strides = array<i32>} : memref<10x16x128xf32, #tpu.memory_space<vmem>>, vector<10x1x128xf32>,
    %c0_59 = arith.constant 0 : index
    %c0_60 = arith.constant 0 : index
    %c0_61 = arith.constant 0 : index
    %71 = vector.load %arg10[%c0_59, %c0_60, %c0_61] : memref<10x16x128xf32, #tpu.memory_space<vmem>>, vector<10x16x128xf32>
    %cst_62 = arith.constant 0.000000e+00 : f32
    %72 = vector.broadcast %cst_62 : f32 to vector<128x128xf32>
    %73 = vector.extract_strided_slice %71 {offsets = [0, 0, 0], sizes = [8, 16, 128], strides = [1, 1, 1]} : vector<10x16x128xf32> to vector<8x16x128xf32>
    %74 = vector.shape_cast %73 : vector<8x16x128xf32> to vector<128x128xf32>
    %c1_i32_63 = arith.constant 1 : i32
    %75 = tpu.dynamic_rotate %74 by %c1_i32_63 dim 0 : vector<128x128xf32>, i32 -> vector<128x128xf32>
    %c127_i32_64 = arith.constant 127 : i32
    %76 = tpu.dynamic_rotate %74 by %c127_i32_64 dim 0 : vector<128x128xf32>, i32 -> vector<128x128xf32>
    %77 = tpu.concatenate %75, %74, %76 in 1 : vector<128x128xf32>, vector<128x128xf32>, vector<128x128xf32> -> vector<128x384xf32>
    %78 = arith.truncf %77 : vector<128x384xf32> to vector<128x384xbf16>
    %c0_65 = arith.constant 0 : index
    %c0_66 = arith.constant 0 : index
    %79 = vector.load %arg3[%c0_65, %c0_66] : memref<1152x128xbf16, #tpu.memory_space<vmem>>, vector<384x128xbf16>
    %cst_67 = arith.constant dense<0.000000e+00> : vector<128x128xf32>
    %80 = tpu.matmul %78, %79, %cst_67 {dimension_numbers = #tpu.dot_dimension_numbers<[1], [0], [0], [1], [0, 0, 1, 1], [], []>} : vector<128x384xbf16>, vector<384x128xbf16>, vector<128x128xf32> -> vector<128x128xf32>
    %81 = arith.addf %72, %80 : vector<128x128xf32>
    %82 = vector.extract_strided_slice %71 {offsets = [1, 0, 0], sizes = [8, 16, 128], strides = [1, 1, 1]} : vector<10x16x128xf32> to vector<8x16x128xf32>
    %83 = vector.shape_cast %82 : vector<8x16x128xf32> to vector<128x128xf32>
    %c1_i32_68 = arith.constant 1 : i32
    %84 = tpu.dynamic_rotate %83 by %c1_i32_68 dim 0 : vector<128x128xf32>, i32 -> vector<128x128xf32>
    %c127_i32_69 = arith.constant 127 : i32
    %85 = tpu.dynamic_rotate %83 by %c127_i32_69 dim 0 : vector<128x128xf32>, i32 -> vector<128x128xf32>
    %86 = tpu.concatenate %84, %83, %85 in 1 : vector<128x128xf32>, vector<128x128xf32>, vector<128x128xf32> -> vector<128x384xf32>
    %87 = arith.truncf %86 : vector<128x384xf32> to vector<128x384xbf16>
    %c384_70 = arith.constant 384 : index
    %c0_71 = arith.constant 0 : index
    %88 = vector.load %arg3[%c384_70, %c0_71] : memref<1152x128xbf16, #tpu.memory_space<vmem>>, vector<384x128xbf16>
    %cst_72 = arith.constant dense<0.000000e+00> : vector<128x128xf32>
    %89 = tpu.matmul %87, %88, %cst_72 {dimension_numbers = #tpu.dot_dimension_numbers<[1], [0], [0], [1], [0, 0, 1, 1], [], []>} : vector<128x384xbf16>, vector<384x128xbf16>, vector<128x128xf32> -> vector<128x128xf32>
    %90 = arith.addf %81, %89 : vector<128x128xf32>
    %91 = vector.extract_strided_slice %71 {offsets = [2, 0, 0], sizes = [8, 16, 128], strides = [1, 1, 1]} : vector<10x16x128xf32> to vector<8x16x128xf32>
    %92 = vector.shape_cast %91 : vector<8x16x128xf32> to vector<128x128xf32>
    %c1_i32_73 = arith.constant 1 : i32
    %93 = tpu.dynamic_rotate %92 by %c1_i32_73 dim 0 : vector<128x128xf32>, i32 -> vector<128x128xf32>
    %c127_i32_74 = arith.constant 127 : i32
    %94 = tpu.dynamic_rotate %92 by %c127_i32_74 dim 0 : vector<128x128xf32>, i32 -> vector<128x128xf32>
    %95 = tpu.concatenate %93, %92, %94 in 1 : vector<128x128xf32>, vector<128x128xf32>, vector<128x128xf32> -> vector<128x384xf32>
    %96 = arith.truncf %95 : vector<128x384xf32> to vector<128x384xbf16>
    %c768_75 = arith.constant 768 : index
    %c0_76 = arith.constant 0 : index
    %97 = vector.load %arg3[%c768_75, %c0_76] : memref<1152x128xbf16, #tpu.memory_space<vmem>>, vector<384x128xbf16>
    %cst_77 = arith.constant dense<0.000000e+00> : vector<128x128xf32>
    %98 = tpu.matmul %96, %97, %cst_77 {dimension_numbers = #tpu.dot_dimension_numbers<[1], [0], [0], [1], [0, 0, 1, 1], [], []>} : vector<128x384xbf16>, vector<384x128xbf16>, vector<128x128xf32> -> vector<128x128xf32>
    %99 = arith.addf %90, %98 : vector<128x128xf32>
    %100 = vector.shape_cast %99 : vector<128x128xf32> to vector<8x16x128xf32>
    %101 = vector.extract_strided_slice %100 {offsets = [0, 1, 0], sizes = [8, 8, 128], strides = [1, 1, 1]} : vector<8x16x128xf32> to vector<8x8x128xf32>
    %c0_78 = arith.constant 0 : index
    %c0_79 = arith.constant 0 : index
    %c0_80 = arith.constant 0 : index
    %c0_81 = arith.constant 0 : index
    %102 = vector.load %arg1[%c0_78, %c0_79, %c0_80, %c0_81] : memref<1x8x8x128xbf16, #tpu.memory_space<vmem>>, vector<1x8x8x128xbf16>
    %103 = vector.shape_cast %102 : vector<1x8x8x128xbf16> to vector<8x8x128xbf16>
    %104 = arith.extf %103 : vector<8x8x128xbf16> to vector<8x8x128xf32>
    %105 = arith.addf %101, %104 : vector<8x8x128xf32>
    %106 = arith.truncf %105 : vector<8x8x128xf32> to vector<8x8x128xbf16>
    %c0_82 = arith.constant 0 : index
    %c0_83 = arith.constant 0 : index
    %c0_84 = arith.constant 0 : index
    %c0_85 = arith.constant 0 : index
    %107 = vector.load %arg8[%c0_82, %c0_83, %c0_84, %c0_85] : memref<1x8x8x128xbf16, #tpu.memory_space<vmem>>, vector<1x8x8x128xbf16>
    %108 = vector.shape_cast %107 : vector<1x8x8x128xbf16> to vector<8x8x128xbf16>
    %109 = vector.shape_cast %106 : vector<8x8x128xbf16> to vector<1x8x8x128xbf16>
    tpu.vector_store %arg8[%c0_82, %c0_83, %c0_84, %c0_85], %109 {strides = array<i32>} : memref<1x8x8x128xbf16, #tpu.memory_space<vmem>>, vector<1x8x8x128xbf16>,
    return
  }
  func.func @transform_0(%arg0: i32) -> (i32, i32, i32, i32) {
    %c0_i32 = arith.constant 0 : i32
    %c0_i32_0 = arith.constant 0 : i32
    %c0_i32_1 = arith.constant 0 : i32
    %c0_i32_2 = arith.constant 0 : i32
    return %arg0, %c0_i32, %c0_i32_0, %c0_i32_1 : i32, i32, i32, i32
  }
  func.func @transform_1(%arg0: i32) -> (i32, i32) {
    %c0_i32 = arith.constant 0 : i32
    %c0_i32_0 = arith.constant 0 : i32
    %c0_i32_1 = arith.constant 0 : i32
    return %c0_i32, %c0_i32_0 : i32, i32
  }
  func.func @transform_2(%arg0: i32) -> (i32, i32) {
    %c0_i32 = arith.constant 0 : i32
    %c0_i32_0 = arith.constant 0 : i32
    %c0_i32_1 = arith.constant 0 : i32
    return %c0_i32, %c0_i32_0 : i32, i32
  }
  func.func @transform_3(%arg0: i32) -> (i32, i32) {
    %c0_i32 = arith.constant 0 : i32
    %c0_i32_0 = arith.constant 0 : i32
    %c0_i32_1 = arith.constant 0 : i32
    return %c0_i32, %c0_i32_0 : i32, i32
  }
  func.func @transform_4(%arg0: i32) -> (i32, i32) {
    %c0_i32 = arith.constant 0 : i32
    %c0_i32_0 = arith.constant 0 : i32
    %c0_i32_1 = arith.constant 0 : i32
    return %c0_i32, %c0_i32_0 : i32, i32
  }
  func.func @transform_5(%arg0: i32) -> (i32, i32) {
    %c0_i32 = arith.constant 0 : i32
    %c0_i32_0 = arith.constant 0 : i32
    %c0_i32_1 = arith.constant 0 : i32
    return %c0_i32, %c0_i32_0 : i32, i32
  }
  func.func @transform_6(%arg0: i32) -> (i32, i32) {
    %c0_i32 = arith.constant 0 : i32
    %c0_i32_0 = arith.constant 0 : i32
    %c0_i32_1 = arith.constant 0 : i32
    return %c0_i32, %c0_i32_0 : i32, i32
  }
  func.func @transform_7(%arg0: i32) -> (i32, i32, i32, i32) {
    %c0_i32 = arith.constant 0 : i32
    %c0_i32_0 = arith.constant 0 : i32
    %c0_i32_1 = arith.constant 0 : i32
    %c0_i32_2 = arith.constant 0 : i32
    return %arg0, %c0_i32, %c0_i32_0, %c0_i32_1 : i32, i32, i32, i32
  }
}

</mosaic_0001>

<bundles_post_ra>
// kernel: tpu_custom_call.1
= control target key start
LH: loop header
LB: loop body
LE: loop exit
PB: predicated region body
PF: predicated region fallthrough
CT: control target
= control target key end

     0   :  { %6 = vsyncpa [#allocation3], 0  ;;  %s103_s0 = inlined_call_operand.hbm [shape: f32[8,128], index: 0, kind: input, shape index: {}]   ;;  %s104_s1 = inlined_call_operand.hbm [shape: f32[8,128], index: 1, kind: output, shape index: {}]  }
   0x1   :  { %7 = vsyncpa [#allocation4], 0  ;;  %s85_s6 = smov [#allocation2]  }
   0x2   :  { %s14_s7 = sshll.u32 %s85_s6, 4  ;;  %s15_s7 = int_to_ptr.vmem [resolvable:$true] %s14_s7 }
   0x3   :  { %s49_s8 = scalar_lea.vmem %s15_s7, 128  ;;  %p54_p1 = scmp.lt.s32.totalorder %s15_s7, %s15_s7 }
   0x4   :  { %p50_p0 = scmp.ne.s32.totalorder %s15_s7, %s49_s8  ;;  %p55_p2 = scmp.lt.s32.totalorder %s49_s8, %s49_s8 }
   0x6   :  { %p56_p3 = por %p55_p2, %p54_p1 }
   0x8   :  { %p57_p4 = pnand %p56_p3, %p50_p0 }
   0xa   :  { %60 = shalt.err (!%p57_p4)
}
   0xb   :  { %17 = dma.hbm_to_vmem [thread:$0]  %s103_s0, 128, %s15_s7, [#allocation3]  }
   0xc   :  { %81 = dma.done.wait [#allocation3], 128  }
   0xd   :  { %82 = vsyncadd [#allocation3], 4294967168  ;;  %s86_s11 = smov [#allocation5]   ;;  %v21_v0 = vld [vmem:[#allocation2] sm:$0xff] }
   0xe   :  { %s30_s12 = sshll.u32 %s86_s11, 4  ;;  %v22_v1 = vrot.slane %v21_v0, 7  ;;  %s31_s12 = int_to_ptr.vmem [resolvable:$true] %s30_s12 }
   0xf   :  { %s61_s13 = scalar_lea.vmem %s31_s12, 128  ;;  %p66_p6 = scmp.lt.s32.totalorder %s31_s12, %s31_s12 }
  0x10   :  { %23 = vst [vmem:[#allocation5] sm:$0xff] %v22_v1  ;;  %p62_p5 = scmp.ne.s32.totalorder %s31_s12, %s61_s13  ;;  %p67_p7 = scmp.lt.s32.totalorder %s61_s13, %s61_s13 }
  0x12   :  { %p68_p8 = por %p67_p7, %p66_p6 }
  0x14   :  { %p69_p9 = pnand %p68_p8, %p62_p5 }
  0x16   :  { %72 = shalt.err (!%p69_p9)
}
  0x17   :  { %33 = dma.vmem_to_hbm [thread:$0]  %s31_s12, 128, %s104_s1, [#allocation4]  }
  0x18   :  { %83 = dma.done.wait [#allocation4], 128  }
  0x19   :  { %84 = vsyncadd [#allocation4], 4294967168 }
  0x1a   :  { %37 = vsyncpa [#allocation3], 1 }
  0x1b   :  { %38 = vsyncpa [#allocation4], 1 }

// kernel: _lambda_.3
= control target key start
LH: loop header
LB: loop body
LE: loop exit
PB: predicated region body
PF: predicated region fallthrough
CT: control target
= control target key end

     0   :  { %s4496_s24 = smov 0   ;;  %s6242_s0 = inlined_call_operand.vmem [shape: bf16[2,8,8,128], index: 0, kind: input, shape index: {}]   ;;  %s6243_s1 = inlined_call_operand.vmem [shape: bf16[1152,128], index: 1, kind: input, shape index: {}]   ;;  %s6244_s2 = inlined_call_operand.vmem [shape: bf16[1152,128], index: 2, kind: input, shape index: {}]   ;;  %s6245_s3 = inlined_call_operand.vmem [shape: f32[1,128], index: 3, kind: input, shape index: {}]   ;;  %s6246_s4 = inlined_call_operand.vmem [shape: f32[1,128], index: 4, kind: input, shape index: {}]   ;;  %s6247_s5 = inlined_call_operand.vmem [shape: f32[1,128], index: 5, kind: input, shape index: {}]   ;;  %s6248_s6 = inlined_call_operand.vmem [shape: f32[1,128], index: 6, kind: input, shape index: {}]   ;;  %s6249_s7 = inlined_call_operand.vmem [shape: bf16[2,8,8,128], index: 7, kind: output, shape index: {}]  }
   0x1 LB: > { %s3390_s25 = sadd.s32 4294967295, %s4453_s24   ;;  %p3394_p0 = scmp.ge.s32.totalorder %s4453_s24, 1  ;;  %s4453_s24 = sphi %s4496_s24, %s17_s24  }
   0x2   : > { %p237_p1 = scmp.lt.s32.totalorder %s4453_s24, 3 }
   0x4   : > { %p238_p2 = pnand %p3394_p0, %p237_p1 }
   0x6   : > { %241 = sbr.rel (%p238_p2) target bundleno = 790 (0x316), region = 48 }
   0xb   : > { %v4302_v0 = vld [vmem:[%s6243_s1 + $0x138] sm:$0xff]   ;;  %v6250_v3 = vmov 0.0   ;;  %v4305_v4 = vld [vmem:[%s6243_s1 + $0x130] sm:$0xff]   ;;  %v4308_v7 = vld [vmem:[%s6243_s1 + $0x128] sm:$0xff]   ;;  %p269_p3 = scmp.lt.s32.totalorder %s3390_s25, 1  ;;  %v404_v51 = vlaneseq }
   0xc   : > { %v4303_v1 = vld [vmem:[%s6243_s1 + $0x178] sm:$0xff]   ;;  %3621 = vmatprep.subr.bf16.mxu0 %v4302_v0  ;;  %349 = vst [vmem:[#allocation2 + $0x10] sm:$0x1] %v6250_v3  ;;  %359 = vst [vmem:[#allocation2 + $0x19] sm:$0x1] %v6250_v3  ;;  %v4306_v5 = vld [vmem:[%s6243_s1 + $0x170] sm:$0xff]  }
   0xd   : > { %v4304_v2 = vld [vmem:[%s6243_s1 + $0xf8] sm:$0xff]   ;;  %343 = vst [vmem:[#allocation2] sm:$0xff] %v6250_v3  ;;  %344 = vst [vmem:[#allocation2 + $0x8] sm:$0xff] %v6250_v3  ;;  %4101 = vmatprep.subr.bf16.mxu1 %v4303_v1  ;;  %v4307_v6 = vld [vmem:[%s6243_s1 + $0xf0] sm:$0xff]   ;;  %s6329_s25 = smov (!%p269_p3, %s3390_s25), 1  ;;  %v4641_v62 = vshrl.u32 %v404_v51, 7 }
   0xe   : > { %346 = vst [vmem:[#allocation2 + $0x90] sm:$0xff] %v6250_v3  ;;  %347 = vst [vmem:[#allocation2 + $0x98] sm:$0xff] %v6250_v3  ;;  %3622 = vmatpush3.bf16.msra.mxu0 %v4304_v2  ;;  %4102 = vmatpush3.bf16.msra.mxu1 %v4303_v1  ;;  %v4309_v8 = vld [vmem:[%s6243_s1 + $0x168] sm:$0xff]   ;;  %v4311_v10 = vld [vmem:[%s6243_s1 + $0x120] sm:$0xff]   ;;  %s3565_s16 = sshll.u32 %s6329_s25, 5 }
   0xf   : > { %350 = vst [vmem:[#allocation2 + $0x20] sm:$0x1] %v6250_v3  ;;  %351 = vst [vmem:[#allocation2 + $0x30] sm:$0x1] %v6250_v3  ;;  %3623 = vmatprep.subr.bf16.mxu0 %v4305_v4  ;;  %4103 = vmatprep.subr.bf16.mxu1 %v4306_v5  ;;  %v4310_v9 = vld [vmem:[%s6243_s1 + $0xe8] sm:$0xff]   ;;  %v4312_v11 = vld [vmem:[%s6243_s1 + $0x160] sm:$0xff]   ;;  %s4608_s27 = scalar_lea.vmem %s6242_s0, %s3565_s16  ;;  %s6162_s17 = scalar_lea.vmem %s6249_s7, %s3565_s16 }
  0x10   : > { %352 = vst [vmem:[#allocation2 + $0x40] sm:$0x1] %v6250_v3  ;;  %353 = vst [vmem:[#allocation2 + $0x50] sm:$0x1] %v6250_v3  ;;  %v4313_v12 = vld [vmem:[%s6243_s1 + $0xe0] sm:$0xff]   ;;  %v4314_v13 = vld [vmem:[%s6243_s1 + $0x118] sm:$0xff]  }
  0x11   : > { %354 = vst [vmem:[#allocation2 + $0x60] sm:$0x1] %v6250_v3  ;;  %355 = vst [vmem:[#allocation2 + $0x70] sm:$0x1] %v6250_v3  ;;  %v4315_v14 = vld [vmem:[%s6243_s1 + $0x158] sm:$0xff]   ;;  %v4317_v16 = vld [vmem:[%s6243_s1 + $0x110] sm:$0xff]  }
  0x12   : > { %356 = vst [vmem:[#allocation2 + $0x80] sm:$0x1] %v6250_v3  ;;  %360 = vst [vmem:[#allocation2 + $0x29] sm:$0x1] %v6250_v3  ;;  %3624 = vmatpush3.bf16.msra.mxu0 %v4307_v6  ;;  %4104 = vmatpush3.bf16.msra.mxu1 %v4306_v5  ;;  %v4316_v15 = vld [vmem:[%s6243_s1 + $0xd8] sm:$0xff]   ;;  %v4318_v17 = vld [vmem:[%s6243_s1 + $0x150] sm:$0xff]  }
  0x13   : > { %361 = vst [vmem:[#allocation2 + $0x39] sm:$0x1] %v6250_v3  ;;  %362 = vst [vmem:[#allocation2 + $0x49] sm:$0x1] %v6250_v3  ;;  %3625 = vmatprep.subr.bf16.mxu0 %v4308_v7  ;;  %4105 = vmatprep.subr.bf16.mxu1 %v4309_v8  ;;  %v4319_v18 = vld [vmem:[%s6243_s1 + $0xd0] sm:$0xff]   ;;  %v4320_v19 = vld [vmem:[%s6243_s1 + $0x108] sm:$0xff]  }
  0x14   : > { %363 = vst [vmem:[#allocation2 + $0x59] sm:$0x1] %v6250_v3  ;;  %364 = vst [vmem:[#allocation2 + $0x69] sm:$0x1] %v6250_v3  ;;  %v4321_v20 = vld [vmem:[%s6243_s1 + $0x148] sm:$0xff]   ;;  %v4323_v22 = vld [vmem:[%s6243_s1 + $0x100] sm:$0xff]  }
  0x15   : > { %365 = vst [vmem:[#allocation2 + $0x79] sm:$0x1] %v6250_v3  ;;  %366 = vst [vmem:[#allocation2 + $0x89] sm:$0x1] %v6250_v3  ;;  %v4322_v21 = vld [vmem:[%s6243_s1 + $0xc8] sm:$0xff]   ;;  %v4324_v23 = vld [vmem:[%s6243_s1 + $0x140] sm:$0xff]  }
  0x16   : > { %1763 = vst [vmem:[#allocation3] sm:$0xff] %v6250_v3  ;;  %1764 = vst [vmem:[#allocation3 + $0x8] sm:$0xff] %v6250_v3  ;;  %3626 = vmatpush3.bf16.msra.mxu0 %v4310_v9  ;;  %4106 = vmatpush3.bf16.msra.mxu1 %v4309_v8  ;;  %v3584_v24 = vld [vmem:[%s4608_s27] sm:$0xff]   ;;  %v3617_v28 = vld [vmem:[%s4608_s27 + $0x18] sm:$0xff]   ;;  %vm439_vm0 = vcmp.lt.s32.totalorder %v4641_v62, 7  ;;  %vm406_vm1 = vcmp.lt.s32.totalorder %v4641_v62, 1 }
  0x17   : > { %1766 = vst [vmem:[#allocation3 + $0x90] sm:$0xff] %v6250_v3  ;;  %1767 = vst [vmem:[#allocation3 + $0x98] sm:$0xff] %v6250_v3  ;;  %3627 = vmatprep.subr.bf16.mxu0 %v4311_v10  ;;  %4107 = vmatprep.subr.bf16.mxu1 %v4312_v11  ;;  %v3399_v25 = vld [vmem:[%s6245_s3] ss:$0 sm:$0xff]  ;;  %v3585_v26 = vunpack.c.l.bf16 %v3584_v24  ;;  %v3586_v27 = vunpack.c.h.bf16 %v3584_v24  ;;  %v3615_v29 = vld [vmem:[%s4608_s27 + $0x8] sm:$0xff]   ;;  %v3598_v31 = vunpack.c.h.bf16 %v3617_v28  ;;  %v3597_v34 = vunpack.c.l.bf16 %v3617_v28 }
  0x18   : > { %348 = vst [vmem:[#allocation2] sm:$0x1] %v6250_v3  ;;  %357 = vst [vmem:[#allocation2 + $0x90] sm:$0x1] %v6250_v3  ;;  %v3400_v30 = vld [vmem:[%s6246_s4] ss:$0 sm:$0xff]  ;;  %v3589_v32 = vunpack.c.l.bf16 %v3615_v29  ;;  %v3590_v33 = vunpack.c.h.bf16 %v3615_v29 }
  0x19   : > { %358 = vst [vmem:[#allocation2 + $0x9] sm:$0x1] %v6250_v3  ;;  %367 = vst [vmem:[#allocation2 + $0x99] sm:$0x1] %v6250_v3  ;;  %v4325_v35 = vld [vmem:[%s6243_s1 + $0xc0] sm:$0xff]   ;;  %v303_v36 = vmul.f32 %v3585_v26, %v3399_v25  ;;  %v304_v37 = vmul.f32 %v3586_v27, %v3399_v25  ;;  %v310_v38 = vmul.f32 %v3598_v31, %v3399_v25  ;;  %v4326_v40 = vld [vmem:[%s6243_s1 + $0x78] sm:$0xff]  }
  0x1a   : > { %1768 = vst [vmem:[#allocation3] sm:$0x1] %v6250_v3  ;;  %1777 = vst [vmem:[#allocation3 + $0x90] sm:$0x1] %v6250_v3  ;;  %3628 = vmatpush3.bf16.msra.mxu0 %v4313_v12  ;;  %4108 = vmatpush3.bf16.msra.mxu1 %v4312_v11  ;;  %v305_v39 = vmul.f32 %v3589_v32, %v3399_v25  ;;  %v306_v41 = vmul.f32 %v3590_v33, %v3399_v25  ;;  %v4637_v44 = vld [vmem:[%s6243_s1 + $0xb8] sm:$0xff]   ;;  %v3616_v52 = vld [vmem:[%s4608_s27 + $0x10] sm:$0xff]  }
  0x1b   : > { %1778 = vst [vmem:[#allocation3 + $0x9] sm:$0x1] %v6250_v3  ;;  %1787 = vst [vmem:[#allocation3 + $0x99] sm:$0x1] %v6250_v3  ;;  %3629 = vmatprep.subr.bf16.mxu0 %v4314_v13  ;;  %4109 = vmatprep.subr.bf16.mxu1 %v4315_v14  ;;  %v318_v42 = vadd.f32 %v3400_v30, %v303_v36  ;;  %v319_v43 = vadd.f32 %v3400_v30, %v304_v37  ;;  %v3593_v57 = vunpack.c.l.bf16 %v3616_v52  ;;  %v4329_v37 = vld [vmem:[%s6243_s1 + $0x70] sm:$0xff]  }
  0x1c   : > { %v309_v45 = vmul.f32 %v3597_v34, %v3399_v25  ;;  %v325_v46 = vadd.f32 %v3400_v30, %v310_v38  ;;  %v320_v47 = vadd.f32 %v3400_v30, %v305_v39  ;;  %v321_v48 = vadd.f32 %v3400_v30, %v306_v41  ;;  %v4328_v34 = vld [vmem:[%s6243_s1 + $0x38] sm:$0xff]   ;;  %v4332_v41 = vld [vmem:[%s6243_s1 + $0xb0] sm:$0xff]  }
  0x1d   : > { %v326_v49 = vmax.f32 %v318_v42, 0.0  ;;  %v327_v50 = vmax.f32 %v319_v43, 0.0  ;;  %v3594_v58 = vunpack.c.h.bf16 %v3616_v52  ;;  %v307_v60 = vmul.f32 %v3593_v57, %v3399_v25  ;;  %v4330_v42 = vld [vmem:[%s6243_s1 + $0x30] sm:$0xff]   ;;  %v4331_v52 = vld [vmem:[%s6243_s1 + $0x68] sm:$0xff]  }
  0x1e   : > { %3630 = vmatpush3.bf16.msra.mxu0 %v4316_v15  ;;  %4110 = vmatpush3.bf16.msra.mxu1 %v4315_v14  ;;  %v324_v53 = vadd.f32 %v3400_v30, %v309_v45  ;;  %v333_v54 = vmax.f32 %v325_v46, 0.0  ;;  %v328_v55 = vmax.f32 %v320_v47, 0.0  ;;  %v329_v56 = vmax.f32 %v321_v48, 0.0 }
  0x1f   : > { %3631 = vmatprep.subr.bf16.mxu0 %v4317_v16  ;;  %4111 = vmatprep.subr.bf16.mxu1 %v4318_v17  ;;  %335 = vst [vmem:[#allocation2 + $0x11] sm:$0xff] %v326_v49  ;;  %336 = vst [vmem:[#allocation2 + $0x21] sm:$0xff] %v327_v50  ;;  %v308_v61 = vmul.f32 %v3594_v58, %v3399_v25  ;;  %v322_v63 = vadd.f32 %v3400_v30, %v307_v60  ;;  %vm3204_vm2 = vsmask.f32 3328  ;;  %vm3205_vm3 = vsmask.f32 7440 }
  0x20   : > { %v332_v59 = vmax.f32 %v324_v53, 0.0  ;;  %342 = vst [vmem:[#allocation2 + $0x81] sm:$0xff] %v333_v54  ;;  %337 = vst [vmem:[#allocation2 + $0x31] sm:$0xff] %v328_v55  ;;  %v4643_v0 = vld [vmem:[#allocation2 + $0x98] sm:$0xff] }
  0x21   : > { %338 = vst [vmem:[#allocation2 + $0x41] sm:$0xff] %v329_v56  ;;  %v323_v1 = vadd.f32 %v3400_v30, %v308_v61  ;;  %v330_v2 = vmax.f32 %v322_v63, 0.0  ;;  %v1268_v8 = vrot.slane %v4643_v0, 7  ;;  %v4376_v0 = vld [vmem:[%s6244_s2 + $0x168] sm:$0xff]   ;;  %vm6153_vm4 = vmor %vm3204_vm2, %vm3205_vm3 }
  0x22   : > { %3632 = vmatpush3.bf16.msra.mxu0 %v4319_v18  ;;  %4112 = vmatpush3.bf16.msra.mxu1 %v4318_v17  ;;  %341 = vst [vmem:[#allocation2 + $0x71] sm:$0xff] %v332_v59 }
  0x23   : > { %3633 = vmatprep.subr.bf16.mxu0 %v4320_v19  ;;  %4113 = vmatprep.subr.bf16.mxu1 %v4321_v20  ;;  %v331_v4 = vmax.f32 %v323_v1, 0.0  ;;  %339 = vst [vmem:[#allocation2 + $0x51] sm:$0xff] %v330_v2  ;;  %v4333_v2 = vld [vmem:[%s6243_s1 + $0x28] sm:$0xff]  }
  0x25   : > { %340 = vst [vmem:[#allocation2 + $0x61] sm:$0xff] %v331_v4 }
  0x26   : > { %3634 = vmatpush3.bf16.msra.mxu0 %v4322_v21  ;;  %4114 = vmatpush3.bf16.msra.mxu1 %v4321_v20  ;;  %v370_v5 = vld [vmem:[#allocation2 + $0x10] sm:$0xff]  ;;  %v371_v6 = vld [vmem:[#allocation2 + $0x18] sm:$0xff]  ;;  %v372_v7 = vld [vmem:[#allocation2 + $0x20] sm:$0xff] }
  0x27   : > { %3635 = vmatprep.subr.bf16.mxu0 %v4323_v22  ;;  %4115 = vmatprep.subr.bf16.mxu1 %v4324_v23  ;;  %v4648_v9 = vrot.slane %v370_v5, 7  ;;  %v391_v10 = vrot.slane %v371_v6, 7  ;;  %v4650_v11 = vrot.slane %v370_v5, 1  ;;  %v426_v12 = vrot.slane %v371_v6, 1  ;;  %v4652_v13 = vld [vmem:[#allocation2 + $0x88] sm:$0xff]  ;;  %v4663_v18 = vld [vmem:[#allocation2 + $0x30] sm:$0xff] }
  0x28   : > { %v4654_v14 = vld [vmem:[#allocation2 + $0x28] sm:$0xff]  ;;  %v4656_v15 = vpack.c.bf16 %v371_v6, %v370_v5  ;;  %v4658_v16 = vrot.slane %v372_v7, 1  ;;  %v4661_v17 = vrot.slane %v4652_v13, 7  ;;  %v4666_v20 = vld [vmem:[#allocation2 + $0x38] sm:$0xff]  ;;  %v4668_v21 = vld [vmem:[#allocation2 + $0x40] sm:$0xff]  ;;  %v429_v24 = vrot.slane %v4663_v18, 1 }
  0x29   : > { %v428_v19 = vrot.slane %v4654_v14, 1  ;;  %v452_v22 = vsel %vm439_vm0, %v4650_v11, %v426_v12  ;;  %v4680_v25 = vpack.c.bf16 %v4654_v14, %v372_v7  ;;  %v430_v29 = vrot.slane %v4666_v20, 1  ;;  %v4694_v30 = vld [vmem:[#allocation2 + $0x48] sm:$0xff]  ;;  %v4756_v57 = vld [vmem:[#allocation2 + $0x70] sm:$0xff]  ;;  %v4766_v63 = vld [vmem:[#allocation2 + $0x78] sm:$0xff] }
  0x2a   : > { %3636 = vmatpush3.bf16.msra.mxu0 %v4325_v35  ;;  %4116 = vmatpush3.bf16.msra.mxu1 %v4324_v23  ;;  %v4676_v23 = vsel %vm406_vm1, %v4648_v9, %v391_v10  ;;  %v451_v26 = vsel %vm439_vm0, %v426_v12, %v4658_v16  ;;  %v532_v27 = vsel %vm406_vm1, %v4661_v17, %v4648_v9  ;;  %v431_v35 = vrot.slane %v4668_v21, 1  ;;  %v4722_v45 = vld [vmem:[#allocation2 + $0x50] sm:$0xff]  ;;  %v4725_v47 = vld [vmem:[#allocation2 + $0x58] sm:$0xff]  ;;  %v4780_v6 = vld [vmem:[#allocation2 + $0x80] sm:$0xff] }
  0x2b   : > { %3701 = vmatprep.subr.bf16.mxu1 %v4326_v40  ;;  %4133 = vmatprep.subr.bf16.mxu0 %v4637_v44  ;;  %v450_v28 = vsel %vm439_vm0, %v4658_v16, %v428_v19  ;;  %v4696_v31 = vpack.c.bf16 %v451_v26, %v452_v22  ;;  %v538_v32 = vpack.c.bf16 %v4676_v23, %v532_v27  ;;  %v392_v39 = vrot.slane %v372_v7, 7  ;;  %v4334_v26 = vld [vmem:[%s6243_s1 + $0x60] sm:$0xff]  }
  0x2c   : > { %767 = vmatprep.mubr.bf16.mxu0 %v4656_v15  ;;  %v449_v33 = vsel %vm439_vm0, %v428_v19, %v429_v24  ;;  %v448_v38 = vsel %vm439_vm0, %v429_v24, %v430_v29  ;;  %v393_v40 = vrot.slane %v4654_v14, 7  ;;  %v447_v43 = vsel %vm439_vm0, %v430_v29, %v431_v35  ;;  %v4741_v53 = vld [vmem:[#allocation2 + $0x60] sm:$0xff]  ;;  %v4764_v61 = vld [vmem:[#allocation2 + $0x68] sm:$0xff] }
  0x2d   : > { %v4705_v36 = vpack.c.bf16 %v449_v33, %v450_v28  ;;  %4117 = vmatprep.mubr.bf16.mxu1 %v4696_v31  ;;  %768 = vmatmul.mubr.bf16.vlgmr.msra.gmra.mxu0 %v538_v32  ;;  %v432_v46 = vrot.slane %v4694_v30, 1  ;;  %v4729_v48 = vpack.c.bf16 %v447_v43, %v448_v38  ;;  %v418_v50 = vsel %vm406_vm1, %v391_v10, %v392_v39  ;;  %v4335_v32 = vld [vmem:[%s6243_s1 + $0x20] sm:$0xff]  }
  0x2e   : > { %4134 = vmatpush3.bf16.msra.mxu0 %v4637_v44  ;;  %v4733_v49 = vsel %vm406_vm1, %v392_v39, %v393_v40  ;;  %v433_v51 = vrot.slane %v4722_v45, 1  ;;  %v4337_v44 = vld [vmem:[%s6243_s1 + $0xa8] sm:$0xff]   ;;  %775 = vmatprep.mubr.bf16.mxu0 %v4680_v25  ;;  %v4751_v54 = vsel %vm406_vm1, %v1268_v8, %v392_v39  ;;  %v434_v56 = vrot.slane %v4725_v47, 1 }
  0x2f   : > { %4118 = vmatmul.mubr.bf16.vlgmr.msra.gmra.mxu1 %v4705_v36  ;;  %v446_v55 = vsel %vm439_vm0, %v431_v35, %v432_v46  ;;  %v1277_v58 = vpack.c.bf16 %v4733_v49, %v4751_v54  ;;  %v435_v60 = vrot.slane %v4741_v53, 1  ;;  %v4769_v1 = vpack.c.bf16 %v4733_v49, %v418_v50  ;;  %4135 = vmatprep.subr.bf16.mxu0 %v4332_v41  ;;  %v4336_v35 = vld [vmem:[%s6243_s1 + $0x58] sm:$0xff]  }
  0x30   : > { %3702 = vmatpush3.bf16.msra.mxu1 %v4328_v34  ;;  %4121 = vmatprep.mubr.bf16.mxu1 %v4729_v48  ;;  %v445_v59 = vsel %vm439_vm0, %v432_v46, %v433_v51  ;;  %v4776_v4 = vpack.c.bf16 %v4666_v20, %v4663_v18  ;;  %v444_v5 = vsel %vm439_vm0, %v433_v51, %v434_v56  ;;  %v394_v12 = vrot.slane %v4663_v18, 7  ;;  %v4342_v18 = vld [vmem:[%s6243_s1 + $0xa0] sm:$0xff]   ;;  %v4338_v50 = vld [vmem:[%s6243_s1 + $0x18] sm:$0xff]  }
  0x31   : > { %3703 = vmatprep.subr.bf16.mxu1 %v4329_v37  ;;  %v4782_v7 = vpack.c.bf16 %v445_v59, %v446_v55  ;;  %v443_v10 = vsel %vm439_vm0, %v434_v56, %v435_v60  ;;  %v395_v14 = vrot.slane %v4666_v20, 7  ;;  %v436_v22 = vrot.slane %v4764_v61, 1  ;;  %v4862_v59 = vld [vmem:[#allocation2] sm:$0xff] }
  0x32   : > { %4136 = vmatpush3.bf16.msra.mxu0 %v4332_v41  ;;  %v4788_v19 = vpack.c.bf16 %v443_v10, %v444_v5  ;;  %v437_v24 = vrot.slane %v4756_v57, 1  ;;  %v438_v27 = vrot.slane %v4766_v63, 1  ;;  %v533_v28 = vrot.slane %v4780_v6, 1  ;;  %v4341_v5 = vld [vmem:[%s6243_s1 + $0x48] sm:$0xff]  }
  0x33   : > { %4137 = vmatprep.subr.bf16.mxu0 %v4337_v44  ;;  %v415_v20 = vsel %vm406_vm1, %v394_v12, %v395_v14  ;;  %v416_v29 = vsel %vm406_vm1, %v393_v40, %v394_v12  ;;  %v442_v34 = vsel %vm439_vm0, %v435_v60, %v436_v22  ;;  %v4346_v40 = vld [vmem:[%s6243_s1 + $0x98] sm:$0xff]   ;;  %v396_v43 = vrot.slane %v4668_v21, 7  ;;  %v4878_v12 = vld [vmem:[#allocation2 + $0x8] sm:$0xff] }
  0x34   : > { %3704 = vmatpush3.bf16.msra.mxu1 %v4330_v42  ;;  %v441_v33 = vsel %vm439_vm0, %v436_v22, %v437_v24  ;;  %v4820_v37 = vsel %vm439_vm0, %v437_v24, %v438_v27  ;;  %v536_v38 = vsel %vm439_vm0, %v438_v27, %v533_v28  ;;  %v4824_v39 = vpack.c.bf16 %v415_v20, %v416_v29  ;;  %v4343_v24 = vld [vmem:[%s6243_s1 + $0x8] sm:$0xff]  }
  0x35   : > { %3705 = vmatprep.subr.bf16.mxu1 %v4331_v52  ;;  %776 = vmatmul.mubr.bf16.gmra.mxu0 %v4769_v1  ;;  %v4829_v41 = vpack.c.bf16 %v441_v33, %v442_v34  ;;  %v4833_v42 = vpack.c.bf16 %v4694_v30, %v4668_v21  ;;  %v397_v46 = vrot.slane %v4694_v30, 7  ;;  %v4841_v51 = vpack.c.bf16 %v536_v38, %v4820_v37  ;;  %v4340_v21 = vld [vmem:[%s6243_s1 + $0x10] sm:$0xff]  }
  0x36   : > { %783 = vmatprep.mubr.bf16.mxu0 %v4776_v4  ;;  %4138 = vmatpush3.bf16.msra.mxu0 %v4337_v44  ;;  %v4844_v52 = vrot.slane %v4652_v13, 1  ;;  %v4339_v44 = vld [vmem:[%s6243_s1 + $0x50] sm:$0xff]   ;;  %v414_v56 = vsel %vm406_vm1, %v395_v14, %v396_v43  ;;  %v423_v10 = vrot.slane %v4862_v59, 1  ;;  %v4881_v14 = vrot.slane %v4766_v63, 7 }
  0x37   : > { %4122 = vmatmul.mubr.bf16.gmra.mxu1 %v4782_v7  ;;  %4139 = vmatprep.subr.bf16.mxu0 %v4342_v18  ;;  %v4347_v30 = vld [vmem:[%s6243_s1 + $0x90] sm:$0xff]   ;;  %v413_v55 = vsel %vm406_vm1, %v396_v43, %v397_v46  ;;  %v398_v29 = vrot.slane %v4722_v45, 7  ;;  %v388_v34 = vrot.slane %v4862_v59, 7  ;;  %v457_v38 = vpack.c.bf16 %v4878_v12, %v4862_v59  ;;  %v4345_v43 = vld [vmem:[%s6243_s1] sm:$0xff]  }
  0x38   : > { %3706 = vmatpush3.bf16.msra.mxu1 %v4333_v2  ;;  %4125 = vmatprep.mubr.bf16.mxu1 %v4788_v19  ;;  %v4868_v60 = vsel %vm439_vm0, %v533_v28, %v4844_v52  ;;  %v537_v2 = vsel %vm439_vm0, %v4844_v52, %v4650_v11  ;;  %v4883_v22 = vpack.c.bf16 %v413_v55, %v414_v56  ;;  %v4348_v28 = vld [vmem:[%s6243_s1 + $0x88] sm:$0xff]   ;;  %v4353_v59 = vld [vmem:[%s6243_s1 + $0x1f0] sm:$0xff]  }
  0x39   : > { %3707 = vmatprep.subr.bf16.mxu1 %v4334_v26  ;;  %v4890_v26 = vpack.c.bf16 %v4725_v47, %v4722_v45  ;;  %v542_v20 = vpack.c.bf16 %v537_v2, %v4868_v60  ;;  %v4349_v45 = vld [vmem:[%s6243_s1 + $0x80] sm:$0xff]   ;;  %v4940_v56 = vpack.c.bf16 %v4764_v61, %v4741_v53  ;;  %v400_v2 = vrot.slane %v4741_v53, 7 }
  0x3a   : > { %4140 = vmatpush3.bf16.msra.mxu0 %v4342_v18  ;;  %v4899_v18 = vsel %vm439_vm0, %v438_v27, %v423_v10  ;;  %v4344_v27 = vld [vmem:[%s6243_s1 + $0x40] sm:$0xff]  }
  0x3b   : > { %4141 = vmatprep.subr.bf16.mxu0 %v4346_v40  ;;  %v479_v33 = vpack.c.bf16 %v4899_v18, %v4820_v37  ;;  %v4374_v37 = vld [vmem:[%s6244_s2 + $0x178] sm:$0xff]  }
  0x3c   : > { %3708 = vmatpush3.bf16.msra.mxu1 %v4335_v32  ;;  %v399_v32 = vrot.slane %v4725_v47, 7 }
  0x3d   : > { %3709 = vmatprep.subr.bf16.mxu1 %v4336_v35  ;;  %784 = vmatmul.mubr.bf16.gmra.mxu0 %v4824_v39  ;;  %v389_v35 = vrot.slane %v4878_v12, 7 }
  0x3e   : > { %791 = vmatprep.mubr.bf16.mxu0 %v4833_v42  ;;  %4142 = vmatpush3.bf16.msra.mxu0 %v4346_v40  ;;  %v411_v47 = vsel %vm406_vm1, %v398_v29, %v399_v32  ;;  %v412_v40 = vsel %vm406_vm1, %v397_v46, %v398_v29  ;;  %v410_v53 = vsel %vm406_vm1, %v399_v32, %v400_v2  ;;  %v402_v29 = vrot.slane %v4756_v57, 7 }
  0x3f   : > { %4126 = vmatmul.mubr.bf16.gmra.mxu1 %v4829_v41  ;;  %4143 = vmatprep.subr.bf16.mxu0 %v4347_v30  ;;  %v4933_v46 = vpack.c.bf16 %v411_v47, %v412_v40  ;;  %v5000_v40 = vpack.c.bf16 %v4652_v13, %v4780_v6 }
  0x40   : > { %3710 = vmatpush3.bf16.msra.mxu1 %v4338_v50  ;;  %4129 = vmatprep.mubr.bf16.mxu1 %v4841_v51  ;;  %v421_v50 = vsel %vm406_vm1, %v388_v34, %v389_v35 }
  0x41   : > { %3711 = vmatprep.subr.bf16.mxu1 %v4339_v44  ;;  %v422_v44 = vsel %vm406_vm1, %v4881_v14, %v388_v34  ;;  %v4358_v34 = vld [vmem:[%s6243_s1 + $0x228] sm:$0xff]  }
  0x42   : > { %4144 = vmatpush3.bf16.msra.mxu0 %v4347_v30  ;;  %v4350_v30 = vld [vmem:[%s6243_s1 + $0x1f8] sm:$0xff]   ;;  %v456_v55 = vpack.c.bf16 %v421_v50, %v422_v44 }
  0x43   : > { %4145 = vmatprep.subr.bf16.mxu0 %v4348_v28 }
  0x44   : > { %3712 = vmatpush3.bf16.msra.mxu1 %v4340_v21  ;;  %v4352_v21 = vld [vmem:[%s6243_s1 + $0x238] sm:$0xff]  }
  0x45   : > { %3713 = vmatprep.subr.bf16.mxu1 %v4341_v5  ;;  %792 = vmatmul.mubr.bf16.gmra.mxu0 %v4883_v22  ;;  %v401_v5 = vrot.slane %v4764_v61, 7  ;;  %v420_v61 = vsel %vm406_vm1, %v389_v35, %v4648_v9  ;;  %v4361_v35 = vld [vmem:[%s6243_s1 + $0x220] sm:$0xff]  }
  0x46   : > { %799 = vmatprep.mubr.bf16.mxu0 %v4890_v26  ;;  %4146 = vmatpush3.bf16.msra.mxu0 %v4348_v28  ;;  %v459_v9 = vpack.c.bf16 %v4676_v23, %v420_v61  ;;  %v4366_v61 = vld [vmem:[%s6243_s1 + $0x190] sm:$0xff]  }
  0x47   : > { %4130 = vmatmul.mubr.bf16.gmra.mxu1 %v542_v20  ;;  %4147 = vmatprep.subr.bf16.mxu0 %v4349_v45  ;;  %v409_v28 = vsel %vm406_vm1, %v400_v2, %v401_v5  ;;  %v424_v20 = vrot.slane %v4878_v12, 1  ;;  %v4971_v12 = vpack.c.bf16 %v4766_v63, %v4756_v57  ;;  %v407_v57 = vsel %vm406_vm1, %v402_v29, %v4881_v14  ;;  %v4357_v2 = vld [vmem:[%s6243_s1 + $0x1a8] sm:$0xff]  }
  0x48   : > { %3714 = vmatpush3.bf16.msra.mxu1 %v4343_v24  ;;  %1105 = vmatprep.mubr.bf16.mxu1 %v457_v38  ;;  %v4355_v24 = vld [vmem:[%s6243_s1 + $0x230] sm:$0xff]   ;;  %v408_v63 = vsel %vm406_vm1, %v401_v5, %v402_v29  ;;  %v4360_v5 = vld [vmem:[%s6243_s1 + $0x1a0] sm:$0xff]   ;;  %v4369_v29 = vld [vmem:[%s6243_s1 + $0x188] sm:$0xff]  }
  0x49   : > { %3715 = vmatprep.subr.bf16.mxu1 %v4344_v27  ;;  %v4962_v38 = vld [vmem:[#allocation2 + $0x90] sm:$0xff]  ;;  %v4964_v27 = vpack.c.bf16 %v409_v28, %v410_v53  ;;  %v4996_v47 = vpack.c.bf16 %v407_v57, %v408_v63  ;;  %v454_v44 = vsel %vm439_vm0, %v423_v10, %v424_v20  ;;  %v4363_v28 = vld [vmem:[%s6243_s1 + $0x198] sm:$0xff]  }
  0x4a   : > { %4148 = vmatpush3.bf16.msra.mxu0 %v4349_v45  ;;  %v1272_v32 = vrot.slane %v4962_v38, 1  ;;  %v4354_v10 = vld [vmem:[%s6243_s1 + $0x1b0] sm:$0xff]  }
  0x4b   : > { %3781 = vmatprep.subr.bf16.mxu0 %v4350_v30  ;;  %v4373_v30 = vld [vmem:[%s6243_s1 + $0x200] sm:$0xff]   ;;  %v4365_v53 = vld [vmem:[%s6243_s1 + $0x1d0] sm:$0xff]  }
  0x4c   : > { %3716 = vmatpush3.bf16.msra.mxu1 %v4345_v43  ;;  %v4981_v45 = vsel %vm439_vm0, %v4844_v52, %v1272_v32  ;;  %v4364_v52 = vld [vmem:[%s6243_s1 + $0x218] sm:$0xff]   ;;  %v4367_v43 = vld [vmem:[%s6243_s1 + $0x210] sm:$0xff]  }
  0x4d   : > { %4165 = vmatprep.subr.bf16.mxu1 %v4352_v21  ;;  %800 = vmatmul.mubr.bf16.gmra.mxu0 %v4933_v46  ;;  %v1278_v23 = vpack.c.bf16 %v4981_v45, %v4868_v60 }
  0x4e   : > { %807 = vmatprep.mubr.bf16.mxu0 %v4940_v56 }
  0x4f   : > { %1106 = vmatmul.mubr.bf16.vlgmr.msra.gmra.mxu1 %v456_v55  ;;  %v4356_v55 = vld [vmem:[%s6243_s1 + $0x1e8] sm:$0xff]  }
  0x50   : > { %1113 = vmatprep.mubr.bf16.mxu1 %v4656_v15  ;;  %4166 = vmatpush3.bf16.msra.mxu1 %v4352_v21  ;;  %v528_v15 = vrot.slane %v4780_v6, 7  ;;  %v4370_v6 = vld [vmem:[%s6243_s1 + $0x208] sm:$0xff]  }
  0x51   : > { %4167 = vmatprep.subr.bf16.mxu1 %v4355_v24 }
  0x52   : > { %v530_v50 = vsel %vm406_vm1, %v528_v15, %v4661_v17  ;;  %v531_v13 = vsel %vm406_vm1, %v4881_v14, %v528_v15  ;;  %v4372_v15 = vld [vmem:[%s6243_s1 + $0x180] sm:$0xff]  }
  0x53   : > { %v5025_v21 = vpack.c.bf16 %v530_v50, %v531_v13 }
  0x54   : > { %4168 = vmatpush3.bf16.msra.mxu1 %v4355_v24  ;;  %v4362_v24 = vld [vmem:[%s6243_s1 + $0x1d8] sm:$0xff]  }
  0x55   : > { %4169 = vmatprep.subr.bf16.mxu1 %v4358_v34  ;;  %808 = vmatmul.mubr.bf16.gmra.mxu0 %v4964_v27 }
  0x56   : > { %815 = vmatprep.mubr.bf16.mxu0 %v4971_v12 }
  0x57   : > { %1114 = vmatmul.mubr.bf16.gmra.mxu1 %v459_v9  ;;  %v4381_v9 = vld [vmem:[%s6244_s2 + $0x140] sm:$0xff]  }
  0x58   : > { %1121 = vmatprep.mubr.bf16.mxu1 %v4680_v25  ;;  %4170 = vmatpush3.bf16.msra.mxu1 %v4358_v34  ;;  %v4371_v34 = vld [vmem:[%s6243_s1 + $0x1c0] sm:$0xff]  }
  0x59   : > { %4171 = vmatprep.subr.bf16.mxu1 %v4361_v35 }
  0x5c   : > { %4172 = vmatpush3.bf16.msra.mxu1 %v4361_v35 }
  0x5d   : > { %4173 = vmatprep.subr.bf16.mxu1 %v4364_v52  ;;  %816 = vmatmul.mubr.bf16.gmra.mxu0 %v4996_v47 }
  0x5e   : > { %823 = vmatprep.mubr.bf16.mxu0 %v5000_v40 }
  0x5f   : > { %1122 = vmatmul.mubr.bf16.gmra.mxu1 %v4769_v1  ;;  %v453_v1 = vsel %vm439_vm0, %v424_v20, %v4650_v11  ;;  %v4351_v11 = vld [vmem:[%s6243_s1 + $0x1b8] sm:$0xff]   ;;  %v4368_v20 = vld [vmem:[%s6243_s1 + $0x1c8] sm:$0xff]  }
  0x60   : > { %1129 = vmatprep.mubr.bf16.mxu1 %v4776_v4  ;;  %4174 = vmatpush3.bf16.msra.mxu1 %v4364_v52  ;;  %v458_v14 = vpack.c.bf16 %v453_v1, %v454_v44 }
  0x61   : > { %4175 = vmatprep.subr.bf16.mxu1 %v4367_v43 }
  0x64   : > { %4176 = vmatpush3.bf16.msra.mxu1 %v4367_v43 }
  0x65   : > { %4177 = vmatprep.subr.bf16.mxu1 %v4370_v6  ;;  %824 = vmatmul.mubr.bf16.gmra.mxu0 %v5025_v21 }
  0x66   : > { %4149 = vmatprep.mubr.bf16.mxu0 %v458_v14 }
  0x67   : > { %1130 = vmatmul.mubr.bf16.gmra.mxu1 %v4824_v39 }
  0x68   : > { %1137 = vmatprep.mubr.bf16.mxu1 %v4833_v42  ;;  %4178 = vmatpush3.bf16.msra.mxu1 %v4370_v6 }
  0x69   : > { %4179 = vmatprep.subr.bf16.mxu1 %v4373_v30 }
  0x6c   : > { %4180 = vmatpush3.bf16.msra.mxu1 %v4373_v30 }
  0x6d   : > { %4150 = vmatmul.mubr.bf16.vlgmr.msra.gmra.mxu0 %v4696_v31  ;;  %v4359_v31 = vld [vmem:[%s6243_s1 + $0x1e0] sm:$0xff]  }
  0x6e   : > { %3782 = vmatpush3.bf16.msra.mxu0 %v4351_v11  ;;  %4153 = vmatprep.mubr.bf16.mxu0 %v4705_v36 }
  0x6f   : > { %1138 = vmatmul.mubr.bf16.gmra.mxu1 %v4883_v22  ;;  %3783 = vmatprep.subr.bf16.mxu0 %v4353_v59 }
  0x70   : > { %1145 = vmatprep.mubr.bf16.mxu1 %v4890_v26 }
  0x72   : > { %3784 = vmatpush3.bf16.msra.mxu0 %v4354_v10 }
  0x73   : > { %3785 = vmatprep.subr.bf16.mxu0 %v4356_v55 }
  0x75   : > { %4154 = vmatmul.mubr.bf16.gmra.mxu0 %v4729_v48 }
  0x76   : > { %3786 = vmatpush3.bf16.msra.mxu0 %v4357_v2  ;;  %4157 = vmatprep.mubr.bf16.mxu0 %v4782_v7  ;;  %v4382_v2 = vld [vmem:[%s6244_s2 + $0x138] sm:$0xff]  }
  0x77   : > { %1146 = vmatmul.mubr.bf16.gmra.mxu1 %v4933_v46  ;;  %3787 = vmatprep.subr.bf16.mxu0 %v4359_v31 }
  0x78   : > { %1153 = vmatprep.mubr.bf16.mxu1 %v4940_v56  ;;  %3861 = vmatprep.subr.bf16.mxu1 %v4382_v2 }
  0x7a   : > { %3788 = vmatpush3.bf16.msra.mxu0 %v4360_v5  ;;  %v4383_v5 = vld [vmem:[%s6244_s2 + $0xf8] sm:$0xff]  }
  0x7b   : > { %3789 = vmatprep.subr.bf16.mxu0 %v4362_v24 }
  0x7d   : > { %4158 = vmatmul.mubr.bf16.gmra.mxu0 %v4788_v19 }
  0x7e   : > { %3790 = vmatpush3.bf16.msra.mxu0 %v4363_v28  ;;  %4161 = vmatprep.mubr.bf16.mxu0 %v4829_v41 }
  0x7f   : > { %1154 = vmatmul.mubr.bf16.gmra.mxu1 %v4964_v27  ;;  %3791 = vmatprep.subr.bf16.mxu0 %v4365_v53 }
  0x80   : > { %1161 = vmatprep.mubr.bf16.mxu1 %v4971_v12 }
  0x82   : > { %3792 = vmatpush3.bf16.msra.mxu0 %v4366_v61 }
  0x83   : > { %3793 = vmatprep.subr.bf16.mxu0 %v4368_v20  ;;  %v4384_v20 = vld [vmem:[%s6244_s2 + $0x130] sm:$0xff]  }
  0x85   : > { %4162 = vmatmul.mubr.bf16.gmra.mxu0 %v479_v33  ;;  %v4380_v33 = vld [vmem:[%s6244_s2 + $0x148] sm:$0xff]  }
  0x86   : > { %3794 = vmatpush3.bf16.msra.mxu0 %v4369_v29  ;;  %1506 = vmatprep.mubr.bf16.mxu0 %v4680_v25  ;;  %v4446_v25 = vld [vmem:[#allocation2 + $0x98] sm:$0xff] }
  0x87   : > { %1162 = vmatmul.mubr.bf16.gmra.mxu1 %v4996_v47  ;;  %3795 = vmatprep.subr.bf16.mxu0 %v4371_v34 }
  0x88   : > { %4181 = vmatprep.mubr.bf16.mxu1 %v4705_v36  ;;  %v1273_v36 = vrot.slane %v4446_v25, 1 }
  0x8a   : > { %3796 = vmatpush3.bf16.msra.mxu0 %v4372_v15  ;;  %v1276_v49 = vsel %vm439_vm0, %v1273_v36, %v4658_v16  ;;  %v4385_v15 = vld [vmem:[%s6244_s2 + $0xf0] sm:$0xff]  }
  0x8b   : > { %4197 = vmatprep.subr.bf16.mxu0 %v4374_v37 }
  0x8d   : > { %1507 = vmatmul.mubr.bf16.vlgmr.msra.gmra.mxu0 %v1277_v58  ;;  %v1280_v58 = vpack.c.bf16 %v4446_v25, %v4962_v38 }
  0x8e   : > { %1514 = vmatprep.mubr.bf16.mxu0 %v4776_v4  ;;  %v1267_v4 = vrot.slane %v4962_v38, 7  ;;  %4198 = vmatpush3.bf16.msra.mxu0 %v4374_v37 }
  0x8f   : > { %4182 = vmatmul.mubr.bf16.vlgmr.msra.gmra.mxu1 %v4729_v48  ;;  %v1274_v48 = vsel %vm439_vm0, %v1272_v32, %v1273_v36 }
  0x90   : > { %4185 = vmatprep.mubr.bf16.mxu1 %v4782_v7  ;;  %v1281_v54 = vpack.c.bf16 %v1276_v49, %v1274_v48  ;;  %v1269_v16 = vsel %vm406_vm1, %v1267_v4, %v1268_v8  ;;  %v1270_v7 = vsel %vm406_vm1, %v4661_v17, %v1267_v4  ;;  %v4377_v8 = vld [vmem:[%s6244_s2 + $0x160] sm:$0xff]   ;;  %v4378_v17 = vld [vmem:[%s6244_s2 + $0x158] sm:$0xff]   ;;  %3862 = vmatpush3.bf16.msra.mxu1 %v4383_v5 }
  0x91   : > { %3863 = vmatprep.subr.bf16.mxu1 %v4384_v20 }
  0x94   : > { %3864 = vmatpush3.bf16.msra.mxu1 %v4385_v15 }
  0x95   : > { %1515 = vmatmul.mubr.bf16.gmra.mxu0 %v4824_v39  ;;  %v4375_v39 = vld [vmem:[%s6244_s2 + $0x170] sm:$0xff]  }
  0x96   : > { %1522 = vmatprep.mubr.bf16.mxu0 %v4833_v42  ;;  %4199 = vmatprep.subr.bf16.mxu0 %v4375_v39  ;;  %v4379_v42 = vld [vmem:[%s6244_s2 + $0x150] sm:$0xff]  }
  0x97   : > { %4186 = vmatmul.mubr.bf16.gmra.mxu1 %v4788_v19  ;;  %v1279_v19 = vpack.c.bf16 %v1269_v16, %v1270_v7  ;;  %4200 = vmatpush3.bf16.msra.mxu0 %v4375_v39  ;;  %v4388_v7 = vld [vmem:[%s6244_s2 + $0xe8] sm:$0xff]  }
  0x98   : > { %4189 = vmatprep.mubr.bf16.mxu1 %v4829_v41  ;;  %4201 = vmatprep.subr.bf16.mxu0 %v4376_v0 }
  0x9b   : > { %4202 = vmatpush3.bf16.msra.mxu0 %v4376_v0 }
  0x9c   : > { %4203 = vmatprep.subr.bf16.mxu0 %v4377_v8 }
  0x9d   : > { %1523 = vmatmul.mubr.bf16.gmra.mxu0 %v4883_v22 }
  0x9e   : > { %1530 = vmatprep.mubr.bf16.mxu0 %v4890_v26 }
  0x9f   : > { %4190 = vmatmul.mubr.bf16.gmra.mxu1 %v4841_v51  ;;  %4204 = vmatpush3.bf16.msra.mxu0 %v4377_v8  ;;  %v4390_v8 = vld [vmem:[%s6244_s2 + $0x120] sm:$0xff]  }
  0xa0   : > { %4193 = vmatprep.mubr.bf16.mxu1 %v1278_v23  ;;  %4205 = vmatprep.subr.bf16.mxu0 %v4378_v17 }
  0xa3   : > { %4206 = vmatpush3.bf16.msra.mxu0 %v4378_v17 }
  0xa4   : > { %4207 = vmatprep.subr.bf16.mxu0 %v4379_v42 }
  0xa5   : > { %1531 = vmatmul.mubr.bf16.gmra.mxu0 %v4933_v46 }
  0xa6   : > { %1538 = vmatprep.mubr.bf16.mxu0 %v4940_v56 }
  0xa7   : > { %4194 = vmatmul.mubr.bf16.gmra.mxu1 %v1281_v54  ;;  %4208 = vmatpush3.bf16.msra.mxu0 %v4379_v42  ;;  %v4386_v54 = vld [vmem:[%s6244_s2 + $0x128] sm:$0xff]   ;;  %v4392_v42 = vld [vmem:[%s6244_s2 + $0xe0] sm:$0xff]  }
  0xa8   : > { %4209 = vmatprep.subr.bf16.mxu0 %v4380_v33  ;;  %3865 = vmatprep.subr.bf16.mxu1 %v4386_v54 }
  0xa9   : > { %3866 = vmatpush3.bf16.msra.mxu1 %v4388_v7 }
  0xaa   : > { %3867 = vmatprep.subr.bf16.mxu1 %v4390_v8 }
  0xab   : > { %4210 = vmatpush3.bf16.msra.mxu0 %v4380_v33 }
  0xac   : > { %4211 = vmatprep.subr.bf16.mxu0 %v4381_v9 }
  0xad   : > { %1539 = vmatmul.mubr.bf16.gmra.mxu0 %v4964_v27  ;;  %3868 = vmatpush3.bf16.msra.mxu1 %v4392_v42 }
  0xae   : > { %1546 = vmatprep.mubr.bf16.mxu0 %v4971_v12 }
  0xaf   : > { %4212 = vmatpush3.bf16.msra.mxu0 %v4381_v9 }
  0xb5   : > { %1547 = vmatmul.mubr.bf16.gmra.mxu0 %v4996_v47 }
  0xb6   : > { %1554 = vmatprep.mubr.bf16.mxu0 %v5000_v40 }
  0xbd   : > { %1555 = vmatmul.mubr.bf16.gmra.mxu0 %v5025_v21 }
  0xbe   : > { %1562 = vmatprep.mubr.bf16.mxu0 %v1280_v58  ;;  %v4387_v58 = vld [vmem:[%s6244_s2 + $0x78] sm:$0xff]  }
  0xbf   : > { %3941 = vmatprep.subr.bf16.mxu0 %v4387_v58  ;;  %v5293_v58 = vld [vmem:[%s6244_s2 + $0xb8] sm:$0xff]  }
  0xc0   : > { %6259 = vst [vmem:[#allocation10_spill] sm:$0xff] %v5293_v58 }
  0xc5   : > { %1563 = vmatmul.mubr.bf16.gmra.mxu0 %v1279_v19 }
  0xed   : > { %v3637_v41 = vpop.f32.mrf.mxu0 }
  0xef   : > { %v4119_v51 = vpop.f32.mrf.mxu1  ;;  %v3638_v60 = vpop.f32.mrf.mxu0 }
  0xf0   : > { %v3639_v22 = vadd.f32 %v3638_v60, %v3637_v41 }
  0xf1   : > { %v866_v26 = vpop.f32.mrf.mxu1  ;;  %v5153_v18 = vpop.f32.mrf.mxu0 }
  0xf2   : > { %v5158_v46 = vadd.f32 %v3639_v22, %v866_v26  ;;  %v4394_v26 = vld [vmem:[%s6244_s2 + $0x118] sm:$0xff]  }
  0xf3   : > { %v4120_v56 = vpop.f32.mrf.mxu1  ;;  %v5160_v38 = vpop.f32.mrf.mxu0  ;;  %3869 = vmatprep.subr.bf16.mxu1 %v4394_v26 }
  0xf5   : > { %v5162_v27 = vpop.f32.mrf.mxu1  ;;  %v3643_v32 = vpop.f32.mrf.mxu0 }
  0xf7   : > { %v4123_v12 = vpop.f32.mrf.mxu1  ;;  %v3644_v35 = vpop.f32.mrf.mxu0 }
  0xf8   : > { %v3645_v45 = vadd.f32 %v3644_v35, %v3643_v32 }
  0xf9   : > { %v882_v23 = vpop.f32.mrf.mxu1  ;;  %v3646_v57 = vpop.f32.mrf.mxu0 }
  0xfa   : > { %v5167_v63 = vadd.f32 %v4119_v51, %v3645_v45  ;;  %v4398_v45 = vld [vmem:[%s6244_s2 + $0x110] sm:$0xff]  }
  0xfb   : > { %v4124_v52 = vpop.f32.mrf.mxu1  ;;  %v3647_v47 = vpop.f32.mrf.mxu0 }
  0xfc   : > { %v3648_v40 = vadd.f32 %v3647_v47, %v3646_v57  ;;  %v4402_v47 = vld [vmem:[%s6244_s2 + $0x108] sm:$0xff]  }
  0xfd   : > { %v5169_v43 = vpop.f32.mrf.mxu1  ;;  %v3649_v50 = vpop.f32.mrf.mxu0 }
  0xfe   : > { %v5171_v13 = vadd.f32 %v4120_v56, %v3648_v40  ;;  %v4396_v56 = vld [vmem:[%s6244_s2 + $0xd8] sm:$0xff]  }
  0xff   : > { %v4127_v6 = vpop.f32.mrf.mxu1  ;;  %v3650_v1 = vpop.f32.mrf.mxu0  ;;  %3870 = vmatpush3.bf16.msra.mxu1 %v4396_v56 }
 0x100   : > { %v3651_v44 = vadd.f32 %v3650_v1, %v3649_v50  ;;  %3871 = vmatprep.subr.bf16.mxu1 %v4398_v45 }
 0x101   : > { %v898_v21 = vpop.f32.mrf.mxu1  ;;  %v5173_v14 = vpop.f32.mrf.mxu0 }
 0x102   : > { %v5175_v30 = vadd.f32 %v3651_v44, %v882_v23 }
 0x103   : > { %v5177_v11 = vpop.f32.mrf.mxu1  ;;  %v5179_v59 = vpop.f32.mrf.mxu0 }
 0x105   : > { %v5181_v10 = vpop.f32.mrf.mxu1  ;;  %v3655_v55 = vpop.f32.mrf.mxu0 }
 0x107   : > { %v5186_v31 = vpop.f32.mrf.mxu1  ;;  %v3656_v24 = vpop.f32.mrf.mxu0 }
 0x108   : > { %v3657_v28 = vadd.f32 %v3656_v24, %v3655_v55 }
 0x109   : > { %v5191_v53 = vpop.f32.mrf.mxu1  ;;  %v3658_v61 = vpop.f32.mrf.mxu0 }
 0x10a   : > { %v5196_v29 = vadd.f32 %v4123_v12, %v3657_v28 }
 0x10b   : > { %v5198_v34 = vpop.f32.mrf.mxu1  ;;  %v3659_v25 = vpop.f32.mrf.mxu0 }
 0x10c   : > { %v3660_v36 = vadd.f32 %v3659_v25, %v3658_v61 }
 0x10d   : > { %v5203_v48 = vpop.f32.mrf.mxu1  ;;  %v3661_v49 = vpop.f32.mrf.mxu0 }
 0x10e   : > { %6253 = vst [vmem:[#allocation4_spill] sm:$0xff] %v5203_v48  ;;  %v5211_v4 = vadd.f32 %v4124_v52, %v3660_v36  ;;  %v4400_v52 = vld [vmem:[%s6244_s2 + $0xd0] sm:$0xff]  }
 0x10f   : > { %v5213_v16 = vpop.f32.mrf.mxu1  ;;  %v3662_v19 = vpop.f32.mrf.mxu0  ;;  %3872 = vmatpush3.bf16.msra.mxu1 %v4400_v52 }
 0x110   : > { %v3663_v37 = vadd.f32 %v3662_v19, %v3661_v49  ;;  %3873 = vmatprep.subr.bf16.mxu1 %v4402_v47 }
 0x111   : > { %v5218_v39 = vpop.f32.mrf.mxu1  ;;  %v5220_v0 = vpop.f32.mrf.mxu0 }
 0x112   : > { %v5225_v17 = vadd.f32 %v3663_v37, %v898_v21  ;;  %v4406_v21 = vld [vmem:[%s6244_s2 + $0x100] sm:$0xff]  }
 0x113   : > { %v5227_v41 = vpop.f32.mrf.mxu1  ;;  %v5232_v51 = vpop.f32.mrf.mxu0 }
 0x115   : > { %v5234_v60 = vpop.f32.mrf.mxu1  ;;  %v3667_v22 = vpop.f32.mrf.mxu0 }
 0x117   : > { %v5239_v33 = vpop.f32.mrf.mxu1  ;;  %v3668_v32 = vpop.f32.mrf.mxu0 }
 0x118   : > { %v3669_v9 = vadd.f32 %v3668_v32, %v3667_v22 }
 0x119   : > { %v5244_v12 = vpop.f32.mrf.mxu1  ;;  %v3670_v35 = vpop.f32.mrf.mxu0 }
 0x11a   : > { %v5249_v23 = vadd.f32 %v4127_v6, %v3669_v9  ;;  %v4404_v6 = vld [vmem:[%s6244_s2 + $0xc8] sm:$0xff]  }
 0x11b   : > { %v5251_v57 = vpop.f32.mrf.mxu1  ;;  %v3671_v40 = vpop.f32.mrf.mxu0  ;;  %3874 = vmatpush3.bf16.msra.mxu1 %v4404_v6 }
 0x11c   : > { %6254 = vst [vmem:[#allocation5_spill] sm:$0xff] %v5249_v23  ;;  %v3672_v50 = vadd.f32 %v3671_v40, %v3670_v35  ;;  %3875 = vmatprep.subr.bf16.mxu1 %v4406_v21 }
 0x11d   : > { %v5259_v1 = vpop.f32.mrf.mxu1  ;;  %v3673_v44 = vpop.f32.mrf.mxu0 }
 0x11e   : > { %v5268_v55 = vadd.f32 %v5177_v11, %v3672_v50  ;;  %v4408_v11 = vld [vmem:[%s6244_s2 + $0xc0] sm:$0xff]  }
 0x11f   : > { %v5270_v2 = vpop.f32.mrf.mxu1  ;;  %v3674_v5 = vpop.f32.mrf.mxu0  ;;  %3876 = vmatpush3.bf16.msra.mxu1 %v4408_v11 }
 0x120   : > { %6255 = vst [vmem:[#allocation6_spill] sm:$0xff] %v5268_v55  ;;  %v3675_v24 = vadd.f32 %v3674_v5, %v3673_v44  ;;  %4229 = vmatprep.subr.bf16.mxu1 %v5293_v58 }
 0x121   : > { %v5272_v28 = vpop.f32.mrf.mxu1  ;;  %v5274_v61 = vpop.f32.mrf.mxu0 }
 0x122   : > { %6256 = vst [vmem:[#allocation7_spill] sm:$0xff] %v5274_v61  ;;  %v5277_v20 = vadd.f32 %v3675_v24, %v5191_v53 }
 0x123   : > { %v5279_v15 = vpop.f32.mrf.mxu1  ;;  %v5284_v25 = vpop.f32.mrf.mxu0 }
 0x124   : > { %6257 = vst [vmem:[#allocation8_spill] sm:$0xff] %v5277_v20  ;;  %6258 = vst [vmem:[#allocation9_spill] sm:$0xff] %v5284_v25 }
 0x125   : > { %v5286_v36 = vpop.f32.mrf.mxu1  ;;  %v3679_v49 = vpop.f32.mrf.mxu0 }
 0x127   : > { %v5288_v54 = vpop.f32.mrf.mxu1  ;;  %v3680_v53 = vpop.f32.mrf.mxu0 }
 0x128   : > { %v3681_v7 = vadd.f32 %v3680_v53, %v3679_v49 }
 0x129   : > { %v5295_v19 = vpop.f32.mrf.mxu1  ;;  %v3682_v37 = vpop.f32.mrf.mxu0 }
 0x12a   : > { %v923_v8 = vadd.f32 %v5186_v31, %v3681_v7 }
 0x12b   : > { %v5299_v42 = vpop.f32.mrf.mxu1  ;;  %v3683_v22 = vpop.f32.mrf.mxu0 }
 0x12c   : > { %v3684_v26 = vadd.f32 %v3683_v22, %v3682_v37 }
 0x12d   : > { %v5301_v56 = vpop.f32.mrf.mxu1  ;;  %v5303_v32 = vpop.f32.mrf.mxu0 }
 0x12e   : > { %v926_v9 = vadd.f32 %v5198_v34, %v3684_v26 }
 0x12f   : > { %v5306_v35 = vpop.f32.mrf.mxu1  ;;  %v1204_v45 = vpop.f32.mrf.mxu0 }
 0x131   : > { %v5308_v52 = vpop.f32.mrf.mxu1  ;;  %v5310_v47 = vpop.f32.mrf.mxu0 }
 0x133   : > { %v5312_v40 = vpop.f32.mrf.mxu1  ;;  %v1207_v31 = vpop.f32.mrf.mxu0 }
 0x135   : > { %v5314_v50 = vpop.f32.mrf.mxu1  ;;  %v5316_v6 = vpop.f32.mrf.mxu0 }
 0x137   : > { %v5318_v44 = vpop.f32.mrf.mxu1  ;;  %v5320_v21 = vpop.f32.mrf.mxu0 }
 0x138   : > { %6260 = vst [vmem:[#allocation11_spill] sm:$0xff] %v5318_v44 }
 0x139   : > { %v5322_v5 = vpop.f32.mrf.mxu1  ;;  %v5324_v34 = vpop.f32.mrf.mxu0 }
 0x13a   : > { %6261 = vst [vmem:[#allocation12_spill] sm:$0xff] %v5322_v5 }
 0x13b   : > { %v5326_v24 = vpop.f32.mrf.mxu1  ;;  %v5328_v11 = vpop.f32.mrf.mxu0 }
 0x13c   : > { %6262 = vst [vmem:[#allocation13_spill] sm:$0xff] %v5326_v24 }
 0x13d   : > { %v5330_v49 = vpop.f32.mrf.mxu1  ;;  %v5332_v53 = vpop.f32.mrf.mxu0 }
 0x13e   : > { %6263 = vst [vmem:[#allocation14_spill] sm:$0xff] %v5330_v49  ;;  %6264 = vst [vmem:[#allocation15_spill] sm:$0xff] %v5332_v53 }
 0x13f   : > { %v5334_v7 = vpop.f32.mrf.mxu1  ;;  %v5336_v37 = vpop.f32.mrf.mxu0 }
 0x140   : > { %6265 = vst [vmem:[#allocation16_spill] sm:$0xff] %v5334_v7  ;;  %6266 = vst [vmem:[#allocation17_spill] sm:$0xff] %v5336_v37 }
 0x141   : > { %v5338_v22 = vpop.f32.mrf.mxu1  ;;  %v5340_v26 = vpop.f32.mrf.mxu0 }
 0x142   : > { %6267 = vst [vmem:[#allocation18_spill] sm:$0xff] %v5338_v22  ;;  %6268 = vst [vmem:[#allocation19_spill] sm:$0xff] %v5340_v26  ;;  %v3719_v26 = vadd.f32 %v5218_v39, %v5213_v16 }
 0x143   : > { %v5342_v3 = vpop.f32.mrf.mxu1  ;;  %v5344_v58 = vpop.f32.mrf.mxu0 }
 0x144   : > { %6269 = vst [vmem:[#allocation20_spill] sm:$0xff] %v5342_v3  ;;  %6270 = vst [vmem:[#allocation21_spill] sm:$0xff] %v5344_v58 }
 0x145   : > { %v5346_v48 = vpop.f32.mrf.mxu1  ;;  %v4163_v20 = vpop.f32.mrf.mxu0 }
 0x146   : > { %6271 = vst [vmem:[#allocation22_spill] sm:$0xff] %v5346_v48  ;;  %v3642_v48 = vadd.f32 %v5160_v38, %v5153_v18  ;;  %v3725_v18 = vadd.f32 %v5244_v12, %v5239_v33  ;;  %v5369_v38 = vld [vmem:[%s6247_s5] ss:$0 sm:$0xff] }
 0x147   : > { %v3759_v25 = vpop.f32.mrf.mxu1  ;;  %v5348_v61 = vpop.f32.mrf.mxu0 }
 0x148   : > { %6272 = vst [vmem:[#allocation23_spill] sm:$0xff] %v5348_v61  ;;  %v870_v39 = vadd.f32 %v3642_v48, %v5162_v27  ;;  %v5374_v27 = vld [vmem:[%s6248_s6] ss:$0 sm:$0xff]  ;;  %v1116_v12 = vadd.f32 %v3725_v18, %v5167_v63  ;;  %v3731_v63 = vadd.f32 %v5272_v28, %v5270_v2 }
 0x149   : > { %v3760_v55 = vpop.f32.mrf.mxu1  ;;  %v4164_v23 = vpop.f32.mrf.mxu0 }
 0x14a   : > { %v3761_v53 = vadd.f32 %v3760_v55, %v3759_v25  ;;  %v3722_v55 = vadd.f32 %v5234_v60, %v5227_v41  ;;  %v1108_v25 = vadd.f32 %v3719_v26, %v5158_v46 }
 0x14b   : > { %v3762_v7 = vpop.f32.mrf.mxu1  ;;  %v5350_v24 = vpop.f32.mrf.mxu0 }
 0x14c   : > { %v1164_v49 = vadd.f32 %v3761_v53, %v923_v8  ;;  %6273 = vst [vmem:[#allocation24_spill] sm:$0xff] %v5350_v24  ;;  %v1111_v46 = vadd.f32 %v3722_v55, %v870_v39 }
 0x14d   : > { %v3763_v22 = vpop.f32.mrf.mxu1  ;;  %v3797_v5 = vpop.f32.mrf.mxu0 }
 0x14e   : > { %v5354_v3 = vadd.f32 %v4163_v20, %v1164_v49  ;;  %v3764_v58 = vadd.f32 %v3763_v22, %v3762_v7  ;;  %v1205_v20 = vadd.f32 %v1204_v45, %v1108_v25 }
 0x14f   : > { %v4183_v44 = vpop.f32.mrf.mxu1  ;;  %v3798_v37 = vpop.f32.mrf.mxu0 }
 0x150   : > { %v1167_v61 = vadd.f32 %v3764_v58, %v926_v9  ;;  %v3799_v8 = vadd.f32 %v3798_v37, %v3797_v5  ;;  %v3728_v37 = vadd.f32 %v5259_v1, %v5251_v57 }
 0x151   : > { %v1605_v53 = vpop.f32.mrf.mxu1  ;;  %v3800_v16 = vpop.f32.mrf.mxu0 }
 0x152   : > { %v5361_v24 = vadd.f32 %v4164_v23, %v1167_v61  ;;  %v1606_v49 = vadd.f32 %v3799_v8, %v1605_v53  ;;  %v1208_v61 = vadd.f32 %v1207_v31, %v1111_v46  ;;  %v1213_v8 = vadd.f32 %v5303_v32, %v1116_v12 }
 0x153   : > { %v4184_v7 = vpop.f32.mrf.mxu1  ;;  %v3801_v41 = vpop.f32.mrf.mxu0  ;;  %v6274_v32 = vmov 0.0  }
 0x154   : > { %v1668_v60 = vadd.f32 %v1606_v49, %v1205_v20  ;;  %v3802_v58 = vadd.f32 %v3801_v41, %v3800_v16  ;;  %v1119_v49 = vadd.f32 %v3728_v37, %v5171_v13  ;;  %v3654_v41 = vadd.f32 %v5179_v59, %v5173_v14 }
 0x155   : > { %v1608_v23 = vpop.f32.mrf.mxu1  ;;  %v3803_v48 = vpop.f32.mrf.mxu0 }
 0x156   : > { %v1691_v9 = vmul.f32 %v5369_v38, %v1668_v60  ;;  %v1609_v33 = vadd.f32 %v3802_v58, %v1608_v23  ;;  %v1124_v58 = vadd.f32 %v3731_v63, %v5175_v30 }
 0x157   : > { %v3804_v45 = vpop.f32.mrf.mxu0  ;;  %v5378_v5 = vpop.f32.mrf.mxu1 }
 0x158   : > { %v1714_v22 = vadd.f32 %v5374_v27, %v1691_v9  ;;  %v1669_v26 = vadd.f32 %v1609_v33, %v1208_v61  ;;  %v3805_v55 = vadd.f32 %v3804_v45, %v3803_v48  ;;  %v3734_v48 = vadd.f32 %v5286_v36, %v5279_v15 }
 0x159   : > { %v3806_v25 = vpop.f32.mrf.mxu0  ;;  %v1621_v20 = vpop.f32.mrf.mxu1  ;;  %v886_v9 = vadd.f32 %v3654_v41, %v5169_v43  ;;  %v3737_v45 = vadd.f32 %v5295_v19, %v5288_v54 }
 0x15a   : > { %v1730_v53 = vmax.f32 %v1714_v22, 0.0  ;;  %v1692_v31 = vmul.f32 %v5369_v38, %v1669_v26  ;;  %v1614_v16 = vadd.f32 %v4183_v44, %v3805_v55  ;;  %v1216_v44 = vadd.f32 %v5310_v47, %v1119_v49 }
 0x15b   : > { %v3807_v39 = vpop.f32.mrf.mxu0  ;;  %v5395_v23 = vpop.f32.mrf.mxu1  ;;  %v1127_v37 = vadd.f32 %v3734_v48, %v886_v9 }
 0x15c   : > { %1747 = vst [vmem:[#allocation3 + $0x10] sm:$0xff] %v1730_v53  ;;  %v1715_v57 = vadd.f32 %v5374_v27, %v1692_v31  ;;  %v1670_v1 = vadd.f32 %v1614_v16, %v1213_v8  ;;  %v3808_v18 = vadd.f32 %v3807_v39, %v3806_v25  ;;  %v1132_v31 = vadd.f32 %v3737_v45, %v5196_v29 }
 0x15d   : > { %1769 = vst [vmem:[#allocation3 + $0x10] sm:$0x1] %v6274_v32  ;;  %v3809_v46 = vpop.f32.mrf.mxu0  ;;  %v1624_v36 = vpop.f32.mrf.mxu1  ;;  %v3740_v16 = vadd.f32 %v5301_v56, %v5299_v42  ;;  %v3743_v29 = vadd.f32 %v5308_v52, %v5306_v35 }
 0x15e   : > { %v1731_v60 = vmax.f32 %v1715_v57, 0.0  ;;  %v1693_v2 = vmul.f32 %v5369_v38, %v1670_v1  ;;  %v1617_v28 = vadd.f32 %v4184_v7, %v3808_v18  ;;  %v1221_v7 = vadd.f32 %v5320_v21, %v1124_v58  ;;  %v5420_v57 = vld [vmem:[#allocation3 + $0x98] sm:$0xff] }
 0x15f   : > { %v3810_v13 = vpop.f32.mrf.mxu0  ;;  %v1224_v21 = vadd.f32 %v5328_v11, %v1127_v37  ;;  %v5411_v19 = vpop.f32.mrf.mxu1  ;;  %v1229_v56 = vadd.f32 %v5316_v6, %v1132_v31  ;;  %v2684_v52 = vrot.slane %v5420_v57, 7  ;;  %v1140_v48 = vadd.f32 %v3743_v29, %v5225_v17 }
 0x160   : > { %1748 = vst [vmem:[#allocation3 + $0x18] sm:$0xff] %v1731_v60  ;;  %v1716_v14 = vadd.f32 %v5374_v27, %v1693_v2  ;;  %v1671_v59 = vadd.f32 %v1617_v28, %v1216_v44  ;;  %v3811_v61 = vadd.f32 %v3810_v13, %v3809_v46  ;;  %v1135_v2 = vadd.f32 %v3740_v16, %v5211_v4 }
 0x161   : > { %1779 = vst [vmem:[#allocation3 + $0x19] sm:$0x1] %v6274_v32  ;;  %v3812_v47 = vpop.f32.mrf.mxu0  ;;  %v1637_v35 = vpop.f32.mrf.mxu1 }
 0x162   : > { %v1732_v33 = vmax.f32 %v1716_v14, 0.0  ;;  %v1694_v30 = vmul.f32 %v5369_v38, %v1671_v59  ;;  %v1622_v12 = vadd.f32 %v3811_v61, %v1621_v20  ;;  %v1232_v61 = vadd.f32 %v5324_v34, %v1135_v2 }
 0x163   : > { %v3813_v15 = vpop.f32.mrf.mxu0 }
 0x164   : > { %1749 = vst [vmem:[#allocation3 + $0x20] sm:$0xff] %v1732_v33  ;;  %v1717_v22 = vadd.f32 %v5374_v27, %v1694_v30  ;;  %v1672_v26 = vadd.f32 %v1622_v12, %v1221_v7  ;;  %v3814_v43 = vadd.f32 %v3813_v15, %v3812_v47  ;;  %v5416_v49 = vld [vmem:[#allocation3 + $0x10] sm:$0xff]  ;;  %v5460_v30 = vpop.f32.mrf.mxu1 }
 0x165   : > { %1770 = vst [vmem:[#allocation3 + $0x20] sm:$0x1] %v6274_v32  ;;  %v3815_v55 = vpop.f32.mrf.mxu0  ;;  %v5444_v14 = vrot.slane %v5416_v49, 1 }
 0x166   : > { %v1733_v25 = vmax.f32 %v1717_v22, 0.0  ;;  %v1695_v8 = vmul.f32 %v5369_v38, %v1672_v26  ;;  %v1625_v53 = vadd.f32 %v3814_v43, %v1624_v36  ;;  %v6275_v22 = vld [vmem:[#allocation17_spill] sm:$0xff]  ;;  %v1640_v16 = vpop.f32.mrf.mxu1 }
 0x167   : > { %v3816_v54 = vpop.f32.mrf.mxu0  ;;  %v1237_v26 = vadd.f32 %v6275_v22, %v1140_v48  ;;  %v6281_v48 = vld [vmem:[#allocation5_spill] sm:$0xff] }
 0x168   : > { %1750 = vst [vmem:[#allocation3 + $0x28] sm:$0xff] %v1733_v25  ;;  %v1718_v63 = vadd.f32 %v5374_v27, %v1695_v8  ;;  %v1673_v39 = vadd.f32 %v1625_v53, %v1224_v21  ;;  %v3817_v20 = vadd.f32 %v3816_v54, %v3815_v55  ;;  %v5418_v11 = vld [vmem:[#allocation3 + $0x18] sm:$0xff]  ;;  %v6277_v8 = vld [vmem:[#allocation12_spill] sm:$0xff] }
 0x169   : > { %1780 = vst [vmem:[#allocation3 + $0x29] sm:$0x1] %v6274_v32  ;;  %v3818_v1 = vpop.f32.mrf.mxu0  ;;  %v5427_v42 = vpack.c.bf16 %v5418_v11, %v5416_v49  ;;  %v1843_v60 = vrot.slane %v5418_v11, 1  ;;  %v6276_v25 = vld [vmem:[#allocation11_spill] sm:$0xff] }
 0x16a   : > { %v1734_v18 = vmax.f32 %v1718_v63, 0.0  ;;  %v1696_v41 = vmul.f32 %v5369_v38, %v1673_v39  ;;  %v1630_v46 = vadd.f32 %v5378_v5, %v3817_v20  ;;  %v3666_v5 = vadd.f32 %v5232_v51, %v5220_v0 }
 0x16b   : > { %v3819_v44 = vpop.f32.mrf.mxu0  ;;  %2183 = vmatprep.mubr.bf16.mxu1 %v5427_v42  ;;  %v3746_v0 = vadd.f32 %v5314_v50, %v5312_v40  ;;  %v1868_v33 = vsel %vm439_vm0, %v5444_v14, %v1843_v60  ;;  %v3749_v53 = vadd.f32 %v6277_v8, %v6276_v25  ;;  %v6284_v25 = vld [vmem:[#allocation18_spill] sm:$0xff] }
 0x16c   : > { %1751 = vst [vmem:[#allocation3 + $0x30] sm:$0xff] %v1734_v18  ;;  %v1719_v28 = vadd.f32 %v5374_v27, %v1696_v41  ;;  %v1674_v58 = vadd.f32 %v1630_v46, %v1229_v56  ;;  %v3820_v6 = vadd.f32 %v3819_v44, %v3818_v1  ;;  %v5437_v13 = vld [vmem:[#allocation3 + $0x20] sm:$0xff]  ;;  %v902_v15 = vadd.f32 %v3666_v5, %v5181_v10  ;;  %v6278_v44 = vld [vmem:[#allocation21_spill] sm:$0xff] }
 0x16d   : > { %1771 = vst [vmem:[#allocation3 + $0x30] sm:$0x1] %v6274_v32  ;;  %v3821_v59 = vpop.f32.mrf.mxu0  ;;  %v5447_v4 = vrot.slane %v5437_v13, 1  ;;  %v5463_v34 = vrot.slane %v5437_v13, 7 }
 0x16e   : > { %v1735_v9 = vmax.f32 %v1719_v28, 0.0  ;;  %v1697_v47 = vmul.f32 %v5369_v38, %v1674_v58  ;;  %v1633_v7 = vadd.f32 %v5395_v23, %v3820_v6  ;;  %v1143_v31 = vadd.f32 %v3746_v0, %v902_v15  ;;  %v6279_v58 = vld [vmem:[#allocation13_spill] sm:$0xff]  ;;  %v6280_v6 = vld [vmem:[#allocation14_spill] sm:$0xff]  ;;  %v4389_v0 = vld [vmem:[%s6244_s2 + $0x38] sm:$0xff]  }
 0x16f   : > { %v3822_v17 = vpop.f32.mrf.mxu0  ;;  %v1867_v51 = vsel %vm439_vm0, %v1843_v60, %v5447_v4  ;;  %v5494_v56 = vsel %vm406_vm1, %v2684_v52, %v5463_v34  ;;  %v3752_v5 = vadd.f32 %v6280_v6, %v6279_v58  ;;  %v6288_v6 = vld [vmem:[#allocation19_spill] sm:$0xff] }
 0x170   : > { %1752 = vst [vmem:[#allocation3 + $0x38] sm:$0xff] %v1735_v9  ;;  %v1720_v23 = vadd.f32 %v5374_v27, %v1697_v47  ;;  %v1675_v12 = vadd.f32 %v1633_v7, %v1232_v61  ;;  %v3823_v45 = vadd.f32 %v3822_v17, %v3821_v59  ;;  %v5466_v40 = vpack.c.bf16 %v1867_v51, %v1868_v33  ;;  %v5468_v50 = vld [vmem:[#allocation3 + $0x28] sm:$0xff]  ;;  %v5510_v7 = vpop.f32.mrf.mxu1 }
 0x171   : > { %1781 = vst [vmem:[#allocation3 + $0x39] sm:$0x1] %v6274_v32  ;;  %v3824_v36 = vpop.f32.mrf.mxu0  ;;  %v1813_v37 = vrot.slane %v5468_v50, 7  ;;  %v1845_v10 = vrot.slane %v5468_v50, 1  ;;  %v1240_v60 = vadd.f32 %v6278_v44, %v1143_v31  ;;  %v1148_v59 = vadd.f32 %v3749_v53, %v6281_v48  ;;  %v4395_v44 = vld [vmem:[%s6244_s2 + $0x68] sm:$0xff]  }
 0x172   : > { %v1736_v43 = vmax.f32 %v1720_v23, 0.0  ;;  %v1698_v55 = vmul.f32 %v5369_v38, %v1675_v12  ;;  %v1638_v21 = vadd.f32 %v3823_v45, %v1637_v35  ;;  %4213 = vmatprep.mubr.bf16.mxu0 %v5466_v40  ;;  %v4391_v45 = vld [vmem:[%s6244_s2 + $0x70] sm:$0xff]   ;;  %v1653_v31 = vpop.f32.mrf.mxu1 }
 0x173   : > { %v3825_v54 = vpop.f32.mrf.mxu0  ;;  %v5484_v63 = vsel %vm406_vm1, %v5463_v34, %v1813_v37  ;;  %v1866_v47 = vsel %vm439_vm0, %v5447_v4, %v1845_v10 }
 0x174   : > { %1753 = vst [vmem:[#allocation3 + $0x40] sm:$0xff] %v1736_v43  ;;  %v1721_v39 = vadd.f32 %v5374_v27, %v1698_v55  ;;  %v1676_v20 = vadd.f32 %v1638_v21, %v1237_v26  ;;  %v3826_v29 = vadd.f32 %v3825_v54, %v3824_v36  ;;  %v5487_v1 = vld [vmem:[#allocation3 + $0x30] sm:$0xff]  ;;  %v2693_v46 = vpack.c.bf16 %v5484_v63, %v5494_v56  ;;  %v6282_v36 = vld [vmem:[#allocation15_spill] sm:$0xff]  ;;  %v6283_v21 = vld [vmem:[#allocation16_spill] sm:$0xff] }
 0x175   : > { %1772 = vst [vmem:[#allocation3 + $0x40] sm:$0x1] %v6274_v32  ;;  %v3827_v18 = vpop.f32.mrf.mxu0  ;;  %v1846_v41 = vrot.slane %v5487_v1, 1  ;;  %v1245_v22 = vadd.f32 %v6282_v36, %v1148_v59  ;;  %v3755_v8 = vadd.f32 %v6284_v25, %v6283_v21  ;;  %v5555_v36 = vpop.f32.mrf.mxu1  ;;  %v6292_v25 = vld [vmem:[#allocation4_spill] sm:$0xff] }
 0x176   : > { %v1737_v35 = vmax.f32 %v1721_v39, 0.0  ;;  %v1699_v2 = vmul.f32 %v5369_v38, %v1676_v20  ;;  %v1641_v28 = vadd.f32 %v3826_v29, %v1640_v16  ;;  %v4393_v16 = vld [vmem:[%s6244_s2 + $0x30] sm:$0xff]  }
 0x177   : > { %v3828_v61 = vpop.f32.mrf.mxu0  ;;  %v1865_v9 = vsel %vm439_vm0, %v1845_v10, %v1846_v41  ;;  %v6285_v10 = vld [vmem:[#allocation6_spill] sm:$0xff] }
 0x178   : > { %1754 = vst [vmem:[#allocation3 + $0x48] sm:$0xff] %v1737_v35  ;;  %v1722_v17 = vadd.f32 %v5374_v27, %v1699_v2  ;;  %v1677_v51 = vadd.f32 %v1641_v28, %v1240_v60  ;;  %v3829_v33 = vadd.f32 %v3828_v61, %v3827_v18  ;;  %v5516_v23 = vpack.c.bf16 %v1865_v9, %v1866_v47  ;;  %v5518_v12 = vld [vmem:[#allocation3 + $0x38] sm:$0xff]  ;;  %v6287_v35 = vld [vmem:[#allocation9_spill] sm:$0xff]  ;;  %v6289_v9 = vld [vmem:[#allocation20_spill] sm:$0xff] }
 0x179   : > { %1782 = vst [vmem:[#allocation3 + $0x49] sm:$0x1] %v6274_v32  ;;  %v3830_v15 = vpop.f32.mrf.mxu0  ;;  %v1847_v54 = vrot.slane %v5518_v12, 1  ;;  %v1151_v39 = vadd.f32 %v3752_v5, %v6285_v10  ;;  %v6286_v60 = vld [vmem:[#allocation7_spill] sm:$0xff]  ;;  %v6290_v47 = vld [vmem:[#allocation22_spill] sm:$0xff] }
 0x17a   : > { %v1738_v26 = vmax.f32 %v1722_v17, 0.0  ;;  %v1700_v43 = vmul.f32 %v5369_v38, %v1677_v51  ;;  %v1646_v55 = vadd.f32 %v5411_v19, %v3829_v33  ;;  %4214 = vmatmul.mubr.bf16.vlgmr.msra.gmra.mxu0 %v5516_v23  ;;  %v3678_v2 = vadd.f32 %v6287_v35, %v6286_v60  ;;  %v6291_v17 = vld [vmem:[#allocation8_spill] sm:$0xff] }
 0x17b   : > { %v3831_v53 = vpop.f32.mrf.mxu0  ;;  %3942 = vmatpush3.bf16.msra.mxu0 %v4389_v0  ;;  %v1248_v5 = vadd.f32 %v6288_v6, %v1151_v39  ;;  %v3758_v0 = vadd.f32 %v6290_v47, %v6289_v9  ;;  %v1156_v51 = vadd.f32 %v3755_v8, %v6291_v17  ;;  %v4401_v60 = vld [vmem:[%s6244_s2 + $0x20] sm:$0xff]  }
 0x17c   : > { %1755 = vst [vmem:[#allocation3 + $0x50] sm:$0xff] %v1738_v26  ;;  %v1723_v20 = vadd.f32 %v5374_v27, %v1700_v43  ;;  %v1678_v19 = vadd.f32 %v1646_v55, %v1245_v22  ;;  %v3832_v29 = vadd.f32 %v3831_v53, %v3830_v15  ;;  %v5536_v18 = vld [vmem:[#allocation3 + $0x40] sm:$0xff]  ;;  %3943 = vmatprep.subr.bf16.mxu0 %v4391_v45  ;;  %v4397_v22 = vld [vmem:[%s6244_s2 + $0x28] sm:$0xff]  }
 0x17d   : > { %1773 = vst [vmem:[#allocation3 + $0x50] sm:$0x1] %v6274_v32  ;;  %v3833_v28 = vpop.f32.mrf.mxu0  ;;  %v1848_v58 = vrot.slane %v5536_v18, 1  ;;  %v1864_v15 = vsel %vm439_vm0, %v1846_v41, %v1847_v54  ;;  %v4399_v41 = vld [vmem:[%s6244_s2 + $0x60] sm:$0xff]   ;;  %v918_v8 = vadd.f32 %v3678_v2, %v6292_v25  ;;  %v4407_v25 = vld [vmem:[%s6244_s2 + $0x50] sm:$0xff]  }
 0x17e   : > { %v1739_v48 = vmax.f32 %v1723_v20, 0.0  ;;  %v1701_v59 = vmul.f32 %v5369_v38, %v1678_v19  ;;  %v1649_v61 = vadd.f32 %v5460_v30, %v3832_v29  ;;  %v1656_v29 = vpop.f32.mrf.mxu1 }
 0x17f   : > { %v3834_v33 = vpop.f32.mrf.mxu0  ;;  %v1863_v45 = vsel %vm439_vm0, %v1847_v54, %v1848_v58  ;;  %3944 = vmatpush3.bf16.msra.mxu0 %v4393_v16  ;;  %v6293_v54 = vld [vmem:[#allocation23_spill] sm:$0xff]  ;;  %v1159_v35 = vadd.f32 %v3758_v0, %v918_v8 }
 0x180   : > { %1756 = vst [vmem:[#allocation3 + $0x58] sm:$0xff] %v1739_v48  ;;  %v1724_v30 = vadd.f32 %v5374_v27, %v1701_v59  ;;  %v1679_v26 = vadd.f32 %v1649_v61, %v1248_v5  ;;  %v3835_v43 = vadd.f32 %v3834_v33, %v3833_v28  ;;  %v5561_v55 = vpack.c.bf16 %v1863_v45, %v1864_v15  ;;  %v5563_v21 = vld [vmem:[#allocation3 + $0x48] sm:$0xff]  ;;  %v6294_v61 = vld [vmem:[#allocation24_spill] sm:$0xff]  ;;  %v4405_v15 = vld [vmem:[%s6244_s2 + $0x18] sm:$0xff]  }
 0x181   : > { %3945 = vmatprep.subr.bf16.mxu0 %v4395_v44  ;;  %1783 = vst [vmem:[#allocation3 + $0x59] sm:$0x1] %v6274_v32  ;;  %v3836_v53 = vpop.f32.mrf.mxu0  ;;  %v1253_v16 = vadd.f32 %v6293_v54, %v1156_v51  ;;  %v1849_v44 = vrot.slane %v5563_v21, 1  ;;  %v1256_v9 = vadd.f32 %v6294_v61, %v1159_v35 }
 0x182   : > { %v1740_v10 = vmax.f32 %v1724_v30, 0.0  ;;  %v1702_v39 = vmul.f32 %v5369_v38, %v1679_v26  ;;  %v1654_v20 = vadd.f32 %v3835_v43, %v1653_v31  ;;  %4217 = vmatprep.mubr.bf16.mxu0 %v5561_v55  ;;  %v4403_v31 = vld [vmem:[%s6244_s2 + $0x58] sm:$0xff]  }
 0x183   : > { %v3837_v19 = vpop.f32.mrf.mxu0  ;;  %3946 = vmatpush3.bf16.msra.mxu0 %v4397_v22  ;;  %v1862_v45 = vsel %vm439_vm0, %v1848_v58, %v1849_v44 }
 0x184   : > { %1757 = vst [vmem:[#allocation3 + $0x60] sm:$0xff] %v1740_v10  ;;  %v1725_v2 = vadd.f32 %v5374_v27, %v1702_v39  ;;  %v1680_v28 = vadd.f32 %v1654_v20, %v1253_v16  ;;  %v3838_v6 = vadd.f32 %v3837_v19, %v3836_v53  ;;  %v5578_v5 = vld [vmem:[#allocation3 + $0x50] sm:$0xff]  ;;  %3947 = vmatprep.subr.bf16.mxu0 %v4399_v41 }
 0x185   : > { %1774 = vst [vmem:[#allocation3 + $0x60] sm:$0x1] %v6274_v32  ;;  %v3839_v48 = vpop.f32.mrf.mxu0  ;;  %v1850_v59 = vrot.slane %v5578_v5, 1  ;;  %v4409_v39 = vld [vmem:[%s6244_s2 + $0x10] sm:$0xff]  }
 0x186   : > { %v1741_v47 = vmax.f32 %v1725_v2, 0.0  ;;  %v1703_v0 = vmul.f32 %v5369_v38, %v1680_v28  ;;  %v1657_v17 = vadd.f32 %v3838_v6, %v1656_v29 }
 0x187   : > { %v3840_v51 = vpop.f32.mrf.mxu0  ;;  %v1861_v33 = vsel %vm439_vm0, %v1849_v44, %v1850_v59  ;;  %3948 = vmatpush3.bf16.msra.mxu0 %v4401_v60 }
 0x188   : > { %1758 = vst [vmem:[#allocation3 + $0x68] sm:$0xff] %v1741_v47  ;;  %v1726_v22 = vadd.f32 %v5374_v27, %v1703_v0  ;;  %v1681_v30 = vadd.f32 %v1657_v17, %v1256_v9  ;;  %v3841_v26 = vadd.f32 %v3840_v51, %v3839_v48  ;;  %v5595_v43 = vpack.c.bf16 %v1861_v33, %v1862_v45  ;;  %v5597_v41 = vld [vmem:[#allocation3 + $0x58] sm:$0xff] }
 0x189   : > { %3949 = vmatprep.subr.bf16.mxu0 %v4403_v31  ;;  %1784 = vst [vmem:[#allocation3 + $0x69] sm:$0x1] %v6274_v32  ;;  %v3842_v58 = vpop.f32.mrf.mxu0  ;;  %v1851_v10 = vrot.slane %v5597_v41, 1  ;;  %v4412_v31 = vld [vmem:[%s6244_s2 + $0x8] sm:$0xff]   ;;  %v5650_v45 = vld [vmem:[%s6244_s2 + $0x238] sm:$0xff]  }
 0x18a   : > { %v1742_v8 = vmax.f32 %v1726_v22, 0.0  ;;  %v1704_v53 = vmul.f32 %v5369_v38, %v1681_v30  ;;  %v1662_v54 = vadd.f32 %v5510_v7, %v3841_v26  ;;  %4218 = vmatmul.mubr.bf16.gmra.mxu0 %v5595_v43  ;;  %v4410_v7 = vld [vmem:[%s6244_s2 + $0x48] sm:$0xff]   ;;  %v5654_v22 = vld [vmem:[#allocation3] sm:$0xff] }
 0x18b   : > { %v3843_v16 = vpop.f32.mrf.mxu0  ;;  %3950 = vmatpush3.bf16.msra.mxu0 %v4405_v15  ;;  %v1860_v6 = vsel %vm439_vm0, %v1850_v59, %v1851_v10 }
 0x18c   : > { %1759 = vst [vmem:[#allocation3 + $0x70] sm:$0xff] %v1742_v8  ;;  %v1727_v20 = vadd.f32 %v5374_v27, %v1704_v53  ;;  %v1682_v19 = vadd.f32 %v1662_v54, %v5354_v3  ;;  %v3844_v29 = vadd.f32 %v3843_v16, %v3842_v58  ;;  %v5612_v44 = vld [vmem:[#allocation3 + $0x60] sm:$0xff]  ;;  %3951 = vmatprep.subr.bf16.mxu0 %v4407_v25  ;;  %v1840_v8 = vrot.slane %v5654_v22, 1 }
 0x18d   : > { %1775 = vst [vmem:[#allocation3 + $0x70] sm:$0x1] %v6274_v32  ;;  %v1852_v60 = vrot.slane %v5612_v44, 1 }
 0x18e   : > { %v1743_v35 = vmax.f32 %v1727_v20, 0.0  ;;  %v1705_v2 = vmul.f32 %v5369_v38, %v1682_v19  ;;  %v1665_v28 = vadd.f32 %v5555_v36, %v3844_v29  ;;  %v4413_v36 = vld [vmem:[%s6244_s2 + $0x40] sm:$0xff]   ;;  %v5687_v19 = vld [vmem:[#allocation3 + $0x90] sm:$0xff] }
 0x18f   : > { %v1859_v3 = vsel %vm439_vm0, %v1851_v10, %v1852_v60  ;;  %3952 = vmatpush3.bf16.msra.mxu0 %v4409_v39  ;;  %v1811_v39 = vrot.slane %v5418_v11, 7  ;;  %v2688_v11 = vrot.slane %v5687_v19, 1 }
 0x190   : > { %1760 = vst [vmem:[#allocation3 + $0x78] sm:$0xff] %v1743_v35  ;;  %v1728_v48 = vadd.f32 %v5374_v27, %v1705_v2  ;;  %v1683_v61 = vadd.f32 %v1665_v28, %v5361_v24  ;;  %v5630_v9 = vpack.c.bf16 %v1859_v3, %v1860_v6  ;;  %v5632_v47 = vld [vmem:[#allocation3 + $0x68] sm:$0xff]  ;;  %3953 = vmatprep.subr.bf16.mxu0 %v4410_v7  ;;  %v4414_v24 = vld [vmem:[%s6244_s2] sm:$0xff]  }
 0x191   : > { %1785 = vst [vmem:[#allocation3 + $0x79] sm:$0x1] %v6274_v32  ;;  %v1853_v17 = vrot.slane %v5632_v47, 1 }
 0x192   : > { %v1744_v59 = vmax.f32 %v1728_v48, 0.0  ;;  %v1706_v0 = vmul.f32 %v5369_v38, %v1683_v61  ;;  %4221 = vmatprep.mubr.bf16.mxu0 %v5630_v9 }
 0x193   : > { %3954 = vmatpush3.bf16.msra.mxu0 %v4412_v31  ;;  %v5713_v31 = vld [vmem:[#allocation3 + $0x8] sm:$0xff] }
 0x194   : > { %1761 = vst [vmem:[#allocation3 + $0x80] sm:$0xff] %v1744_v59  ;;  %v1729_v51 = vadd.f32 %v5374_v27, %v1706_v0  ;;  %v5645_v33 = vld [vmem:[#allocation3 + $0x70] sm:$0xff]  ;;  %3955 = vmatprep.subr.bf16.mxu0 %v4413_v36  ;;  %v1858_v27 = vsel %vm439_vm0, %v1852_v60, %v1853_v17  ;;  %v1810_v60 = vrot.slane %v5416_v49, 7  ;;  %v1873_v36 = vpack.c.bf16 %v5713_v31, %v5654_v22 }
 0x195   : > { %1776 = vst [vmem:[#allocation3 + $0x80] sm:$0x1] %v6274_v32  ;;  %v1854_v38 = vrot.slane %v5645_v33, 1  ;;  %v4415_v59 = vld [vmem:[%s6244_s2 + $0xb0] sm:$0xff]  }
 0x196   : > { %v1745_v15 = vmax.f32 %v1729_v51, 0.0  ;;  %v1836_v28 = vsel %vm406_vm1, %v1810_v60, %v1811_v39  ;;  %v1808_v51 = vrot.slane %v5654_v22, 7  ;;  %v4431_v22 = vld [vmem:[%s6244_s2 + $0x1f0] sm:$0xff]  }
 0x197   : > { %v1857_v30 = vsel %vm439_vm0, %v1853_v17, %v1854_v38  ;;  %3956 = vmatpush3.bf16.msra.mxu0 %v4414_v24  ;;  %v5732_v24 = vpack.c.bf16 %v5468_v50, %v5437_v13  ;;  %v4416_v13 = vld [vmem:[%s6244_s2 + $0xa8] sm:$0xff]   ;;  %v4419_v50 = vld [vmem:[%s6244_s2 + $0x90] sm:$0xff]  }
 0x198   : > { %1762 = vst [vmem:[#allocation3 + $0x88] sm:$0xff] %v1745_v15  ;;  %v5660_v26 = vpack.c.bf16 %v1857_v30, %v1858_v27  ;;  %v5662_v25 = vld [vmem:[#allocation3 + $0x78] sm:$0xff]  ;;  %4261 = vmatprep.subr.bf16.mxu0 %v5650_v45  ;;  %v6295_v15 = vld [vmem:[#allocation10_spill] sm:$0xff]  ;;  %v1809_v30 = vrot.slane %v5713_v31, 7 }
 0x199   : > { %1786 = vst [vmem:[#allocation3 + $0x89] sm:$0x1] %v6274_v32  ;;  %v1855_v58 = vrot.slane %v5662_v25, 1  ;;  %v5728_v17 = vrot.slane %v5662_v25, 7 }
 0x19a   : > { %4222 = vmatmul.mubr.bf16.gmra.mxu0 %v5660_v26  ;;  %v1838_v27 = vsel %vm406_vm1, %v1808_v51, %v1809_v30 }
 0x19b   : > { %v5671_v53 = vsel %vm439_vm0, %v1854_v38, %v1855_v58  ;;  %v5677_v54 = vsel %vm439_vm0, %v1855_v58, %v1840_v8 }
 0x19c   : > { %v5679_v16 = vld [vmem:[#allocation3 + $0x80] sm:$0xff]  ;;  %v1895_v32 = vpack.c.bf16 %v5677_v54, %v5671_v53 }
 0x19d   : > { %v1949_v10 = vrot.slane %v5679_v16, 1 }
 0x19f   : > { %v1952_v20 = vsel %vm439_vm0, %v1855_v58, %v1949_v10  ;;  %v1839_v58 = vsel %vm406_vm1, %v5728_v17, %v1808_v51  ;;  %v5785_v51 = vpack.c.bf16 %v5563_v21, %v5536_v18 }
 0x1a0   : > { %v5690_v29 = vpack.c.bf16 %v1952_v20, %v5671_v53  ;;  %v5692_v7 = vld [vmem:[#allocation3 + $0x88] sm:$0xff] }
 0x1a1   : > { %v5696_v35 = vrot.slane %v5692_v7, 7  ;;  %v1950_v2 = vrot.slane %v5692_v7, 1 }
 0x1a2   : > { %4225 = vmatprep.mubr.bf16.mxu0 %v5690_v29 }
 0x1a3   : > { %v1948_v3 = vsel %vm406_vm1, %v5696_v35, %v1810_v60  ;;  %v5708_v6 = vsel %vm439_vm0, %v1949_v10, %v1950_v2  ;;  %v1953_v49 = vsel %vm439_vm0, %v1950_v2, %v5444_v14  ;;  %v5725_v0 = vsel %vm439_vm0, %v1950_v2, %v2688_v11 }
 0x1a4   : > { %v1954_v48 = vpack.c.bf16 %v1836_v28, %v1948_v3  ;;  %v1958_v61 = vpack.c.bf16 %v1953_v49, %v5708_v6  ;;  %v2694_v38 = vpack.c.bf16 %v5725_v0, %v5708_v6  ;;  %v1835_v10 = vsel %vm406_vm1, %v1811_v39, %v5463_v34  ;;  %v4418_v39 = vld [vmem:[%s6244_s2 + $0x98] sm:$0xff]  }
 0x1a5   : > { %v1878_v20 = vpack.c.bf16 %v5484_v63, %v1835_v10  ;;  %v1872_v2 = vpack.c.bf16 %v1838_v27, %v1839_v58  ;;  %v5754_v3 = vpack.c.bf16 %v5518_v12, %v5487_v1  ;;  %v1815_v49 = vrot.slane %v5518_v12, 7  ;;  %v4425_v10 = vld [vmem:[%s6244_s2 + $0x80] sm:$0xff]  }
 0x1a6   : > { %2184 = vmatmul.mubr.bf16.vlgmr.msra.gmra.mxu1 %v1954_v48  ;;  %4226 = vmatmul.mubr.bf16.gmra.mxu0 %v1958_v61  ;;  %v4417_v48 = vld [vmem:[%s6244_s2 + $0xa0] sm:$0xff]   ;;  %v4421_v61 = vld [vmem:[%s6244_s2 + $0x230] sm:$0xff]   ;;  %v1814_v34 = vrot.slane %v5487_v1, 7  ;;  %v1837_v1 = vsel %vm406_vm1, %v1809_v30, %v1810_v60  ;;  %v1816_v60 = vrot.slane %v5536_v18, 7  ;;  %v4426_v30 = vld [vmem:[%s6244_s2 + $0x218] sm:$0xff]   ;;  %v5812_v18 = vpack.c.bf16 %v5597_v41, %v5578_v5 }
 0x1a7   : > { %2191 = vmatprep.mubr.bf16.mxu1 %v5732_v24  ;;  %4230 = vmatpush3.bf16.msra.mxu1 %v6295_v15  ;;  %v1817_v15 = vrot.slane %v5563_v21, 7  ;;  %v1819_v58 = vrot.slane %v5597_v41, 7  ;;  %v2683_v63 = vrot.slane %v5687_v19, 7 }
 0x1a8   : > { %2521 = vmatprep.mubr.bf16.mxu0 %v1873_v36  ;;  %4231 = vmatprep.subr.bf16.mxu1 %v4415_v59  ;;  %v1832_v12 = vsel %vm406_vm1, %v1814_v34, %v1815_v49  ;;  %v4423_v36 = vld [vmem:[%s6244_s2 + $0x228] sm:$0xff]  }
 0x1a9   : > { %v1830_v21 = vsel %vm406_vm1, %v1816_v60, %v1817_v15  ;;  %v2685_v56 = vsel %vm406_vm1, %v2683_v63, %v2684_v52 }
 0x1ab   : > { %4232 = vmatpush3.bf16.msra.mxu1 %v4415_v59  ;;  %v1875_v59 = vpack.c.bf16 %v1836_v28, %v1837_v1  ;;  %v4422_v28 = vld [vmem:[%s6244_s2 + $0x88] sm:$0xff]  }
 0x1ac   : > { %4233 = vmatprep.subr.bf16.mxu1 %v4416_v13 }
 0x1ae   : > { %2192 = vmatmul.mubr.bf16.gmra.mxu1 %v1878_v20  ;;  %2522 = vmatmul.mubr.bf16.vlgmr.msra.gmra.mxu0 %v1872_v2  ;;  %v4427_v2 = vld [vmem:[%s6244_s2 + $0x210] sm:$0xff]  }
 0x1af   : > { %2199 = vmatprep.mubr.bf16.mxu1 %v5754_v3  ;;  %2529 = vmatprep.mubr.bf16.mxu0 %v5427_v42  ;;  %v1833_v42 = vsel %vm406_vm1, %v1813_v37, %v1814_v34  ;;  %v4424_v37 = vld [vmem:[%s6244_s2 + $0x220] sm:$0xff]  }
 0x1b0   : > { %4234 = vmatpush3.bf16.msra.mxu1 %v4416_v13  ;;  %4262 = vmatpush3.bf16.msra.mxu0 %v5650_v45  ;;  %v5781_v45 = vpack.c.bf16 %v1832_v12, %v1833_v42  ;;  %v1831_v13 = vsel %vm406_vm1, %v1815_v49, %v1816_v60  ;;  %v1818_v49 = vrot.slane %v5578_v5, 7  ;;  %v5839_v5 = vpack.c.bf16 %v5632_v47, %v5612_v44 }
 0x1b1   : > { %4235 = vmatprep.subr.bf16.mxu1 %v4417_v48  ;;  %4263 = vmatprep.subr.bf16.mxu0 %v4421_v61  ;;  %v5808_v27 = vpack.c.bf16 %v1830_v21, %v1831_v13  ;;  %v1821_v12 = vrot.slane %v5632_v47, 7  ;;  %v1841_v60 = vrot.slane %v5713_v31, 1  ;;  %v4435_v13 = vld [vmem:[%s6244_s2 + $0x1a8] sm:$0xff]  }
 0x1b2   : > { %v1828_v41 = vsel %vm406_vm1, %v1818_v49, %v1819_v58 }
 0x1b3   : > { %v1870_v31 = vsel %vm439_vm0, %v1840_v8, %v1841_v60  ;;  %v4433_v8 = vld [vmem:[%s6244_s2 + $0x1b0] sm:$0xff]  }
 0x1b4   : > { %4236 = vmatpush3.bf16.msra.mxu1 %v4417_v48  ;;  %4264 = vmatpush3.bf16.msra.mxu0 %v4421_v61  ;;  %v4428_v48 = vld [vmem:[%s6244_s2 + $0x1f8] sm:$0xff]   ;;  %v1829_v61 = vsel %vm406_vm1, %v1817_v15, %v1818_v49  ;;  %v4443_v49 = vld [vmem:[%s6244_s2 + $0x188] sm:$0xff]  }
 0x1b5   : > { %4237 = vmatprep.subr.bf16.mxu1 %v4418_v39  ;;  %4265 = vmatprep.subr.bf16.mxu0 %v4423_v36  ;;  %v5835_v34 = vpack.c.bf16 %v1828_v41, %v1829_v61  ;;  %v2689_v41 = vrot.slane %v5420_v57, 1 }
 0x1b6   : > { %2200 = vmatmul.mubr.bf16.gmra.mxu1 %v5781_v45  ;;  %2530 = vmatmul.mubr.bf16.gmra.mxu0 %v1875_v59  ;;  %v5858_v59 = vpack.c.bf16 %v5662_v25, %v5645_v33  ;;  %v5874_v25 = vpack.c.bf16 %v5692_v7, %v5679_v16  ;;  %v1869_v7 = vsel %vm439_vm0, %v1841_v60, %v5444_v14  ;;  %v4430_v14 = vld [vmem:[%s6244_s2 + $0x1b8] sm:$0xff]  }
 0x1b7   : > { %2207 = vmatprep.mubr.bf16.mxu1 %v5785_v51  ;;  %2537 = vmatprep.mubr.bf16.mxu0 %v5732_v24  ;;  %v2690_v53 = vsel %vm439_vm0, %v2688_v11, %v2689_v41  ;;  %v2692_v54 = vsel %vm439_vm0, %v2689_v41, %v5447_v4  ;;  %v2696_v4 = vpack.c.bf16 %v5420_v57, %v5687_v19 }
 0x1b8   : > { %4238 = vmatpush3.bf16.msra.mxu1 %v4418_v39  ;;  %4266 = vmatpush3.bf16.msra.mxu0 %v4423_v36  ;;  %v4432_v39 = vld [vmem:[%s6244_s2 + $0x200] sm:$0xff]   ;;  %v1820_v36 = vrot.slane %v5612_v44, 7  ;;  %v1822_v44 = vrot.slane %v5645_v33, 7  ;;  %v1944_v33 = vrot.slane %v5679_v16, 7  ;;  %v1874_v16 = vpack.c.bf16 %v1869_v7, %v1870_v31 }
 0x1b9   : > { %4239 = vmatprep.subr.bf16.mxu1 %v4419_v50  ;;  %4267 = vmatprep.subr.bf16.mxu0 %v4424_v37 }
 0x1ba   : > { %v1826_v47 = vsel %vm406_vm1, %v1820_v36, %v1821_v12  ;;  %v1827_v42 = vsel %vm406_vm1, %v1819_v58, %v1820_v36  ;;  %v1824_v15 = vsel %vm406_vm1, %v1822_v44, %v5728_v17  ;;  %v1946_v21 = vsel %vm406_vm1, %v1944_v33, %v5696_v35  ;;  %v4438_v58 = vld [vmem:[%s6244_s2 + $0x1d8] sm:$0xff]  }
 0x1bb   : > { %v5854_v1 = vpack.c.bf16 %v1826_v47, %v1827_v42 }
 0x1bc   : > { %4240 = vmatpush3.bf16.msra.mxu1 %v4419_v50  ;;  %4268 = vmatpush3.bf16.msra.mxu0 %v4424_v37  ;;  %v1825_v50 = vsel %vm406_vm1, %v1821_v12, %v1822_v44 }
 0x1bd   : > { %4241 = vmatprep.subr.bf16.mxu1 %v4422_v28  ;;  %4269 = vmatprep.subr.bf16.mxu0 %v4426_v30  ;;  %v5870_v37 = vpack.c.bf16 %v1824_v15, %v1825_v50 }
 0x1be   : > { %2208 = vmatmul.mubr.bf16.gmra.mxu1 %v5808_v27  ;;  %2538 = vmatmul.mubr.bf16.gmra.mxu0 %v1878_v20  ;;  %v4429_v20 = vld [vmem:[%s6244_s2 + $0x208] sm:$0xff]  }
 0x1bf   : > { %2215 = vmatprep.mubr.bf16.mxu1 %v5812_v18  ;;  %2545 = vmatprep.mubr.bf16.mxu0 %v5754_v3 }
 0x1c0   : > { %4242 = vmatpush3.bf16.msra.mxu1 %v4422_v28  ;;  %4270 = vmatpush3.bf16.msra.mxu0 %v4426_v30  ;;  %v1947_v28 = vsel %vm406_vm1, %v5728_v17, %v1944_v33  ;;  %v4434_v17 = vld [vmem:[%s6244_s2 + $0x1e8] sm:$0xff]  }
 0x1c1   : > { %4243 = vmatprep.subr.bf16.mxu1 %v4425_v10  ;;  %4271 = vmatprep.subr.bf16.mxu0 %v4427_v2  ;;  %v5895_v30 = vpack.c.bf16 %v1946_v21, %v1947_v28 }
 0x1c4   : > { %4244 = vmatpush3.bf16.msra.mxu1 %v4425_v10  ;;  %4272 = vmatpush3.bf16.msra.mxu0 %v4427_v2  ;;  %v4439_v10 = vld [vmem:[%s6244_s2 + $0x198] sm:$0xff]   ;;  %v4442_v2 = vld [vmem:[%s6244_s2 + $0x1c8] sm:$0xff]  }
 0x1c5   : > { %4021 = vmatprep.subr.bf16.mxu1 %v4428_v48  ;;  %4273 = vmatprep.subr.bf16.mxu0 %v4429_v20 }
 0x1c6   : > { %2216 = vmatmul.mubr.bf16.gmra.mxu1 %v5835_v34  ;;  %2546 = vmatmul.mubr.bf16.gmra.mxu0 %v5781_v45 }
 0x1c7   : > { %2223 = vmatprep.mubr.bf16.mxu1 %v5839_v5  ;;  %2553 = vmatprep.mubr.bf16.mxu0 %v5785_v51 }
 0x1c8   : > { %4274 = vmatpush3.bf16.msra.mxu0 %v4429_v20 }
 0x1c9   : > { %4275 = vmatprep.subr.bf16.mxu0 %v4432_v39 }
 0x1cc   : > { %4276 = vmatpush3.bf16.msra.mxu0 %v4432_v39 }
 0x1ce   : > { %2224 = vmatmul.mubr.bf16.gmra.mxu1 %v5854_v1  ;;  %2554 = vmatmul.mubr.bf16.gmra.mxu0 %v5808_v27 }
 0x1cf   : > { %2231 = vmatprep.mubr.bf16.mxu1 %v5858_v59  ;;  %2561 = vmatprep.mubr.bf16.mxu0 %v5812_v18 }
 0x1d6   : > { %2232 = vmatmul.mubr.bf16.gmra.mxu1 %v5870_v37  ;;  %2562 = vmatmul.mubr.bf16.gmra.mxu0 %v5835_v34 }
 0x1d7   : > { %2239 = vmatprep.mubr.bf16.mxu1 %v5874_v25  ;;  %2569 = vmatprep.mubr.bf16.mxu0 %v5839_v5 }
 0x1de   : > { %2240 = vmatmul.mubr.bf16.gmra.mxu1 %v5895_v30  ;;  %2570 = vmatmul.mubr.bf16.gmra.mxu0 %v5854_v1 }
 0x1df   : > { %2577 = vmatprep.mubr.bf16.mxu0 %v5858_v59  ;;  %4245 = vmatprep.mubr.bf16.mxu1 %v1874_v16 }
 0x1e6   : > { %2578 = vmatmul.mubr.bf16.gmra.mxu0 %v5870_v37  ;;  %4246 = vmatmul.mubr.bf16.vlgmr.msra.gmra.mxu1 %v5466_v40  ;;  %v4436_v40 = vld [vmem:[%s6244_s2 + $0x1e0] sm:$0xff]  }
 0x1e7   : > { %4249 = vmatprep.mubr.bf16.mxu1 %v5516_v23  ;;  %4022 = vmatpush3.bf16.msra.mxu1 %v4430_v14 }
 0x1e8   : > { %4277 = vmatprep.mubr.bf16.mxu0 %v5516_v23  ;;  %4023 = vmatprep.subr.bf16.mxu1 %v4431_v22  ;;  %v4437_v23 = vld [vmem:[%s6244_s2 + $0x1a0] sm:$0xff]  }
 0x1eb   : > { %4024 = vmatpush3.bf16.msra.mxu1 %v4433_v8 }
 0x1ec   : > { %4025 = vmatprep.subr.bf16.mxu1 %v4434_v17 }
 0x1ee   : > { %4250 = vmatmul.mubr.bf16.gmra.mxu1 %v5561_v55  ;;  %4278 = vmatmul.mubr.bf16.vlgmr.msra.gmra.mxu0 %v5561_v55  ;;  %v4440_v55 = vld [vmem:[%s6244_s2 + $0x1d0] sm:$0xff]  }
 0x1ef   : > { %4253 = vmatprep.mubr.bf16.mxu1 %v5595_v43  ;;  %4026 = vmatpush3.bf16.msra.mxu1 %v4435_v13 }
 0x1f0   : > { %4281 = vmatprep.mubr.bf16.mxu0 %v5595_v43  ;;  %4027 = vmatprep.subr.bf16.mxu1 %v4436_v40  ;;  %v4441_v43 = vld [vmem:[%s6244_s2 + $0x190] sm:$0xff]  }
 0x1f3   : > { %4028 = vmatpush3.bf16.msra.mxu1 %v4437_v23 }
 0x1f4   : > { %4029 = vmatprep.subr.bf16.mxu1 %v4438_v58 }
 0x1f6   : > { %4254 = vmatmul.mubr.bf16.gmra.mxu1 %v5630_v9  ;;  %4282 = vmatmul.mubr.bf16.gmra.mxu0 %v5630_v9  ;;  %v4444_v9 = vld [vmem:[%s6244_s2 + $0x1c0] sm:$0xff]  }
 0x1f7   : > { %4257 = vmatprep.mubr.bf16.mxu1 %v5660_v26  ;;  %4030 = vmatpush3.bf16.msra.mxu1 %v4439_v10 }
 0x1f8   : > { %4285 = vmatprep.mubr.bf16.mxu0 %v5660_v26  ;;  %4031 = vmatprep.subr.bf16.mxu1 %v4440_v55  ;;  %v4445_v26 = vld [vmem:[%s6244_s2 + $0x180] sm:$0xff]  }
 0x1fb   : > { %4032 = vmatpush3.bf16.msra.mxu1 %v4441_v43 }
 0x1fc   : > { %4033 = vmatprep.subr.bf16.mxu1 %v4442_v2 }
 0x1fe   : > { %4258 = vmatmul.mubr.bf16.gmra.mxu1 %v1895_v32  ;;  %4286 = vmatmul.mubr.bf16.gmra.mxu0 %v5690_v29  ;;  %v2697_v32 = vpack.c.bf16 %v2692_v54, %v2690_v53 }
 0x1ff   : > { %4034 = vmatpush3.bf16.msra.mxu1 %v4443_v49  ;;  %2922 = vmatprep.mubr.bf16.mxu1 %v5732_v24 }
 0x200   : > { %4289 = vmatprep.mubr.bf16.mxu0 %v2694_v38  ;;  %4035 = vmatprep.subr.bf16.mxu1 %v4444_v9 }
 0x203   : > { %4036 = vmatpush3.bf16.msra.mxu1 %v4445_v26 }
 0x206   : > { %2923 = vmatmul.mubr.bf16.vlgmr.msra.gmra.mxu1 %v2693_v46  ;;  %4290 = vmatmul.mubr.bf16.gmra.mxu0 %v2697_v32  ;;  %v2686_v46 = vsel %vm406_vm1, %v5696_v35, %v2683_v63 }
 0x207   : > { %2930 = vmatprep.mubr.bf16.mxu1 %v5754_v3  ;;  %v2695_v29 = vpack.c.bf16 %v2685_v56, %v2686_v46 }
 0x20e   : > { %2931 = vmatmul.mubr.bf16.gmra.mxu1 %v5781_v45 }
 0x20f   : > { %2938 = vmatprep.mubr.bf16.mxu1 %v5785_v51 }
 0x216   : > { %2939 = vmatmul.mubr.bf16.gmra.mxu1 %v5808_v27 }
 0x217   : > { %2946 = vmatprep.mubr.bf16.mxu1 %v5812_v18 }
 0x21e   : > { %2947 = vmatmul.mubr.bf16.gmra.mxu1 %v5835_v34 }
 0x21f   : > { %2954 = vmatprep.mubr.bf16.mxu1 %v5839_v5 }
 0x226   : > { %2955 = vmatmul.mubr.bf16.gmra.mxu1 %v5854_v1 }
 0x227   : > { %2962 = vmatprep.mubr.bf16.mxu1 %v5858_v59 }
 0x22e   : > { %2963 = vmatmul.mubr.bf16.gmra.mxu1 %v5870_v37 }
 0x22f   : > { %2970 = vmatprep.mubr.bf16.mxu1 %v5874_v25 }
 0x236   : > { %2971 = vmatmul.mubr.bf16.gmra.mxu1 %v5895_v30 }
 0x237   : > { %2978 = vmatprep.mubr.bf16.mxu1 %v2696_v4 }
 0x23a   : > { %v4215_v11 = vpop.f32.mrf.mxu0 }
 0x23c   : > { %v2282_v6 = vpop.f32.mrf.mxu0 }
 0x23e   : > { %2979 = vmatmul.mubr.bf16.gmra.mxu1 %v2695_v29  ;;  %v4216_v0 = vpop.f32.mrf.mxu0 }
 0x240   : > { %v2285_v24 = vpop.f32.mrf.mxu0 }
 0x24a   : > { %v4219_v38 = vpop.f32.mrf.mxu0 }
 0x24c   : > { %v2298_v19 = vpop.f32.mrf.mxu0 }
 0x24e   : > { %v4220_v3 = vpop.f32.mrf.mxu0 }
 0x250   : > { %v2301_v45 = vpop.f32.mrf.mxu0 }
 0x25a   : > { %v5998_v51 = vpop.f32.mrf.mxu0 }
 0x25c   : > { %v2314_v57 = vpop.f32.mrf.mxu0 }
 0x25e   : > { %v6000_v27 = vpop.f32.mrf.mxu0 }
 0x260   : > { %v2317_v52 = vpop.f32.mrf.mxu0 }
 0x266   : > { %v3877_v18 = vpop.f32.mrf.mxu1  ;;  %v6002_v48 = vpop.f32.mrf.mxu0 }
 0x268   : > { %v3878_v62 = vpop.f32.mrf.mxu1  ;;  %v6004_v35 = vpop.f32.mrf.mxu0 }
 0x269   : > { %v3879_v20 = vadd.f32 %v3878_v62, %v3877_v18 }
 0x26a   : > { %v3880_v61 = vpop.f32.mrf.mxu1  ;;  %v6006_v34 = vpop.f32.mrf.mxu0 }
 0x26b   : > { %v6008_v5 = vadd.f32 %v3879_v20, %v2282_v6 }
 0x26c   : > { %v3881_v12 = vpop.f32.mrf.mxu1  ;;  %v6010_v39 = vpop.f32.mrf.mxu0 }
 0x26d   : > { %v3882_v36 = vadd.f32 %v3881_v12, %v3880_v61 }
 0x26e   : > { %v3883_v47 = vpop.f32.mrf.mxu1  ;;  %v6012_v42 = vpop.f32.mrf.mxu0 }
 0x26f   : > { %v6014_v1 = vadd.f32 %v3882_v36, %v2285_v24 }
 0x270   : > { %v3884_v59 = vpop.f32.mrf.mxu1  ;;  %v6016_v44 = vpop.f32.mrf.mxu0 }
 0x271   : > { %v3885_v15 = vadd.f32 %v3884_v59, %v3883_v47 }
 0x272   : > { %v3886_v50 = vpop.f32.mrf.mxu1  ;;  %v6018_v37 = vpop.f32.mrf.mxu0 }
 0x273   : > { %v6020_v25 = vadd.f32 %v4215_v11, %v3885_v15 }
 0x274   : > { %v3887_v60 = vpop.f32.mrf.mxu1  ;;  %v6022_v33 = vpop.f32.mrf.mxu0 }
 0x275   : > { %v3888_v21 = vadd.f32 %v3887_v60, %v3886_v50 }
 0x276   : > { %v3889_v7 = vpop.f32.mrf.mxu1  ;;  %v6024_v31 = vpop.f32.mrf.mxu0 }
 0x277   : > { %v6026_v28 = vadd.f32 %v4216_v0, %v3888_v21 }
 0x278   : > { %v3890_v30 = vpop.f32.mrf.mxu1  ;;  %v6028_v16 = vpop.f32.mrf.mxu0 }
 0x279   : > { %v3891_v14 = vadd.f32 %v3890_v30, %v3889_v7 }
 0x27a   : > { %v3892_v22 = vpop.f32.mrf.mxu1  ;;  %v6030_v8 = vpop.f32.mrf.mxu0 }
 0x27b   : > { %v6032_v17 = vadd.f32 %v3891_v14, %v2298_v19 }
 0x27c   : > { %v3893_v13 = vpop.f32.mrf.mxu1  ;;  %v6034_v40 = vpop.f32.mrf.mxu0 }
 0x27d   : > { %v3894_v23 = vadd.f32 %v3893_v13, %v3892_v22 }
 0x27e   : > { %v3895_v58 = vpop.f32.mrf.mxu1  ;;  %v6036_v10 = vpop.f32.mrf.mxu0 }
 0x27f   : > { %v6038_v55 = vadd.f32 %v3894_v23, %v2301_v45 }
 0x280   : > { %v3896_v43 = vpop.f32.mrf.mxu1  ;;  %v6040_v2 = vpop.f32.mrf.mxu0 }
 0x281   : > { %v3897_v49 = vadd.f32 %v3896_v43, %v3895_v58 }
 0x282   : > { %v3898_v9 = vpop.f32.mrf.mxu1  ;;  %v6042_v41 = vpop.f32.mrf.mxu0 }
 0x283   : > { %v6044_v26 = vadd.f32 %v4219_v38, %v3897_v49 }
 0x284   : > { %v3899_v53 = vpop.f32.mrf.mxu1  ;;  %v6046_v54 = vpop.f32.mrf.mxu0 }
 0x285   : > { %v3900_v32 = vadd.f32 %v3899_v53, %v3898_v9 }
 0x286   : > { %v3901_v4 = vpop.f32.mrf.mxu1  ;;  %v6048_v63 = vpop.f32.mrf.mxu0 }
 0x287   : > { %v6050_v56 = vadd.f32 %v4220_v3, %v3900_v32 }
 0x288   : > { %v3902_v46 = vpop.f32.mrf.mxu1  ;;  %v6052_v29 = vpop.f32.mrf.mxu0 }
 0x289   : > { %v3903_v11 = vadd.f32 %v3902_v46, %v3901_v4 }
 0x28a   : > { %v3904_v6 = vpop.f32.mrf.mxu1  ;;  %v6054_v0 = vpop.f32.mrf.mxu0 }
 0x28b   : > { %v6056_v24 = vadd.f32 %v3903_v11, %v2314_v57 }
 0x28c   : > { %v3905_v38 = vpop.f32.mrf.mxu1  ;;  %v6058_v19 = vpop.f32.mrf.mxu0 }
 0x28d   : > { %v3906_v45 = vadd.f32 %v3905_v38, %v3904_v6 }
 0x28e   : > { %v3907_v18 = vpop.f32.mrf.mxu1  ;;  %v6060_v62 = vpop.f32.mrf.mxu0 }
 0x28f   : > { %v6062_v20 = vadd.f32 %v3906_v45, %v2317_v52 }
 0x290   : > { %v3908_v3 = vpop.f32.mrf.mxu1  ;;  %v6064_v61 = vpop.f32.mrf.mxu0 }
 0x291   : > { %v3909_v12 = vadd.f32 %v3908_v3, %v3907_v18 }
 0x292   : > { %v3910_v36 = vpop.f32.mrf.mxu1  ;;  %v6066_v47 = vpop.f32.mrf.mxu0 }
 0x293   : > { %v6069_v59 = vadd.f32 %v5998_v51, %v3909_v12 }
 0x294   : > { %v3911_v57 = vpop.f32.mrf.mxu1  ;;  %v6071_v15 = vpop.f32.mrf.mxu0 }
 0x295   : > { %v3912_v50 = vadd.f32 %v3911_v57, %v3910_v36 }
 0x296   : > { %v3913_v60 = vpop.f32.mrf.mxu1  ;;  %v6073_v21 = vpop.f32.mrf.mxu0 }
 0x297   : > { %v6076_v52 = vadd.f32 %v6000_v27, %v3912_v50 }
 0x298   : > { %v3914_v7 = vpop.f32.mrf.mxu1  ;;  %v6078_v30 = vpop.f32.mrf.mxu0 }
 0x299   : > { %6296 = vst [vmem:[#allocation17_spill] sm:$0xff] %v6076_v52  ;;  %v3915_v14 = vadd.f32 %v3914_v7, %v3913_v60 }
 0x29a   : > { %v3916_v22 = vpop.f32.mrf.mxu1  ;;  %v6080_v13 = vpop.f32.mrf.mxu0 }
 0x29b   : > { %6297 = vst [vmem:[#allocation11_spill] sm:$0xff] %v6080_v13  ;;  %v6083_v51 = vadd.f32 %v3915_v14, %v6004_v35 }
 0x29c   : > { %v3917_v23 = vpop.f32.mrf.mxu1  ;;  %v6085_v58 = vpop.f32.mrf.mxu0 }
 0x29d   : > { %6298 = vst [vmem:[#allocation12_spill] sm:$0xff] %v6083_v51  ;;  %6299 = vst [vmem:[#allocation21_spill] sm:$0xff] %v6085_v58  ;;  %v3918_v43 = vadd.f32 %v3917_v23, %v3916_v22 }
 0x29e   : > { %v3919_v49 = vpop.f32.mrf.mxu1  ;;  %v6087_v9 = vpop.f32.mrf.mxu0 }
 0x29f   : > { %6300 = vst [vmem:[#allocation13_spill] sm:$0xff] %v6087_v9  ;;  %v6090_v27 = vadd.f32 %v3918_v43, %v6010_v39 }
 0x2a0   : > { %v3920_v53 = vpop.f32.mrf.mxu1  ;;  %v6092_v4 = vpop.f32.mrf.mxu0 }
 0x2a1   : > { %6301 = vst [vmem:[#allocation14_spill] sm:$0xff] %v6090_v27  ;;  %v3921_v32 = vadd.f32 %v3920_v53, %v3919_v49  ;;  %6302 = vst [vmem:[#allocation5_spill] sm:$0xff] %v6092_v4 }
 0x2a2   : > { %v3922_v46 = vpop.f32.mrf.mxu1  ;;  %v6095_v38 = vpop.f32.mrf.mxu0 }
 0x2a3   : > { %v2339_v11 = vadd.f32 %v6002_v48, %v3921_v32  ;;  %6303 = vst [vmem:[#allocation15_spill] sm:$0xff] %v6095_v38 }
 0x2a4   : > { %v3923_v6 = vpop.f32.mrf.mxu1  ;;  %v6098_v12 = vpop.f32.mrf.mxu0 }
 0x2a5   : > { %v3924_v35 = vadd.f32 %v3923_v6, %v3922_v46  ;;  %6304 = vst [vmem:[#allocation16_spill] sm:$0xff] %v6098_v12 }
 0x2a6   : > { %v4247_v45 = vpop.f32.mrf.mxu1  ;;  %v3999_v57 = vpop.f32.mrf.mxu0 }
 0x2a7   : > { %v2342_v18 = vadd.f32 %v6006_v34, %v3924_v35 }
 0x2a8   : > { %v2620_v3 = vpop.f32.mrf.mxu1  ;;  %v4000_v7 = vpop.f32.mrf.mxu0 }
 0x2a9   : > { %v4001_v43 = vadd.f32 %v4000_v7, %v3999_v57  ;;  %v3600_v57 = vld [vmem:[%s4608_s27] sm:$0xff]   ;;  %v3959_v7 = vadd.f32 %v6016_v44, %v6012_v42 }
 0x2aa   : > { %v6100_v36 = vpop.f32.mrf.mxu1  ;;  %v4002_v22 = vpop.f32.mrf.mxu0  ;;  %v3602_v13 = vunpack.c.h.bf16 %v3600_v57 }
 0x2ab   : > { %v2580_v6 = vadd.f32 %v4001_v43, %v2339_v11  ;;  %v3962_v43 = vadd.f32 %v6022_v33, %v6018_v37 }
 0x2ac   : > { %v2623_v39 = vpop.f32.mrf.mxu1  ;;  %v4003_v49 = vpop.f32.mrf.mxu0 }
 0x2ad   : > { %v4004_v46 = vadd.f32 %v4003_v49, %v4002_v22  ;;  %v3601_v22 = vunpack.c.l.bf16 %v3600_v57  ;;  %v2524_v49 = vadd.f32 %v3959_v7, %v6008_v5  ;;  %v2527_v42 = vadd.f32 %v3962_v43, %v6014_v1 }
 0x2ae   : > { %v6102_v50 = vpop.f32.mrf.mxu1  ;;  %v4279_v38 = vpop.f32.mrf.mxu0 }
 0x2af   : > { %v2583_v12 = vadd.f32 %v4004_v46, %v2342_v18  ;;  %v2624_v37 = vadd.f32 %v2623_v39, %v2527_v42 }
 0x2b0   : > { %v6104_v60 = vpop.f32.mrf.mxu1 }
 0x2b2   : > { %v6106_v48 = vpop.f32.mrf.mxu1 }
 0x2b4   : > { %v6108_v14 = vpop.f32.mrf.mxu1 }
 0x2b6   : > { %v6110_v23 = vpop.f32.mrf.mxu1 }
 0x2b7   : > { %6305 = vst [vmem:[#allocation18_spill] sm:$0xff] %v6110_v23 }
 0x2b8   : > { %v6112_v34 = vpop.f32.mrf.mxu1 }
 0x2ba   : > { %v6114_v53 = vpop.f32.mrf.mxu1 }
 0x2bb   : > { %6306 = vst [vmem:[#allocation6_spill] sm:$0xff] %v6114_v53  ;;  %v3021_v53 = vpop.f32.mrf.mxu0 }
 0x2bc   : > { %v6116_v32 = vpop.f32.mrf.mxu1 }
 0x2bd   : > { %v4280_v46 = vpop.f32.mrf.mxu0 }
 0x2be   : > { %v4259_v35 = vpop.f32.mrf.mxu1 }
 0x2bf   : > { %v6118_v27 = vadd.f32 %v4259_v35, %v2580_v6  ;;  %v3124_v35 = vrot.slane %v3601_v22, 7 }
 0x2c0   : > { %v6120_v51 = vpop.f32.mrf.mxu1 }
 0x2c1   : > { %6307 = vst [vmem:[#allocation7_spill] sm:$0xff] %v6118_v27  ;;  %6308 = vst [vmem:[#allocation9_spill] sm:$0xff] %v6120_v51  ;;  %v3024_v51 = vpop.f32.mrf.mxu0 }
 0x2c2   : > { %v4260_v52 = vpop.f32.mrf.mxu1 }
 0x2c3   : > { %v6122_v4 = vadd.f32 %v4260_v52, %v2583_v12  ;;  %v2621_v52 = vadd.f32 %v2620_v3, %v2524_v49  ;;  %v6138_v1 = vpop.f32.mrf.mxu0 }
 0x2c4   : > { %v6124_v9 = vpop.f32.mrf.mxu1 }
 0x2c5   : > { %6309 = vst [vmem:[#allocation19_spill] sm:$0xff] %v6122_v4  ;;  %6310 = vst [vmem:[#allocation20_spill] sm:$0xff] %v6124_v9  ;;  %v3965_v4 = vadd.f32 %v6028_v16, %v6024_v31  ;;  %v3968_v31 = vadd.f32 %v6034_v40, %v6030_v8 }
 0x2c6   : > { %v4037_v23 = vpop.f32.mrf.mxu1 }
 0x2c8   : > { %v4038_v11 = vpop.f32.mrf.mxu1 }
 0x2c9   : > { %v4039_v18 = vadd.f32 %v4038_v11, %v4037_v23  ;;  %v2532_v23 = vadd.f32 %v3965_v4, %v6020_v25  ;;  %v3971_v25 = vadd.f32 %v6040_v2, %v6036_v10  ;;  %v3037_v4 = vpop.f32.mrf.mxu0  ;;  %v3974_v10 = vadd.f32 %v6046_v54, %v6042_v41 }
 0x2ca   : > { %v4040_v6 = vpop.f32.mrf.mxu1 }
 0x2cb   : > { %v3022_v12 = vadd.f32 %v4039_v18, %v3021_v53  ;;  %v2629_v16 = vadd.f32 %v4247_v45, %v2532_v23  ;;  %v6141_v18 = vld [vmem:[%s4608_s27 + $0x8] sm:$0xff]   ;;  %v2540_v42 = vadd.f32 %v3971_v25, %v6032_v17 }
 0x2cc   : > { %v4041_v27 = vpop.f32.mrf.mxu1 }
 0x2cd   : > { %v3084_v44 = vadd.f32 %v3022_v12, %v2621_v52  ;;  %v4042_v9 = vadd.f32 %v4041_v27, %v4040_v6  ;;  %v3125_v27 = vrot.slane %v3602_v13, 7  ;;  %v2535_v13 = vadd.f32 %v3968_v31, %v6026_v28 }
 0x2ce   : > { %v4043_v58 = vpop.f32.mrf.mxu1  ;;  %v2637_v17 = vadd.f32 %v6104_v60, %v2540_v42 }
 0x2cf   : > { %v3140_v33 = vadd.f32 %v3124_v35, %v3084_v44  ;;  %v3025_v5 = vadd.f32 %v4042_v9, %v3024_v51  ;;  %v2632_v2 = vadd.f32 %v6100_v36, %v2535_v13 }
 0x2d0   : > { %v4044_v3 = vpop.f32.mrf.mxu1 }
 0x2d1   : > { %v3567_v53 = vpack.c.bf16 %v3140_v33, %v3140_v33  ;;  %v3085_v7 = vadd.f32 %v3025_v5, %v2624_v37  ;;  %v4045_v22 = vadd.f32 %v4044_v3, %v4043_v58  ;;  %v4284_v5 = vpop.f32.mrf.mxu0 }
 0x2d2   : > { %v4046_v11 = vpop.f32.mrf.mxu1 }
 0x2d3   : > { %v3208_v43 = vshrl.u32 %v3567_v53, 16  ;;  %v3211_v57 = vshll.u32 %v3567_v53, 16  ;;  %v3141_v39 = vadd.f32 %v3124_v35, %v3085_v7  ;;  %v3030_v49 = vadd.f32 %v4279_v38, %v4045_v22 }
 0x2d4   : > { %v4047_v51 = vpop.f32.mrf.mxu1  ;;  %v3605_v38 = vunpack.c.l.bf16 %v6141_v18 }
 0x2d5   : > { %v3210_v58 = vrot.slane %v3208_v43, 4  ;;  %v3213_v9 = vrot.slane %v3211_v57, 5  ;;  %v3568_v8 = vpack.c.bf16 %v3141_v39, %v3141_v39  ;;  %v3086_v40 = vadd.f32 %v3030_v49, %v2629_v16 }
 0x2d6   : > { %v4048_v45 = vadd.f32 %v4047_v51, %v4046_v11  ;;  %v4049_v6 = vpop.f32.mrf.mxu1  ;;  %v3126_v3 = vrot.slane %v3605_v38, 7  ;;  %v3977_v16 = vadd.f32 %v6052_v29, %v6048_v63  ;;  %v2543_v11 = vadd.f32 %v3974_v10, %v6038_v55  ;;  %v3040_v51 = vpop.f32.mrf.mxu0 }
 0x2d7   : > { %v3214_v52 = vor.u32 %v3213_v9, %v3210_v58  ;;  %v3217_v12 = vshll.u32 %v3568_v8, 16  ;;  %v3142_v35 = vadd.f32 %v3125_v27, %v3086_v40  ;;  %v3606_v8 = vunpack.c.h.bf16 %v6141_v18 }
 0x2d8   : > { %v3033_v28 = vadd.f32 %v4280_v46, %v4048_v45  ;;  %v4050_v37 = vpop.f32.mrf.mxu1  ;;  %v2640_v40 = vadd.f32 %v6108_v14, %v2543_v11  ;;  %v2548_v63 = vadd.f32 %v3977_v16, %v6044_v26 }
 0x2d9   : > { %v3215_v33 = vrot.slane %v3214_v52, 4  ;;  %v3219_v41 = vrot.slane %v3217_v12, 5  ;;  %v3569_v54 = vpack.c.bf16 %v3142_v35, %v3142_v35  ;;  %v4051_v36 = vadd.f32 %v4050_v37, %v4049_v6  ;;  %v6177_v35 = vpop.f32.mrf.mxu0 }
 0x2da   : > { %v3087_v23 = vadd.f32 %v3033_v28, %v2632_v2  ;;  %v4052_v53 = vpop.f32.mrf.mxu1  ;;  %v3980_v12 = vadd.f32 %v6058_v19, %v6054_v0  ;;  %v2645_v18 = vadd.f32 %v6102_v50, %v2548_v63  ;;  %v3127_v10 = vrot.slane %v3606_v8, 7 }
 0x2db   : > { %v3220_v46 = vsel %vm6153_vm4, %v3215_v33, %v3219_v41  ;;  %v3222_v7 = vshrl.u32 %v3569_v54, 16  ;;  %v3225_v22 = vshll.u32 %v3569_v54, 16  ;;  %v3038_v31 = vadd.f32 %v4051_v36, %v3037_v4  ;;  %v6181_v33 = vld [vmem:[%s4608_s27 + $0x10] sm:$0xff]  }
 0x2dc   : > { %3327 = vst [vmem:[%s6162_s17] sm:$0xf] %v3220_v46  ;;  %v3143_v43 = vadd.f32 %v3125_v27, %v3087_v23  ;;  %v4053_v57 = vpop.f32.mrf.mxu1  ;;  %v3983_v41 = vadd.f32 %v6064_v61, %v6060_v62  ;;  %v2551_v23 = vadd.f32 %v3980_v12, %v6050_v56  ;;  %v3986_v62 = vadd.f32 %v6071_v15, %v6066_v47 }
 0x2dd   : > { %v3224_v39 = vrot.slane %v3222_v7, 4  ;;  %v3227_v60 = vrot.slane %v3225_v22, 5  ;;  %v3088_v49 = vadd.f32 %v3038_v31, %v2637_v17  ;;  %v4054_v25 = vadd.f32 %v4053_v57, %v4052_v53  ;;  %v3053_v53 = vpop.f32.mrf.mxu0 }
 0x2de   : > { %v3570_v58 = vpack.c.bf16 %v3143_v43, %v3143_v43  ;;  %v4055_v9 = vpop.f32.mrf.mxu1  ;;  %v2648_v61 = vadd.f32 %v6106_v48, %v2551_v23  ;;  %v2556_v16 = vadd.f32 %v3983_v41, %v6056_v24  ;;  %v3989_v24 = vadd.f32 %v6078_v30, %v6073_v21  ;;  %v6315_v41 = vld [vmem:[#allocation18_spill] sm:$0xff]  ;;  %v3620_v23 = vld [vmem:[%s4608_s27 + $0x18] sm:$0xff]  }
 0x2df   : > { %v3228_v13 = vor.u32 %v3227_v60, %v3224_v39  ;;  %v3144_v4 = vadd.f32 %v3126_v3, %v3088_v49  ;;  %v3041_v45 = vadd.f32 %v4054_v25, %v3040_v51  ;;  %v4288_v25 = vpop.f32.mrf.mxu0 }
 0x2e0   : > { %v3231_v55 = vshll.u32 %v3570_v58, 16  ;;  %v4056_v29 = vpop.f32.mrf.mxu1  ;;  %v2653_v49 = vadd.f32 %v6112_v34, %v2556_v16  ;;  %v2564_v21 = vadd.f32 %v3989_v24, %v6069_v59  ;;  %v6318_v16 = vld [vmem:[#allocation17_spill] sm:$0xff] }
 0x2e1   : > { %v3229_v27 = vrot.slane %v3228_v13, 4  ;;  %v3571_v6 = vpack.c.bf16 %v3144_v4, %v3144_v4  ;;  %v3089_v38 = vadd.f32 %v3041_v45, %v2640_v40  ;;  %v4057_v52 = vadd.f32 %v4056_v29, %v4055_v9 }
 0x2e2   : > { %v3233_v14 = vrot.slane %v3231_v55, 5  ;;  %v4058_v2 = vpop.f32.mrf.mxu1  ;;  %v3056_v55 = vpop.f32.mrf.mxu0 }
 0x2e3   : > { %v3236_v42 = vshrl.u32 %v3571_v6, 16  ;;  %v3239_v26 = vshll.u32 %v3571_v6, 16  ;;  %v3145_v28 = vadd.f32 %v3126_v3, %v3089_v38  ;;  %v3046_v37 = vadd.f32 %v6138_v1, %v4057_v52 }
 0x2e4   : > { %v3234_v0 = vsel %vm6153_vm4, %v3229_v27, %v3233_v14  ;;  %v4059_v19 = vpop.f32.mrf.mxu1  ;;  %v3609_v1 = vunpack.c.l.bf16 %v6181_v33  ;;  %v3610_v6 = vunpack.c.h.bf16 %v6181_v33  ;;  %v2661_v33 = vadd.f32 %v6315_v41, %v2564_v21  ;;  %v6324_v21 = vld [vmem:[#allocation14_spill] sm:$0xff] }
 0x2e5   : > { %3328 = vst [vmem:[%s6162_s17 + $0x4] sm:$0xf] %v3234_v0  ;;  %v3238_v50 = vrot.slane %v3236_v42, 4  ;;  %v3241_v54 = vrot.slane %v3239_v26, 5  ;;  %v3572_v36 = vpack.c.bf16 %v3145_v28, %v3145_v28  ;;  %v3090_v17 = vadd.f32 %v3046_v37, %v2645_v18  ;;  %v6313_v26 = vld [vmem:[#allocation11_spill] sm:$0xff]  ;;  %v6314_v28 = vld [vmem:[#allocation21_spill] sm:$0xff]  ;;  %v6207_v0 = vpop.f32.mrf.mxu0 }
 0x2e6   : > { %v4060_v3 = vadd.f32 %v4059_v19, %v4058_v2  ;;  %v4061_v46 = vpop.f32.mrf.mxu1  ;;  %v3128_v58 = vrot.slane %v3609_v1, 7  ;;  %v3992_v37 = vadd.f32 %v6314_v28, %v6313_v26  ;;  %v3129_v19 = vrot.slane %v3610_v6, 7 }
 0x2e7   : > { %v3242_v7 = vor.u32 %v3241_v54, %v3238_v50  ;;  %v3245_v22 = vshll.u32 %v3572_v36, 16  ;;  %v3146_v31 = vadd.f32 %v3127_v10, %v3090_v17  ;;  %v3614_v41 = vunpack.c.h.bf16 %v3620_v23 }
 0x2e8   : > { %v3049_v11 = vadd.f32 %v4284_v5, %v4060_v3  ;;  %v4062_v43 = vpop.f32.mrf.mxu1  ;;  %v2559_v5 = vadd.f32 %v3986_v62, %v6062_v20  ;;  %v6317_v3 = vld [vmem:[#allocation5_spill] sm:$0xff] }
 0x2e9   : > { %v3243_v57 = vrot.slane %v3242_v7, 4  ;;  %v3247_v56 = vrot.slane %v3245_v22, 5  ;;  %v3573_v39 = vpack.c.bf16 %v3146_v31, %v3146_v31  ;;  %v4063_v60 = vadd.f32 %v4062_v43, %v4061_v46  ;;  %v3069_v43 = vpop.f32.mrf.mxu0 }
 0x2ea   : > { %v3091_v51 = vadd.f32 %v3049_v11, %v2648_v61  ;;  %v4064_v9 = vpop.f32.mrf.mxu1  ;;  %v2656_v38 = vadd.f32 %v6116_v32, %v2559_v5  ;;  %v2567_v11 = vadd.f32 %v3992_v37, %v6318_v16 }
 0x2eb   : > { %v3248_v47 = vsel %vm6153_vm4, %v3243_v57, %v3247_v56  ;;  %v3250_v15 = vshrl.u32 %v3573_v39, 16  ;;  %v3253_v48 = vshll.u32 %v3573_v39, 16  ;;  %v3054_v8 = vadd.f32 %v4063_v60, %v3053_v53  ;;  %v6316_v53 = vld [vmem:[#allocation13_spill] sm:$0xff] }
 0x2ec   : > { %3329 = vst [vmem:[%s6162_s17 + $0x8] sm:$0xf] %v3248_v47  ;;  %v3147_v40 = vadd.f32 %v3127_v10, %v3091_v51  ;;  %v4065_v13 = vpop.f32.mrf.mxu1  ;;  %v3995_v46 = vadd.f32 %v6317_v3, %v6316_v53  ;;  %v3613_v39 = vunpack.c.l.bf16 %v3620_v23  ;;  %v6319_v51 = vld [vmem:[#allocation15_spill] sm:$0xff]  ;;  %v6321_v47 = vld [vmem:[#allocation6_spill] sm:$0xff] }
 0x2ed   : > { %v3252_v4 = vrot.slane %v3250_v15, 4  ;;  %v3255_v34 = vrot.slane %v3253_v48, 5  ;;  %v3092_v45 = vadd.f32 %v3054_v8, %v2653_v49  ;;  %v4066_v63 = vadd.f32 %v4065_v13, %v4064_v9  ;;  %v6322_v48 = vld [vmem:[#allocation12_spill] sm:$0xff] }
 0x2ee   : > { %v3574_v29 = vpack.c.bf16 %v3147_v40, %v3147_v40  ;;  %v4067_v27 = vpop.f32.mrf.mxu1  ;;  %v2664_v15 = vadd.f32 %v6321_v47, %v2567_v11  ;;  %v2572_v8 = vadd.f32 %v3995_v46, %v6322_v48  ;;  %v6327_v48 = vld [vmem:[#allocation19_spill] sm:$0xff] }
 0x2ef   : > { %v3256_v52 = vor.u32 %v3255_v34, %v3252_v4  ;;  %v3148_v12 = vadd.f32 %v3128_v58, %v3092_v45  ;;  %v3057_v18 = vadd.f32 %v4066_v63, %v3056_v55  ;;  %v6323_v45 = vld [vmem:[#allocation9_spill] sm:$0xff]  ;;  %v4292_v55 = vpop.f32.mrf.mxu0 }
 0x2f0   : > { %v3259_v20 = vshll.u32 %v3574_v29, 16  ;;  %v4068_v30 = vpop.f32.mrf.mxu1  ;;  %v2669_v63 = vadd.f32 %v6323_v45, %v2572_v8 }
 0x2f1   : > { %v3257_v14 = vrot.slane %v3256_v52, 4  ;;  %v3575_v10 = vpack.c.bf16 %v3148_v12, %v3148_v12  ;;  %v3093_v2 = vadd.f32 %v3057_v18, %v2656_v38  ;;  %v4069_v42 = vadd.f32 %v4068_v30, %v4067_v27  ;;  %v3072_v26 = vpop.f32.mrf.mxu0 }
 0x2f2   : > { %v3261_v32 = vrot.slane %v3259_v20, 5  ;;  %v4070_v50 = vpop.f32.mrf.mxu1  ;;  %v3130_v27 = vrot.slane %v3613_v39, 7  ;;  %v6326_v39 = vld [vmem:[#allocation7_spill] sm:$0xff] }
 0x2f3   : > { %v3264_v54 = vshrl.u32 %v3575_v10, 16  ;;  %v3267_v59 = vshll.u32 %v3575_v10, 16  ;;  %v3149_v36 = vadd.f32 %v3128_v58, %v3093_v2  ;;  %v3062_v17 = vadd.f32 %v6177_v35, %v4069_v42  ;;  %v6320_v58 = vld [vmem:[#allocation16_spill] sm:$0xff] }
 0x2f4   : > { %v3262_v1 = vsel %vm6153_vm4, %v3257_v14, %v3261_v32  ;;  %v4071_v7 = vpop.f32.mrf.mxu1  ;;  %v3998_v9 = vadd.f32 %v6320_v58, %v6319_v51 }
 0x2f5   : > { %3330 = vst [vmem:[%s6162_s17 + $0xc] sm:$0xf] %v3262_v1  ;;  %v3266_v22 = vrot.slane %v3264_v54, 4  ;;  %v3269_v31 = vrot.slane %v3267_v59, 5  ;;  %v3576_v62 = vpack.c.bf16 %v3149_v36, %v3149_v36  ;;  %v3094_v61 = vadd.f32 %v3062_v17, %v2661_v33  ;;  %v6325_v33 = vld [vmem:[#allocation20_spill] sm:$0xff] }
 0x2f6   : > { %v4072_v57 = vadd.f32 %v4071_v7, %v4070_v50  ;;  %v4073_v56 = vpop.f32.mrf.mxu1  ;;  %v3131_v7 = vrot.slane %v3614_v41, 7 }
 0x2f7   : > { %v3270_v35 = vor.u32 %v3269_v31, %v3266_v22  ;;  %v3273_v60 = vshll.u32 %v3576_v62, 16  ;;  %v3150_v49 = vadd.f32 %v3129_v19, %v3094_v61 }
 0x2f8   : > { %v3065_v24 = vadd.f32 %v4288_v25, %v4072_v57  ;;  %v4074_v5 = vpop.f32.mrf.mxu1  ;;  %v2575_v25 = vadd.f32 %v3998_v9, %v6324_v21 }
 0x2f9   : > { %v3271_v40 = vrot.slane %v3270_v35, 4  ;;  %v3275_v13 = vrot.slane %v3273_v60, 5  ;;  %v3577_v4 = vpack.c.bf16 %v3150_v49, %v3150_v49  ;;  %v4075_v34 = vadd.f32 %v4074_v5, %v4073_v56 }
 0x2fa   : > { %v3095_v29 = vadd.f32 %v3065_v24, %v2664_v15  ;;  %v4076_v6 = vpop.f32.mrf.mxu1  ;;  %v2672_v32 = vadd.f32 %v6325_v33, %v2575_v25 }
 0x2fb   : > { %v3276_v38 = vsel %vm6153_vm4, %v3271_v40, %v3275_v13  ;;  %v3278_v52 = vshrl.u32 %v3577_v4, 16  ;;  %v3281_v12 = vshll.u32 %v3577_v4, 16  ;;  %v3070_v18 = vadd.f32 %v4075_v34, %v3069_v43 }
 0x2fc   : > { %3331 = vst [vmem:[%s6162_s17 + $0x10] sm:$0xf] %v3276_v38  ;;  %v3151_v20 = vadd.f32 %v3129_v19, %v3095_v29  ;;  %v4077_v30 = vpop.f32.mrf.mxu1 }
 0x2fd   : > { %v3280_v14 = vrot.slane %v3278_v52, 4  ;;  %v3283_v10 = vrot.slane %v3281_v12, 5  ;;  %v3096_v2 = vadd.f32 %v3070_v18, %v2669_v63  ;;  %v4078_v42 = vadd.f32 %v4077_v30, %v4076_v6 }
 0x2fe   : > { %v3578_v28 = vpack.c.bf16 %v3151_v20, %v3151_v20  ;;  %v4079_v37 = vpop.f32.mrf.mxu1 }
 0x2ff   : > { %v3284_v50 = vor.u32 %v3283_v10, %v3280_v14  ;;  %v3152_v54 = vadd.f32 %v3130_v27, %v3096_v2  ;;  %v3073_v59 = vadd.f32 %v4078_v42, %v3072_v26 }
 0x300   : > { %v3287_v36 = vshll.u32 %v3578_v28, 16  ;;  %v4080_v17 = vpop.f32.mrf.mxu1 }
 0x301   : > { %v3285_v53 = vrot.slane %v3284_v50, 4  ;;  %v3579_v3 = vpack.c.bf16 %v3152_v54, %v3152_v54  ;;  %v3097_v19 = vadd.f32 %v3073_v59, %v2672_v32  ;;  %v4081_v46 = vadd.f32 %v4080_v17, %v4079_v37 }
 0x302   : > { %v3289_v1 = vrot.slane %v3287_v36, 5  ;;  %v4082_v22 = vpop.f32.mrf.mxu1 }
 0x303   : > { %v3292_v31 = vshrl.u32 %v3579_v3, 16  ;;  %v3295_v62 = vshll.u32 %v3579_v3, 16  ;;  %v3153_v61 = vadd.f32 %v3130_v27, %v3097_v19  ;;  %v3078_v23 = vadd.f32 %v6207_v0, %v4081_v46 }
 0x304   : > { %v3290_v16 = vsel %vm6153_vm4, %v3285_v53, %v3289_v1  ;;  %v4083_v11 = vpop.f32.mrf.mxu1 }
 0x305   : > { %3332 = vst [vmem:[%s6162_s17 + $0x14] sm:$0xf] %v3290_v16  ;;  %v3294_v43 = vrot.slane %v3292_v31, 4  ;;  %v3297_v57 = vrot.slane %v3295_v62, 5  ;;  %v3580_v56 = vpack.c.bf16 %v3153_v61, %v3153_v61  ;;  %v3098_v35 = vadd.f32 %v3078_v23, %v6326_v39 }
 0x306   : > { %v4084_v60 = vadd.f32 %v4083_v11, %v4082_v22 }
 0x307   : > { %v3298_v49 = vor.u32 %v3297_v57, %v3294_v43  ;;  %v3301_v51 = vshll.u32 %v3580_v56, 16  ;;  %v3154_v58 = vadd.f32 %v3131_v7, %v3098_v35 }
 0x308   : > { %v3081_v9 = vadd.f32 %v4292_v55, %v4084_v60 }
 0x309   : > { %v3299_v47 = vrot.slane %v3298_v49, 4  ;;  %v3303_v15 = vrot.slane %v3301_v51, 5  ;;  %v3581_v0 = vpack.c.bf16 %v3154_v58, %v3154_v58 }
 0x30a   : > { %v3099_v8 = vadd.f32 %v3081_v9, %v6327_v48 }
 0x30b   : > { %v3304_v24 = vsel %vm6153_vm4, %v3299_v47, %v3303_v15  ;;  %v3306_v5 = vshrl.u32 %v3581_v0, 16  ;;  %v3309_v40 = vshll.u32 %v3581_v0, 16 }
 0x30c   : > { %3333 = vst [vmem:[%s6162_s17 + $0x18] sm:$0xf] %v3304_v24  ;;  %v3155_v13 = vadd.f32 %v3131_v7, %v3099_v8 }
 0x30d   : > { %v3308_v4 = vrot.slane %v3306_v5, 4  ;;  %v3311_v34 = vrot.slane %v3309_v40, 5 }
 0x30e   : > { %v3582_v45 = vpack.c.bf16 %v3155_v13, %v3155_v13 }
 0x30f   : > { %v3312_v63 = vor.u32 %v3311_v34, %v3308_v4 }
 0x310   : > { %v3315_v29 = vshll.u32 %v3582_v45, 16 }
 0x311   : > { %v3313_v27 = vrot.slane %v3312_v63, 4 }
 0x312   : > { %v3317_v55 = vrot.slane %v3315_v29, 5 }
 0x314   : > { %v3318_v6 = vsel %vm6153_vm4, %v3313_v27, %v3317_v55 }
 0x315   : > { %3334 = vst [vmem:[%s6162_s17 + $0x1c] sm:$0xf] %v3318_v6 }
 0x316 PF: > { %s17_s24 = sadd.s32 1, %s4453_s24  }
 0x317   : > { %p14_p4 = scmp.ge.s32.totalorder %s17_s24, 4  }
 0x319   :  { %16 = sbr.rel (!%p14_p4) target bundleno = 1 (0x1), region = 82 }

// kernel: _lambda_.2
= control target key start
LH: loop header
LB: loop body
LE: loop exit
PB: predicated region body
PF: predicated region fallthrough
CT: control target
= control target key end

     0   :  { %s5116_s27 = smov 0   ;;  %s7171_s0 = inlined_call_operand.vmem [shape: bf16[2,9,16,512], index: 0, kind: input, shape index: {}]   ;;  %s7172_s1 = inlined_call_operand.vmem [shape: bf16[1152,128], index: 1, kind: input, shape index: {}]   ;;  %s7173_s2 = inlined_call_operand.vmem [shape: bf16[1152,128], index: 2, kind: input, shape index: {}]   ;;  %s7174_s3 = inlined_call_operand.vmem [shape: f32[1,512], index: 3, kind: input, shape index: {}]   ;;  %s7175_s4 = inlined_call_operand.vmem [shape: f32[1,512], index: 4, kind: input, shape index: {}]   ;;  %s7176_s5 = inlined_call_operand.vmem [shape: f32[1,128], index: 5, kind: input, shape index: {}]   ;;  %s7177_s6 = inlined_call_operand.vmem [shape: f32[1,128], index: 6, kind: input, shape index: {}]   ;;  %s7178_s7 = inlined_call_operand.vmem [shape: bf16[128,128], index: 7, kind: input, shape index: {}]   ;;  %s7179_s8 = inlined_call_operand.vmem [shape: bf16[2,8,8,128], index: 8, kind: output, shape index: {}]  }
   0x1 LB: > { %s3996_s28 = sadd.s32 4294967295, %s5068_s27   ;;  %p4000_p0 = scmp.ge.s32.totalorder %s5068_s27, 1  ;;  %s5068_s27 = sphi %s5116_s27, %s18_s27  }
   0x2   : > { %p262_p1 = scmp.lt.s32.totalorder %s5068_s27, 3 }
   0x4   : > { %p263_p2 = pnand %p4000_p0, %p262_p1 }
   0x6   : > { %266 = sbr.rel (%p263_p2) target bundleno = 797 (0x31d), region = 52 }
   0xb   : > { %v4907_v0 = vld [vmem:[%s7172_s1 + $0x178] sm:$0xff]   ;;  %v5070_v3 = vmov 0.0   ;;  %v4911_v5 = vld [vmem:[%s7172_s1 + $0x170] sm:$0xff]   ;;  %v4915_v9 = vld [vmem:[%s7172_s1 + $0x168] sm:$0xff]   ;;  %p296_p3 = scmp.lt.s32.totalorder %s3996_s28, 1  ;;  %v417_v21 = vlaneseq }
   0xc   : > { %v4908_v1 = vld [vmem:[%s7172_s1 + $0x78] sm:$0xff]   ;;  %4193 = vmatprep.subr.bf16.mxu0 %v4907_v0  ;;  %747 = vst [vmem:[#allocation2 + $0x8] sm:$0xff] %v5070_v3  ;;  %749 = vst [vmem:[#allocation2 + $0x28] sm:$0xff] %v5070_v3  ;;  %v4912_v6 = vld [vmem:[%s7172_s1 + $0x70] sm:$0xff]   ;;  %v5254_v40 = vrot.slane %v5070_v3, 7 }
   0xd   : > { %v4909_v2 = vld [vmem:[%s7172_s1 + $0x138] sm:$0xff]   ;;  %2247 = vst [vmem:[#allocation3] sm:$0xff] %v5070_v3  ;;  %2248 = vst [vmem:[#allocation3 + $0x8] sm:$0xff] %v5070_v3  ;;  %4257 = vmatprep.subr.bf16.mxu1 %v4908_v1  ;;  %v4913_v7 = vld [vmem:[%s7172_s1 + $0x130] sm:$0xff]   ;;  %s7262_s28 = smov (!%p296_p3, %s3996_s28), 1  ;;  %v5213_v26 = vshrl.u32 %v417_v21, 7 }
   0xe   : > { %2250 = vst [vmem:[#allocation3 + $0x90] sm:$0xff] %v5070_v3  ;;  %2251 = vst [vmem:[#allocation3 + $0x98] sm:$0xff] %v5070_v3  ;;  %v4910_v4 = vld [vmem:[%s7172_s1 + $0x38] sm:$0xff]   ;;  %4194 = vmatpush3.bf16.msra.mxu0 %v4909_v2  ;;  %v4914_v8 = vld [vmem:[%s7172_s1 + $0x30] sm:$0xff]   ;;  %s4897_s19 = smul.u32 288, %s7262_s28  ;;  %vm5249_vm0 = vcmp.lt.s32.totalorder %v417_v21, 256 }
   0xf   : > { %750 = vst [vmem:[#allocation2 + $0x30] sm:$0xff] %v5070_v3  ;;  %2252 = vst [vmem:[#allocation3] sm:$0x1] %v5070_v3  ;;  %4258 = vmatpush3.bf16.msra.mxu1 %v4910_v4  ;;  %4195 = vmatprep.subr.bf16.mxu0 %v4911_v5  ;;  %v4916_v10 = vld [vmem:[%s7172_s1 + $0x68] sm:$0xff]   ;;  %v4919_v13 = vld [vmem:[%s7172_s1 + $0x160] sm:$0xff]   ;;  %v419_v31 = vsub.s32 0, %v5213_v26 }
  0x10   : > { %2261 = vst [vmem:[#allocation3 + $0x90] sm:$0x1] %v5070_v3  ;;  %2262 = vst [vmem:[#allocation3 + $0x9] sm:$0x1] %v5070_v3  ;;  %4259 = vmatprep.subr.bf16.mxu1 %v4912_v6  ;;  %v4917_v11 = vld [vmem:[%s7172_s1 + $0x128] sm:$0xff]   ;;  %v4920_v14 = vld [vmem:[%s7172_s1 + $0x60] sm:$0xff]   ;;  %s5239_s10 = scalar_lea.vmem %s7171_s0, %s4897_s19 }
  0x11   : > { %2271 = vst [vmem:[#allocation3 + $0x99] sm:$0x1] %v5070_v3  ;;  %v4918_v12 = vld [vmem:[%s7172_s1 + $0x28] sm:$0xff]   ;;  %v4921_v15 = vld [vmem:[%s7172_s1 + $0x120] sm:$0xff]   ;;  %v4923_v17 = vld [vmem:[%s7172_s1 + $0x158] sm:$0xff]   ;;  %v423_v33 = vsub.s32 1, %v5213_v26 }
  0x12   : > { %4196 = vmatpush3.bf16.msra.mxu0 %v4913_v7  ;;  %v4922_v16 = vld [vmem:[%s7172_s1 + $0x20] sm:$0xff]   ;;  %v4924_v18 = vld [vmem:[%s7172_s1 + $0x58] sm:$0xff]   ;;  %v4927_v22 = vld [vmem:[%s7172_s1 + $0x150] sm:$0xff]   ;;  %7192 = vst [vmem:[#allocation4_spill] sm:$0xff] %v5213_v26  ;;  %v427_v35 = vsub.s32 2, %v5213_v26  ;;  %v431_v37 = vsub.s32 3, %v5213_v26 }
  0x13   : > { %4260 = vmatpush3.bf16.msra.mxu1 %v4914_v8  ;;  %4197 = vmatprep.subr.bf16.mxu0 %v4915_v9  ;;  %v4925_v19 = vld [vmem:[%s7172_s1 + $0x118] sm:$0xff]   ;;  %v4928_v23 = vld [vmem:[%s7172_s1 + $0x50] sm:$0xff]   ;;  %v4931_v27 = vld [vmem:[%s7172_s1 + $0x148] sm:$0xff]   ;;  %vm947_vm1 = vcmp.lt.s32.totalorder %v5213_v26, 1  ;;  %vm3810_vm3 = vsmask.f32 3328 }
  0x14   : > { %4261 = vmatprep.subr.bf16.mxu1 %v4916_v10  ;;  %v4926_v20 = vld [vmem:[%s7172_s1 + $0x18] sm:$0xff]   ;;  %v4929_v24 = vld [vmem:[%s7172_s1 + $0x110] sm:$0xff]   ;;  %v4932_v28 = vld [vmem:[%s7172_s1 + $0x48] sm:$0xff]   ;;  %vm3811_vm4 = vsmask.f32 7440  ;;  %s4176_s26 = sshll.u32 %s7262_s28, 5 }
  0x15   : > { %v4930_v25 = vld [vmem:[%s7172_s1 + $0x10] sm:$0xff]   ;;  %v4933_v29 = vld [vmem:[%s7172_s1 + $0x108] sm:$0xff]   ;;  %v4935_v32 = vld [vmem:[%s7172_s1 + $0x140] sm:$0xff]   ;;  %s7120_s28 = scalar_lea.vmem %s7179_s8, %s4176_s26 }
  0x16   : > { %4198 = vmatpush3.bf16.msra.mxu0 %v4917_v11  ;;  %v4934_v30 = vld [vmem:[%s7172_s1 + $0x8] sm:$0xff]   ;;  %v4936_v34 = vld [vmem:[%s7172_s1 + $0x40] sm:$0xff]   ;;  %v337_v47 = vld [vmem:[%s5239_s10 + $0xf0] sm:$0xff] }
  0x17   : > { %4262 = vmatpush3.bf16.msra.mxu1 %v4918_v12  ;;  %4199 = vmatprep.subr.bf16.mxu0 %v4919_v13  ;;  %v4937_v36 = vld [vmem:[%s7172_s1 + $0x100] sm:$0xff]   ;;  %v4939_v52 = vld [vmem:[%s7172_s1 + $0xf8] sm:$0xff]   ;;  %v404_v56 = vunpack.c.l.bf16 %v337_v47  ;;  %v313_v58 = vld [vmem:[%s5239_s10 + $0x30] sm:$0xff]  ;;  %v405_v59 = vunpack.c.h.bf16 %v337_v47 }
  0x18   : > { %4263 = vmatprep.subr.bf16.mxu1 %v4920_v14  ;;  %v4938_v38 = vld [vmem:[%s7172_s1] sm:$0xff]   ;;  %v341_v63 = vld [vmem:[%s5239_s10 + $0x110] sm:$0xff]  ;;  %v357_v2 = vunpack.c.h.bf16 %v313_v58  ;;  %v4947_v47 = vld [vmem:[%s7172_s1 + $0x1f8] sm:$0xff]  }
  0x19   : > { %v307_v41 = vld [vmem:[%s5239_s10] ss:$16 sps:$4 sm:$0xff]   ;;  %v413_v4 = vunpack.c.h.bf16 %v341_v63  ;;  %vm7113_vm5 = vmor %vm3810_vm3, %vm3811_vm4 }
  0x1a   : > { %4200 = vmatpush3.bf16.msra.mxu0 %v4921_v15  ;;  %v343_v42 = vld [vmem:[%s7174_s3] sm:$0xf]  ;;  %v344_v44 = vunpack.c.l.bf16 %v307_v41  ;;  %v348_v45 = vunpack.c.h.bf16 %v307_v41 }
  0x1b   : > { %4264 = vmatpush3.bf16.msra.mxu1 %v4922_v16  ;;  %4201 = vmatprep.subr.bf16.mxu0 %v4923_v17  ;;  %v5263_v43 = vld [vmem:[%s7175_s4] sm:$0xf]  ;;  %v5265_v46 = vrot.slane %v343_v42, %v419_v31  ;;  %v5268_v48 = vrot.slane %v343_v42, %v423_v33  ;;  %v5270_v49 = vrot.slane %v343_v42, %v427_v35 }
  0x1c   : > { %4265 = vmatprep.subr.bf16.mxu1 %v4924_v18  ;;  %v5274_v50 = vrot.slane %v343_v42, %v431_v37  ;;  %v5277_v51 = vrot.slane %v5263_v43, %v419_v31  ;;  %v5284_v54 = vrot.slane %v5263_v43, %v423_v33  ;;  %v5287_v55 = vrot.slane %v5263_v43, %v427_v35  ;;  %v311_v57 = vld [vmem:[%s5239_s10 + $0x20] sm:$0xff] }
  0x1d   : > { %v437_v53 = vmul.f32 %v5265_v46, %v344_v44  ;;  %v441_v60 = vmul.f32 %v5265_v46, %v348_v45  ;;  %v352_v61 = vunpack.c.l.bf16 %v311_v57  ;;  %v353_v62 = vunpack.c.h.bf16 %v311_v57  ;;  %v315_v21 = vld [vmem:[%s5239_s10 + $0x40] sm:$0xff] }
  0x1e   : > { %4202 = vmatpush3.bf16.msra.mxu0 %v4925_v19  ;;  %v497_v1 = vmul.f32 %v5265_v46, %v404_v56  ;;  %v498_v5 = vmul.f32 %v5268_v48, %v405_v59  ;;  %v450_v11 = vmul.f32 %v5268_v48, %v357_v2  ;;  %v506_v12 = vmul.f32 %v5268_v48, %v413_v4 }
  0x1f   : > { %4266 = vmatpush3.bf16.msra.mxu1 %v4926_v20  ;;  %4203 = vmatprep.subr.bf16.mxu0 %v4927_v22  ;;  %v531_v0 = vadd.f32 %v5277_v51, %v437_v53  ;;  %v5297_v6 = vadd.f32 %v5277_v51, %v441_v60  ;;  %v445_v7 = vmul.f32 %v5265_v46, %v352_v61  ;;  %v356_v20 = vunpack.c.l.bf16 %v313_v58  ;;  %v317_v22 = vld [vmem:[%s5239_s10 + $0x50] sm:$0xff] }
  0x20   : > { %4267 = vmatprep.subr.bf16.mxu1 %v4928_v23  ;;  %v446_v8 = vmul.f32 %v5268_v48, %v353_v62  ;;  %v5302_v10 = vadd.f32 %v5277_v51, %v497_v1  ;;  %v5307_v13 = vadd.f32 %v5284_v54, %v498_v5  ;;  %v5315_v18 = vadd.f32 %v5284_v54, %v450_v11  ;;  %v4940_v5 = vld [vmem:[%s7172_s1 + $0xb8] sm:$0xff]  }
  0x21   : > { %v603_v9 = vmax.f32 %v531_v0, 0.0  ;;  %v607_v14 = vmax.f32 %v5297_v6, 0.0  ;;  %v539_v15 = vadd.f32 %v5277_v51, %v445_v7  ;;  %v600_v19 = vadd.f32 %v5284_v54, %v506_v12 }
  0x22   : > { %4204 = vmatpush3.bf16.msra.mxu0 %v4929_v24  ;;  %v540_v16 = vadd.f32 %v5284_v54, %v446_v8  ;;  %v663_v17 = vmax.f32 %v5302_v10, 0.0  ;;  %v664_v23 = vmax.f32 %v5307_v13, 0.0  ;;  %v449_v31 = vmul.f32 %v5265_v46, %v356_v20 }
  0x23   : > { %4268 = vmatpush3.bf16.msra.mxu1 %v4930_v25  ;;  %4205 = vmatprep.subr.bf16.mxu0 %v4931_v27  ;;  %675 = vst [vmem:[#allocation2] sm:$0xff] %v603_v9  ;;  %v5324_v24 = vrot.slane %v607_v14, 7  ;;  %v611_v25 = vmax.f32 %v539_v15, 0.0  ;;  %v361_v35 = vunpack.c.h.bf16 %v315_v21  ;;  %v364_v45 = vunpack.c.l.bf16 %v317_v22 }
  0x24   : > { %4269 = vmatprep.subr.bf16.mxu1 %v4932_v28  ;;  %760 = vst.msk [vmem:[#allocation2] ss:$8 sm:$0x3] %vm5249_vm0, %v5070_v3  ;;  %v612_v27 = vmax.f32 %v540_v16, 0.0  ;;  %v5328_v28 = vrot.slane %v663_v17, 7  ;;  %v5335_v33 = vrot.slane %v664_v23, 7  ;;  %v543_v44 = vadd.f32 %v5277_v51, %v449_v31 }
  0x25   : > { %683 = vst [vmem:[#allocation2 + $0x40] sm:$0xff] %v611_v25  ;;  %v454_v53 = vmul.f32 %v5268_v48, %v361_v35  ;;  %v457_v59 = vmul.f32 %v5265_v46, %v364_v45 }
  0x26   : > { %4206 = vmatpush3.bf16.msra.mxu0 %v4933_v29  ;;  %v616_v29 = vmax.f32 %v5315_v18, 0.0  ;;  %684 = vst [vmem:[#allocation2 + $0x48] sm:$0xff] %v612_v27  ;;  %v615_v58 = vmax.f32 %v543_v44, 0.0  ;;  %v4941_v18 = vld [vmem:[%s7172_s1 + $0xf0] sm:$0xff]  }
  0x27   : > { %4270 = vmatpush3.bf16.msra.mxu1 %v4934_v30  ;;  %4207 = vmatprep.subr.bf16.mxu0 %v4935_v32  ;;  %v672_v30 = vmax.f32 %v600_v19, 0.0  ;;  %v319_v32 = vld [vmem:[%s5239_s10 + $0x60] sm:$0xff]  ;;  %763 = vst.msk [vmem:[#allocation2 + $0x40] ss:$8 sm:$0x3] %vm5249_vm0, %v5070_v3  ;;  %v548_v63 = vadd.f32 %v5284_v54, %v454_v53  ;;  %v5368_v7 = vadd.f32 %v5277_v51, %v457_v59 }
  0x28   : > { %4271 = vmatprep.subr.bf16.mxu1 %v4936_v34  ;;  %v360_v34 = vunpack.c.l.bf16 %v315_v21  ;;  %v5343_v41 = vrot.slane %v616_v29, 7  ;;  %v368_v57 = vunpack.c.l.bf16 %v319_v32  ;;  %v369_v60 = vunpack.c.h.bf16 %v319_v32  ;;  %v323_v53 = vld [vmem:[%s5239_s10 + $0x80] sm:$0xff] }
  0x29   : > { %744 = vst [vmem:[#allocation2 + $0x228] sm:$0xff] %v672_v30  ;;  %v5345_v42 = vrot.slane %v672_v30, 7  ;;  %v5365_v6 = vrot.slane %v615_v58, 7  ;;  %v620_v20 = vmax.f32 %v548_v63, 0.0 }
  0x2a   : > { %4208 = vmatpush3.bf16.msra.mxu0 %v4937_v36  ;;  %v365_v36 = vunpack.c.h.bf16 %v317_v22  ;;  %v461_v1 = vmul.f32 %v5265_v46, %v368_v57  ;;  %v462_v8 = vmul.f32 %v5268_v48, %v369_v60  ;;  %v623_v22 = vmax.f32 %v5368_v7, 0.0  ;;  %v325_v60 = vld [vmem:[%s5239_s10 + $0x90] sm:$0xff] }
  0x2b   : > { %4272 = vmatpush3.bf16.msra.mxu1 %v4938_v38  ;;  %4321 = vmatprep.subr.bf16.mxu0 %v4939_v52  ;;  %v5338_v38 = vld [vmem:[%s5239_s10 + $0x70] sm:$0xff]  ;;  %v453_v52 = vmul.f32 %v5265_v46, %v360_v34  ;;  %v814_v2 = vld [vmem:[#allocation2 + $0x8] sm:$0xff]  ;;  %v813_v4 = vld [vmem:[#allocation2] sm:$0xff]  ;;  %692 = vst [vmem:[#allocation2 + $0x88] sm:$0xff] %v620_v20  ;;  %v377_v20 = vunpack.c.h.bf16 %v323_v53 }
  0x2c   : > { %v458_v56 = vmul.f32 %v5268_v48, %v365_v36  ;;  %v373_v61 = vunpack.c.h.bf16 %v5338_v38  ;;  %4385 = vmatprep.subr.bf16.mxu1 %v4947_v47  ;;  %v882_v11 = vrot.slane %v814_v2, 7  ;;  %v1109_v12 = vpack.c.bf16 %v5070_v3, %v814_v2  ;;  %v4942_v34 = vld [vmem:[%s7172_s1 + $0xb0] sm:$0xff]   ;;  %v4943_v47 = vld [vmem:[%s7172_s1 + $0xe8] sm:$0xff]  }
  0x2d   : > { %v547_v62 = vadd.f32 %v5277_v51, %v453_v52  ;;  %v881_v15 = vrot.slane %v813_v4, 7  ;;  %v1108_v16 = vpack.c.bf16 %v607_v14, %v813_v4  ;;  %v4948_v52 = vld [vmem:[%s7172_s1 + $0x1b8] sm:$0xff]   ;;  %v5416_v59 = vrot.slane %v623_v22, 7 }
  0x2e   : > { %v5359_v0 = vadd.f32 %v5284_v54, %v458_v56  ;;  %v466_v9 = vmul.f32 %v5268_v48, %v373_v61  ;;  %1284 = vmatprep.mubr.bf16.mxu0 %v1109_v12  ;;  %v1005_v25 = vsel %vm947_vm1, %v882_v11, %v5254_v40  ;;  %v1009_v14 = vsel %vm947_vm1, %v5335_v33, %v882_v11  ;;  %v822_v31 = vld [vmem:[#allocation2 + $0x48] sm:$0xff]  ;;  %v821_v32 = vld [vmem:[#allocation2 + $0x40] sm:$0xff] }
  0x2f   : > { %v619_v19 = vmax.f32 %v547_v62, 0.0  ;;  %v1004_v27 = vsel %vm947_vm1, %v881_v15, %v5324_v24  ;;  %v1008_v30 = vsel %vm947_vm1, %v5328_v28, %v881_v15  ;;  %v1013_v35 = vpack.c.bf16 %v1005_v25, %v1009_v14  ;;  %1285 = vmatmul.mubr.bf16.vlgmr.msra.gmra.mxu0 %v1108_v16  ;;  %v4944_v11 = vld [vmem:[%s7172_s1 + $0xa8] sm:$0xff]  }
  0x30   : > { %v624_v21 = vmax.f32 %v5359_v0, 0.0  ;;  %v1012_v36 = vpack.c.bf16 %v1004_v27, %v1008_v30  ;;  %v890_v44 = vrot.slane %v822_v31, 7  ;;  %v5393_v45 = vpack.c.bf16 %v616_v29, %v822_v31  ;;  %4322 = vmatpush3.bf16.msra.mxu0 %v4940_v5  ;;  %v4952_v30 = vld [vmem:[%s7172_s1 + $0x1b0] sm:$0xff]  }
  0x31   : > { %691 = vst [vmem:[#allocation2 + $0x80] sm:$0xff] %v619_v19  ;;  %v5405_v56 = vrot.slane %v5263_v43, %v431_v37  ;;  %v889_v57 = vrot.slane %v821_v32, 7  ;;  %1573 = vmatprep.mubr.bf16.mxu1 %v1013_v35  ;;  %v1110_v61 = vpack.c.bf16 %v615_v58, %v821_v32  ;;  %v372_v62 = vunpack.c.l.bf16 %v5338_v38  ;;  %v4951_v38 = vld [vmem:[%s7172_s1 + $0x1f0] sm:$0xff]   ;;  %4323 = vmatprep.subr.bf16.mxu0 %v4941_v18  ;;  %v5454_v18 = vld [vmem:[%s5239_s10 + $0xa0] sm:$0xff] }
  0x32   : > { %766 = vst.msk [vmem:[#allocation2 + $0x80] ss:$8 sm:$0x3] %vm5249_vm0, %v5070_v3  ;;  %v5412_v29 = vrot.slane %v624_v21, 7  ;;  %1292 = vmatprep.mubr.bf16.mxu0 %v5393_v45  ;;  %v5423_v37 = vsel %vm947_vm1, %v890_v44, %v5343_v41  ;;  %v1001_v43 = vsel %vm947_vm1, %v5254_v40, %v890_v44  ;;  %1574 = vmatmul.mubr.bf16.vlgmr.msra.gmra.mxu1 %v1012_v36  ;;  %v376_v19 = vunpack.c.l.bf16 %v323_v53  ;;  %v5464_v31 = vld [vmem:[%s5239_s10 + $0xb0] sm:$0xff] }
  0x33   : > { %v1017_v63 = vpack.c.bf16 %v5423_v37, %v1001_v43  ;;  %v5433_v2 = vsel %vm947_vm1, %v5345_v42, %v890_v44  ;;  %v996_v4 = vsel %vm947_vm1, %v889_v57, %v5365_v6  ;;  %v1000_v5 = vsel %vm947_vm1, %v5324_v24, %v889_v57  ;;  %4386 = vmatpush3.bf16.msra.mxu1 %v4948_v52  ;;  %v4955_v44 = vld [vmem:[%s7172_s1 + $0x1e8] sm:$0xff]  }
  0x34   : > { %v1016_v58 = vpack.c.bf16 %v996_v4, %v1000_v5  ;;  %v555_v12 = vadd.f32 %v5277_v51, %v461_v1  ;;  %v556_v15 = vadd.f32 %v5284_v54, %v462_v8  ;;  %v5450_v16 = vadd.f32 %v5284_v54, %v466_v9  ;;  %4324 = vmatpush3.bf16.msra.mxu0 %v4942_v34  ;;  %v4945_v8 = vld [vmem:[%s7172_s1 + $0xe0] sm:$0xff]  }
  0x35   : > { %1581 = vmatprep.mubr.bf16.mxu1 %v1017_v63  ;;  %v465_v24 = vmul.f32 %v5265_v46, %v372_v62  ;;  %v381_v25 = vunpack.c.h.bf16 %v325_v60  ;;  %4325 = vmatprep.subr.bf16.mxu0 %v4943_v47  ;;  %v380_v9 = vunpack.c.l.bf16 %v325_v60  ;;  %v469_v34 = vmul.f32 %v5265_v46, %v376_v19  ;;  %v4946_v5 = vld [vmem:[%s7172_s1 + $0xa0] sm:$0xff]   ;;  %v4950_v19 = vld [vmem:[%s7172_s1 + $0x98] sm:$0xff]  }
  0x36   : > { %v627_v14 = vmax.f32 %v555_v12, 0.0  ;;  %v628_v27 = vmax.f32 %v556_v15, 0.0  ;;  %v632_v1 = vmax.f32 %v5450_v16, 0.0  ;;  %v470_v35 = vmul.f32 %v5268_v48, %v377_v20  ;;  %4387 = vmatprep.subr.bf16.mxu1 %v4951_v38  ;;  %v4949_v38 = vld [vmem:[%s7172_s1 + $0xd8] sm:$0xff]  }
  0x37   : > { %v5467_v32 = vadd.f32 %v5277_v51, %v465_v24  ;;  %v474_v36 = vmul.f32 %v5268_v48, %v381_v25  ;;  %1293 = vmatmul.mubr.bf16.gmra.mxu0 %v1110_v61  ;;  %v473_v57 = vmul.f32 %v5265_v46, %v380_v9  ;;  %v384_v60 = vunpack.c.l.bf16 %v5454_v18  ;;  %4388 = vmatpush3.bf16.msra.mxu1 %v4952_v30  ;;  %v4961_v16 = vld [vmem:[%s7172_s1 + $0x1d8] sm:$0xff]  }
  0x38   : > { %699 = vst [vmem:[#allocation2 + $0xc0] sm:$0xff] %v627_v14  ;;  %700 = vst [vmem:[#allocation2 + $0xc8] sm:$0xff] %v628_v27  ;;  %v5477_v53 = vrot.slane %v632_v1, 7  ;;  %v385_v43 = vunpack.c.h.bf16 %v5454_v18  ;;  %4326 = vmatpush3.bf16.msra.mxu0 %v4944_v11  ;;  %v564_v7 = vadd.f32 %v5284_v54, %v470_v35  ;;  %v4956_v11 = vld [vmem:[%s7172_s1 + $0x1a8] sm:$0xff]   ;;  %4389 = vmatprep.subr.bf16.mxu1 %v4955_v44  ;;  %v5531_v27 = vld [vmem:[%s5239_s10 + $0xc0] sm:$0xff] }
  0x39   : > { %v830_v47 = vld [vmem:[#allocation2 + $0x88] sm:$0xff]  ;;  %v829_v52 = vld [vmem:[#allocation2 + $0x80] sm:$0xff]  ;;  %769 = vst.msk [vmem:[#allocation2 + $0xc0] ss:$8 sm:$0x3] %vm5249_vm0, %v5070_v3  ;;  %v631_v0 = vmax.f32 %v5467_v32, 0.0  ;;  %4327 = vmatprep.subr.bf16.mxu0 %v4945_v8  ;;  %v1745_v8 = vpack.c.bf16 %v5423_v37, %v5433_v2  ;;  %v477_v32 = vmul.f32 %v5265_v46, %v384_v60 }
  0x3a   : > { %v898_v62 = vrot.slane %v830_v47, 7  ;;  %v5484_v63 = vpack.c.bf16 %v624_v21, %v830_v47  ;;  %v897_v61 = vrot.slane %v829_v52, 7  ;;  %v1112_v4 = vpack.c.bf16 %v623_v22, %v829_v52  ;;  %1582 = vmatmul.mubr.bf16.gmra.mxu1 %v1016_v58  ;;  %v4953_v44 = vld [vmem:[%s7172_s1 + $0xd0] sm:$0xff]  }
  0x3b   : > { %v563_v21 = vadd.f32 %v5277_v51, %v469_v34  ;;  %v5501_v22 = vadd.f32 %v5284_v54, %v474_v36  ;;  %v389_v58 = vunpack.c.h.bf16 %v5464_v31  ;;  %v5525_v18 = vrot.slane %v631_v0, 7  ;;  %v4954_v60 = vld [vmem:[%s7172_s1 + $0x90] sm:$0xff]   ;;  %4390 = vmatpush3.bf16.msra.mxu1 %v4956_v11 }
  0x3c   : > { %1300 = vmatprep.mubr.bf16.mxu0 %v5484_v63  ;;  %v989_v12 = vsel %vm947_vm1, %v898_v62, %v5412_v29  ;;  %v993_v15 = vsel %vm947_vm1, %v5343_v41, %v898_v62  ;;  %v988_v24 = vsel %vm947_vm1, %v897_v61, %v5416_v59  ;;  %v992_v25 = vsel %vm947_vm1, %v5365_v6, %v897_v61  ;;  %v4957_v41 = vld [vmem:[%s7172_s1 + $0x1e0] sm:$0xff]  }
  0x3d   : > { %v5520_v20 = vpack.c.bf16 %v989_v12, %v993_v15  ;;  %v635_v14 = vmax.f32 %v563_v21, 0.0  ;;  %4328 = vmatpush3.bf16.msra.mxu0 %v4946_v5  ;;  %v636_v9 = vmax.f32 %v564_v7, 0.0  ;;  %v640_v30 = vmax.f32 %v5501_v22, 0.0  ;;  %v4958_v62 = vld [vmem:[%s7172_s1 + $0x1a0] sm:$0xff]   ;;  %4391 = vmatprep.subr.bf16.mxu1 %v4957_v41 }
  0x3e   : > { %v5537_v6 = vadd.f32 %v5277_v51, %v473_v57  ;;  %4329 = vmatprep.subr.bf16.mxu0 %v4949_v38  ;;  %v478_v34 = vmul.f32 %v5268_v48, %v385_v43  ;;  %v482_v35 = vmul.f32 %v5268_v48, %v389_v58  ;;  %v388_v36 = vunpack.c.l.bf16 %v5464_v31  ;;  %v5556_v43 = vld [vmem:[%s5239_s10 + $0xd0] sm:$0xff] }
  0x3f   : > { %1589 = vmatprep.mubr.bf16.mxu1 %v5520_v20  ;;  %707 = vst [vmem:[#allocation2 + $0x100] sm:$0xff] %v635_v14  ;;  %v1020_v47 = vpack.c.bf16 %v988_v24, %v992_v25  ;;  %708 = vst [vmem:[#allocation2 + $0x108] sm:$0xff] %v636_v9  ;;  %v5549_v52 = vrot.slane %v640_v30, 7  ;;  %v392_v31 = vunpack.c.l.bf16 %v5531_v27  ;;  %1301 = vmatmul.mubr.bf16.gmra.mxu0 %v1112_v4  ;;  %v393_v24 = vunpack.c.h.bf16 %v5531_v27 }
  0x40   : > { %v639_v57 = vmax.f32 %v5537_v6, 0.0  ;;  %v838_v61 = vld [vmem:[#allocation2 + $0xc8] sm:$0xff]  ;;  %v837_v5 = vld [vmem:[#allocation2 + $0xc0] sm:$0xff]  ;;  %772 = vst.msk [vmem:[#allocation2 + $0x100] ss:$8 sm:$0x3] %vm5249_vm0, %v5070_v3  ;;  %v571_v38 = vadd.f32 %v5277_v51, %v477_v32  ;;  %v572_v21 = vadd.f32 %v5284_v54, %v478_v34  ;;  %v5568_v7 = vadd.f32 %v5284_v54, %v482_v35  ;;  %4392 = vmatpush3.bf16.msra.mxu1 %v4958_v62 }
  0x41   : > { %v481_v11 = vmul.f32 %v5265_v46, %v388_v36  ;;  %v906_v12 = vrot.slane %v838_v61, 7  ;;  %v5573_v4 = vpack.c.bf16 %v632_v1, %v838_v61  ;;  %v905_v15 = vrot.slane %v837_v5, 7  ;;  %4330 = vmatpush3.bf16.msra.mxu0 %v4950_v19  ;;  %v4959_v32 = vld [vmem:[%s7172_s1 + $0xc8] sm:$0xff]   ;;  %v5584_v1 = vld [vmem:[%s5239_s10 + $0xe0] sm:$0xff]  ;;  %v4963_v62 = vld [vmem:[%s7172_s1 + $0x1d0] sm:$0xff]   ;;  %4393 = vmatprep.subr.bf16.mxu1 %v4961_v16 }
  0x42   : > { %v1114_v58 = vpack.c.bf16 %v631_v0, %v837_v5  ;;  %v643_v25 = vmax.f32 %v571_v38, 0.0  ;;  %v644_v14 = vmax.f32 %v572_v21, 0.0  ;;  %v648_v9 = vmax.f32 %v5568_v7, 0.0  ;;  %4331 = vmatprep.subr.bf16.mxu0 %v4953_v44  ;;  %1590 = vmatmul.mubr.bf16.gmra.mxu1 %v1020_v47  ;;  %v4960_v34 = vld [vmem:[%s7172_s1 + $0x88] sm:$0xff]   ;;  %v4962_v47 = vld [vmem:[%s7172_s1 + $0x198] sm:$0xff]   ;;  %v4966_v16 = vld [vmem:[%s7172_s1 + $0x80] sm:$0xff]  }
  0x43   : > { %1308 = vmatprep.mubr.bf16.mxu0 %v5573_v4  ;;  %v981_v0 = vsel %vm947_vm1, %v906_v12, %v5477_v53  ;;  %v985_v19 = vsel %vm947_vm1, %v5412_v29, %v906_v12  ;;  %v980_v41 = vsel %vm947_vm1, %v905_v15, %v5525_v18  ;;  %v397_v27 = vunpack.c.h.bf16 %v5556_v43  ;;  %v5629_v21 = vld [vmem:[%s5239_s10 + $0x8] sm:$0xff] }
  0x44   : > { %v5600_v35 = vpack.c.bf16 %v981_v0, %v985_v19  ;;  %v984_v36 = vsel %vm947_vm1, %v5416_v59, %v905_v15  ;;  %v5607_v29 = vrot.slane %v639_v57, 7  ;;  %715 = vst [vmem:[#allocation2 + $0x140] sm:$0xff] %v643_v25  ;;  %716 = vst [vmem:[#allocation2 + $0x148] sm:$0xff] %v644_v14  ;;  %v5610_v44 = vadd.f32 %v5277_v51, %v481_v11 }
  0x45   : > { %775 = vst.msk [vmem:[#allocation2 + $0x140] ss:$8 sm:$0x3] %vm5249_vm0, %v5070_v3  ;;  %v5620_v59 = vrot.slane %v648_v9, 7  ;;  %4332 = vmatpush3.bf16.msra.mxu0 %v4954_v60  ;;  %v485_v61 = vmul.f32 %v5265_v46, %v392_v31  ;;  %v486_v5 = vmul.f32 %v5268_v48, %v393_v24  ;;  %v490_v38 = vmul.f32 %v5268_v48, %v397_v27  ;;  %v4965_v31 = vld [vmem:[%s7172_s1 + $0xc0] sm:$0xff]   ;;  %v4964_v27 = vld [vmem:[%s7172_s1 + $0x190] sm:$0xff]  }
  0x46   : > { %1597 = vmatprep.mubr.bf16.mxu1 %v5600_v35  ;;  %v1024_v3 = vpack.c.bf16 %v980_v41, %v984_v36  ;;  %v647_v11 = vmax.f32 %v5610_v44, 0.0  ;;  %v396_v12 = vunpack.c.l.bf16 %v5556_v43  ;;  %4333 = vmatprep.subr.bf16.mxu0 %v4959_v32  ;;  %v400_v60 = vunpack.c.l.bf16 %v5584_v1 }
  0x47   : > { %v846_v15 = vld [vmem:[#allocation2 + $0x108] sm:$0xff]  ;;  %v845_v24 = vld [vmem:[#allocation2 + $0x100] sm:$0xff]  ;;  %v579_v25 = vadd.f32 %v5277_v51, %v485_v61  ;;  %v580_v14 = vadd.f32 %v5284_v54, %v486_v5  ;;  %v5641_v0 = vadd.f32 %v5284_v54, %v490_v38  ;;  %v401_v43 = vunpack.c.h.bf16 %v5584_v1  ;;  %1309 = vmatmul.mubr.bf16.gmra.mxu0 %v1114_v58  ;;  %4394 = vmatpush3.bf16.msra.mxu1 %v4962_v47  ;;  %v310_v47 = vld [vmem:[%s5239_s10 + $0x18] sm:$0xff] }
  0x48   : > { %v914_v32 = vrot.slane %v846_v15, 7  ;;  %v5646_v19 = vpack.c.bf16 %v640_v30, %v846_v15  ;;  %v913_v41 = vrot.slane %v845_v24, 7  ;;  %v347_v36 = vunpack.c.h.bf16 %v5629_v21  ;;  %4395 = vmatprep.subr.bf16.mxu1 %v4963_v62  ;;  %v338_v38 = vld [vmem:[%s5239_s10 + $0xf8] sm:$0xff] }
  0x49   : > { %v1116_v58 = vpack.c.bf16 %v639_v57, %v845_v24  ;;  %v651_v1 = vmax.f32 %v579_v25, 0.0  ;;  %v652_v22 = vmax.f32 %v580_v14, 0.0  ;;  %v656_v30 = vmax.f32 %v5641_v0, 0.0  ;;  %4334 = vmatpush3.bf16.msra.mxu0 %v4960_v34  ;;  %v4967_v34 = vld [vmem:[%s7172_s1 + $0x1c8] sm:$0xff]   ;;  %v5679_v62 = vld [vmem:[%s7172_s1 + $0x238] sm:$0xff]  }
  0x4a   : > { %1316 = vmatprep.mubr.bf16.mxu0 %v5646_v19  ;;  %v973_v61 = vsel %vm947_vm1, %v914_v32, %v5549_v52  ;;  %v977_v5 = vsel %vm947_vm1, %v5477_v53, %v914_v32  ;;  %v972_v6 = vsel %vm947_vm1, %v913_v41, %v5607_v29  ;;  %v976_v57 = vsel %vm947_vm1, %v5525_v18, %v913_v41  ;;  %v5688_v32 = vld [vmem:[#allocation2 + $0x28] sm:$0xff] }
  0x4b   : > { %1598 = vmatmul.mubr.bf16.gmra.mxu1 %v1024_v3  ;;  %v5681_v53 = vpack.c.bf16 %v973_v61, %v977_v5  ;;  %v1028_v15 = vpack.c.bf16 %v972_v6, %v976_v57  ;;  %v5685_v24 = vrot.slane %v647_v11, 7  ;;  %723 = vst [vmem:[#allocation2 + $0x180] sm:$0xff] %v651_v1  ;;  %724 = vst [vmem:[#allocation2 + $0x188] sm:$0xff] %v652_v22  ;;  %4335 = vmatprep.subr.bf16.mxu0 %v4965_v31  ;;  %v5731_v57 = vld [vmem:[%s5239_s10 + $0x28] sm:$0xff] }
  0x4c   : > { %v489_v18 = vmul.f32 %v5265_v46, %v396_v12  ;;  %v854_v25 = vld [vmem:[#allocation2 + $0x148] sm:$0xff]  ;;  %v853_v14 = vld [vmem:[#allocation2 + $0x140] sm:$0xff]  ;;  %778 = vst.msk [vmem:[#allocation2 + $0x180] ss:$8 sm:$0x3] %vm5249_vm0, %v5688_v32  ;;  %v5695_v3 = vrot.slane %v656_v30, 7  ;;  %v493_v41 = vmul.f32 %v5265_v46, %v400_v60  ;;  %v494_v1 = vmul.f32 %v5268_v48, %v401_v43  ;;  %4396 = vmatpush3.bf16.msra.mxu1 %v4964_v27 }
  0x4d   : > { %v4968_v12 = vld [vmem:[%s7172_s1 + $0x188] sm:$0xff]   ;;  %v351_v31 = vunpack.c.h.bf16 %v310_v47  ;;  %1605 = vmatprep.mubr.bf16.mxu1 %v5681_v53  ;;  %v922_v22 = vrot.slane %v854_v25, 7  ;;  %v5705_v61 = vpack.c.bf16 %v648_v9, %v854_v25  ;;  %v921_v5 = vrot.slane %v853_v14, 7  ;;  %4336 = vmatpush3.bf16.msra.mxu0 %v4966_v16  ;;  %v4969_v46 = vld [vmem:[%s7172_s1 + $0x1c0] sm:$0xff]  }
  0x4e   : > { %v406_v60 = vunpack.c.l.bf16 %v338_v38  ;;  %v583_v43 = vadd.f32 %v5277_v51, %v489_v18  ;;  %v587_v27 = vadd.f32 %v5277_v51, %v493_v41  ;;  %v588_v47 = vadd.f32 %v5284_v54, %v494_v1  ;;  %4397 = vmatprep.subr.bf16.mxu1 %v4967_v34  ;;  %4721 = vmatprep.subr.bf16.mxu0 %v5679_v62  ;;  %v4970_v25 = vld [vmem:[%s7172_s1 + $0x180] sm:$0xff]   ;;  %v314_v41 = vld [vmem:[%s5239_s10 + $0x38] sm:$0xff] }
  0x4f   : > { %v407_v6 = vunpack.c.h.bf16 %v338_v38  ;;  %v965_v7 = vsel %vm947_vm1, %v922_v22, %v5620_v59  ;;  %v969_v9 = vsel %vm947_vm1, %v5549_v52, %v922_v22  ;;  %v5723_v16 = vsel %vm947_vm1, %v921_v5, %v5685_v24  ;;  %1317 = vmatmul.mubr.bf16.gmra.mxu0 %v1116_v58 }
  0x50   : > { %v5728_v51 = vsel %vm947_vm1, %v5607_v29, %v921_v5  ;;  %v5733_v34 = vpack.c.bf16 %v965_v7, %v969_v9  ;;  %v1118_v38 = vpack.c.bf16 %v647_v11, %v853_v14  ;;  %v655_v18 = vmax.f32 %v583_v43, 0.0  ;;  %4398 = vmatpush3.bf16.msra.mxu1 %v4968_v12  ;;  %1324 = vmatprep.mubr.bf16.mxu0 %v5705_v61 }
  0x51   : > { %v659_v52 = vmax.f32 %v587_v27, 0.0  ;;  %v660_v29 = vmax.f32 %v588_v47, 0.0  ;;  %4399 = vmatprep.subr.bf16.mxu1 %v4969_v46  ;;  %v440_v58 = vmul.f32 %v5274_v50, %v347_v36  ;;  %v444_v1 = vmul.f32 %v5274_v50, %v351_v31  ;;  %v342_v47 = vld [vmem:[%s5239_s10 + $0x118] sm:$0xf] }
  0x52   : > { %v499_v44 = vmul.f32 %v5270_v49, %v406_v60  ;;  %v1032_v11 = vpack.c.bf16 %v5723_v16, %v5728_v51  ;;  %v5749_v14 = vrot.slane %v655_v18, 7  ;;  %v500_v12 = vmul.f32 %v5274_v50, %v407_v6 }
  0x53   : > { %731 = vst [vmem:[#allocation2 + $0x1c0] sm:$0xff] %v659_v52  ;;  %v354_v22 = vunpack.c.l.bf16 %v5731_v57  ;;  %1606 = vmatmul.mubr.bf16.gmra.mxu1 %v1028_v15  ;;  %v862_v5 = vld [vmem:[#allocation2 + $0x188] sm:$0xff]  ;;  %v861_v21 = vld [vmem:[#allocation2 + $0x180] sm:$0xff]  ;;  %732 = vst [vmem:[#allocation2 + $0x1c8] sm:$0xff] %v660_v29  ;;  %v534_v36 = vadd.f32 %v5405_v56, %v440_v58  ;;  %v538_v31 = vadd.f32 %v5405_v56, %v444_v1  ;;  %v358_v60 = vunpack.c.l.bf16 %v314_v41 }
  0x54   : > { %v593_v46 = vadd.f32 %v5287_v55, %v499_v44  ;;  %1613 = vmatprep.mubr.bf16.mxu1 %v5733_v34  ;;  %v930_v43 = vrot.slane %v862_v5, 7  ;;  %v5759_v27 = vpack.c.bf16 %v656_v30, %v862_v5  ;;  %v929_v15 = vrot.slane %v861_v21, 7  ;;  %781 = vst.msk [vmem:[#allocation2 + $0x1c0] ss:$8 sm:$0x3] %vm5249_vm0, %v5688_v32  ;;  %4400 = vmatpush3.bf16.msra.mxu1 %v4970_v25  ;;  %v5767_v52 = vld [vmem:[%s5239_s10 + $0x48] sm:$0xff] }
  0x55   : > { %v359_v6 = vunpack.c.h.bf16 %v314_v41  ;;  %v594_v7 = vadd.f32 %v5405_v56, %v500_v12  ;;  %v606_v9 = vmax.f32 %v534_v36, 0.0  ;;  %v610_v16 = vmax.f32 %v538_v31, 0.0  ;;  %v318_v29 = vld [vmem:[%s5239_s10 + $0x58] sm:$0xff] }
  0x56   : > { %v665_v51 = vmax.f32 %v593_v46, 0.0  ;;  %v957_v0 = vsel %vm947_vm1, %v930_v43, %v5695_v3  ;;  %v961_v30 = vsel %vm947_vm1, %v5620_v59, %v930_v43  ;;  %v5778_v25 = vsel %vm947_vm1, %v929_v15, %v5749_v14 }
  0x57   : > { %v5783_v41 = vsel %vm947_vm1, %v5685_v24, %v929_v15  ;;  %v5786_v58 = vpack.c.bf16 %v957_v0, %v961_v30  ;;  %v1120_v1 = vpack.c.bf16 %v655_v18, %v861_v21  ;;  %v666_v12 = vmax.f32 %v594_v7, 0.0  ;;  %682 = vst [vmem:[#allocation2 + $0x38] sm:$0xff] %v610_v16  ;;  %1325 = vmatmul.mubr.bf16.gmra.mxu0 %v1118_v38 }
  0x58   : > { %v1036_v44 = vpack.c.bf16 %v5778_v25, %v5783_v41  ;;  %737 = vst [vmem:[#allocation2 + $0x1f0] sm:$0xff] %v665_v51  ;;  %787 = vst.msk [vmem:[#allocation2 + $0x30] ss:$8 sm:$0x3] %vm5249_vm0, %v5688_v32  ;;  %v414_v59 = vunpack.c.l.bf16 %v342_v47  ;;  %v447_v5 = vmul.f32 %v5270_v49, %v354_v22  ;;  %v451_v24 = vmul.f32 %v5270_v49, %v358_v60 }
  0x59   : > { %v452_v36 = vmul.f32 %v5274_v50, %v359_v6  ;;  %1332 = vmatprep.mubr.bf16.mxu0 %v5759_v27  ;;  %738 = vst [vmem:[#allocation2 + $0x1f8] sm:$0xff] %v666_v12  ;;  %v355_v18 = vunpack.c.h.bf16 %v5731_v57  ;;  %v362_v21 = vunpack.c.l.bf16 %v5767_v52  ;;  %v366_v31 = vunpack.c.l.bf16 %v318_v29 }
  0x5a   : > { %v367_v38 = vunpack.c.h.bf16 %v318_v29  ;;  %808 = vst.msk [vmem:[#allocation2 + $0x1f0] ss:$8 sm:$0x3] %vm5249_vm0, %v5688_v32  ;;  %v507_v46 = vmul.f32 %v5270_v49, %v414_v59  ;;  %v541_v22 = vadd.f32 %v5287_v55, %v447_v5  ;;  %v545_v60 = vadd.f32 %v5287_v55, %v451_v24  ;;  %v5817_v5 = vld [vmem:[%s5239_s10 + $0x68] sm:$0xff] }
  0x5b   : > { %v546_v43 = vadd.f32 %v5405_v56, %v452_v36  ;;  %1614 = vmatmul.mubr.bf16.gmra.mxu1 %v1032_v11  ;;  %v870_v15 = vld [vmem:[#allocation2 + $0x1c8] sm:$0xff]  ;;  %v869_v57 = vld [vmem:[#allocation2 + $0x1c0] sm:$0xff]  ;;  %v884_v47 = vrot.slane %v606_v9, 7  ;;  %v448_v6 = vmul.f32 %v5274_v50, %v355_v18  ;;  %v455_v7 = vmul.f32 %v5270_v49, %v362_v21 }
  0x5c   : > { %v459_v16 = vmul.f32 %v5270_v49, %v366_v31  ;;  %1621 = vmatprep.mubr.bf16.mxu1 %v5786_v58  ;;  %v938_v51 = vrot.slane %v870_v15, 7  ;;  %v5812_v0 = vpack.c.bf16 %v664_v23, %v870_v15  ;;  %v937_v30 = vrot.slane %v869_v57, 7 }
  0x5d   : > { %v460_v11 = vmul.f32 %v5274_v50, %v367_v38  ;;  %v601_v29 = vadd.f32 %v5287_v55, %v507_v46  ;;  %v613_v12 = vmax.f32 %v541_v22, 0.0  ;;  %v617_v9 = vmax.f32 %v545_v60, 0.0 }
  0x5e   : > { %v618_v59 = vmax.f32 %v546_v43, 0.0  ;;  %v949_v24 = vsel %vm947_vm1, %v938_v51, %v5335_v33  ;;  %v953_v13 = vsel %vm947_vm1, %v5695_v3, %v938_v51  ;;  %v5828_v23 = vsel %vm947_vm1, %v937_v30, %v5328_v28 }
  0x5f   : > { %v5833_v36 = vsel %vm947_vm1, %v5749_v14, %v937_v30  ;;  %v5835_v18 = vpack.c.bf16 %v949_v24, %v953_v13  ;;  %v1122_v21 = vpack.c.bf16 %v663_v17, %v869_v57  ;;  %v820_v38 = vld [vmem:[#allocation2 + $0x38] sm:$0xff]  ;;  %v819_v3 = vld [vmem:[#allocation2 + $0x30] sm:$0xff]  ;;  %v673_v46 = vmax.f32 %v601_v29, 0.0  ;;  %689 = vst [vmem:[#allocation2 + $0x70] sm:$0xff] %v617_v9  ;;  %1333 = vmatmul.mubr.bf16.gmra.mxu0 %v1120_v1 }
  0x60   : > { %v1040_v31 = vpack.c.bf16 %v5828_v23, %v5833_v36  ;;  %690 = vst [vmem:[#allocation2 + $0x78] sm:$0xff] %v618_v59  ;;  %v888_v28 = vrot.slane %v820_v38, 7  ;;  %v887_v22 = vrot.slane %v819_v3, 7  ;;  %v542_v14 = vadd.f32 %v5405_v56, %v448_v6  ;;  %1340 = vmatprep.mubr.bf16.mxu0 %v5812_v0  ;;  %v322_v57 = vld [vmem:[%s5239_s10 + $0x78] sm:$0xff] }
  0x61   : > { %790 = vst.msk [vmem:[#allocation2 + $0x70] ss:$8 sm:$0x3] %vm5249_vm0, %v5688_v32  ;;  %v549_v10 = vadd.f32 %v5287_v55, %v455_v7  ;;  %v5847_v17 = vld [vmem:[#allocation2 + $0x1f8] sm:$0xff]  ;;  %v875_v60 = vld [vmem:[#allocation2 + $0x1f0] sm:$0xff]  ;;  %745 = vst [vmem:[#allocation2 + $0x230] sm:$0xff] %v673_v46  ;;  %v553_v43 = vadd.f32 %v5287_v55, %v459_v16  ;;  %v554_v1 = vadd.f32 %v5405_v56, %v460_v11  ;;  %v363_v15 = vunpack.c.h.bf16 %v5767_v52 }
  0x62   : > { %v370_v51 = vunpack.c.l.bf16 %v5817_v5  ;;  %v944_v6 = vrot.slane %v5847_v17, 7  ;;  %v1007_v7 = vsel %vm947_vm1, %v884_v47, %v888_v28  ;;  %v5857_v30 = vrot.slane %v875_v60, 7  ;;  %811 = vst.msk [vmem:[#allocation2 + $0x230] ss:$8 sm:$0x3] %vm5249_vm0, %v5688_v32  ;;  %v326_v3 = vld [vmem:[%s5239_s10 + $0x98] sm:$0xff] }
  0x63   : > { %v5862_v29 = vsel %vm947_vm1, %v5254_v40, %v887_v22  ;;  %1622 = vmatmul.mubr.bf16.gmra.mxu1 %v1036_v44  ;;  %v891_v52 = vrot.slane %v613_v12, 7  ;;  %v614_v16 = vmax.f32 %v542_v14, 0.0  ;;  %v621_v11 = vmax.f32 %v549_v10, 0.0  ;;  %v5883_v44 = vld [vmem:[%s5239_s10 + $0x88] sm:$0xff] }
  0x64   : > { %v625_v9 = vmax.f32 %v553_v43, 0.0  ;;  %1629 = vmatprep.mubr.bf16.mxu1 %v5835_v18  ;;  %v1011_v59 = vsel %vm947_vm1, %v944_v6, %v884_v47  ;;  %v5879_v24 = vsel %vm947_vm1, %v5857_v30, %v5254_v40  ;;  %v626_v25 = vmax.f32 %v554_v1, 0.0 }
  0x65   : > { %v456_v41 = vmul.f32 %v5274_v50, %v363_v15  ;;  %v5885_v12 = vpack.c.bf16 %v1007_v7, %v1011_v59  ;;  %v1014_v13 = vpack.c.bf16 %v5862_v29, %v5879_v24  ;;  %v892_v38 = vrot.slane %v614_v16, 7 }
  0x66   : > { %v5891_v47 = vsel %vm947_vm1, %v887_v22, %v891_v52  ;;  %697 = vst [vmem:[#allocation2 + $0xb0] sm:$0xff] %v625_v9  ;;  %698 = vst [vmem:[#allocation2 + $0xb8] sm:$0xff] %v626_v25  ;;  %v374_v46 = vunpack.c.l.bf16 %v322_v57  ;;  %v375_v14 = vunpack.c.h.bf16 %v322_v57  ;;  %v463_v10 = vmul.f32 %v5270_v49, %v370_v51 }
  0x67   : > { %7195 = vst [vmem:[#allocation5_spill] sm:$0xff] %v5885_v12  ;;  %v550_v40 = vadd.f32 %v5405_v56, %v456_v41  ;;  %v1003_v1 = vsel %vm947_vm1, %v888_v28, %v892_v38  ;;  %793 = vst.msk [vmem:[#allocation2 + $0xb0] ss:$8 sm:$0x3] %vm5249_vm0, %v5688_v32  ;;  %v899_v22 = vrot.slane %v621_v11, 7  ;;  %v371_v15 = vunpack.c.h.bf16 %v5817_v5  ;;  %1341 = vmatmul.mubr.bf16.gmra.mxu0 %v1122_v21 }
  0x68   : > { %v827_v60 = vld [vmem:[#allocation2 + $0x70] sm:$0xff]  ;;  %v828_v43 = vld [vmem:[#allocation2 + $0x78] sm:$0xff]  ;;  %v378_v7 = vunpack.c.l.bf16 %v5883_v44  ;;  %v467_v51 = vmul.f32 %v5270_v49, %v374_v46  ;;  %1670 = vmatprep.mubr.bf16.mxu0 %v5885_v12  ;;  %v468_v28 = vmul.f32 %v5274_v50, %v375_v14  ;;  %v557_v59 = vadd.f32 %v5287_v55, %v463_v10 }
  0x69   : > { %v895_v29 = vrot.slane %v827_v60, 7  ;;  %v896_v16 = vrot.slane %v828_v43, 7  ;;  %v622_v57 = vmax.f32 %v550_v40, 0.0  ;;  %v5905_v9 = vld [vmem:[#allocation2 + $0x230] sm:$0xff]  ;;  %v464_v11 = vmul.f32 %v5274_v50, %v371_v15 }
  0x6a   : > { %v382_v24 = vunpack.c.l.bf16 %v326_v3  ;;  %v7180_v21 = vrot.slane %v5905_v9, 7  ;;  %v383_v41 = vunpack.c.h.bf16 %v326_v3  ;;  %v561_v10 = vadd.f32 %v5287_v55, %v467_v51 }
  0x6b   : > { %v5912_v5 = vsel %vm947_vm1, %v891_v52, %v895_v29  ;;  %v999_v25 = vsel %vm947_vm1, %v892_v38, %v896_v16  ;;  %1630 = vmatmul.mubr.bf16.gmra.mxu1 %v1040_v31  ;;  %v994_v46 = vsel %vm947_vm1, %v895_v29, %v899_v22  ;;  %v900_v14 = vrot.slane %v622_v57, 7  ;;  %v4972_v38 = vld [vmem:[%s7172_s1 + $0x230] sm:$0xff]   ;;  %v328_v29 = vld [vmem:[%s5239_s10 + $0xa8] sm:$0xff] }
  0x6c   : > { %v5920_v40 = vpack.c.bf16 %v999_v25, %v1003_v1  ;;  %v1744_v60 = vsel %vm947_vm1, %v7180_v21, %v891_v52  ;;  %v562_v23 = vadd.f32 %v5405_v56, %v468_v28  ;;  %v629_v36 = vmax.f32 %v557_v59, 0.0  ;;  %v330_v59 = vld [vmem:[%s5239_s10 + $0xb8] sm:$0xff] }
  0x6d   : > { %v558_v31 = vadd.f32 %v5405_v56, %v464_v11  ;;  %v1746_v3 = vpack.c.bf16 %v5912_v5, %v1744_v60  ;;  %v995_v43 = vsel %vm947_vm1, %v896_v16, %v900_v14  ;;  %v633_v1 = vmax.f32 %v561_v10, 0.0 }
  0x6e   : > { %7196 = vst [vmem:[#allocation6_spill] sm:$0xff] %v5920_v40  ;;  %v471_v15 = vmul.f32 %v5270_v49, %v378_v7  ;;  %v835_v52 = vld [vmem:[#allocation2 + $0xb0] sm:$0xff]  ;;  %v836_v57 = vld [vmem:[#allocation2 + $0xb8] sm:$0xff]  ;;  %v634_v51 = vmax.f32 %v562_v23, 0.0  ;;  %v5939_v25 = vrot.slane %v629_v36, 7  ;;  %v475_v28 = vmul.f32 %v5270_v49, %v382_v24  ;;  %v4973_v7 = vld [vmem:[%s7172_s1 + $0x228] sm:$0xff]  }
  0x6f   : > { %v630_v21 = vmax.f32 %v558_v31, 0.0  ;;  %1909 = vmatprep.mubr.bf16.mxu1 %v1746_v3  ;;  %v903_v11 = vrot.slane %v835_v52, 7  ;;  %v904_v60 = vrot.slane %v836_v57, 7  ;;  %705 = vst [vmem:[#allocation2 + $0xf0] sm:$0xff] %v633_v1  ;;  %v476_v16 = vmul.f32 %v5274_v50, %v383_v41  ;;  %1671 = vmatmul.mubr.bf16.vlgmr.msra.gmra.mxu0 %v1014_v13  ;;  %v5953_v3 = vld [vmem:[%s5239_s10 + $0xc8] sm:$0xff]  ;;  %v334_v1 = vld [vmem:[%s5239_s10 + $0xd8] sm:$0xff] }
  0x70   : > { %v565_v10 = vadd.f32 %v5287_v55, %v471_v15  ;;  %706 = vst [vmem:[#allocation2 + $0xf8] sm:$0xff] %v634_v51  ;;  %v569_v24 = vadd.f32 %v5287_v55, %v475_v28  ;;  %v379_v36 = vunpack.c.h.bf16 %v5883_v44  ;;  %v386_v31 = vunpack.c.l.bf16 %v328_v29  ;;  %4722 = vmatpush3.bf16.msra.mxu0 %v5679_v62  ;;  %1678 = vmatprep.mubr.bf16.mxu0 %v5920_v40 }
  0x71   : > { %v5948_v23 = vrot.slane %v630_v21, 7  ;;  %v1018_v13 = vpack.c.bf16 %v5912_v5, %v5891_v47  ;;  %v990_v41 = vsel %vm947_vm1, %v899_v22, %v903_v11  ;;  %v991_v21 = vsel %vm947_vm1, %v900_v14, %v904_v60  ;;  %796 = vst.msk [vmem:[#allocation2 + $0xf0] ss:$8 sm:$0x3] %vm5249_vm0, %v5688_v32  ;;  %4723 = vmatprep.subr.bf16.mxu0 %v4972_v38 }
  0x72   : > { %v637_v44 = vmax.f32 %v565_v10, 0.0  ;;  %v5967_v15 = vpack.c.bf16 %v990_v41, %v994_v46  ;;  %v5969_v62 = vpack.c.bf16 %v991_v21, %v995_v43  ;;  %v986_v47 = vsel %vm947_vm1, %v903_v11, %v5939_v25  ;;  %v4974_v43 = vld [vmem:[%s7172_s1 + $0x220] sm:$0xff]  }
  0x73   : > { %v570_v22 = vadd.f32 %v5405_v56, %v476_v16  ;;  %1910 = vmatmul.mubr.bf16.vlgmr.msra.gmra.mxu1 %v1745_v8  ;;  %v987_v5 = vsel %vm947_vm1, %v904_v60, %v5948_v23  ;;  %v641_v14 = vmax.f32 %v569_v24, 0.0  ;;  %v472_v46 = vmul.f32 %v5274_v50, %v379_v36 }
  0x74   : > { %7197 = vst [vmem:[#allocation7_spill] sm:$0xff] %v5969_v62  ;;  %v390_v52 = vunpack.c.l.bf16 %v330_v59  ;;  %1917 = vmatprep.mubr.bf16.mxu1 %v5967_v15  ;;  %v391_v51 = vunpack.c.h.bf16 %v330_v59  ;;  %v479_v28 = vmul.f32 %v5270_v49, %v386_v31  ;;  %v387_v37 = vunpack.c.h.bf16 %v328_v29  ;;  %4724 = vmatpush3.bf16.msra.mxu0 %v4972_v38 }
  0x75   : > { %v642_v57 = vmax.f32 %v570_v22, 0.0  ;;  %713 = vst [vmem:[#allocation2 + $0x130] sm:$0xff] %v641_v14  ;;  %v566_v2 = vadd.f32 %v5405_v56, %v472_v46  ;;  %v394_v11 = vunpack.c.l.bf16 %v5953_v3  ;;  %v398_v60 = vunpack.c.l.bf16 %v334_v1  ;;  %4725 = vmatprep.subr.bf16.mxu0 %v4973_v7 }
  0x76   : > { %v483_v8 = vmul.f32 %v5270_v49, %v390_v52  ;;  %v484_v16 = vmul.f32 %v5274_v50, %v391_v51  ;;  %v573_v10 = vadd.f32 %v5287_v55, %v479_v28  ;;  %v480_v59 = vmul.f32 %v5274_v50, %v387_v37  ;;  %v340_v28 = vld [vmem:[%s5239_s10 + $0x108] sm:$0xf] }
  0x77   : > { %714 = vst [vmem:[#allocation2 + $0x138] sm:$0xff] %v642_v57  ;;  %v399_v24 = vunpack.c.h.bf16 %v334_v1  ;;  %v5996_v38 = vrot.slane %v637_v44, 7  ;;  %v638_v29 = vmax.f32 %v566_v2, 0.0  ;;  %v487_v31 = vmul.f32 %v5270_v49, %v394_v11  ;;  %1679 = vmatmul.mubr.bf16.gmra.mxu0 %v1018_v13  ;;  %v4975_v13 = vld [vmem:[%s7172_s1 + $0x218] sm:$0xff]  }
  0x78   : > { %799 = vst.msk [vmem:[#allocation2 + $0x130] ss:$8 sm:$0x3] %vm5249_vm0, %v5688_v32  ;;  %v577_v36 = vadd.f32 %v5287_v55, %v483_v8  ;;  %v843_v41 = vld [vmem:[#allocation2 + $0xf0] sm:$0xff]  ;;  %v6000_v21 = vld [vmem:[#allocation2 + $0xf8] sm:$0xff]  ;;  %v578_v22 = vadd.f32 %v5405_v56, %v484_v16  ;;  %v645_v14 = vmax.f32 %v573_v10, 0.0  ;;  %v6004_v1 = vadd.f32 %v5405_v56, %v480_v59  ;;  %1686 = vmatprep.mubr.bf16.mxu0 %v5969_v62 }
  0x79   : > { %v491_v44 = vmul.f32 %v5270_v49, %v398_v60  ;;  %v911_v46 = vrot.slane %v843_v41, 7  ;;  %4726 = vmatpush3.bf16.msra.mxu0 %v4973_v7  ;;  %v912_v52 = vrot.slane %v6000_v21, 7  ;;  %v492_v51 = vmul.f32 %v5274_v50, %v399_v24  ;;  %v336_v7 = vld [vmem:[%s5239_s10 + $0xe8] sm:$0xff] }
  0x7a   : > { %v649_v57 = vmax.f32 %v577_v36, 0.0  ;;  %4727 = vmatprep.subr.bf16.mxu0 %v4974_v43  ;;  %v916_v37 = vrot.slane %v638_v29, 7  ;;  %v650_v2 = vmax.f32 %v578_v22, 0.0  ;;  %v646_v8 = vmax.f32 %v6004_v1, 0.0  ;;  %v339_v36 = vld [vmem:[%s5239_s10 + $0x100] sm:$0xff] }
  0x7b   : > { %v6016_v11 = vadd.f32 %v5287_v55, %v487_v31  ;;  %1918 = vmatmul.mubr.bf16.gmra.mxu1 %v5520_v20  ;;  %v982_v60 = vsel %vm947_vm1, %v5939_v25, %v911_v46  ;;  %v983_v16 = vsel %vm947_vm1, %v5948_v23, %v912_v52  ;;  %v923_v24 = vrot.slane %v645_v14, 7  ;;  %v4976_v20 = vld [vmem:[%s7172_s1 + $0x210] sm:$0xff]  }
  0x7c   : > { %721 = vst [vmem:[#allocation2 + $0x170] sm:$0xff] %v649_v57  ;;  %v6026_v10 = vpack.c.bf16 %v982_v60, %v986_v47  ;;  %v6028_v59 = vpack.c.bf16 %v983_v16, %v987_v5  ;;  %722 = vst [vmem:[#allocation2 + $0x178] sm:$0xff] %v650_v2  ;;  %v585_v29 = vadd.f32 %v5287_v55, %v491_v44  ;;  %v395_v47 = vunpack.c.h.bf16 %v5953_v3  ;;  %v4977_v2 = vld [vmem:[%s7172_s1 + $0x208] sm:$0xff]  }
  0x7d   : > { %4728 = vmatpush3.bf16.msra.mxu0 %v4974_v43  ;;  %802 = vst.msk [vmem:[#allocation2 + $0x170] ss:$8 sm:$0x3] %vm5249_vm0, %v5688_v32  ;;  %v586_v25 = vadd.f32 %v5405_v56, %v492_v51  ;;  %v653_v23 = vmax.f32 %v6016_v11, 0.0  ;;  %v402_v5 = vunpack.c.l.bf16 %v336_v7  ;;  %v978_v43 = vsel %vm947_vm1, %v911_v46, %v5996_v38 }
  0x7e   : > { %7198 = vst [vmem:[#allocation8_spill] sm:$0xff] %v6028_v59  ;;  %1925 = vmatprep.mubr.bf16.mxu1 %v6026_v10  ;;  %4729 = vmatprep.subr.bf16.mxu0 %v4975_v13  ;;  %v657_v21 = vmax.f32 %v585_v29, 0.0  ;;  %v403_v22 = vunpack.c.h.bf16 %v336_v7  ;;  %v410_v14 = vunpack.c.l.bf16 %v340_v28  ;;  %v409_v51 = vunpack.c.h.bf16 %v339_v36 }
  0x7f   : > { %v851_v31 = vld [vmem:[#allocation2 + $0x130] sm:$0xff]  ;;  %v852_v41 = vld [vmem:[#allocation2 + $0x138] sm:$0xff]  ;;  %v658_v57 = vmax.f32 %v586_v25, 0.0  ;;  %1687 = vmatmul.mubr.bf16.gmra.mxu0 %v5967_v15  ;;  %v488_v3 = vmul.f32 %v5274_v50, %v395_v47  ;;  %v495_v46 = vmul.f32 %v5270_v49, %v402_v5  ;;  %v979_v16 = vsel %vm947_vm1, %v912_v52, %v916_v37 }
  0x80   : > { %v919_v1 = vrot.slane %v851_v31, 7  ;;  %v920_v44 = vrot.slane %v852_v41, 7  ;;  %729 = vst [vmem:[#allocation2 + $0x1b0] sm:$0xff] %v657_v21  ;;  %v496_v11 = vmul.f32 %v5274_v50, %v403_v22  ;;  %v503_v7 = vmul.f32 %v5270_v49, %v410_v14  ;;  %1694 = vmatprep.mubr.bf16.mxu0 %v6028_v59 }
  0x81   : > { %4730 = vmatpush3.bf16.msra.mxu0 %v4975_v13  ;;  %730 = vst [vmem:[#allocation2 + $0x1b8] sm:$0xff] %v658_v57  ;;  %v582_v49 = vadd.f32 %v5405_v56, %v488_v3  ;;  %v589_v50 = vadd.f32 %v5287_v55, %v495_v46  ;;  %v502_v29 = vmul.f32 %v5268_v48, %v409_v51  ;;  %v924_v25 = vrot.slane %v646_v8, 7 }
  0x82   : > { %v974_v28 = vsel %vm947_vm1, %v5996_v38, %v919_v1  ;;  %v975_v60 = vsel %vm947_vm1, %v916_v37, %v920_v44  ;;  %4731 = vmatprep.subr.bf16.mxu0 %v4976_v20  ;;  %805 = vst.msk [vmem:[#allocation2 + $0x1b0] ss:$8 sm:$0x3] %vm5249_vm0, %v5688_v32  ;;  %v590_v38 = vadd.f32 %v5405_v56, %v496_v11  ;;  %v931_v22 = vrot.slane %v653_v23, 7 }
  0x83   : > { %v1030_v15 = vpack.c.bf16 %v974_v28, %v978_v43  ;;  %1926 = vmatmul.mubr.bf16.gmra.mxu1 %v5600_v35  ;;  %v597_v13 = vadd.f32 %v5287_v55, %v503_v7  ;;  %v970_v52 = vsel %vm947_vm1, %v919_v1, %v923_v24  ;;  %v654_v47 = vmax.f32 %v582_v49, 0.0  ;;  %v4978_v55 = vld [vmem:[%s7172_s1 + $0x200] sm:$0xff]  }
  0x84   : > { %v859_v36 = vld [vmem:[#allocation2 + $0x170] sm:$0xff]  ;;  %v860_v37 = vld [vmem:[#allocation2 + $0x178] sm:$0xff]  ;;  %v6072_v5 = vpack.c.bf16 %v975_v60, %v979_v16  ;;  %v661_v35 = vmax.f32 %v589_v50, 0.0  ;;  %v662_v43 = vmax.f32 %v590_v38, 0.0  ;;  %v596_v41 = vadd.f32 %v5284_v54, %v502_v29 }
  0x85   : > { %1933 = vmatprep.mubr.bf16.mxu1 %v1030_v15  ;;  %v927_v31 = vrot.slane %v859_v36, 7  ;;  %4732 = vmatpush3.bf16.msra.mxu0 %v4976_v20  ;;  %v928_v56 = vrot.slane %v860_v37, 7  ;;  %v669_v48 = vmax.f32 %v597_v13, 0.0  ;;  %v932_v14 = vrot.slane %v654_v47, 7 }
  0x86   : > { %7199 = vst [vmem:[#allocation9_spill] sm:$0xff] %v6072_v5  ;;  %4733 = vmatprep.subr.bf16.mxu0 %v4977_v2  ;;  %v939_v57 = vrot.slane %v661_v35, 7  ;;  %v668_v51 = vmax.f32 %v596_v41, 0.0  ;;  %v971_v54 = vsel %vm947_vm1, %v920_v44, %v924_v25  ;;  %v7203_v38 = vrot.slane %v5905_v9, 7 }
  0x87   : > { %v966_v21 = vsel %vm947_vm1, %v923_v24, %v927_v31  ;;  %1695 = vmatmul.mubr.bf16.gmra.mxu0 %v6026_v10  ;;  %v967_v3 = vsel %vm947_vm1, %v924_v25, %v928_v56  ;;  %v963_v39 = vsel %vm947_vm1, %v928_v56, %v932_v14  ;;  %v1736_v11 = vrot.slane %v669_v48, 7 }
  0x88   : > { %v1034_v8 = vpack.c.bf16 %v966_v21, %v970_v52  ;;  %1702 = vmatprep.mubr.bf16.mxu0 %v6072_v5  ;;  %740 = vst [vmem:[#allocation2 + $0x208] sm:$0xff] %v668_v51  ;;  %v6090_v10 = vpack.c.bf16 %v967_v3, %v971_v54  ;;  %v950_v28 = vsel %vm947_vm1, %v939_v57, %v5857_v30 }
  0x89   : > { %v867_v20 = vld [vmem:[#allocation2 + $0x1b0] sm:$0xff]  ;;  %v868_v1 = vld [vmem:[#allocation2 + $0x1b8] sm:$0xff]  ;;  %4734 = vmatpush3.bf16.msra.mxu0 %v4977_v2  ;;  %784 = vst.msk [vmem:[#allocation2 + $0x200] ss:$8 sm:$0x3] %vm5249_vm0, %v5688_v32  ;;  %v962_v2 = vsel %vm947_vm1, %v927_v31, %v931_v22  ;;  %v940_v32 = vrot.slane %v662_v43, 7  ;;  %v1740_v13 = vsel %vm947_vm1, %v1736_v11, %v7203_v38  ;;  %v1742_v17 = vsel %vm947_vm1, %v5857_v30, %v1736_v11 }
  0x8a   : > { %v935_v46 = vrot.slane %v867_v20, 7  ;;  %v936_v24 = vrot.slane %v868_v1, 7  ;;  %4735 = vmatprep.subr.bf16.mxu0 %v4978_v55  ;;  %7200 = vst [vmem:[#allocation10_spill] sm:$0xff] %v6090_v10  ;;  %v4986_v31 = vld [vmem:[%s7173_s2 + $0x170] sm:$0xff]  }
  0x8b   : > { %1934 = vmatmul.mubr.bf16.gmra.mxu1 %v5681_v53 }
  0x8c   : > { %1941 = vmatprep.mubr.bf16.mxu1 %v1034_v8  ;;  %v958_v23 = vsel %vm947_vm1, %v931_v22, %v935_v46  ;;  %v959_v53 = vsel %vm947_vm1, %v932_v14, %v936_v24  ;;  %v955_v16 = vsel %vm947_vm1, %v936_v24, %v940_v32  ;;  %v4990_v24 = vld [vmem:[%s7173_s2 + $0x160] sm:$0xff]  }
  0x8d   : > { %4736 = vmatpush3.bf16.msra.mxu0 %v4978_v55  ;;  %v1038_v44 = vpack.c.bf16 %v958_v23, %v962_v2  ;;  %v6102_v7 = vpack.c.bf16 %v959_v53, %v963_v39 }
  0x8f   : > { %1703 = vmatmul.mubr.bf16.gmra.mxu0 %v1030_v15  ;;  %7201 = vst [vmem:[#allocation11_spill] sm:$0xff] %v6102_v7  ;;  %v954_v15 = vsel %vm947_vm1, %v935_v46, %v939_v57  ;;  %v4984_v57 = vld [vmem:[%s7173_s2 + $0x128] sm:$0xff]  }
  0x90   : > { %1710 = vmatprep.mubr.bf16.mxu0 %v6090_v10  ;;  %v1042_v60 = vpack.c.bf16 %v950_v28, %v954_v15  ;;  %v877_v49 = vld [vmem:[#allocation2 + $0x208] sm:$0xff]  ;;  %v4991_v28 = vld [vmem:[%s7173_s2 + $0x158] sm:$0xff]  }
  0x91   : > { %v1735_v29 = vrot.slane %v877_v49, 7  ;;  %v4985_v46 = vld [vmem:[%s7173_s2 + $0xe8] sm:$0xff]  }
  0x93   : > { %1942 = vmatmul.mubr.bf16.gmra.mxu1 %v5733_v34  ;;  %v951_v34 = vsel %vm947_vm1, %v940_v32, %v944_v6  ;;  %v1748_v6 = vpack.c.bf16 %v1740_v13, %v1742_v17  ;;  %v1741_v9 = vsel %vm947_vm1, %v5335_v33, %v1735_v29  ;;  %v4979_v33 = vld [vmem:[%s7173_s2 + $0x138] sm:$0xff]  }
  0x94   : > { %1949 = vmatprep.mubr.bf16.mxu1 %v1038_v44  ;;  %v6117_v50 = vpack.c.bf16 %v951_v34, %v955_v16  ;;  %4465 = vmatprep.subr.bf16.mxu1 %v4979_v33 }
  0x96   : > { %7202 = vst [vmem:[#allocation12_spill] sm:$0xff] %v6117_v50 }
  0x97   : > { %1711 = vmatmul.mubr.bf16.gmra.mxu0 %v1034_v8  ;;  %v4987_v8 = vld [vmem:[%s7173_s2 + $0x168] sm:$0xff]  }
  0x98   : > { %1718 = vmatprep.mubr.bf16.mxu0 %v6102_v7 }
  0x9b   : > { %1950 = vmatmul.mubr.bf16.gmra.mxu1 %v5786_v58  ;;  %v1739_v58 = vsel %vm947_vm1, %v1735_v29, %v5345_v42  ;;  %v5060_v42 = vld [vmem:[#allocation2 + $0x228] sm:$0xff]  ;;  %v4994_v29 = vld [vmem:[%s7173_s2 + $0x150] sm:$0xff]  }
  0x9c   : > { %1957 = vmatprep.mubr.bf16.mxu1 %v1042_v60  ;;  %v1747_v36 = vpack.c.bf16 %v1739_v58, %v1741_v9 }
  0x9f   : > { %1719 = vmatmul.mubr.bf16.gmra.mxu0 %v1038_v44 }
  0xa0   : > { %1726 = vmatprep.mubr.bf16.mxu0 %v6117_v50 }
  0xa3   : > { %1958 = vmatmul.mubr.bf16.gmra.mxu1 %v5835_v18  ;;  %v1990_v18 = vpack.c.bf16 %v5060_v42, %v877_v49  ;;  %v4988_v49 = vld [vmem:[%s7173_s2 + $0x120] sm:$0xff]  }
  0xa4   : > { %1965 = vmatprep.mubr.bf16.mxu1 %v1748_v6  ;;  %v4989_v6 = vld [vmem:[%s7173_s2 + $0xe0] sm:$0xff]  }
  0xa7   : > { %1727 = vmatmul.mubr.bf16.gmra.mxu0 %v1042_v60 }
  0xa8   : > { %4737 = vmatprep.mubr.bf16.mxu0 %v5393_v45  ;;  %v4980_v45 = vld [vmem:[%s7173_s2 + $0xf8] sm:$0xff]  }
  0xa9   : > { %4466 = vmatpush3.bf16.msra.mxu1 %v4980_v45 }
  0xab   : > { %1966 = vmatmul.mubr.bf16.gmra.mxu1 %v1747_v36 }
  0xaf   : > { %4738 = vmatmul.mubr.bf16.vlgmr.msra.gmra.mxu0 %v5484_v63  ;;  %v4981_v63 = vld [vmem:[%s7173_s2 + $0x130] sm:$0xff]  }
  0xb0   : > { %4741 = vmatprep.mubr.bf16.mxu0 %v5573_v4  ;;  %v4982_v4 = vld [vmem:[%s7173_s2 + $0xf0] sm:$0xff]   ;;  %4467 = vmatprep.subr.bf16.mxu1 %v4981_v63  ;;  %v4995_v63 = vld [vmem:[%s7173_s2 + $0x148] sm:$0xff]  }
  0xb1   : > { %4468 = vmatpush3.bf16.msra.mxu1 %v4982_v4 }
  0xb2   : > { %4469 = vmatprep.subr.bf16.mxu1 %v4984_v57 }
  0xb5   : > { %4470 = vmatpush3.bf16.msra.mxu1 %v4985_v46 }
  0xb6   : > { %4471 = vmatprep.subr.bf16.mxu1 %v4988_v49 }
  0xb7   : > { %4742 = vmatmul.mubr.bf16.gmra.mxu0 %v5646_v19 }
  0xb8   : > { %4745 = vmatprep.mubr.bf16.mxu0 %v5705_v61 }
  0xb9   : > { %4472 = vmatpush3.bf16.msra.mxu1 %v4989_v6  ;;  %v5008_v6 = vld [vmem:[%s7173_s2 + $0xc0] sm:$0xff]  }
  0xbf   : > { %4746 = vmatmul.mubr.bf16.gmra.mxu0 %v5759_v27  ;;  %v4983_v27 = vld [vmem:[%s7173_s2 + $0x178] sm:$0xff]  }
  0xc0   : > { %4749 = vmatprep.mubr.bf16.mxu0 %v5812_v0  ;;  %4753 = vmatprep.subr.bf16.mxu0 %v4983_v27 }
  0xc1   : > { %4754 = vmatpush3.bf16.msra.mxu0 %v4983_v27 }
  0xc2   : > { %4755 = vmatprep.subr.bf16.mxu0 %v4986_v31 }
  0xc5   : > { %4756 = vmatpush3.bf16.msra.mxu0 %v4986_v31 }
  0xc6   : > { %4757 = vmatprep.subr.bf16.mxu0 %v4987_v8 }
  0xc7   : > { %4750 = vmatmul.mubr.bf16.gmra.mxu0 %v1990_v18 }
  0xc9   : > { %4758 = vmatpush3.bf16.msra.mxu0 %v4987_v8  ;;  %v4999_v8 = vld [vmem:[%s7173_s2 + $0x78] sm:$0xff]  }
  0xca   : > { %4759 = vmatprep.subr.bf16.mxu0 %v4990_v24 }
  0xcd   : > { %4760 = vmatpush3.bf16.msra.mxu0 %v4990_v24  ;;  %v4997_v24 = vld [vmem:[%s7173_s2 + $0xd0] sm:$0xff]  }
  0xce   : > { %4761 = vmatprep.subr.bf16.mxu0 %v4991_v28 }
  0xd1   : > { %4762 = vmatpush3.bf16.msra.mxu0 %v4991_v28 }
  0xd2   : > { %4763 = vmatprep.subr.bf16.mxu0 %v4994_v29 }
  0xd5   : > { %4764 = vmatpush3.bf16.msra.mxu0 %v4994_v29 }
  0xd6   : > { %4765 = vmatprep.subr.bf16.mxu0 %v4995_v63 }
  0xd9   : > { %4766 = vmatpush3.bf16.msra.mxu0 %v4995_v63 }
  0xef   : > { %v4209_v19 = vpop.f32.mrf.mxu0 }
  0xf1   : > { %v4210_v61 = vpop.f32.mrf.mxu0 }
  0xf2   : > { %v4273_v0 = vpop.f32.mrf.mxu1  ;;  %v4211_v30 = vadd.f32 %v4210_v61, %v4209_v19 }
  0xf3   : > { %v4212_v52 = vpop.f32.mrf.mxu0 }
  0xf4   : > { %v4274_v37 = vpop.f32.mrf.mxu1 }
  0xf5   : > { %v4275_v25 = vadd.f32 %v4274_v37, %v4273_v0  ;;  %v4213_v47 = vpop.f32.mrf.mxu0  ;;  %v4992_v0 = vld [vmem:[%s7173_s2 + $0x118] sm:$0xff]  }
  0xf6   : > { %v4276_v35 = vpop.f32.mrf.mxu1  ;;  %v4214_v55 = vadd.f32 %v4213_v47, %v4212_v52  ;;  %4473 = vmatprep.subr.bf16.mxu1 %v4992_v0  ;;  %v4998_v47 = vld [vmem:[%s7173_s2 + $0x140] sm:$0xff]  }
  0xf7   : > { %v6159_v43 = vadd.f32 %v4275_v25, %v4211_v30  ;;  %v4215_v56 = vpop.f32.mrf.mxu0  ;;  %v4993_v25 = vld [vmem:[%s7173_s2 + $0xd8] sm:$0xff]   ;;  %4767 = vmatprep.subr.bf16.mxu0 %v4998_v47 }
  0xf8   : > { %v4277_v48 = vpop.f32.mrf.mxu1  ;;  %4474 = vmatpush3.bf16.msra.mxu1 %v4993_v25  ;;  %4768 = vmatpush3.bf16.msra.mxu0 %v4998_v47 }
  0xf9   : > { %v4278_v41 = vadd.f32 %v4277_v48, %v4276_v35  ;;  %v4216_v21 = vpop.f32.mrf.mxu0  ;;  %4545 = vmatprep.subr.bf16.mxu0 %v4999_v8 }
  0xfa   : > { %v4279_v22 = vpop.f32.mrf.mxu1  ;;  %v4217_v14 = vadd.f32 %v4216_v21, %v4215_v56 }
  0xfb   : > { %v6164_v20 = vadd.f32 %v4278_v41, %v4214_v55  ;;  %v4218_v1 = vpop.f32.mrf.mxu0 }
  0xfc   : > { %v4280_v51 = vpop.f32.mrf.mxu1 }
  0xfd   : > { %v4281_v3 = vadd.f32 %v4280_v51, %v4279_v22  ;;  %v4219_v54 = vpop.f32.mrf.mxu0  ;;  %v4996_v51 = vld [vmem:[%s7173_s2 + $0x110] sm:$0xff]  }
  0xfe   : > { %v4282_v23 = vpop.f32.mrf.mxu1  ;;  %v4220_v44 = vadd.f32 %v4219_v54, %v4218_v1  ;;  %4475 = vmatprep.subr.bf16.mxu1 %v4996_v51 }
  0xff   : > { %v6175_v2 = vadd.f32 %v4281_v3, %v4217_v14  ;;  %v4221_v53 = vpop.f32.mrf.mxu0  ;;  %4476 = vmatpush3.bf16.msra.mxu1 %v4997_v24 }
 0x100   : > { %v4283_v39 = vpop.f32.mrf.mxu1 }
 0x101   : > { %v4284_v32 = vadd.f32 %v4283_v39, %v4282_v23  ;;  %v4222_v11 = vpop.f32.mrf.mxu0 }
 0x102   : > { %v4285_v15 = vpop.f32.mrf.mxu1  ;;  %v4223_v60 = vadd.f32 %v4222_v11, %v4221_v53  ;;  %v5002_v11 = vld [vmem:[%s7173_s2 + $0xc8] sm:$0xff]  }
 0x103   : > { %v6180_v34 = vadd.f32 %v4284_v32, %v4220_v44  ;;  %v4224_v16 = vpop.f32.mrf.mxu0  ;;  %v5001_v32 = vld [vmem:[%s7173_s2 + $0x108] sm:$0xff]  }
 0x104   : > { %v4286_v38 = vpop.f32.mrf.mxu1  ;;  %4477 = vmatprep.subr.bf16.mxu1 %v5001_v32 }
 0x105   : > { %v4287_v13 = vadd.f32 %v4286_v38, %v4285_v15  ;;  %v4225_v17 = vpop.f32.mrf.mxu0  ;;  %v5007_v38 = vld [vmem:[%s7173_s2 + $0x100] sm:$0xff]   ;;  %4478 = vmatpush3.bf16.msra.mxu1 %v5002_v11 }
 0x106   : > { %v4288_v58 = vpop.f32.mrf.mxu1  ;;  %v4226_v36 = vadd.f32 %v4225_v17, %v4224_v16  ;;  %4479 = vmatprep.subr.bf16.mxu1 %v5007_v38 }
 0x107   : > { %v6191_v9 = vadd.f32 %v4287_v13, %v4223_v60  ;;  %v4227_v42 = vpop.f32.mrf.mxu0 }
 0x108   : > { %v4289_v18 = vpop.f32.mrf.mxu1 }
 0x109   : > { %v4290_v33 = vadd.f32 %v4289_v18, %v4288_v58  ;;  %v4228_v45 = vpop.f32.mrf.mxu0  ;;  %4480 = vmatpush3.bf16.msra.mxu1 %v5008_v6 }
 0x10a   : > { %v4229_v19 = vadd.f32 %v4228_v45, %v4227_v42 }
 0x10b   : > { %v4291_v4 = vpop.f32.mrf.mxu1  ;;  %v6196_v61 = vadd.f32 %v4290_v33, %v4226_v36  ;;  %v4230_v27 = vpop.f32.mrf.mxu0 }
 0x10d   : > { %v4292_v30 = vpop.f32.mrf.mxu1  ;;  %v4231_v37 = vpop.f32.mrf.mxu0 }
 0x10e   : > { %v4293_v52 = vadd.f32 %v4292_v30, %v4291_v4  ;;  %v4232_v55 = vadd.f32 %v4231_v37, %v4230_v27  ;;  %v6241_v30 = vld [vmem:[%s7173_s2 + $0xb8] sm:$0xff]  }
 0x10f   : > { %v4294_v31 = vpop.f32.mrf.mxu1  ;;  %v4233_v56 = vpop.f32.mrf.mxu0  ;;  %7207 = vst [vmem:[#allocation16_spill] sm:$0xff] %v6241_v30  ;;  %4785 = vmatprep.subr.bf16.mxu1 %v6241_v30 }
 0x110   : > { %v6207_v35 = vadd.f32 %v4293_v52, %v4229_v19 }
 0x111   : > { %v4295_v48 = vpop.f32.mrf.mxu1  ;;  %v4234_v21 = vpop.f32.mrf.mxu0 }
 0x112   : > { %v4296_v41 = vadd.f32 %v4295_v48, %v4294_v31  ;;  %v4235_v14 = vadd.f32 %v4234_v21, %v4233_v56 }
 0x113   : > { %v4297_v22 = vpop.f32.mrf.mxu1  ;;  %v4236_v57 = vpop.f32.mrf.mxu0 }
 0x114   : > { %v6212_v1 = vadd.f32 %v4296_v41, %v4232_v55 }
 0x115   : > { %v4298_v3 = vpop.f32.mrf.mxu1  ;;  %v4237_v46 = vpop.f32.mrf.mxu0 }
 0x116   : > { %v4299_v54 = vadd.f32 %v4298_v3, %v4297_v22  ;;  %v4238_v53 = vadd.f32 %v4237_v46, %v4236_v57 }
 0x117   : > { %v4300_v23 = vpop.f32.mrf.mxu1  ;;  %v4239_v39 = vpop.f32.mrf.mxu0 }
 0x118   : > { %v6220_v44 = vadd.f32 %v4299_v54, %v4235_v14 }
 0x119   : > { %v4301_v28 = vpop.f32.mrf.mxu1  ;;  %v4240_v60 = vpop.f32.mrf.mxu0 }
 0x11a   : > { %7204 = vst [vmem:[#allocation13_spill] sm:$0xff] %v6220_v44  ;;  %v4302_v15 = vadd.f32 %v4301_v28, %v4300_v23  ;;  %v4241_v49 = vadd.f32 %v4240_v60, %v4239_v39 }
 0x11b   : > { %v4303_v16 = vpop.f32.mrf.mxu1  ;;  %v4242_v17 = vpop.f32.mrf.mxu0 }
 0x11c   : > { %v6231_v13 = vadd.f32 %v4302_v15, %v4238_v53 }
 0x11d   : > { %v4304_v29 = vpop.f32.mrf.mxu1  ;;  %v4243_v36 = vpop.f32.mrf.mxu0 }
 0x11e   : > { %7205 = vst [vmem:[#allocation14_spill] sm:$0xff] %v6231_v13  ;;  %v4305_v58 = vadd.f32 %v4304_v29, %v4303_v16  ;;  %v4244_v33 = vadd.f32 %v4243_v36, %v4242_v17 }
 0x11f   : > { %v4306_v42 = vpop.f32.mrf.mxu1  ;;  %v4245_v45 = vpop.f32.mrf.mxu0 }
 0x120   : > { %v6236_v18 = vadd.f32 %v4305_v58, %v4241_v49 }
 0x121   : > { %v4307_v63 = vpop.f32.mrf.mxu1  ;;  %v4246_v19 = vpop.f32.mrf.mxu0 }
 0x122   : > { %7206 = vst [vmem:[#allocation15_spill] sm:$0xff] %v6236_v18  ;;  %v4308_v4 = vadd.f32 %v4307_v63, %v4306_v42  ;;  %v4247_v0 = vadd.f32 %v4246_v19, %v4245_v45 }
 0x123   : > { %v4309_v27 = vpop.f32.mrf.mxu1  ;;  %v4248_v37 = vpop.f32.mrf.mxu0 }
 0x124   : > { %v6243_v52 = vadd.f32 %v4308_v4, %v4244_v33 }
 0x125   : > { %v4310_v25 = vpop.f32.mrf.mxu1  ;;  %v4249_v31 = vpop.f32.mrf.mxu0 }
 0x126   : > { %7208 = vst [vmem:[#allocation17_spill] sm:$0xff] %v6243_v52  ;;  %v4311_v47 = vadd.f32 %v4310_v25, %v4309_v27  ;;  %v4250_v48 = vadd.f32 %v4249_v31, %v4248_v37 }
 0x127   : > { %v4312_v55 = vpop.f32.mrf.mxu1  ;;  %v4251_v41 = vpop.f32.mrf.mxu0 }
 0x128   : > { %v6246_v56 = vadd.f32 %v4311_v47, %v4247_v0 }
 0x129   : > { %v4313_v21 = vpop.f32.mrf.mxu1  ;;  %v4252_v22 = vpop.f32.mrf.mxu0 }
 0x12a   : > { %7209 = vst [vmem:[#allocation18_spill] sm:$0xff] %v6246_v56  ;;  %v4314_v8 = vadd.f32 %v4313_v21, %v4312_v55  ;;  %v6250_v57 = vadd.f32 %v4252_v22, %v4251_v41 }
 0x12b   : > { %v6248_v14 = vpop.f32.mrf.mxu1  ;;  %v6254_v3 = vpop.f32.mrf.mxu0 }
 0x12c   : > { %v6252_v51 = vadd.f32 %v4314_v8, %v4250_v48 }
 0x12d   : > { %v6256_v54 = vpop.f32.mrf.mxu1  ;;  %v6258_v46 = vpop.f32.mrf.mxu0 }
 0x12e   : > { %7210 = vst [vmem:[#allocation19_spill] sm:$0xff] %v6252_v51 }
 0x12f   : > { %v6260_v24 = vpop.f32.mrf.mxu1  ;;  %v4337_v23 = vpop.f32.mrf.mxu0 }
 0x131   : > { %v6262_v53 = vpop.f32.mrf.mxu1  ;;  %v4338_v39 = vpop.f32.mrf.mxu0 }
 0x133   : > { %v6264_v32 = vpop.f32.mrf.mxu1  ;;  %v4340_v11 = vpop.f32.mrf.mxu0 }
 0x135   : > { %v4402_v28 = vpop.f32.mrf.mxu1  ;;  %v4341_v15 = vpop.f32.mrf.mxu0 }
 0x137   : > { %v4404_v60 = vpop.f32.mrf.mxu1  ;;  %v4343_v16 = vpop.f32.mrf.mxu0 }
 0x139   : > { %v4405_v49 = vpop.f32.mrf.mxu1  ;;  %v4344_v38 = vpop.f32.mrf.mxu0 }
 0x13b   : > { %v4407_v17 = vpop.f32.mrf.mxu1  ;;  %v4346_v6 = vpop.f32.mrf.mxu0 }
 0x13d   : > { %v4408_v29 = vpop.f32.mrf.mxu1  ;;  %v4347_v58 = vpop.f32.mrf.mxu0 }
 0x13e   : > { %v4348_v44 = vadd.f32 %v4347_v58, %v4346_v6 }
 0x13f   : > { %v4410_v36 = vpop.f32.mrf.mxu1  ;;  %v4349_v42 = vpop.f32.mrf.mxu0 }
 0x141   : > { %v4411_v33 = vpop.f32.mrf.mxu1  ;;  %v4350_v45 = vpop.f32.mrf.mxu0 }
 0x143   : > { %v6266_v63 = vpop.f32.mrf.mxu1  ;;  %v4352_v4 = vpop.f32.mrf.mxu0 }
 0x145   : > { %v6268_v19 = vpop.f32.mrf.mxu1  ;;  %v4353_v27 = vpop.f32.mrf.mxu0 }
 0x147   : > { %v6270_v0 = vpop.f32.mrf.mxu1  ;;  %v4355_v37 = vpop.f32.mrf.mxu0 }
 0x149   : > { %v6272_v25 = vpop.f32.mrf.mxu1  ;;  %v4356_v47 = vpop.f32.mrf.mxu0 }
 0x14b   : > { %v4419_v31 = vpop.f32.mrf.mxu1  ;;  %v4358_v55 = vpop.f32.mrf.mxu0 }
 0x14d   : > { %v4420_v48 = vpop.f32.mrf.mxu1  ;;  %v4359_v41 = vpop.f32.mrf.mxu0 }
 0x14f   : > { %v6274_v21 = vpop.f32.mrf.mxu1  ;;  %v4361_v8 = vpop.f32.mrf.mxu0 }
 0x151   : > { %v6276_v22 = vpop.f32.mrf.mxu1  ;;  %v4362_v50 = vpop.f32.mrf.mxu0 }
 0x153   : > { %v6278_v7 = vpop.f32.mrf.mxu1  ;;  %v6280_v10 = vpop.f32.mrf.mxu0 }
 0x154   : > { %7211 = vst [vmem:[#allocation20_spill] sm:$0xff] %v6278_v7  ;;  %7212 = vst [vmem:[#allocation21_spill] sm:$0xff] %v6280_v10  ;;  %v4342_v7 = vadd.f32 %v4341_v15, %v4340_v11  ;;  %v4357_v11 = vadd.f32 %v4356_v47, %v4355_v37 }
 0x155   : > { %v6282_v5 = vpop.f32.mrf.mxu1  ;;  %v6284_v59 = vpop.f32.mrf.mxu0 }
 0x156   : > { %7213 = vst [vmem:[#allocation22_spill] sm:$0xff] %v6282_v5  ;;  %7214 = vst [vmem:[#allocation23_spill] sm:$0xff] %v6284_v59  ;;  %v4345_v5 = vadd.f32 %v4344_v38, %v4343_v16  ;;  %v4403_v38 = vadd.f32 %v4402_v28, %v6264_v32 }
 0x157   : > { %v6286_v62 = vpop.f32.mrf.mxu1  ;;  %v4367_v40 = vpop.f32.mrf.mxu0 }
 0x158   : > { %7215 = vst [vmem:[#allocation24_spill] sm:$0xff] %v6286_v62 }
 0x159   : > { %v6288_v12 = vpop.f32.mrf.mxu1  ;;  %v4368_v30 = vpop.f32.mrf.mxu0 }
 0x15a   : > { %7216 = vst [vmem:[#allocation25_spill] sm:$0xff] %v6288_v12  ;;  %v4369_v58 = vadd.f32 %v4368_v30, %v4367_v40 }
 0x15b   : > { %v6290_v26 = vpop.f32.mrf.mxu1  ;;  %v6292_v51 = vpop.f32.mrf.mxu0  ;;  %v7230_v47 = vld [vmem:[#allocation21_spill] sm:$0xff] }
 0x15c   : > { %7217 = vst [vmem:[#allocation26_spill] sm:$0xff] %v6290_v26  ;;  %7218 = vst [vmem:[#allocation27_spill] sm:$0xff] %v6292_v51 }
 0x15d   : > { %v6294_v56 = vpop.f32.mrf.mxu1  ;;  %v6296_v52 = vpop.f32.mrf.mxu0 }
 0x15e   : > { %7219 = vst [vmem:[#allocation28_spill] sm:$0xff] %v6294_v56  ;;  %7220 = vst [vmem:[#allocation29_spill] sm:$0xff] %v6296_v52  ;;  %v4339_v56 = vadd.f32 %v4338_v39, %v4337_v23  ;;  %v1676_v23 = vadd.f32 %v4342_v7, %v6164_v20  ;;  %v4406_v39 = vadd.f32 %v4405_v49, %v4404_v60 }
 0x15f   : > { %v6298_v13 = vpop.f32.mrf.mxu1  ;;  %v6300_v18 = vpop.f32.mrf.mxu0  ;;  %v6340_v7 = vadd.f32 %v6262_v53, %v6260_v24  ;;  %v4360_v20 = vadd.f32 %v4359_v41, %v4358_v55  ;;  %v6354_v24 = vld [vmem:[%s7177_s6] ss:$0 sm:$0xff] }
 0x160   : > { %7221 = vst [vmem:[#allocation30_spill] sm:$0xff] %v6298_v13  ;;  %7222 = vst [vmem:[#allocation31_spill] sm:$0xff] %v6300_v18  ;;  %v1681_v13 = vadd.f32 %v4345_v5, %v6175_v2  ;;  %v4409_v18 = vadd.f32 %v4408_v29, %v4407_v17  ;;  %v1673_v16 = vadd.f32 %v4339_v56, %v6159_v43 }
 0x161   : > { %v6302_v10 = vpop.f32.mrf.mxu0  ;;  %v6304_v59 = vpop.f32.mrf.mxu1  ;;  %v1684_v5 = vadd.f32 %v4348_v44, %v6180_v34  ;;  %v4412_v2 = vadd.f32 %v4411_v33, %v4410_v36  ;;  %v4354_v17 = vadd.f32 %v4353_v27, %v4352_v4  ;;  %v6336_v43 = vadd.f32 %v6258_v46, %v6254_v3  ;;  %v6345_v34 = vld [vmem:[%s7176_s5] ss:$0 sm:$0xff]  ;;  %v7229_v27 = vld [vmem:[#allocation22_spill] sm:$0xff] }
 0x162   : > { %7223 = vst [vmem:[#allocation32_spill] sm:$0xff] %v6302_v10  ;;  %7224 = vst [vmem:[#allocation33_spill] sm:$0xff] %v6304_v59  ;;  %v4317_v59 = vadd.f32 %v6256_v54, %v6248_v14  ;;  %v1976_v14 = vadd.f32 %v4409_v18, %v1681_v13  ;;  %v1974_v18 = vadd.f32 %v4403_v38, %v1673_v16 }
 0x163   : > { %v6306_v62 = vpop.f32.mrf.mxu0  ;;  %v6310_v26 = vpop.f32.mrf.mxu1  ;;  %v4421_v3 = vadd.f32 %v4420_v48, %v4419_v31  ;;  %v4363_v46 = vadd.f32 %v4362_v50, %v4361_v8  ;;  %v1975_v32 = vadd.f32 %v4406_v39, %v1676_v23  ;;  %v1692_v28 = vadd.f32 %v4354_v17, %v6196_v61 }
 0x164   : > { %7225 = vst [vmem:[#allocation34_spill] sm:$0xff] %v6306_v62  ;;  %7226 = vst [vmem:[#allocation35_spill] sm:$0xff] %v6310_v26  ;;  %v4351_v26 = vadd.f32 %v4350_v45, %v4349_v42  ;;  %v6332_v54 = vadd.f32 %v4317_v59, %v6250_v57  ;;  %v4415_v59 = vadd.f32 %v6268_v19, %v6266_v63  ;;  %v7227_v63 = vld [vmem:[#allocation13_spill] sm:$0xff]  ;;  %v7228_v19 = vld [vmem:[#allocation20_spill] sm:$0xff] }
 0x165   : > { %v6308_v12 = vpop.f32.mrf.mxu0  ;;  %v6317_v10 = vpop.f32.mrf.mxu1  ;;  %v1697_v57 = vadd.f32 %v4357_v11, %v6207_v35  ;;  %v1977_v49 = vadd.f32 %v4412_v2, %v1684_v5  ;;  %v4418_v35 = vadd.f32 %v6272_v25, %v6270_v0  ;;  %v1700_v50 = vadd.f32 %v4360_v20, %v6212_v1  ;;  %v7231_v0 = vld [vmem:[#allocation23_spill] sm:$0xff]  ;;  %v7234_v16 = vld [vmem:[#allocation28_spill] sm:$0xff]  ;;  %v7235_v20 = vld [vmem:[#allocation14_spill] sm:$0xff] }
 0x166   : > { %v1689_v44 = vadd.f32 %v4351_v26, %v6191_v9  ;;  %v4424_v29 = vadd.f32 %v6276_v22, %v6274_v21  ;;  %v1705_v4 = vadd.f32 %v4363_v46, %v7227_v63  ;;  %v4427_v37 = vadd.f32 %v7229_v27, %v7228_v19  ;;  %v7232_v21 = vld [vmem:[#allocation15_spill] sm:$0xff]  ;;  %v7233_v22 = vld [vmem:[#allocation26_spill] sm:$0xff]  ;;  %v6386_v46 = vld [vmem:[#allocation2 + $0x28] sm:$0xff] }
 0x167   : > { %v6312_v51 = vpop.f32.mrf.mxu0  ;;  %v6329_v6 = vpop.f32.mrf.mxu1  ;;  %v4366_v25 = vadd.f32 %v7231_v0, %v7230_v47  ;;  %v1980_v31 = vadd.f32 %v4421_v3, %v1697_v57  ;;  %v1713_v8 = vadd.f32 %v4369_v58, %v7232_v21  ;;  %v4433_v38 = vadd.f32 %v7234_v16, %v7233_v22  ;;  %v7244_v0 = vld [vmem:[#allocation30_spill] sm:$0xff]  ;;  %v6409_v22 = vld [vmem:[#allocation3 + $0x98] sm:$0xff] }
 0x168   : > { %v1978_v45 = vadd.f32 %v4415_v59, %v1689_v44  ;;  %v1981_v39 = vadd.f32 %v4424_v29, %v1700_v50  ;;  %v1979_v11 = vadd.f32 %v4418_v35, %v1692_v28  ;;  %v7236_v44 = vld [vmem:[#allocation27_spill] sm:$0xff]  ;;  %v7237_v59 = vld [vmem:[#allocation29_spill] sm:$0xff]  ;;  %v7240_v50 = vld [vmem:[#allocation24_spill] sm:$0xff] }
 0x169   : > { %v6314_v52 = vpop.f32.mrf.mxu0  ;;  %v6357_v60 = vpop.f32.mrf.mxu1  ;;  %v7239_v57 = vld [vmem:[#allocation32_spill] sm:$0xff]  ;;  %v7241_v29 = vld [vmem:[#allocation25_spill] sm:$0xff]  ;;  %v1984_v63 = vadd.f32 %v4433_v38, %v1713_v8  ;;  %v7248_v16 = vld [vmem:[#allocation19_spill] sm:$0xff] }
 0x16a   : > { %v4430_v58 = vadd.f32 %v7241_v29, %v7240_v50 }
 0x16b   : > { %v6321_v62 = vpop.f32.mrf.mxu0  ;;  %v4443_v55 = vpop.f32.mrf.mxu1 }
 0x16d   : > { %v6326_v15 = vpop.f32.mrf.mxu0  ;;  %v4444_v28 = vpop.f32.mrf.mxu1 }
 0x16f   : > { %v4739_v56 = vpop.f32.mrf.mxu0 }
 0x170   : > { %v2154_v13 = vadd.f32 %v4739_v56, %v1976_v14  ;;  %v6380_v56 = vadd.f32 %v4366_v25, %v7235_v20  ;;  %v7245_v25 = vld [vmem:[#allocation33_spill] sm:$0xff]  ;;  %v7249_v20 = vld [vmem:[#allocation4_spill] sm:$0xff] }
 0x171   : > { %v2089_v53 = vpop.f32.mrf.mxu0  ;;  %vm2340_vm2 = vcmp.lt.s32.totalorder %v7249_v20, 7 }
 0x172   : > { %v2177_v26 = vmul.f32 %v6345_v34, %v2154_v13  ;;  %v2152_v9 = vadd.f32 %v2089_v53, %v1974_v18  ;;  %v4372_v13 = vadd.f32 %v7237_v59, %v7236_v44  ;;  %v7238_v18 = vld [vmem:[#allocation31_spill] sm:$0xff]  ;;  %v1635_v44 = vadd.f32 %v6340_v7, %v6336_v43 }
 0x173   : > { %v4740_v36 = vpop.f32.mrf.mxu0  ;;  %v4375_v3 = vadd.f32 %v7239_v57, %v7238_v18 }
 0x174   : > { %v2200_v42 = vadd.f32 %v6354_v24, %v2177_v26  ;;  %v2175_v61 = vmul.f32 %v6345_v34, %v2152_v9  ;;  %v2155_v33 = vadd.f32 %v4740_v36, %v1977_v49  ;;  %v7242_v36 = vld [vmem:[#allocation34_spill] sm:$0xff] }
 0x175   : > { %v2092_v1 = vpop.f32.mrf.mxu0 }
 0x176   : > { %v2216_v48 = vmax.f32 %v2200_v42, 0.0  ;;  %v2198_v40 = vadd.f32 %v6354_v24, %v2175_v61  ;;  %v2178_v30 = vmul.f32 %v6345_v34, %v2155_v33  ;;  %v2153_v41 = vadd.f32 %v2092_v1, %v1975_v32 }
 0x177   : > { %v4743_v23 = vpop.f32.mrf.mxu0  ;;  %v1982_v32 = vadd.f32 %v4427_v37, %v1705_v4  ;;  %v4378_v42 = vadd.f32 %v6308_v12, %v7242_v36  ;;  %v4381_v61 = vadd.f32 %v6314_v52, %v6312_v51  ;;  %v7243_v37 = vld [vmem:[#allocation17_spill] sm:$0xff]  ;;  %v4436_v1 = vadd.f32 %v7245_v25, %v7244_v0  ;;  %v7246_v12 = vld [vmem:[#allocation18_spill] sm:$0xff] }
 0x178   : > { %2233 = vst [vmem:[#allocation3 + $0x20] sm:$0xff] %v2216_v48  ;;  %v2214_v5 = vmax.f32 %v2198_v40, 0.0  ;;  %v2201_v2 = vadd.f32 %v6354_v24, %v2178_v30  ;;  %v2176_v17 = vmul.f32 %v6345_v34, %v2153_v41  ;;  %v2158_v14 = vadd.f32 %v4743_v23, %v1980_v31  ;;  %v7247_v48 = vld [vmem:[#allocation35_spill] sm:$0xff]  ;;  %v4446_v40 = vpop.f32.mrf.mxu1 }
 0x179   : > { %2254 = vst [vmem:[#allocation3 + $0x20] sm:$0x1] %v6386_v46  ;;  %v2105_v53 = vpop.f32.mrf.mxu0  ;;  %v1716_v47 = vadd.f32 %v4372_v13, %v7243_v37  ;;  %v1721_v31 = vadd.f32 %v4375_v3, %v7246_v12  ;;  %v4439_v52 = vadd.f32 %v6317_v10, %v7247_v48  ;;  %v1724_v38 = vadd.f32 %v4378_v42, %v7248_v16 }
 0x17a   : > { %2231 = vst [vmem:[#allocation3 + $0x10] sm:$0xff] %v2214_v5  ;;  %v2217_v26 = vmax.f32 %v2201_v2, 0.0  ;;  %v2199_v9 = vadd.f32 %v6354_v24, %v2176_v17  ;;  %v2181_v49 = vmul.f32 %v6345_v34, %v2158_v14  ;;  %v2156_v35 = vadd.f32 %v2105_v53, %v1978_v45  ;;  %v4447_v59 = vpop.f32.mrf.mxu1 }
 0x17b   : > { %2253 = vst [vmem:[#allocation3 + $0x10] sm:$0x1] %v6386_v46  ;;  %v4744_v33 = vpop.f32.mrf.mxu0  ;;  %v4442_v23 = vadd.f32 %v6357_v60, %v6329_v6  ;;  %v1729_v10 = vadd.f32 %v4381_v61, %v6332_v54  ;;  %v4384_v6 = vadd.f32 %v6326_v15, %v6321_v62  ;;  %v1985_v60 = vadd.f32 %v4436_v1, %v1716_v47 }
 0x17c   : > { %2234 = vst [vmem:[#allocation3 + $0x28] sm:$0xff] %v2217_v26  ;;  %v2215_v4 = vmax.f32 %v2199_v9, 0.0  ;;  %v2204_v19 = vadd.f32 %v6354_v24, %v2181_v49  ;;  %v2179_v27 = vmul.f32 %v6345_v34, %v2156_v35  ;;  %v2159_v45 = vadd.f32 %v4744_v33, %v1981_v39 }
 0x17d   : > { %2264 = vst [vmem:[#allocation3 + $0x29] sm:$0x1] %v6386_v46  ;;  %v2108_v51 = vpop.f32.mrf.mxu0  ;;  %v4445_v39 = vadd.f32 %v4444_v28, %v4443_v55  ;;  %v3169_v55 = vrot.slane %v6409_v22, 7  ;;  %v1983_v62 = vadd.f32 %v4430_v58, %v6380_v56  ;;  %v1986_v7 = vadd.f32 %v4439_v52, %v1721_v31 }
 0x17e   : > { %2232 = vst [vmem:[#allocation3 + $0x18] sm:$0xff] %v2215_v4  ;;  %v2220_v30 = vmax.f32 %v2204_v19, 0.0  ;;  %v2202_v41 = vadd.f32 %v6354_v24, %v2179_v27  ;;  %v2182_v21 = vmul.f32 %v6345_v34, %v2159_v45  ;;  %v2157_v8 = vadd.f32 %v2108_v51, %v1979_v11 }
 0x17f   : > { %2263 = vst [vmem:[#allocation3 + $0x19] sm:$0x1] %v6386_v46  ;;  %v4747_v5 = vpop.f32.mrf.mxu0  ;;  %v1988_v15 = vadd.f32 %v4445_v39, %v1729_v10  ;;  %v6431_v28 = vadd.f32 %v4442_v23, %v1724_v38  ;;  %v1732_v29 = vadd.f32 %v4384_v6, %v1635_v44  ;;  %v4448_v36 = vadd.f32 %v4447_v59, %v4446_v40 }
 0x180   : > { %2237 = vst [vmem:[#allocation3 + $0x40] sm:$0xff] %v2220_v30  ;;  %v2218_v2 = vmax.f32 %v2202_v41, 0.0  ;;  %v2205_v17 = vadd.f32 %v6354_v24, %v2182_v21  ;;  %v2180_v14 = vmul.f32 %v6345_v34, %v2157_v8  ;;  %v2162_v11 = vadd.f32 %v4747_v5, %v1984_v63  ;;  %v6427_v53 = vld [vmem:[#allocation3 + $0x20] sm:$0xff] }
 0x181   : > { %2256 = vst [vmem:[#allocation3 + $0x40] sm:$0x1] %v6386_v46  ;;  %v2121_v54 = vpop.f32.mrf.mxu0  ;;  %v6441_v58 = vrot.slane %v6427_v53, 1  ;;  %v6444_v42 = vrot.slane %v6427_v53, 7  ;;  %v1989_v52 = vadd.f32 %v4448_v36, %v1732_v29 }
 0x182   : > { %2235 = vst [vmem:[#allocation3 + $0x30] sm:$0xff] %v2218_v2  ;;  %v2221_v13 = vmax.f32 %v2205_v17, 0.0  ;;  %v2203_v18 = vadd.f32 %v6354_v24, %v2180_v14  ;;  %v2185_v57 = vmul.f32 %v6345_v34, %v2162_v11  ;;  %v2160_v3 = vadd.f32 %v2121_v54, %v1982_v32  ;;  %v6435_v50 = vld [vmem:[#allocation3 + $0x10] sm:$0xff] }
 0x183   : > { %2255 = vst [vmem:[#allocation3 + $0x30] sm:$0x1] %v6386_v46  ;;  %v4748_v43 = vpop.f32.mrf.mxu0  ;;  %v6452_v45 = vrot.slane %v6435_v50, 1  ;;  %v6491_v2 = vsel %vm947_vm1, %v3169_v55, %v6444_v42 }
 0x184   : > { %2238 = vst [vmem:[#allocation3 + $0x48] sm:$0xff] %v2221_v13  ;;  %v2219_v26 = vmax.f32 %v2203_v18, 0.0  ;;  %v2208_v9 = vadd.f32 %v6354_v24, %v2185_v57  ;;  %v2183_v49 = vmul.f32 %v6345_v34, %v2160_v3  ;;  %v2163_v35 = vadd.f32 %v4748_v43, %v1985_v60  ;;  %v6437_v32 = vld [vmem:[#allocation3 + $0x28] sm:$0xff] }
 0x185   : > { %2266 = vst [vmem:[#allocation3 + $0x49] sm:$0x1] %v6386_v46  ;;  %v2124_v56 = vpop.f32.mrf.mxu0  ;;  %v2297_v0 = vrot.slane %v6437_v32, 7  ;;  %v2329_v30 = vrot.slane %v6437_v32, 1 }
 0x186   : > { %2236 = vst [vmem:[#allocation3 + $0x38] sm:$0xff] %v2219_v26  ;;  %v2224_v61 = vmax.f32 %v2208_v9, 0.0  ;;  %v2206_v33 = vadd.f32 %v6354_v24, %v2183_v49  ;;  %v2186_v63 = vmul.f32 %v6345_v34, %v2163_v35  ;;  %v2161_v4 = vadd.f32 %v2124_v56, %v1983_v62  ;;  %v6448_v19 = vld [vmem:[#allocation3 + $0x18] sm:$0xff] }
 0x187   : > { %2265 = vst [vmem:[#allocation3 + $0x39] sm:$0x1] %v6386_v46  ;;  %v4751_v27 = vpop.f32.mrf.mxu0  ;;  %v2327_v37 = vrot.slane %v6448_v19, 1  ;;  %v6457_v47 = vpack.c.bf16 %v6448_v19, %v6435_v50  ;;  %v6484_v5 = vsel %vm947_vm1, %v6444_v42, %v2297_v0  ;;  %v2351_v59 = vsel %vm2340_vm2, %v6441_v58, %v2329_v30  ;;  %v5000_v62 = vld [vmem:[%s7173_s2 + $0x38] sm:$0xff]  }
 0x188   : > { %2241 = vst [vmem:[#allocation3 + $0x60] sm:$0xff] %v2224_v61  ;;  %v2222_v25 = vmax.f32 %v2206_v33, 0.0  ;;  %v2209_v1 = vadd.f32 %v6354_v24, %v2186_v63  ;;  %v2184_v12 = vmul.f32 %v6345_v34, %v2161_v4  ;;  %v2166_v31 = vadd.f32 %v4751_v27, %v1988_v15  ;;  %v6495_v6 = vld [vmem:[#allocation3 + $0x40] sm:$0xff] }
 0x189   : > { %2258 = vst [vmem:[#allocation3 + $0x60] sm:$0x1] %v6386_v46  ;;  %v2137_v48 = vpop.f32.mrf.mxu0  ;;  %2668 = vmatprep.mubr.bf16.mxu1 %v6457_v47  ;;  %v2352_v51 = vsel %vm2340_vm2, %v2327_v37, %v6441_v58  ;;  %v2353_v40 = vsel %vm2340_vm2, %v6452_v45, %v2327_v37  ;;  %v3178_v13 = vpack.c.bf16 %v6484_v5, %v6491_v2  ;;  %v2332_v49 = vrot.slane %v6495_v6, 1  ;;  %v5058_v2 = vld [vmem:[%s7178_s7] sm:$0xff]  }
 0x18a   : > { %2239 = vst [vmem:[#allocation3 + $0x50] sm:$0xff] %v2222_v25  ;;  %v2225_v41 = vmax.f32 %v2209_v1, 0.0  ;;  %v2207_v21 = vadd.f32 %v6354_v24, %v2184_v12  ;;  %v2189_v8 = vmul.f32 %v6345_v34, %v2166_v31  ;;  %v2164_v16 = vadd.f32 %v2137_v48, %v1986_v7  ;;  %v6473_v38 = vld [vmem:[#allocation3 + $0x30] sm:$0xff]  ;;  %v5005_v1 = vld [vmem:[%s7173_s2 + $0x68] sm:$0xff]  }
 0x18b   : > { %2257 = vst [vmem:[#allocation3 + $0x50] sm:$0x1] %v6386_v46  ;;  %v4752_v23 = vpop.f32.mrf.mxu0  ;;  %v6476_v10 = vpack.c.bf16 %v2352_v51, %v2353_v40  ;;  %v2330_v39 = vrot.slane %v6473_v38, 1  ;;  %v5006_v51 = vld [vmem:[%s7173_s2 + $0x28] sm:$0xff]  }
 0x18c   : > { %2242 = vst [vmem:[#allocation3 + $0x68] sm:$0xff] %v2225_v41  ;;  %v2223_v17 = vmax.f32 %v2207_v21, 0.0  ;;  %v2212_v14 = vadd.f32 %v6354_v24, %v2189_v8  ;;  %v2187_v11 = vmul.f32 %v6345_v34, %v2164_v16  ;;  %v2167_v44 = vadd.f32 %v4752_v23, %v1989_v52  ;;  %v6514_v7 = vld [vmem:[#allocation3 + $0x48] sm:$0xff]  ;;  %v5009_v8 = vld [vmem:[%s7173_s2 + $0x60] sm:$0xff]  }
 0x18d   : > { %2268 = vst [vmem:[#allocation3 + $0x69] sm:$0x1] %v6386_v46  ;;  %4769 = vmatprep.mubr.bf16.mxu0 %v6476_v10  ;;  %v2140_v54 = vpop.f32.mrf.mxu0  ;;  %v2350_v60 = vsel %vm2340_vm2, %v2329_v30, %v2330_v39  ;;  %v2333_v33 = vrot.slane %v6514_v7, 1 }
 0x18e   : > { %2240 = vst [vmem:[#allocation3 + $0x58] sm:$0xff] %v2223_v17  ;;  %v2228_v18 = vmax.f32 %v2212_v14, 0.0  ;;  %v2210_v57 = vadd.f32 %v6354_v24, %v2187_v11  ;;  %v2190_v3 = vmul.f32 %v6345_v34, %v2167_v44  ;;  %v2165_v43 = vadd.f32 %v2140_v54, %v6431_v28  ;;  %v6512_v15 = vld [vmem:[#allocation3 + $0x38] sm:$0xff]  ;;  %v5003_v28 = vld [vmem:[%s7173_s2 + $0x70] sm:$0xff]   ;;  %v5010_v17 = vld [vmem:[%s7173_s2 + $0x20] sm:$0xff]  }
 0x18f   : > { %2267 = vst [vmem:[#allocation3 + $0x59] sm:$0x1] %v6386_v46  ;;  %v6517_v26 = vpack.c.bf16 %v2350_v60, %v2351_v59  ;;  %v2331_v9 = vrot.slane %v6512_v15, 1  ;;  %v2347_v48 = vsel %vm2340_vm2, %v2332_v49, %v2333_v33  ;;  %v2295_v11 = vrot.slane %v6448_v19, 7  ;;  %v5011_v54 = vld [vmem:[%s7173_s2 + $0x58] sm:$0xff]  }
 0x190   : > { %2245 = vst [vmem:[#allocation3 + $0x80] sm:$0xff] %v2228_v18  ;;  %v2226_v35 = vmax.f32 %v2210_v57, 0.0  ;;  %v2213_v29 = vadd.f32 %v6354_v24, %v2190_v3  ;;  %v2188_v36 = vmul.f32 %v6345_v34, %v2165_v43  ;;  %v5004_v34 = vld [vmem:[%s7173_s2 + $0x30] sm:$0xff]   ;;  %v6547_v12 = vld [vmem:[#allocation3 + $0x60] sm:$0xff]  ;;  %v6593_v18 = vrot.slane %v6435_v50, 7 }
 0x191   : > { %2260 = vst [vmem:[#allocation3 + $0x80] sm:$0x1] %v6386_v46  ;;  %4770 = vmatmul.mubr.bf16.vlgmr.msra.gmra.mxu0 %v6517_v26  ;;  %v2348_v56 = vsel %vm2340_vm2, %v2331_v9, %v2332_v49  ;;  %v2349_v61 = vsel %vm2340_vm2, %v2330_v39, %v2331_v9  ;;  %v2336_v21 = vrot.slane %v6547_v12, 1  ;;  %v6610_v49 = vld [vmem:[#allocation3] sm:$0xff] }
 0x192   : > { %2243 = vst [vmem:[#allocation3 + $0x70] sm:$0xff] %v2226_v35  ;;  %v2229_v63 = vmax.f32 %v2213_v29, 0.0  ;;  %v2211_v4 = vadd.f32 %v6354_v24, %v2188_v36  ;;  %4546 = vmatpush3.bf16.msra.mxu0 %v5000_v62  ;;  %v6534_v27 = vpack.c.bf16 %v2348_v56, %v2349_v61  ;;  %v6539_v37 = vld [vmem:[#allocation3 + $0x50] sm:$0xff]  ;;  %v5012_v62 = vld [vmem:[%s7173_s2 + $0x18] sm:$0xff]  }
 0x193   : > { %2259 = vst [vmem:[#allocation3 + $0x70] sm:$0x1] %v6386_v46  ;;  %4547 = vmatprep.subr.bf16.mxu0 %v5003_v28  ;;  %v2334_v25 = vrot.slane %v6539_v37, 1  ;;  %v6615_v28 = vsel %vm947_vm1, %v6593_v18, %v2295_v11  ;;  %v6623_v56 = vld [vmem:[#allocation3 + $0x90] sm:$0xff] }
 0x194   : > { %2246 = vst [vmem:[#allocation3 + $0x88] sm:$0xff] %v2229_v63  ;;  %v2227_v24 = vmax.f32 %v2211_v4, 0.0  ;;  %4773 = vmatprep.mubr.bf16.mxu0 %v6534_v27  ;;  %v6561_v30 = vld [vmem:[#allocation3 + $0x68] sm:$0xff]  ;;  %v6632_v63 = vpack.c.bf16 %v6437_v32, %v6427_v53  ;;  %v5015_v53 = vld [vmem:[%s7173_s2 + $0x10] sm:$0xff]  }
 0x195   : > { %2270 = vst [vmem:[#allocation3 + $0x89] sm:$0x1] %v6386_v46  ;;  %v2346_v31 = vsel %vm2340_vm2, %v2333_v33, %v2334_v25  ;;  %v2337_v39 = vrot.slane %v6561_v30, 1  ;;  %v5014_v33 = vld [vmem:[%s7173_s2 + $0x50] sm:$0xff]  }
 0x196   : > { %2244 = vst [vmem:[#allocation3 + $0x78] sm:$0xff] %v2227_v24  ;;  %4548 = vmatpush3.bf16.msra.mxu0 %v5004_v34  ;;  %v6554_v52 = vpack.c.bf16 %v2346_v31, %v2347_v48  ;;  %v6559_v40 = vld [vmem:[#allocation3 + $0x58] sm:$0xff]  ;;  %v3173_v48 = vrot.slane %v6623_v56, 1  ;;  %v5024_v32 = vld [vmem:[%s7173_s2 + $0x90] sm:$0xff]  }
 0x197   : > { %2269 = vst [vmem:[#allocation3 + $0x79] sm:$0x1] %v6386_v46  ;;  %4549 = vmatprep.subr.bf16.mxu0 %v5005_v1  ;;  %v2335_v41 = vrot.slane %v6559_v40, 1  ;;  %v2343_v19 = vsel %vm2340_vm2, %v2336_v21, %v2337_v39  ;;  %v2324_v1 = vrot.slane %v6610_v49, 1 }
 0x198   : > { %v6590_v59 = vld [vmem:[#allocation3 + $0x80] sm:$0xff] }
 0x199   : > { %4774 = vmatmul.mubr.bf16.gmra.mxu0 %v6554_v52  ;;  %v2344_v16 = vsel %vm2340_vm2, %v2335_v41, %v2336_v21  ;;  %v2345_v23 = vsel %vm2340_vm2, %v2334_v25, %v2335_v41  ;;  %v2434_v36 = vrot.slane %v6590_v59, 1  ;;  %v5018_v25 = vld [vmem:[%s7173_s2 + $0xb0] sm:$0xff]   ;;  %v5016_v41 = vld [vmem:[%s7173_s2 + $0x48] sm:$0xff]  }
 0x19a   : > { %4550 = vmatpush3.bf16.msra.mxu0 %v5006_v51  ;;  %v6575_v46 = vpack.c.bf16 %v2344_v16, %v2345_v23  ;;  %v6580_v14 = vld [vmem:[#allocation3 + $0x70] sm:$0xff]  ;;  %v7250_v51 = vld [vmem:[#allocation16_spill] sm:$0xff]  ;;  %v5021_v16 = vld [vmem:[%s7173_s2 + $0xa8] sm:$0xff]  }
 0x19b   : > { %4551 = vmatprep.subr.bf16.mxu0 %v5009_v8  ;;  %v2338_v44 = vrot.slane %v6580_v14, 1 }
 0x19c   : > { %4777 = vmatprep.mubr.bf16.mxu0 %v6575_v46  ;;  %v6588_v60 = vld [vmem:[#allocation3 + $0x88] sm:$0xff] }
 0x19d   : > { %v2342_v57 = vsel %vm2340_vm2, %v2337_v39, %v2338_v44  ;;  %v6600_v3 = vrot.slane %v6588_v60, 7  ;;  %v2435_v50 = vrot.slane %v6588_v60, 1 }
 0x19e   : > { %4552 = vmatpush3.bf16.msra.mxu0 %v5010_v17  ;;  %v6602_v43 = vpack.c.bf16 %v2342_v57, %v2343_v19  ;;  %v6607_v9 = vld [vmem:[#allocation3 + $0x78] sm:$0xff]  ;;  %v2319_v17 = vsel %vm947_vm1, %v2295_v11, %v6444_v42  ;;  %v5019_v19 = vld [vmem:[%s7173_s2 + $0x40] sm:$0xff]  }
 0x19f   : > { %4553 = vmatprep.subr.bf16.mxu0 %v5011_v54  ;;  %v2433_v35 = vsel %vm947_vm1, %v6600_v3, %v6593_v18  ;;  %v2339_v29 = vrot.slane %v6607_v9, 1  ;;  %v6652_v31 = vsel %vm2340_vm2, %v2434_v36, %v2435_v50  ;;  %v2438_v8 = vsel %vm2340_vm2, %v2435_v50, %v6452_v45  ;;  %v5017_v54 = vld [vmem:[%s7173_s2 + $0x8] sm:$0xff]  }
 0x1a0   : > { %v2439_v61 = vpack.c.bf16 %v6615_v28, %v2433_v35  ;;  %v6679_v39 = vsel %vm2340_vm2, %v2435_v50, %v3173_v48  ;;  %v2443_v57 = vpack.c.bf16 %v2438_v8, %v6652_v31  ;;  %v6696_v42 = vrot.slane %v6607_v9, 7 }
 0x1a1   : > { %4778 = vmatmul.mubr.bf16.gmra.mxu0 %v6602_v43  ;;  %v6636_v4 = vsel %vm2340_vm2, %v2338_v44, %v2339_v29  ;;  %v2437_v34 = vsel %vm2340_vm2, %v2339_v29, %v2434_v36  ;;  %v6664_v21 = vsel %vm2340_vm2, %v2339_v29, %v2324_v1  ;;  %v3179_v44 = vpack.c.bf16 %v6679_v39, %v6652_v31 }
 0x1a2   : > { %4554 = vmatpush3.bf16.msra.mxu0 %v5012_v62  ;;  %2669 = vmatmul.mubr.bf16.vlgmr.msra.gmra.mxu1 %v2439_v61  ;;  %v6645_v24 = vpack.c.bf16 %v2437_v34, %v6636_v4  ;;  %v2380_v23 = vpack.c.bf16 %v6664_v21, %v6636_v4  ;;  %v6693_v62 = vld [vmem:[#allocation3 + $0x8] sm:$0xff]  ;;  %v6699_v11 = vpack.c.bf16 %v6484_v5, %v2319_v17  ;;  %v2292_v50 = vrot.slane %v6610_v49, 7  ;;  %v5022_v61 = vld [vmem:[%s7173_s2 + $0xa0] sm:$0xff]  }
 0x1a3   : > { %2676 = vmatprep.mubr.bf16.mxu1 %v6632_v63  ;;  %4786 = vmatpush3.bf16.msra.mxu1 %v7250_v51  ;;  %v2358_v35 = vpack.c.bf16 %v6693_v62, %v6610_v49  ;;  %v6706_v29 = vpack.c.bf16 %v6512_v15, %v6473_v38  ;;  %v2299_v36 = vrot.slane %v6512_v15, 7  ;;  %v2293_v34 = vrot.slane %v6693_v62, 7  ;;  %v5025_v15 = vld [vmem:[%s7173_s2 + $0x238] sm:$0xff]   ;;  %v5035_v49 = vld [vmem:[%s7173_s2 + $0x1f0] sm:$0xff]   ;;  %v7254_v21 = vld [vmem:[#allocation8_spill] sm:$0xff] }
 0x1a4   : > { %4781 = vmatprep.mubr.bf16.mxu0 %v6645_v24  ;;  %4555 = vmatprep.subr.bf16.mxu0 %v5014_v33  ;;  %v5020_v33 = vld [vmem:[%s7173_s2] sm:$0xff]   ;;  %v2323_v51 = vsel %vm947_vm1, %v6696_v42, %v2292_v50  ;;  %v3174_v4 = vrot.slane %v6409_v22, 1  ;;  %v3168_v39 = vrot.slane %v6623_v56, 7 }
 0x1a5   : > { %4787 = vmatprep.subr.bf16.mxu1 %v5018_v25 }
 0x1a6   : > { %4556 = vmatpush3.bf16.msra.mxu0 %v5015_v53  ;;  %v2322_v53 = vsel %vm947_vm1, %v2292_v50, %v2293_v34  ;;  %v5028_v50 = vld [vmem:[%s7173_s2 + $0x228] sm:$0xff]   ;;  %v3177_v31 = vsel %vm2340_vm2, %v3174_v4, %v6441_v58  ;;  %v7252_v58 = vld [vmem:[#allocation6_spill] sm:$0xff] }
 0x1a7   : > { %4557 = vmatprep.subr.bf16.mxu0 %v5016_v41  ;;  %4788 = vmatpush3.bf16.msra.mxu1 %v5018_v25  ;;  %v2298_v25 = vrot.slane %v6473_v38, 7  ;;  %v5023_v38 = vld [vmem:[%s7173_s2 + $0x98] sm:$0xff]   ;;  %v2357_v8 = vpack.c.bf16 %v2322_v53, %v2323_v51 }
 0x1a8   : > { %4789 = vmatprep.subr.bf16.mxu1 %v5021_v16  ;;  %v5032_v53 = vld [vmem:[%s7173_s2 + $0x1f8] sm:$0xff]  }
 0x1a9   : > { %4782 = vmatmul.mubr.bf16.gmra.mxu0 %v2443_v57  ;;  %v2316_v41 = vsel %vm947_vm1, %v2298_v25, %v2299_v36  ;;  %v2317_v17 = vsel %vm947_vm1, %v2297_v0, %v2298_v25  ;;  %v6743_v57 = vpack.c.bf16 %v6514_v7, %v6495_v6  ;;  %v2300_v0 = vrot.slane %v6495_v6, 7 }
 0x1aa   : > { %4558 = vmatpush3.bf16.msra.mxu0 %v5017_v54  ;;  %2677 = vmatmul.mubr.bf16.gmra.mxu1 %v6699_v11  ;;  %v6736_v54 = vpack.c.bf16 %v2316_v41, %v2317_v17  ;;  %v2321_v6 = vsel %vm947_vm1, %v2293_v34, %v6593_v18  ;;  %v6774_v25 = vpack.c.bf16 %v6559_v40, %v6539_v37  ;;  %v2303_v18 = vrot.slane %v6559_v40, 7  ;;  %v5031_v40 = vld [vmem:[%s7173_s2 + $0x218] sm:$0xff]   ;;  %v5034_v41 = vld [vmem:[%s7173_s2 + $0x210] sm:$0xff]  }
 0x1ab   : > { %2684 = vmatprep.mubr.bf16.mxu1 %v6706_v29  ;;  %4559 = vmatprep.subr.bf16.mxu0 %v5019_v19  ;;  %v2301_v19 = vrot.slane %v6514_v7, 7  ;;  %v2360_v7 = vpack.c.bf16 %v6615_v28, %v2321_v6  ;;  %v5029_v28 = vld [vmem:[%s7173_s2 + $0x80] sm:$0xff]   ;;  %v2302_v34 = vrot.slane %v6539_v37, 7  ;;  %v2305_v17 = vrot.slane %v6561_v30, 7 }
 0x1ac   : > { %3006 = vmatprep.mubr.bf16.mxu0 %v2358_v35  ;;  %4790 = vmatpush3.bf16.msra.mxu1 %v5021_v16  ;;  %v5027_v16 = vld [vmem:[%s7173_s2 + $0x230] sm:$0xff]   ;;  %v2315_v35 = vsel %vm947_vm1, %v2299_v36, %v2300_v0  ;;  %v5030_v36 = vld [vmem:[%s7173_s2 + $0x220] sm:$0xff]   ;;  %v2325_v6 = vrot.slane %v6693_v62, 1 }
 0x1ad   : > { %4791 = vmatprep.subr.bf16.mxu1 %v5022_v61  ;;  %v2313_v51 = vsel %vm947_vm1, %v2301_v19, %v2302_v34 }
 0x1ae   : > { %4560 = vmatpush3.bf16.msra.mxu0 %v5020_v33 }
 0x1af   : > { %4817 = vmatprep.subr.bf16.mxu0 %v5025_v15 }
 0x1b0   : > { %4792 = vmatpush3.bf16.msra.mxu1 %v5022_v61  ;;  %v2314_v61 = vsel %vm947_vm1, %v2300_v0, %v2301_v19  ;;  %v2306_v19 = vrot.slane %v6580_v14, 7 }
 0x1b1   : > { %3007 = vmatmul.mubr.bf16.vlgmr.msra.gmra.mxu0 %v2357_v8  ;;  %4793 = vmatprep.subr.bf16.mxu1 %v5023_v38  ;;  %v6767_v33 = vpack.c.bf16 %v2314_v61, %v2315_v35  ;;  %v2304_v8 = vrot.slane %v6547_v12, 7 }
 0x1b2   : > { %3014 = vmatprep.mubr.bf16.mxu0 %v6457_v47  ;;  %2685 = vmatmul.mubr.bf16.gmra.mxu1 %v6736_v54  ;;  %v5026_v47 = vld [vmem:[%s7173_s2 + $0x88] sm:$0xff]   ;;  %v2309_v35 = vsel %vm947_vm1, %v2305_v17, %v2306_v19 }
 0x1b3   : > { %2692 = vmatprep.mubr.bf16.mxu1 %v6743_v57  ;;  %4818 = vmatpush3.bf16.msra.mxu0 %v5025_v15  ;;  %v2312_v15 = vsel %vm947_vm1, %v2302_v34, %v2303_v18  ;;  %v5042_v34 = vld [vmem:[%s7173_s2 + $0x1a0] sm:$0xff]  }
 0x1b4   : > { %4794 = vmatpush3.bf16.msra.mxu1 %v5023_v38  ;;  %4819 = vmatprep.subr.bf16.mxu0 %v5027_v16  ;;  %v6794_v37 = vpack.c.bf16 %v2312_v15, %v2313_v51  ;;  %v6802_v38 = vpack.c.bf16 %v6561_v30, %v6547_v12  ;;  %v5040_v12 = vld [vmem:[%s7173_s2 + $0x200] sm:$0xff]   ;;  %v6824_v30 = vpack.c.bf16 %v6607_v9, %v6580_v14  ;;  %v5046_v15 = vld [vmem:[%s7178_s7 + $0x30] sm:$0xff]   ;;  %v5049_v51 = vld [vmem:[%s7178_s7 + $0x28] sm:$0xff]  }
 0x1b5   : > { %4795 = vmatprep.subr.bf16.mxu1 %v5024_v32  ;;  %v2308_v9 = vsel %vm947_vm1, %v2306_v19, %v6696_v42  ;;  %v6846_v14 = vpack.c.bf16 %v6588_v60, %v6590_v59  ;;  %v2355_v60 = vsel %vm2340_vm2, %v2324_v1, %v2325_v6  ;;  %v5036_v1 = vld [vmem:[%s7173_s2 + $0x1b0] sm:$0xff]  }
 0x1b7   : > { %4820 = vmatpush3.bf16.msra.mxu0 %v5027_v16  ;;  %v2311_v16 = vsel %vm947_vm1, %v2303_v18, %v2304_v8 }
 0x1b8   : > { %4796 = vmatpush3.bf16.msra.mxu1 %v5024_v32  ;;  %4821 = vmatprep.subr.bf16.mxu0 %v5028_v50  ;;  %v2310_v32 = vsel %vm947_vm1, %v2304_v8, %v2305_v17  ;;  %v5051_v8 = vld [vmem:[%s7173_s2 + $0x188] sm:$0xff]   ;;  %v5053_v17 = vld [vmem:[%s7173_s2 + $0x1c0] sm:$0xff]  }
 0x1b9   : > { %3015 = vmatmul.mubr.bf16.gmra.mxu0 %v2360_v7  ;;  %4797 = vmatprep.subr.bf16.mxu1 %v5026_v47  ;;  %v6816_v0 = vpack.c.bf16 %v2310_v32, %v2311_v16  ;;  %v2429_v7 = vrot.slane %v6590_v59, 7 }
 0x1ba   : > { %3022 = vmatprep.mubr.bf16.mxu0 %v6632_v63  ;;  %2693 = vmatmul.mubr.bf16.gmra.mxu1 %v6767_v33 }
 0x1bb   : > { %2700 = vmatprep.mubr.bf16.mxu1 %v6774_v25  ;;  %4822 = vmatpush3.bf16.msra.mxu0 %v5028_v50  ;;  %v6833_v50 = vld [vmem:[%s7178_s7 + $0x38] sm:$0xff]   ;;  %v2432_v61 = vsel %vm947_vm1, %v6696_v42, %v2429_v7  ;;  %v2431_v62 = vsel %vm947_vm1, %v2429_v7, %v6600_v3  ;;  %v5038_v42 = vld [vmem:[%s7173_s2 + $0x1e8] sm:$0xff]  }
 0x1bc   : > { %4798 = vmatpush3.bf16.msra.mxu1 %v5026_v47  ;;  %4823 = vmatprep.subr.bf16.mxu0 %v5030_v36  ;;  %v6840_v47 = vpack.c.bf16 %v2308_v9, %v2309_v35  ;;  %v6866_v18 = vpack.c.bf16 %v2431_v62, %v2432_v61 }
 0x1bd   : > { %4799 = vmatprep.subr.bf16.mxu1 %v5029_v28 }
 0x1bf   : > { %4824 = vmatpush3.bf16.msra.mxu0 %v5030_v36  ;;  %v2354_v36 = vsel %vm2340_vm2, %v2325_v6, %v6452_v45  ;;  %v5033_v45 = vld [vmem:[%s7173_s2 + $0x1b8] sm:$0xff]  }
 0x1c0   : > { %4800 = vmatpush3.bf16.msra.mxu1 %v5029_v28  ;;  %4825 = vmatprep.subr.bf16.mxu0 %v5031_v40  ;;  %v2359_v59 = vpack.c.bf16 %v2354_v36, %v2355_v60  ;;  %v5039_v28 = vld [vmem:[%s7173_s2 + $0x1a8] sm:$0xff]  }
 0x1c1   : > { %3023 = vmatmul.mubr.bf16.gmra.mxu0 %v6699_v11  ;;  %4625 = vmatprep.subr.bf16.mxu1 %v5032_v53  ;;  %v5037_v11 = vld [vmem:[%s7173_s2 + $0x208] sm:$0xff]   ;;  %v5047_v53 = vld [vmem:[%s7173_s2 + $0x1d0] sm:$0xff]  }
 0x1c2   : > { %3030 = vmatprep.mubr.bf16.mxu0 %v6706_v29  ;;  %2701 = vmatmul.mubr.bf16.gmra.mxu1 %v6794_v37 }
 0x1c3   : > { %2708 = vmatprep.mubr.bf16.mxu1 %v6802_v38  ;;  %4826 = vmatpush3.bf16.msra.mxu0 %v5031_v40  ;;  %v5044_v40 = vld [vmem:[%s7173_s2 + $0x1d8] sm:$0xff]  }
 0x1c4   : > { %4827 = vmatprep.subr.bf16.mxu0 %v5034_v41 }
 0x1c7   : > { %4828 = vmatpush3.bf16.msra.mxu0 %v5034_v41  ;;  %v5052_v41 = vld [vmem:[%s7178_s7 + $0x20] sm:$0xff]  }
 0x1c8   : > { %4829 = vmatprep.subr.bf16.mxu0 %v5037_v11 }
 0x1c9   : > { %3031 = vmatmul.mubr.bf16.gmra.mxu0 %v6736_v54 }
 0x1ca   : > { %3038 = vmatprep.mubr.bf16.mxu0 %v6743_v57  ;;  %2709 = vmatmul.mubr.bf16.gmra.mxu1 %v6816_v0 }
 0x1cb   : > { %2716 = vmatprep.mubr.bf16.mxu1 %v6824_v30  ;;  %4830 = vmatpush3.bf16.msra.mxu0 %v5037_v11  ;;  %v5055_v11 = vld [vmem:[%s7178_s7 + $0x18] sm:$0xff]  }
 0x1cc   : > { %4831 = vmatprep.subr.bf16.mxu0 %v5040_v12 }
 0x1cf   : > { %4832 = vmatpush3.bf16.msra.mxu0 %v5040_v12 }
 0x1d0   : > { %4849 = vmatprep.subr.bf16.mxu0 %v6833_v50 }
 0x1d1   : > { %3039 = vmatmul.mubr.bf16.gmra.mxu0 %v6767_v33 }
 0x1d2   : > { %3046 = vmatprep.mubr.bf16.mxu0 %v6774_v25  ;;  %2717 = vmatmul.mubr.bf16.gmra.mxu1 %v6840_v47 }
 0x1d3   : > { %2724 = vmatprep.mubr.bf16.mxu1 %v6846_v14 }
 0x1d9   : > { %3047 = vmatmul.mubr.bf16.gmra.mxu0 %v6794_v37 }
 0x1da   : > { %3054 = vmatprep.mubr.bf16.mxu0 %v6802_v38  ;;  %2725 = vmatmul.mubr.bf16.gmra.mxu1 %v6866_v18 }
 0x1db   : > { %4801 = vmatprep.mubr.bf16.mxu1 %v2359_v59 }
 0x1e1   : > { %3055 = vmatmul.mubr.bf16.gmra.mxu0 %v6816_v0 }
 0x1e2   : > { %3062 = vmatprep.mubr.bf16.mxu0 %v6824_v30  ;;  %4802 = vmatmul.mubr.bf16.vlgmr.msra.gmra.mxu1 %v6476_v10  ;;  %v5041_v10 = vld [vmem:[%s7173_s2 + $0x1e0] sm:$0xff]  }
 0x1e3   : > { %4805 = vmatprep.mubr.bf16.mxu1 %v6517_v26  ;;  %4626 = vmatpush3.bf16.msra.mxu1 %v5033_v45 }
 0x1e4   : > { %4627 = vmatprep.subr.bf16.mxu1 %v5035_v49 }
 0x1e7   : > { %4628 = vmatpush3.bf16.msra.mxu1 %v5036_v1 }
 0x1e8   : > { %4629 = vmatprep.subr.bf16.mxu1 %v5038_v42 }
 0x1e9   : > { %3063 = vmatmul.mubr.bf16.gmra.mxu0 %v6840_v47 }
 0x1ea   : > { %4833 = vmatprep.mubr.bf16.mxu0 %v6517_v26  ;;  %4806 = vmatmul.mubr.bf16.gmra.mxu1 %v6534_v27  ;;  %v5045_v26 = vld [vmem:[%s7173_s2 + $0x198] sm:$0xff]  }
 0x1eb   : > { %4809 = vmatprep.mubr.bf16.mxu1 %v6554_v52  ;;  %4630 = vmatpush3.bf16.msra.mxu1 %v5039_v28 }
 0x1ec   : > { %4631 = vmatprep.subr.bf16.mxu1 %v5041_v10 }
 0x1ef   : > { %4632 = vmatpush3.bf16.msra.mxu1 %v5042_v34 }
 0x1f0   : > { %4633 = vmatprep.subr.bf16.mxu1 %v5044_v40 }
 0x1f1   : > { %4834 = vmatmul.mubr.bf16.vlgmr.msra.gmra.mxu0 %v6534_v27  ;;  %v5048_v27 = vld [vmem:[%s7173_s2 + $0x190] sm:$0xff]  }
 0x1f2   : > { %4837 = vmatprep.mubr.bf16.mxu0 %v6554_v52  ;;  %4850 = vmatpush3.bf16.msra.mxu0 %v6833_v50  ;;  %v5050_v52 = vld [vmem:[%s7173_s2 + $0x1c8] sm:$0xff]  }
 0x1f3   : > { %4810 = vmatmul.mubr.bf16.gmra.mxu1 %v6575_v46  ;;  %4851 = vmatprep.subr.bf16.mxu0 %v5046_v15 }
 0x1f4   : > { %4813 = vmatprep.mubr.bf16.mxu1 %v6602_v43  ;;  %4634 = vmatpush3.bf16.msra.mxu1 %v5045_v26 }
 0x1f5   : > { %4635 = vmatprep.subr.bf16.mxu1 %v5047_v53 }
 0x1f6   : > { %4852 = vmatpush3.bf16.msra.mxu0 %v5046_v15 }
 0x1f7   : > { %4853 = vmatprep.subr.bf16.mxu0 %v5049_v51 }
 0x1f8   : > { %4636 = vmatpush3.bf16.msra.mxu1 %v5048_v27 }
 0x1f9   : > { %4838 = vmatmul.mubr.bf16.gmra.mxu0 %v6575_v46  ;;  %4637 = vmatprep.subr.bf16.mxu1 %v5050_v52  ;;  %v5054_v46 = vld [vmem:[%s7173_s2 + $0x180] sm:$0xff]  }
 0x1fa   : > { %4841 = vmatprep.mubr.bf16.mxu0 %v6602_v43  ;;  %4854 = vmatpush3.bf16.msra.mxu0 %v5049_v51  ;;  %v5056_v43 = vld [vmem:[%s7178_s7 + $0x10] sm:$0xff]  }
 0x1fb   : > { %4814 = vmatmul.mubr.bf16.gmra.mxu1 %v2380_v23  ;;  %4855 = vmatprep.subr.bf16.mxu0 %v5052_v41  ;;  %v3181_v23 = vpack.c.bf16 %v6409_v22, %v6623_v56  ;;  %v7258_v56 = vld [vmem:[#allocation12_spill] sm:$0xff] }
 0x1fc   : > { %4638 = vmatpush3.bf16.msra.mxu1 %v5051_v8  ;;  %3407 = vmatprep.mubr.bf16.mxu1 %v6632_v63  ;;  %v5057_v63 = vld [vmem:[%s7178_s7 + $0x8] sm:$0xff]  }
 0x1fd   : > { %4639 = vmatprep.subr.bf16.mxu1 %v5053_v17 }
 0x1fe   : > { %4856 = vmatpush3.bf16.msra.mxu0 %v5052_v41 }
 0x1ff   : > { %4857 = vmatprep.subr.bf16.mxu0 %v5055_v11 }
 0x200   : > { %4640 = vmatpush3.bf16.msra.mxu1 %v5054_v46 }
 0x201   : > { %4842 = vmatmul.mubr.bf16.gmra.mxu0 %v6645_v24  ;;  %4881 = vmatprep.subr.bf16.mxu1 %v6833_v50  ;;  %v3175_v24 = vsel %vm2340_vm2, %v3173_v48, %v3174_v4  ;;  %v7253_v48 = vld [vmem:[#allocation7_spill] sm:$0xff] }
 0x202   : > { %4845 = vmatprep.mubr.bf16.mxu0 %v3179_v44  ;;  %4858 = vmatpush3.bf16.msra.mxu0 %v5055_v11  ;;  %v3182_v5 = vpack.c.bf16 %v3177_v31, %v3175_v24  ;;  %v3170_v44 = vsel %vm947_vm1, %v3168_v39, %v3169_v55 }
 0x203   : > { %3408 = vmatmul.mubr.bf16.vlgmr.msra.gmra.mxu1 %v3178_v13  ;;  %4859 = vmatprep.subr.bf16.mxu0 %v5056_v43  ;;  %v7251_v13 = vld [vmem:[#allocation5_spill] sm:$0xff] }
 0x204   : > { %3415 = vmatprep.mubr.bf16.mxu1 %v6706_v29  ;;  %4889 = vmatpush3.bf16.msra.mxu1 %v6833_v50  ;;  %v3171_v29 = vsel %vm947_vm1, %v6600_v3, %v3168_v39 }
 0x205   : > { %4882 = vmatprep.subr.bf16.mxu1 %v5046_v15 }
 0x206   : > { %4860 = vmatpush3.bf16.msra.mxu0 %v5056_v43 }
 0x207   : > { %4861 = vmatprep.subr.bf16.mxu0 %v5057_v63 }
 0x208   : > { %4890 = vmatpush3.bf16.msra.mxu1 %v5046_v15 }
 0x209   : > { %4846 = vmatmul.mubr.bf16.gmra.mxu0 %v3182_v5  ;;  %4883 = vmatprep.subr.bf16.mxu1 %v5049_v51 }
 0x20a   : > { %4862 = vmatpush3.bf16.msra.mxu0 %v5057_v63  ;;  %4865 = vmatprep.mubr.bf16.mxu0 %v7251_v13 }
 0x20b   : > { %3416 = vmatmul.mubr.bf16.gmra.mxu1 %v6736_v54  ;;  %4863 = vmatprep.subr.bf16.mxu0 %v5058_v2  ;;  %v3180_v54 = vpack.c.bf16 %v3170_v44, %v3171_v29 }
 0x20c   : > { %3423 = vmatprep.mubr.bf16.mxu1 %v6743_v57  ;;  %4891 = vmatpush3.bf16.msra.mxu1 %v5049_v51  ;;  %v7255_v57 = vld [vmem:[#allocation9_spill] sm:$0xff] }
 0x20d   : > { %4884 = vmatprep.subr.bf16.mxu1 %v5052_v41 }
 0x20e   : > { %4864 = vmatpush3.bf16.msra.mxu0 %v5058_v2 }
 0x210   : > { %4892 = vmatpush3.bf16.msra.mxu1 %v5052_v41 }
 0x211   : > { %4866 = vmatmul.mubr.bf16.vlgmr.msra.gmra.mxu0 %v7252_v58  ;;  %4885 = vmatprep.subr.bf16.mxu1 %v5055_v11 }
 0x212   : > { %4869 = vmatprep.mubr.bf16.mxu0 %v7253_v48 }
 0x213   : > { %3424 = vmatmul.mubr.bf16.gmra.mxu1 %v6767_v33  ;;  %v7256_v33 = vld [vmem:[#allocation10_spill] sm:$0xff] }
 0x214   : > { %3431 = vmatprep.mubr.bf16.mxu1 %v6774_v25  ;;  %4893 = vmatpush3.bf16.msra.mxu1 %v5055_v11  ;;  %v7257_v25 = vld [vmem:[#allocation11_spill] sm:$0xff] }
 0x215   : > { %4886 = vmatprep.subr.bf16.mxu1 %v5056_v43 }
 0x218   : > { %4894 = vmatpush3.bf16.msra.mxu1 %v5056_v43 }
 0x219   : > { %4870 = vmatmul.mubr.bf16.gmra.mxu0 %v7254_v21  ;;  %4887 = vmatprep.subr.bf16.mxu1 %v5057_v63 }
 0x21b   : > { %3432 = vmatmul.mubr.bf16.gmra.mxu1 %v6794_v37 }
 0x21c   : > { %3439 = vmatprep.mubr.bf16.mxu1 %v6802_v38  ;;  %4895 = vmatpush3.bf16.msra.mxu1 %v5057_v63 }
 0x21d   : > { %4888 = vmatprep.subr.bf16.mxu1 %v5058_v2 }
 0x220   : > { %4896 = vmatpush3.bf16.msra.mxu1 %v5058_v2 }
 0x223   : > { %3440 = vmatmul.mubr.bf16.gmra.mxu1 %v6816_v0 }
 0x224   : > { %3447 = vmatprep.mubr.bf16.mxu1 %v6824_v30 }
 0x22b   : > { %3448 = vmatmul.mubr.bf16.gmra.mxu1 %v6840_v47 }
 0x22c   : > { %3455 = vmatprep.mubr.bf16.mxu1 %v6846_v14 }
 0x233   : > { %3456 = vmatmul.mubr.bf16.gmra.mxu1 %v6866_v18 }
 0x234   : > { %3463 = vmatprep.mubr.bf16.mxu1 %v3181_v23 }
 0x23b   : > { %3464 = vmatmul.mubr.bf16.gmra.mxu1 %v3180_v54 }
 0x23c   : > { %4873 = vmatprep.mubr.bf16.mxu1 %v7255_v57 }
 0x243   : > { %4874 = vmatmul.mubr.bf16.vlgmr.msra.gmra.mxu1 %v7256_v33 }
 0x244   : > { %4877 = vmatprep.mubr.bf16.mxu1 %v7257_v25 }
 0x24b   : > { %4878 = vmatmul.mubr.bf16.gmra.mxu1 %v7258_v56 }
 0x251   : > { %v4771_v37 = vpop.f32.mrf.mxu0 }
 0x253   : > { %v2767_v38 = vpop.f32.mrf.mxu0 }
 0x255   : > { %v4772_v22 = vpop.f32.mrf.mxu0 }
 0x257   : > { %v2770_v16 = vpop.f32.mrf.mxu0 }
 0x259   : > { %v4775_v32 = vpop.f32.mrf.mxu0 }
 0x25b   : > { %v2783_v55 = vpop.f32.mrf.mxu0 }
 0x25d   : > { %v4776_v0 = vpop.f32.mrf.mxu0 }
 0x25f   : > { %v2786_v12 = vpop.f32.mrf.mxu0 }
 0x261   : > { %v7003_v20 = vpop.f32.mrf.mxu0 }
 0x262   : > { %v4481_v3 = vpop.f32.mrf.mxu1 }
 0x263   : > { %v7005_v30 = vpop.f32.mrf.mxu0 }
 0x264   : > { %v4482_v19 = vpop.f32.mrf.mxu1 }
 0x265   : > { %v4483_v50 = vadd.f32 %v4482_v19, %v4481_v3  ;;  %v7007_v9 = vpop.f32.mrf.mxu0 }
 0x266   : > { %v4484_v35 = vpop.f32.mrf.mxu1 }
 0x267   : > { %v2768_v47 = vadd.f32 %v4483_v50, %v2767_v38  ;;  %v7009_v14 = vpop.f32.mrf.mxu0 }
 0x268   : > { %v4485_v6 = vpop.f32.mrf.mxu1 }
 0x269   : > { %v4486_v7 = vadd.f32 %v4485_v6, %v4484_v35  ;;  %v7011_v61 = vpop.f32.mrf.mxu0 }
 0x26a   : > { %v4487_v36 = vpop.f32.mrf.mxu1 }
 0x26b   : > { %v2771_v60 = vadd.f32 %v4486_v7, %v2770_v16  ;;  %v7013_v62 = vpop.f32.mrf.mxu0 }
 0x26c   : > { %v4488_v18 = vpop.f32.mrf.mxu1 }
 0x26d   : > { %v4489_v59 = vadd.f32 %v4488_v18, %v4487_v36  ;;  %v7015_v45 = vpop.f32.mrf.mxu0 }
 0x26e   : > { %v4490_v49 = vpop.f32.mrf.mxu1 }
 0x26f   : > { %v2776_v1 = vadd.f32 %v4771_v37, %v4489_v59  ;;  %v7017_v42 = vpop.f32.mrf.mxu0 }
 0x270   : > { %v4491_v28 = vpop.f32.mrf.mxu1 }
 0x271   : > { %v4492_v10 = vadd.f32 %v4491_v28, %v4490_v49  ;;  %v4561_v34 = vpop.f32.mrf.mxu0 }
 0x272   : > { %v4493_v40 = vpop.f32.mrf.mxu1 }
 0x273   : > { %v2779_v15 = vadd.f32 %v4772_v22, %v4492_v10  ;;  %v4562_v26 = vpop.f32.mrf.mxu0 }
 0x274   : > { %v4563_v53 = vadd.f32 %v4562_v26, %v4561_v34  ;;  %v4494_v51 = vpop.f32.mrf.mxu1 }
 0x275   : > { %v4495_v27 = vadd.f32 %v4494_v51, %v4493_v40  ;;  %v4564_v52 = vpop.f32.mrf.mxu0 }
 0x276   : > { %v4496_v41 = vpop.f32.mrf.mxu1  ;;  %v7019_v8 = vadd.f32 %v4563_v53, %v2768_v47 }
 0x277   : > { %v2784_v17 = vadd.f32 %v4495_v27, %v2783_v55  ;;  %v4565_v11 = vpop.f32.mrf.mxu0 }
 0x278   : > { %v4566_v46 = vadd.f32 %v4565_v11, %v4564_v52  ;;  %v4497_v43 = vpop.f32.mrf.mxu1 }
 0x279   : > { %v4498_v4 = vadd.f32 %v4497_v43, %v4496_v41  ;;  %v4567_v63 = vpop.f32.mrf.mxu0 }
 0x27a   : > { %v4499_v24 = vpop.f32.mrf.mxu1  ;;  %v7021_v31 = vadd.f32 %v4566_v46, %v2771_v60 }
 0x27b   : > { %v2787_v5 = vadd.f32 %v4498_v4, %v2786_v12  ;;  %v4568_v2 = vpop.f32.mrf.mxu0 }
 0x27c   : > { %v4569_v13 = vadd.f32 %v4568_v2, %v4567_v63  ;;  %v4500_v58 = vpop.f32.mrf.mxu1 }
 0x27d   : > { %v4501_v48 = vadd.f32 %v4500_v58, %v4499_v24  ;;  %v4570_v21 = vpop.f32.mrf.mxu0 }
 0x27e   : > { %v4502_v23 = vpop.f32.mrf.mxu1  ;;  %v7023_v39 = vadd.f32 %v4569_v13, %v2776_v1 }
 0x27f   : > { %v2792_v44 = vadd.f32 %v4775_v32, %v4501_v48  ;;  %v4571_v29 = vpop.f32.mrf.mxu0 }
 0x280   : > { %v4572_v54 = vadd.f32 %v4571_v29, %v4570_v21  ;;  %v4503_v57 = vpop.f32.mrf.mxu1 }
 0x281   : > { %v4504_v33 = vadd.f32 %v4503_v57, %v4502_v23  ;;  %v4573_v25 = vpop.f32.mrf.mxu0 }
 0x282   : > { %v4505_v56 = vpop.f32.mrf.mxu1  ;;  %v7025_v37 = vadd.f32 %v4572_v54, %v2779_v15 }
 0x283   : > { %v2795_v38 = vadd.f32 %v4776_v0, %v4504_v33  ;;  %v4574_v22 = vpop.f32.mrf.mxu0 }
 0x284   : > { %v4575_v16 = vadd.f32 %v4574_v22, %v4573_v25  ;;  %v4506_v55 = vpop.f32.mrf.mxu1 }
 0x285   : > { %v4507_v12 = vadd.f32 %v4506_v55, %v4505_v56  ;;  %v4576_v3 = vpop.f32.mrf.mxu0 }
 0x286   : > { %v4508_v19 = vpop.f32.mrf.mxu1  ;;  %v7027_v50 = vadd.f32 %v4575_v16, %v2784_v17 }
 0x287   : > { %v2800_v35 = vadd.f32 %v4507_v12, %v7005_v30  ;;  %v4577_v32 = vpop.f32.mrf.mxu0 }
 0x288   : > { %v4578_v47 = vadd.f32 %v4577_v32, %v4576_v3  ;;  %v4509_v6 = vpop.f32.mrf.mxu1 }
 0x289   : > { %v4510_v7 = vadd.f32 %v4509_v6, %v4508_v19  ;;  %v4579_v36 = vpop.f32.mrf.mxu0 }
 0x28a   : > { %v4511_v60 = vpop.f32.mrf.mxu1  ;;  %v7030_v18 = vadd.f32 %v4578_v47, %v2787_v5 }
 0x28b   : > { %v2803_v0 = vadd.f32 %v4510_v7, %v7009_v14  ;;  %v4580_v59 = vpop.f32.mrf.mxu0 }
 0x28c   : > { %v4581_v49 = vadd.f32 %v4580_v59, %v4579_v36  ;;  %v4512_v1 = vpop.f32.mrf.mxu1 }
 0x28d   : > { %v4513_v28 = vadd.f32 %v4512_v1, %v4511_v60  ;;  %v4582_v10 = vpop.f32.mrf.mxu0 }
 0x28e   : > { %v4514_v34 = vpop.f32.mrf.mxu1  ;;  %v7033_v40 = vadd.f32 %v4581_v49, %v2792_v44 }
 0x28f   : > { %v2808_v30 = vadd.f32 %v7003_v20, %v4513_v28  ;;  %v4583_v15 = vpop.f32.mrf.mxu0 }
 0x290   : > { %v4584_v26 = vadd.f32 %v4583_v15, %v4582_v10  ;;  %v4515_v53 = vpop.f32.mrf.mxu1 }
 0x291   : > { %v4516_v51 = vadd.f32 %v4515_v53, %v4514_v34  ;;  %v4585_v27 = vpop.f32.mrf.mxu0 }
 0x292   : > { %v4517_v52 = vpop.f32.mrf.mxu1  ;;  %v7036_v41 = vadd.f32 %v4584_v26, %v2795_v38 }
 0x293   : > { %v2811_v14 = vadd.f32 %v7007_v9, %v4516_v51  ;;  %v4586_v17 = vpop.f32.mrf.mxu0 }
 0x294   : > { %v4587_v11 = vadd.f32 %v4586_v17, %v4585_v27  ;;  %v4518_v46 = vpop.f32.mrf.mxu1 }
 0x295   : > { %v4519_v43 = vadd.f32 %v4518_v46, %v4517_v52  ;;  %v4588_v4 = vpop.f32.mrf.mxu0 }
 0x296   : > { %v4520_v63 = vpop.f32.mrf.mxu1  ;;  %v3041_v24 = vadd.f32 %v4587_v11, %v2800_v35 }
 0x297   : > { %v2816_v5 = vadd.f32 %v4519_v43, %v7013_v62  ;;  %v4589_v20 = vpop.f32.mrf.mxu0 }
 0x298   : > { %v4590_v2 = vadd.f32 %v4589_v20, %v4588_v4  ;;  %v4521_v13 = vpop.f32.mrf.mxu1 }
 0x299   : > { %v4522_v58 = vadd.f32 %v4521_v13, %v4520_v63  ;;  %v4591_v48 = vpop.f32.mrf.mxu0 }
 0x29a   : > { %v4523_v21 = vpop.f32.mrf.mxu1  ;;  %v3044_v23 = vadd.f32 %v4590_v2, %v2803_v0 }
 0x29b   : > { %v2819_v44 = vadd.f32 %v4522_v58, %v7017_v42  ;;  %v4592_v29 = vpop.f32.mrf.mxu0 }
 0x29c   : > { %v4593_v9 = vadd.f32 %v4592_v29, %v4591_v48  ;;  %v4524_v54 = vpop.f32.mrf.mxu1 }
 0x29d   : > { %v4525_v57 = vadd.f32 %v4524_v54, %v4523_v21  ;;  %v4594_v33 = vpop.f32.mrf.mxu0 }
 0x29e   : > { %v4526_v25 = vpop.f32.mrf.mxu1  ;;  %v3049_v56 = vadd.f32 %v4593_v9, %v2808_v30 }
 0x29f   : > { %v2824_v38 = vadd.f32 %v7011_v61, %v4525_v57  ;;  %v4595_v22 = vpop.f32.mrf.mxu0 }
 0x2a0   : > { %v4596_v62 = vadd.f32 %v4595_v22, %v4594_v33  ;;  %v4527_v16 = vpop.f32.mrf.mxu1 }
 0x2a1   : > { %v4528_v55 = vadd.f32 %v4527_v16, %v4526_v25  ;;  %v4597_v12 = vpop.f32.mrf.mxu0 }
 0x2a2   : > { %v7042_v3 = vpop.f32.mrf.mxu1  ;;  %v3052_v19 = vadd.f32 %v4596_v62, %v2811_v14 }
 0x2a3   : > { %v2827_v35 = vadd.f32 %v7015_v45, %v4528_v55  ;;  %v4598_v42 = vpop.f32.mrf.mxu0 }
 0x2a4   : > { %v4599_v32 = vadd.f32 %v4598_v42, %v4597_v12  ;;  %v7045_v47 = vpop.f32.mrf.mxu1 }
 0x2a5   : > { %v4600_v6 = vpop.f32.mrf.mxu0 }
 0x2a6   : > { %v7047_v7 = vpop.f32.mrf.mxu1  ;;  %v3057_v36 = vadd.f32 %v4599_v32, %v2816_v5 }
 0x2a7   : > { %v4601_v60 = vpop.f32.mrf.mxu0 }
 0x2a8   : > { %v4602_v61 = vadd.f32 %v4601_v60, %v4600_v6  ;;  %v7049_v0 = vpop.f32.mrf.mxu1 }
 0x2a9   : > { %v4603_v59 = vpop.f32.mrf.mxu0 }
 0x2aa   : > { %v7051_v49 = vpop.f32.mrf.mxu1  ;;  %v3060_v1 = vadd.f32 %v4602_v61, %v2819_v44 }
 0x2ab   : > { %v4604_v28 = vpop.f32.mrf.mxu0 }
 0x2ac   : > { %v4605_v10 = vadd.f32 %v4604_v28, %v4603_v59  ;;  %v7053_v34 = vpop.f32.mrf.mxu1 }
 0x2ad   : > { %v4606_v45 = vpop.f32.mrf.mxu0 }
 0x2ae   : > { %v7055_v30 = vpop.f32.mrf.mxu1  ;;  %v3065_v15 = vadd.f32 %v4605_v10, %v2824_v38 }
 0x2af   : > { %v4607_v26 = vpop.f32.mrf.mxu0 }
 0x2b0   : > { %v4608_v53 = vadd.f32 %v4607_v26, %v4606_v45  ;;  %v7057_v51 = vpop.f32.mrf.mxu1  ;;  %v3114_v45 = vadd.f32 %v7042_v3, %v7023_v39  ;;  %v3109_v39 = vadd.f32 %v7049_v0, %v7021_v31 }
 0x2b1   : > { %v4835_v27 = vpop.f32.mrf.mxu0 }
 0x2b2   : > { %v3068_v52 = vadd.f32 %v4608_v53, %v2827_v35 }
 0x2b3   : > { %v4811_v14 = vpop.f32.mrf.mxu1  ;;  %v3506_v17 = vpop.f32.mrf.mxu0 }
 0x2b4   : > { %v7059_v11 = vadd.f32 %v4811_v14, %v3049_v56 }
 0x2b5   : > { %v3137_v46 = vpop.f32.mrf.mxu1  ;;  %v4836_v43 = vpop.f32.mrf.mxu0 }
 0x2b6   : > { %v7061_v4 = vadd.f32 %v3137_v46, %v3041_v24 }
 0x2b7   : > { %v4812_v63 = vpop.f32.mrf.mxu1  ;;  %v3509_v5 = vpop.f32.mrf.mxu0 }
 0x2b8   : > { %v7063_v20 = vadd.f32 %v4812_v63, %v3052_v19 }
 0x2b9   : > { %v3140_v2 = vpop.f32.mrf.mxu1  ;;  %v7065_v13 = vpop.f32.mrf.mxu0 }
 0x2ba   : > { %v7067_v58 = vadd.f32 %v3140_v2, %v3044_v23 }
 0x2bb   : > { %v4815_v48 = vpop.f32.mrf.mxu1  ;;  %v3522_v21 = vpop.f32.mrf.mxu0 }
 0x2bc   : > { %v7069_v44 = vadd.f32 %v4815_v48, %v3065_v15  ;;  %v3106_v15 = vadd.f32 %v7045_v47, %v7019_v8 }
 0x2bd   : > { %v3153_v29 = vpop.f32.mrf.mxu1  ;;  %v7071_v9 = vpop.f32.mrf.mxu0 }
 0x2be   : > { %v7073_v54 = vadd.f32 %v3153_v29, %v3057_v36  ;;  %v3117_v29 = vadd.f32 %v7047_v7, %v7025_v37 }
 0x2bf   : > { %v4816_v24 = vpop.f32.mrf.mxu1  ;;  %v7075_v57 = vpop.f32.mrf.mxu0 }
 0x2c0   : > { %v7077_v33 = vadd.f32 %v4816_v24, %v3068_v52 }
 0x2c1   : > { %v3156_v25 = vpop.f32.mrf.mxu1  ;;  %v7079_v56 = vpop.f32.mrf.mxu0 }
 0x2c2   : > { %v7081_v38 = vadd.f32 %v3156_v25, %v3060_v1 }
 0x2c3   : > { %v4641_v23 = vpop.f32.mrf.mxu1  ;;  %v7083_v22 = vpop.f32.mrf.mxu0 }
 0x2c5   : > { %v4642_v62 = vpop.f32.mrf.mxu1  ;;  %v7085_v16 = vpop.f32.mrf.mxu0 }
 0x2c6   : > { %v4643_v42 = vadd.f32 %v4642_v62, %v4641_v23 }
 0x2c7   : > { %v4644_v55 = vpop.f32.mrf.mxu1  ;;  %v7087_v12 = vpop.f32.mrf.mxu0 }
 0x2c8   : > { %v3507_v61 = vadd.f32 %v4643_v42, %v3506_v17 }
 0x2c9   : > { %v4645_v19 = vpop.f32.mrf.mxu1  ;;  %v7089_v35 = vpop.f32.mrf.mxu0 }
 0x2ca   : > { %v4646_v1 = vadd.f32 %v4645_v19, %v4644_v55  ;;  %v3569_v63 = vadd.f32 %v3507_v61, %v3106_v15 }
 0x2cb   : > { %v4647_v32 = vpop.f32.mrf.mxu1  ;;  %v7091_v6 = vpop.f32.mrf.mxu0 }
 0x2cc   : > { %v3510_v2 = vadd.f32 %v4646_v1, %v3509_v5 }
 0x2cd   : > { %v4648_v36 = vpop.f32.mrf.mxu1  ;;  %v7093_v60 = vpop.f32.mrf.mxu0 }
 0x2ce   : > { %v4649_v59 = vadd.f32 %v4648_v36, %v4647_v32  ;;  %v3570_v19 = vadd.f32 %v3510_v2, %v3109_v39 }
 0x2cf   : > { %v4650_v28 = vpop.f32.mrf.mxu1  ;;  %v7095_v10 = vpop.f32.mrf.mxu0 }
 0x2d0   : > { %v3515_v26 = vadd.f32 %v4835_v27, %v4649_v59 }
 0x2d1   : > { %v4651_v53 = vpop.f32.mrf.mxu1  ;;  %v4867_v52 = vpop.f32.mrf.mxu0 }
 0x2d2   : > { %v4652_v14 = vadd.f32 %v4651_v53, %v4650_v28  ;;  %v3571_v46 = vadd.f32 %v3515_v26, %v3114_v45 }
 0x2d3   : > { %v4653_v48 = vpop.f32.mrf.mxu1  ;;  %v3683_v17 = vpop.f32.mrf.mxu0 }
 0x2d4   : > { %v3518_v24 = vadd.f32 %v4836_v43, %v4652_v14  ;;  %v3748_v25 = vadd.f32 %v4867_v52, %v3571_v46  ;;  %v3746_v23 = vadd.f32 %v3683_v17, %v3569_v63  ;;  %v3122_v43 = vadd.f32 %v7053_v34, %v7027_v50 }
 0x2d5   : > { %v4654_v3 = vpop.f32.mrf.mxu1  ;;  %v4868_v8 = vpop.f32.mrf.mxu0 }
 0x2d6   : > { %v4179_v47 = vpack.c.bf16 %v3748_v25, %v3748_v25  ;;  %v4177_v27 = vpack.c.bf16 %v3746_v23, %v3746_v23  ;;  %v4655_v62 = vadd.f32 %v4654_v3, %v4653_v48  ;;  %v3572_v55 = vadd.f32 %v3518_v24, %v3117_v29 }
 0x2d7   : > { %v4656_v5 = vpop.f32.mrf.mxu1  ;;  %v3686_v42 = vpop.f32.mrf.mxu0  ;;  %v3125_v48 = vadd.f32 %v7057_v51, %v7030_v18 }
 0x2d8   : > { %v3828_v32 = vshrl.u32 %v4179_v47, 16  ;;  %v3831_v36 = vshll.u32 %v4179_v47, 16  ;;  %v3814_v37 = vshrl.u32 %v4177_v27, 16  ;;  %v3817_v7 = vshll.u32 %v4177_v27, 16 }
 0x2d9   : > { %v3523_v61 = vadd.f32 %v4655_v62, %v3522_v21  ;;  %v3749_v31 = vadd.f32 %v4868_v8, %v3572_v55  ;;  %v3747_v0 = vadd.f32 %v3686_v42, %v3570_v19  ;;  %v4657_v59 = vpop.f32.mrf.mxu1  ;;  %v4871_v1 = vpop.f32.mrf.mxu0 }
 0x2da   : > { %v3830_v28 = vrot.slane %v3828_v32, 4  ;;  %v3833_v45 = vrot.slane %v3831_v36, 5  ;;  %v3816_v15 = vrot.slane %v3814_v37, 4  ;;  %v3819_v26 = vrot.slane %v3817_v7, 5 }
 0x2db   : > { %v4180_v53 = vpack.c.bf16 %v3749_v31, %v3749_v31  ;;  %v4178_v52 = vpack.c.bf16 %v3747_v0, %v3747_v0  ;;  %v4658_v14 = vadd.f32 %v4657_v59, %v4656_v5  ;;  %v4659_v46 = vpop.f32.mrf.mxu1  ;;  %v3573_v63 = vadd.f32 %v3523_v61, %v3122_v43  ;;  %v3699_v2 = vpop.f32.mrf.mxu0 }
 0x2dc   : > { %v3834_v50 = vor.u32 %v3833_v45, %v3830_v28  ;;  %v3820_v34 = vor.u32 %v3819_v26, %v3816_v15  ;;  %v3130_v5 = vadd.f32 %v7051_v49, %v7033_v40  ;;  %v3133_v40 = vadd.f32 %v7055_v30, %v7036_v41 }
 0x2dd   : > { %v3837_v21 = vshll.u32 %v4180_v53, 16  ;;  %v3823_v17 = vshll.u32 %v4178_v52, 16  ;;  %v3526_v29 = vadd.f32 %v4658_v14, %v7075_v57  ;;  %v3750_v24 = vadd.f32 %v3699_v2, %v3573_v63  ;;  %v4660_v25 = vpop.f32.mrf.mxu1  ;;  %v4872_v23 = vpop.f32.mrf.mxu0 }
 0x2de   : > { %v3835_v39 = vrot.slane %v3834_v50, 4  ;;  %v3821_v3 = vrot.slane %v3820_v34, 4  ;;  %v4661_v47 = vadd.f32 %v4660_v25, %v4659_v46 }
 0x2df   : > { %v3839_v18 = vrot.slane %v3837_v21, 5  ;;  %v3825_v51 = vrot.slane %v3823_v17, 5  ;;  %v4181_v57 = vpack.c.bf16 %v3750_v24, %v3750_v24  ;;  %v4662_v27 = vpop.f32.mrf.mxu1  ;;  %v3574_v62 = vadd.f32 %v3526_v29, %v3125_v48  ;;  %v3702_v55 = vpop.f32.mrf.mxu0 }
 0x2e0   : > { %v3531_v19 = vadd.f32 %v7065_v13, %v4661_v47 }
 0x2e1   : > { %v3840_v42 = vsel %vm7113_vm5, %v3835_v39, %v3839_v18  ;;  %v3826_v32 = vsel %vm7113_vm5, %v3821_v3, %v3825_v51  ;;  %v3842_v36 = vshrl.u32 %v4181_v57, 16  ;;  %v3845_v37 = vshll.u32 %v4181_v57, 16  ;;  %v4663_v7 = vpop.f32.mrf.mxu1 }
 0x2e2   : > { %3934 = vst [vmem:[%s7120_s28 + $0x4] sm:$0xf] %v3840_v42  ;;  %3933 = vst [vmem:[%s7120_s28] sm:$0xf] %v3826_v32  ;;  %v3575_v43 = vadd.f32 %v3531_v19, %v3130_v5  ;;  %v3751_v61 = vadd.f32 %v3702_v55, %v3574_v62  ;;  %v4664_v31 = vadd.f32 %v4663_v7, %v4662_v27 }
 0x2e3   : > { %v3844_v0 = vrot.slane %v3842_v36, 4  ;;  %v3847_v59 = vrot.slane %v3845_v37, 5  ;;  %v4665_v28 = vpop.f32.mrf.mxu1 }
 0x2e4   : > { %v3752_v49 = vadd.f32 %v4871_v1, %v3575_v43  ;;  %v4182_v13 = vpack.c.bf16 %v3751_v61, %v3751_v61  ;;  %v3534_v45 = vadd.f32 %v7071_v9, %v4664_v31 }
 0x2e5   : > { %v3848_v15 = vor.u32 %v3847_v59, %v3844_v0  ;;  %v4666_v26 = vpop.f32.mrf.mxu1 }
 0x2e6   : > { %v4183_v53 = vpack.c.bf16 %v3752_v49, %v3752_v49  ;;  %v3851_v52 = vshll.u32 %v4182_v13, 16  ;;  %v3576_v14 = vadd.f32 %v3534_v45, %v3133_v40  ;;  %v4667_v19 = vadd.f32 %v4666_v26, %v4665_v28 }
 0x2e7   : > { %v3849_v46 = vrot.slane %v3848_v15, 4  ;;  %v4668_v63 = vpop.f32.mrf.mxu1 }
 0x2e8   : > { %v3856_v2 = vshrl.u32 %v4183_v53, 16  ;;  %v3859_v48 = vshll.u32 %v4183_v53, 16  ;;  %v3853_v50 = vrot.slane %v3851_v52, 5  ;;  %v3753_v34 = vadd.f32 %v4872_v23, %v3576_v14 }
 0x2e9   : > { %v4669_v21 = vpop.f32.mrf.mxu1  ;;  %v3539_v7 = vadd.f32 %v4667_v19, %v7083_v22 }
 0x2ea   : > { %v3858_v17 = vrot.slane %v3856_v2, 4  ;;  %v3861_v41 = vrot.slane %v3859_v48, 5  ;;  %v3854_v30 = vsel %vm7113_vm5, %v3849_v46, %v3853_v50  ;;  %v4184_v9 = vpack.c.bf16 %v3753_v34, %v3753_v34 }
 0x2eb   : > { %3935 = vst [vmem:[%s7120_s28 + $0x8] sm:$0xf] %v3854_v30  ;;  %v4671_v1 = vpop.f32.mrf.mxu1  ;;  %v4670_v43 = vadd.f32 %v4669_v21, %v4668_v63  ;;  %v3577_v45 = vadd.f32 %v3539_v7, %v7061_v4 }
 0x2ec   : > { %v3862_v29 = vor.u32 %v3861_v41, %v3858_v17  ;;  %v3865_v24 = vshll.u32 %v4184_v9, 16 }
 0x2ed   : > { %v4672_v25 = vpop.f32.mrf.mxu1  ;;  %v3542_v28 = vadd.f32 %v4670_v43, %v7087_v12 }
 0x2ee   : > { %v3863_v39 = vrot.slane %v3862_v29, 4  ;;  %v3867_v3 = vrot.slane %v3865_v24, 5  ;;  %v4673_v55 = vadd.f32 %v4672_v25, %v4671_v1 }
 0x2ef   : > { %v4674_v47 = vpop.f32.mrf.mxu1  ;;  %v3578_v4 = vadd.f32 %v3542_v28, %v7067_v58 }
 0x2f0   : > { %v3868_v18 = vsel %vm7113_vm5, %v3863_v39, %v3867_v3  ;;  %v3547_v32 = vadd.f32 %v7079_v56, %v4673_v55 }
 0x2f1   : > { %3936 = vst [vmem:[%s7120_s28 + $0xc] sm:$0xf] %v3868_v18  ;;  %v4675_v23 = vpop.f32.mrf.mxu1 }
 0x2f2   : > { %v4676_v36 = vadd.f32 %v4675_v23, %v4674_v47  ;;  %v3579_v59 = vadd.f32 %v3547_v32, %v7059_v11 }
 0x2f3   : > { %v4677_v51 = vpop.f32.mrf.mxu1 }
 0x2f4   : > { %v3550_v0 = vadd.f32 %v7085_v16, %v4676_v36 }
 0x2f5   : > { %v4678_v57 = vpop.f32.mrf.mxu1 }
 0x2f6   : > { %v4679_v40 = vadd.f32 %v4678_v57, %v4677_v51  ;;  %v3580_v22 = vadd.f32 %v3550_v0, %v7063_v20 }
 0x2f7   : > { %v4680_v27 = vpop.f32.mrf.mxu1 }
 0x2f8   : > { %v3555_v52 = vadd.f32 %v4679_v40, %v7091_v6 }
 0x2f9   : > { %v4681_v62 = vpop.f32.mrf.mxu1 }
 0x2fa   : > { %v4682_v48 = vadd.f32 %v4681_v62, %v4680_v27  ;;  %v3581_v9 = vadd.f32 %v3555_v52, %v7073_v54 }
 0x2fb   : > { %v4683_v5 = vpop.f32.mrf.mxu1 }
 0x2fc   : > { %v3558_v58 = vadd.f32 %v4682_v48, %v7095_v10 }
 0x2fd   : > { %v4684_v42 = vpop.f32.mrf.mxu1 }
 0x2fe   : > { %v4685_v61 = vadd.f32 %v4684_v42, %v4683_v5  ;;  %v3582_v36 = vadd.f32 %v3558_v58, %v7081_v38 }
 0x2ff   : > { %v4686_v37 = vpop.f32.mrf.mxu1 }
 0x300   : > { %v3563_v56 = vadd.f32 %v7089_v35, %v4685_v61 }
 0x301   : > { %v4687_v31 = vpop.f32.mrf.mxu1 }
 0x302   : > { %v4688_v14 = vadd.f32 %v4687_v31, %v4686_v37  ;;  %v3583_v12 = vadd.f32 %v3563_v56, %v7069_v44 }
 0x303   : > { %v4875_v49 = vpop.f32.mrf.mxu1 }
 0x304   : > { %v3756_v13 = vadd.f32 %v4875_v49, %v3579_v59  ;;  %v3566_v20 = vadd.f32 %v7093_v60, %v4688_v14 }
 0x305   : > { %v3715_v15 = vpop.f32.mrf.mxu1 }
 0x306   : > { %v4187_v26 = vpack.c.bf16 %v3756_v13, %v3756_v13  ;;  %v3754_v53 = vadd.f32 %v3715_v15, %v3577_v45  ;;  %v3584_v27 = vadd.f32 %v3566_v20, %v7077_v33 }
 0x307   : > { %v4876_v16 = vpop.f32.mrf.mxu1 }
 0x308   : > { %v3884_v46 = vshrl.u32 %v4187_v26, 16  ;;  %v3887_v11 = vshll.u32 %v4187_v26, 16  ;;  %v4185_v63 = vpack.c.bf16 %v3754_v53, %v3754_v53  ;;  %v3757_v2 = vadd.f32 %v4876_v16, %v3580_v22 }
 0x309   : > { %v3718_v50 = vpop.f32.mrf.mxu1 }
 0x30a   : > { %v3886_v35 = vrot.slane %v3884_v46, 4  ;;  %v3889_v34 = vrot.slane %v3887_v11, 5  ;;  %v3870_v21 = vshrl.u32 %v4185_v63, 16  ;;  %v3873_v17 = vshll.u32 %v4185_v63, 16 }
 0x30b   : > { %v4188_v41 = vpack.c.bf16 %v3757_v2, %v3757_v2  ;;  %v3755_v6 = vadd.f32 %v3718_v50, %v3578_v4  ;;  %v4879_v30 = vpop.f32.mrf.mxu1 }
 0x30c   : > { %v3890_v1 = vor.u32 %v3889_v34, %v3886_v35  ;;  %v3872_v29 = vrot.slane %v3870_v21, 4  ;;  %v3875_v24 = vrot.slane %v3873_v17, 5  ;;  %v3760_v25 = vadd.f32 %v4879_v30, %v3583_v12 }
 0x30d   : > { %v3893_v39 = vshll.u32 %v4188_v41, 16  ;;  %v4186_v3 = vpack.c.bf16 %v3755_v6, %v3755_v6  ;;  %v3731_v44 = vpop.f32.mrf.mxu1 }
 0x30e   : > { %v3891_v47 = vrot.slane %v3890_v1, 4  ;;  %v3876_v18 = vor.u32 %v3875_v24, %v3872_v29  ;;  %v4191_v23 = vpack.c.bf16 %v3760_v25, %v3760_v25  ;;  %v3758_v51 = vadd.f32 %v3731_v44, %v3581_v9 }
 0x30f   : > { %v3895_v60 = vrot.slane %v3893_v39, 5  ;;  %v3879_v57 = vshll.u32 %v4186_v3, 16  ;;  %v4880_v62 = vpop.f32.mrf.mxu1 }
 0x310   : > { %v3877_v54 = vrot.slane %v3876_v18, 4  ;;  %v3912_v55 = vshrl.u32 %v4191_v23, 16  ;;  %v3915_v5 = vshll.u32 %v4191_v23, 16  ;;  %v4189_v19 = vpack.c.bf16 %v3758_v51, %v3758_v51 }
 0x311   : > { %v3896_v10 = vsel %vm7113_vm5, %v3891_v47, %v3895_v60  ;;  %v3881_v42 = vrot.slane %v3879_v57, 5  ;;  %v3761_v32 = vadd.f32 %v4880_v62, %v3584_v27  ;;  %v3734_v37 = vpop.f32.mrf.mxu1 }
 0x312   : > { %3938 = vst [vmem:[%s7120_s28 + $0x14] sm:$0xf] %v3896_v10  ;;  %v3914_v7 = vrot.slane %v3912_v55, 4  ;;  %v3917_v43 = vrot.slane %v3915_v5, 5  ;;  %v3898_v61 = vshrl.u32 %v4189_v19, 16  ;;  %v3901_v31 = vshll.u32 %v4189_v19, 16 }
 0x313   : > { %v3882_v33 = vsel %vm7113_vm5, %v3877_v54, %v3881_v42  ;;  %v4192_v0 = vpack.c.bf16 %v3761_v32, %v3761_v32  ;;  %v3759_v59 = vadd.f32 %v3734_v37, %v3582_v36 }
 0x314   : > { %3937 = vst [vmem:[%s7120_s28 + $0x10] sm:$0xf] %v3882_v33  ;;  %v3918_v40 = vor.u32 %v3917_v43, %v3914_v7  ;;  %v3900_v49 = vrot.slane %v3898_v61, 4  ;;  %v3903_v13 = vrot.slane %v3901_v31, 5 }
 0x315   : > { %v3921_v45 = vshll.u32 %v4192_v0, 16  ;;  %v4190_v28 = vpack.c.bf16 %v3759_v59, %v3759_v59 }
 0x316   : > { %v3919_v38 = vrot.slane %v3918_v40, 4  ;;  %v3904_v56 = vor.u32 %v3903_v13, %v3900_v49 }
 0x317   : > { %v3923_v15 = vrot.slane %v3921_v45, 5  ;;  %v3907_v26 = vshll.u32 %v4190_v28, 16 }
 0x318   : > { %v3905_v53 = vrot.slane %v3904_v56, 4 }
 0x319   : > { %v3924_v22 = vsel %vm7113_vm5, %v3919_v38, %v3923_v15  ;;  %v3909_v52 = vrot.slane %v3907_v26, 5 }
 0x31a   : > { %3940 = vst [vmem:[%s7120_s28 + $0x1c] sm:$0xf] %v3924_v22 }
 0x31b   : > { %v3910_v14 = vsel %vm7113_vm5, %v3905_v53, %v3909_v52 }
 0x31c   : > { %3939 = vst [vmem:[%s7120_s28 + $0x18] sm:$0xf] %v3910_v14 }
 0x31d PF: > { %s18_s27 = sadd.s32 1, %s5068_s27  }
 0x31e   : > { %p15_p4 = scmp.ge.s32.totalorder %s18_s27, 4  }
 0x320   :  { %17 = sbr.rel (!%p15_p4) target bundleno = 1 (0x1), region = 102 }

</bundles_post_ra>
